<compile_context>
chip_gen: v6e
topology: v6e:2x2x1
jax: 0.10.0
libtpu: 0.0.40
codegen_flags: <defaults>
</compile_context>

<pallas_src>
import math

import jax
import jax.numpy as jnp
from jax.experimental import pallas as pl
from jax.experimental.pallas import tpu as pltpu


def _round_up(x, m):
    return ((x + m - 1) // m) * m


def _pick_tg(n):
    """Graphs per grid step: multiple of 8 (sublane-aligned blocks and
    unmasked output stores), capped at 32 (VMEM), and small enough that >=2
    grid steps exist once there is enough work for v7x's two TensorCores."""
    if n <= 8:
        return 8
    return max(8, min(32, ((n // 2) // 8) * 8))


# ---------------------------------------------------------------------------
# Fused kernel: conv1x1+ReLU -> (Lnorm-folded) blocked fc1+ReLU -> fc2,
# processing TG graphs per grid step.
# ---------------------------------------------------------------------------
def _gcn_audio_fused_kernel(x_ref, cw_ref, cb_ref, w1_ref, b1_ref, w2_ref,
                            b2_ref, o_ref):
    K, TG, Cin = x_ref.shape
    Cmid = cw_ref.shape[1]
    H1 = b1_ref.shape[1]
    # conv1 (1x1) + bias + ReLU over all K*TG node rows of this graph tile.
    x = x_ref[...].reshape(K * TG, Cin)          # major-dim merge: no relayout
    h = jnp.dot(x, cw_ref[...], preferred_element_type=jnp.float32)
    h = jnp.maximum(h + cb_ref[...], 0.0)        # (K*TG, Cmid) f32
    hb = h.astype(jnp.bfloat16).reshape(K, TG, Cmid)
    # fc1 on vec(Lnorm @ X_g), with Lnorm folded into w1 offline:
    #   out_g = sum_k (Lnorm @ X_g)[k,:] @ W1_k = sum_j X_g[j,:] @ W1fold_j
    # K-blocked so no in-kernel (K, Cmid) -> (1, K*Cmid) relayout is needed;
    # each partial is a (TG, Cmid) @ (Cmid, H1) MXU matmul over contiguous
    # leading-dim slabs (node-major layout -> no sublane gather).
    acc = jnp.zeros((TG, H1), jnp.float32)
    for k in range(K):                           # static unroll, K = 16
        acc = acc + jnp.dot(hb[k], w1_ref[k],
                            preferred_element_type=jnp.float32)
    hid = jnp.maximum(acc + b1_ref[...], 0.0)    # (TG, H1)
    # TODO(synk): Dropout(0.5) has no deterministic forward; eval-mode identity.
    o_ref[...] = (jnp.dot(hid.astype(jnp.bfloat16), w2_ref[...],
                          preferred_element_type=jnp.float32) + b2_ref[...])


def gcn_audio_head(sound_knc, conv_wT, conv_b, w1fold, b1, w2pT, b2p,
                   num_classes):
    """sound_knc: (K, N, Cin) bf16 -> logits (N, num_classes) f32."""
    K, N, Cin = sound_knc.shape
    Cmid = conv_wT.shape[1]
    H1 = b1.shape[0]
    NCP = w2pT.shape[1]                      # 128-lane padded class dim
    TG = _pick_tg(N)
    Np = _round_up(N, TG)
    x = sound_knc
    if Np != N:
        x = jnp.pad(x, ((0, 0), (0, Np - N), (0, 0)))
    out = pl.pallas_call(
        _gcn_audio_fused_kernel,
        out_shape=jax.ShapeDtypeStruct((Np, NCP), jnp.float32),
        grid=(Np // TG,),
        in_specs=[
            pl.BlockSpec((K, TG, Cin), lambda i: (0, i, 0)),
            pl.BlockSpec((Cin, Cmid), lambda i: (0, 0)),        # conv W resident
            pl.BlockSpec((1, Cmid), lambda i: (0, 0)),          # conv bias
            pl.BlockSpec((K, Cmid, H1), lambda i: (0, 0, 0)),   # folded fc1 W resident
            pl.BlockSpec((1, H1), lambda i: (0, 0)),            # fc1 bias
            pl.BlockSpec((H1, NCP), lambda i: (0, 0)),          # fc2 W resident
            pl.BlockSpec((1, NCP), lambda i: (0, 0)),           # fc2 bias (padded)
        ],
        out_specs=pl.BlockSpec((TG, NCP), lambda i: (i, 0)),
        compiler_params=pltpu.CompilerParams(
            dimension_semantics=("parallel",),
            vmem_limit_bytes=32 * 1024 * 1024),
    )(x, conv_wT, conv_b.reshape(1, Cmid), w1fold, b1.reshape(1, H1),
      w2pT, b2p.reshape(1, NCP))
    return out[:N, :num_classes]


# ---------------------------------------------------------------------------
# audio_forward: channel sum -> top-K -> node gather (node-major, bf16).
# ---------------------------------------------------------------------------
def make_lnorm(K):
    # TODO(synk): Graph_Init / Dynamic_Lnorm are not defined in the reference;
    # substitute a deterministic symmetric-normalised fully-connected adjacency
    # (with self-loops) as the shared Lnorm used by forward().
    ahat = jnp.ones((K, K), jnp.float32) + jnp.eye(K, dtype=jnp.float32)
    return ahat / float(K + 1)


def audio_forward_jax(K, faudio):
    """Mirror of audio_forward(); returns node features (K, N, C) bf16."""
    N, C, W, H = faudio.shape
    # TODO(synk): reference accumulates channels into an *uninitialized*
    # torch.empty buffer; implemented as the intended zero-init channel sum.
    fre = jnp.sum(faudio, axis=1)                        # (N, W, H)
    feature = fre.reshape(N, W * H)
    _, idx = jax.lax.top_k(feature, K)                   # descending, (N, K)
    # Mirror the reference's (quirky) row/column index math exactly.
    row = jnp.where(idx < H, idx // H, idx // H - 1)
    col = jnp.where(idx % H == 0, H - 1, idx % H - 1)
    # TODO(synk): data-dependent gather kept in XLA (advanced indexing).
    # Node-major output (K, N, C) + bf16 cast are fused into the gather.
    sound_knc = faudio[jnp.arange(N)[None, :], :, row.T, col.T]   # (K, N, C)
    return sound_knc.astype(jnp.bfloat16)


# ---------------------------------------------------------------------------
# Module wrapper (parameters laid out for the kernel at construction time).
# ---------------------------------------------------------------------------
class GCNAudioPallas:
    def __init__(self, num_classes=50, key=None):
        self.num_classes = num_classes
        self.K = 16
        c_in, c_mid, h1 = 2048, 256, 512
        self.c_in, self.c_mid, self.h1 = c_in, c_mid, h1
        ncp = _round_up(num_classes, 128)     # lane-dense fc2 output (pad->slice)
        self.ncp = ncp
        if key is None:
            key = jax.random.PRNGKey(0)
        ks = jax.random.split(key, 6)

        def u(kk, shape, fan_in):             # PyTorch-style default init bound
            b = 1.0 / math.sqrt(fan_in)
            return jax.random.uniform(kk, shape, jnp.float32, -b, b)

        # conv1: Conv2d(2048, 256, kernel_size=1, bias=True)
        conv_w = u(ks[0], (c_mid, c_in), c_in)            # (256, 2048)
        self.conv_wT = conv_w.T.astype(jnp.bfloat16)      # pre-transposed, bf16
        self.conv_b = u(ks[1], (c_mid,), c_in)
        # fc1: Linear(4096, 512); W1^T blocked per node: (K, 256, 512), with the
        # (static placeholder) Lnorm folded in offline:
        #   W1fold_j = sum_k Lnorm[k, j] * W1_k
        # TODO(synk): only valid while Lnorm is input-independent; if
        # Graph_Init/Dynamic_Lnorm ever become data-dependent, re-add the
        # in-kernel Lnorm matmul (or fold per call).
        fc1_w = u(ks[2], (h1, self.K * c_mid), self.K * c_mid)
        w1r = fc1_w.T.reshape(self.K, c_mid, h1)          # f32
        self.lnorm = make_lnorm(self.K)
        self.w1fold = jnp.einsum("kj,kch->jch", self.lnorm, w1r
                                 ).astype(jnp.bfloat16)
        self.b1 = u(ks[3], (h1,), self.K * c_mid)
        # fc2: Linear(512, num_classes); transposed + zero-padded to 128 lanes
        fc2_w = u(ks[4], (num_classes, h1), h1)
        self.w2pT = jnp.pad(fc2_w.T, ((0, 0), (0, ncp - num_classes))
                            ).astype(jnp.bfloat16)
        self.b2p = jnp.pad(u(ks[5], (num_classes,), h1), (0, ncp - num_classes))

    def forward(self, sounds):
        sound_knc = audio_forward_jax(self.K, sounds)     # (K, N, 2048) bf16
        return gcn_audio_head(sound_knc, self.conv_wT, self.conv_b,
                              self.w1fold, self.b1, self.w2pT, self.b2p,
                              self.num_classes)           # (N, num_classes)


if __name__ == "__main__":
    key = jax.random.PRNGKey(0)
    kx, kp = jax.random.split(key)

    # conv1 hard-codes 2048 input channels and fc1 hard-codes K*256 = 4096,
    # so the only "small" free dims are batch and spatial extent.
    N, C, W, H = 2, 2048, 8, 8
    num_classes = 50
    sounds = jax.random.normal(kx, (N, C, W, H), jnp.float32)

    model = GCNAudioPallas(num_classes=num_classes, key=kp)
    fwd = jax.jit(model.forward)
    out = fwd(sounds)
    jax.block_until_ready(out)
    assert out.shape == (N, num_classes)

    # ---- pure-JAX reference (operands rounded to bf16 to match kernel math) ----
    f32 = jnp.float32
    K = model.K
    sound_knc = audio_forward_jax(K, sounds).astype(f32)          # (K, N, Cin)
    h_ref = jnp.maximum(
        jnp.einsum("knc,cd->knd", sound_knc, model.conv_wT.astype(f32))
        + model.conv_b[None, None, :], 0.0)                       # (K, N, Cmid)
    hb_ref = h_ref.astype(jnp.bfloat16).astype(f32)
    fc1_ref = jnp.maximum(
        jnp.einsum("knc,kch->nh", hb_ref, model.w1fold.astype(f32))
        + model.b1[None, :], 0.0)
    out_ref = (fc1_ref.astype(jnp.bfloat16).astype(f32) @ model.w2pT.astype(f32)
               + model.b2p[None, :])[:, :num_classes]

    assert jnp.allclose(out, out_ref, rtol=3e-2, atol=3e-2), (
        float(jnp.max(jnp.abs(out - out_ref))))

    print("KERNEL_OK")
</pallas_src>

<mosaic_0001>
module attributes {stable_mosaic.version = 11 : i64} {
  func.func @_gcn_audio_fused_kernel(%arg0: i32, %arg1: memref<16x8x2048xbf16, #tpu.memory_space<vmem>>, %arg2: memref<2048x256xbf16, #tpu.memory_space<vmem>>, %arg3: memref<1x256xf32, #tpu.memory_space<vmem>>, %arg4: memref<16x256x512xbf16, #tpu.memory_space<vmem>>, %arg5: memref<1x512xf32, #tpu.memory_space<vmem>>, %arg6: memref<512x128xbf16, #tpu.memory_space<vmem>>, %arg7: memref<1x128xf32, #tpu.memory_space<vmem>>, %arg8: memref<8x128xf32, #tpu.memory_space<vmem>>) attributes {dimension_semantics = [#tpu.dimension_semantics<parallel>], iteration_bounds = array<i64: 1>, scalar_prefetch = 0 : i64, scratch_operands = 0 : i64, tpu.core_type = #tpu.core_type<tc>, window_params = [{transform_indices = @transform_0, window_bounds = array<i64: 16, 8, 2048>}, {pipeline_mode = #tpu.pipeline_mode<synchronous>, transform_indices = @transform_1, window_bounds = array<i64: 2048, 256>}, {pipeline_mode = #tpu.pipeline_mode<synchronous>, transform_indices = @transform_2, window_bounds = array<i64: 1, 256>}, {pipeline_mode = #tpu.pipeline_mode<synchronous>, transform_indices = @transform_3, window_bounds = array<i64: 16, 256, 512>}, {pipeline_mode = #tpu.pipeline_mode<synchronous>, transform_indices = @transform_4, window_bounds = array<i64: 1, 512>}, {pipeline_mode = #tpu.pipeline_mode<synchronous>, transform_indices = @transform_5, window_bounds = array<i64: 512, 128>}, {pipeline_mode = #tpu.pipeline_mode<synchronous>, transform_indices = @transform_6, window_bounds = array<i64: 1, 128>}, {transform_indices = @transform_7, window_bounds = array<i64: 8, 128>}]} {
    %c0 = arith.constant 0 : index
    %c0_0 = arith.constant 0 : index
    %c0_1 = arith.constant 0 : index
    %0 = vector.load %arg1[%c0, %c0_0, %c0_1] : memref<16x8x2048xbf16, #tpu.memory_space<vmem>>, vector<16x8x2048xbf16>
    %1 = vector.shape_cast %0 : vector<16x8x2048xbf16> to vector<128x2048xbf16>
    %c0_2 = arith.constant 0 : index
    %c0_3 = arith.constant 0 : index
    %2 = vector.load %arg2[%c0_2, %c0_3] : memref<2048x256xbf16, #tpu.memory_space<vmem>>, vector<2048x256xbf16>
    %cst = arith.constant dense<0.000000e+00> : vector<128x256xf32>
    %3 = tpu.matmul %1, %2, %cst {dimension_numbers = #tpu.dot_dimension_numbers<[1], [0], [0], [1], [0, 0, 1, 1], [], []>} : vector<128x2048xbf16>, vector<2048x256xbf16>, vector<128x256xf32> -> vector<128x256xf32>
    %c0_4 = arith.constant 0 : index
    %c0_5 = arith.constant 0 : index
    %4 = vector.load %arg3[%c0_4, %c0_5] : memref<1x256xf32, #tpu.memory_space<vmem>>, vector<1x256xf32>
    %5 = vector.broadcast %4 : vector<1x256xf32> to vector<128x256xf32>
    %6 = arith.addf %3, %5 : vector<128x256xf32>
    %cst_6 = arith.constant 0.000000e+00 : f32
    %7 = vector.broadcast %cst_6 : f32 to vector<128x256xf32>
    %8 = arith.maximumf %6, %7 : vector<128x256xf32>
    %9 = arith.truncf %8 : vector<128x256xf32> to vector<128x256xbf16>
    %10 = vector.shape_cast %9 : vector<128x256xbf16> to vector<16x8x256xbf16>
    %cst_7 = arith.constant 0.000000e+00 : f32
    %11 = vector.broadcast %cst_7 : f32 to vector<8x512xf32>
    %12 = vector.extract_strided_slice %10 {offsets = [0, 0, 0], sizes = [1, 8, 256], strides = [1, 1, 1]} : vector<16x8x256xbf16> to vector<1x8x256xbf16>
    %13 = vector.shape_cast %12 : vector<1x8x256xbf16> to vector<8x256xbf16>
    %c0_8 = arith.constant 0 : index
    %c0_9 = arith.constant 0 : index
    %c0_10 = arith.constant 0 : index
    %14 = vector.load %arg4[%c0_8, %c0_9, %c0_10] : memref<16x256x512xbf16, #tpu.memory_space<vmem>>, vector<1x256x512xbf16>
    %15 = vector.shape_cast %14 : vector<1x256x512xbf16> to vector<256x512xbf16>
    %cst_11 = arith.constant dense<0.000000e+00> : vector<8x512xf32>
    %16 = tpu.matmul %13, %15, %cst_11 {dimension_numbers = #tpu.dot_dimension_numbers<[1], [0], [0], [1], [0, 0, 1, 1], [], []>} : vector<8x256xbf16>, vector<256x512xbf16>, vector<8x512xf32> -> vector<8x512xf32>
    %17 = arith.addf %11, %16 : vector<8x512xf32>
    %18 = vector.extract_strided_slice %10 {offsets = [1, 0, 0], sizes = [1, 8, 256], strides = [1, 1, 1]} : vector<16x8x256xbf16> to vector<1x8x256xbf16>
    %19 = vector.shape_cast %18 : vector<1x8x256xbf16> to vector<8x256xbf16>
    %c1 = arith.constant 1 : index
    %c0_12 = arith.constant 0 : index
    %c0_13 = arith.constant 0 : index
    %20 = vector.load %arg4[%c1, %c0_12, %c0_13] : memref<16x256x512xbf16, #tpu.memory_space<vmem>>, vector<1x256x512xbf16>
    %21 = vector.shape_cast %20 : vector<1x256x512xbf16> to vector<256x512xbf16>
    %cst_14 = arith.constant dense<0.000000e+00> : vector<8x512xf32>
    %22 = tpu.matmul %19, %21, %cst_14 {dimension_numbers = #tpu.dot_dimension_numbers<[1], [0], [0], [1], [0, 0, 1, 1], [], []>} : vector<8x256xbf16>, vector<256x512xbf16>, vector<8x512xf32> -> vector<8x512xf32>
    %23 = arith.addf %17, %22 : vector<8x512xf32>
    %24 = vector.extract_strided_slice %10 {offsets = [2, 0, 0], sizes = [1, 8, 256], strides = [1, 1, 1]} : vector<16x8x256xbf16> to vector<1x8x256xbf16>
    %25 = vector.shape_cast %24 : vector<1x8x256xbf16> to vector<8x256xbf16>
    %c2 = arith.constant 2 : index
    %c0_15 = arith.constant 0 : index
    %c0_16 = arith.constant 0 : index
    %26 = vector.load %arg4[%c2, %c0_15, %c0_16] : memref<16x256x512xbf16, #tpu.memory_space<vmem>>, vector<1x256x512xbf16>
    %27 = vector.shape_cast %26 : vector<1x256x512xbf16> to vector<256x512xbf16>
    %cst_17 = arith.constant dense<0.000000e+00> : vector<8x512xf32>
    %28 = tpu.matmul %25, %27, %cst_17 {dimension_numbers = #tpu.dot_dimension_numbers<[1], [0], [0], [1], [0, 0, 1, 1], [], []>} : vector<8x256xbf16>, vector<256x512xbf16>, vector<8x512xf32> -> vector<8x512xf32>
    %29 = arith.addf %23, %28 : vector<8x512xf32>
    %30 = vector.extract_strided_slice %10 {offsets = [3, 0, 0], sizes = [1, 8, 256], strides = [1, 1, 1]} : vector<16x8x256xbf16> to vector<1x8x256xbf16>
    %31 = vector.shape_cast %30 : vector<1x8x256xbf16> to vector<8x256xbf16>
    %c3 = arith.constant 3 : index
    %c0_18 = arith.constant 0 : index
    %c0_19 = arith.constant 0 : index
    %32 = vector.load %arg4[%c3, %c0_18, %c0_19] : memref<16x256x512xbf16, #tpu.memory_space<vmem>>, vector<1x256x512xbf16>
    %33 = vector.shape_cast %32 : vector<1x256x512xbf16> to vector<256x512xbf16>
    %cst_20 = arith.constant dense<0.000000e+00> : vector<8x512xf32>
    %34 = tpu.matmul %31, %33, %cst_20 {dimension_numbers = #tpu.dot_dimension_numbers<[1], [0], [0], [1], [0, 0, 1, 1], [], []>} : vector<8x256xbf16>, vector<256x512xbf16>, vector<8x512xf32> -> vector<8x512xf32>
    %35 = arith.addf %29, %34 : vector<8x512xf32>
    %36 = vector.extract_strided_slice %10 {offsets = [4, 0, 0], sizes = [1, 8, 256], strides = [1, 1, 1]} : vector<16x8x256xbf16> to vector<1x8x256xbf16>
    %37 = vector.shape_cast %36 : vector<1x8x256xbf16> to vector<8x256xbf16>
    %c4 = arith.constant 4 : index
    %c0_21 = arith.constant 0 : index
    %c0_22 = arith.constant 0 : index
    %38 = vector.load %arg4[%c4, %c0_21, %c0_22] : memref<16x256x512xbf16, #tpu.memory_space<vmem>>, vector<1x256x512xbf16>
    %39 = vector.shape_cast %38 : vector<1x256x512xbf16> to vector<256x512xbf16>
    %cst_23 = arith.constant dense<0.000000e+00> : vector<8x512xf32>
    %40 = tpu.matmul %37, %39, %cst_23 {dimension_numbers = #tpu.dot_dimension_numbers<[1], [0], [0], [1], [0, 0, 1, 1], [], []>} : vector<8x256xbf16>, vector<256x512xbf16>, vector<8x512xf32> -> vector<8x512xf32>
    %41 = arith.addf %35, %40 : vector<8x512xf32>
    %42 = vector.extract_strided_slice %10 {offsets = [5, 0, 0], sizes = [1, 8, 256], strides = [1, 1, 1]} : vector<16x8x256xbf16> to vector<1x8x256xbf16>
    %43 = vector.shape_cast %42 : vector<1x8x256xbf16> to vector<8x256xbf16>
    %c5 = arith.constant 5 : index
    %c0_24 = arith.constant 0 : index
    %c0_25 = arith.constant 0 : index
    %44 = vector.load %arg4[%c5, %c0_24, %c0_25] : memref<16x256x512xbf16, #tpu.memory_space<vmem>>, vector<1x256x512xbf16>
    %45 = vector.shape_cast %44 : vector<1x256x512xbf16> to vector<256x512xbf16>
    %cst_26 = arith.constant dense<0.000000e+00> : vector<8x512xf32>
    %46 = tpu.matmul %43, %45, %cst_26 {dimension_numbers = #tpu.dot_dimension_numbers<[1], [0], [0], [1], [0, 0, 1, 1], [], []>} : vector<8x256xbf16>, vector<256x512xbf16>, vector<8x512xf32> -> vector<8x512xf32>
    %47 = arith.addf %41, %46 : vector<8x512xf32>
    %48 = vector.extract_strided_slice %10 {offsets = [6, 0, 0], sizes = [1, 8, 256], strides = [1, 1, 1]} : vector<16x8x256xbf16> to vector<1x8x256xbf16>
    %49 = vector.shape_cast %48 : vector<1x8x256xbf16> to vector<8x256xbf16>
    %c6 = arith.constant 6 : index
    %c0_27 = arith.constant 0 : index
    %c0_28 = arith.constant 0 : index
    %50 = vector.load %arg4[%c6, %c0_27, %c0_28] : memref<16x256x512xbf16, #tpu.memory_space<vmem>>, vector<1x256x512xbf16>
    %51 = vector.shape_cast %50 : vector<1x256x512xbf16> to vector<256x512xbf16>
    %cst_29 = arith.constant dense<0.000000e+00> : vector<8x512xf32>
    %52 = tpu.matmul %49, %51, %cst_29 {dimension_numbers = #tpu.dot_dimension_numbers<[1], [0], [0], [1], [0, 0, 1, 1], [], []>} : vector<8x256xbf16>, vector<256x512xbf16>, vector<8x512xf32> -> vector<8x512xf32>
    %53 = arith.addf %47, %52 : vector<8x512xf32>
    %54 = vector.extract_strided_slice %10 {offsets = [7, 0, 0], sizes = [1, 8, 256], strides = [1, 1, 1]} : vector<16x8x256xbf16> to vector<1x8x256xbf16>
    %55 = vector.shape_cast %54 : vector<1x8x256xbf16> to vector<8x256xbf16>
    %c7 = arith.constant 7 : index
    %c0_30 = arith.constant 0 : index
    %c0_31 = arith.constant 0 : index
    %56 = vector.load %arg4[%c7, %c0_30, %c0_31] : memref<16x256x512xbf16, #tpu.memory_space<vmem>>, vector<1x256x512xbf16>
    %57 = vector.shape_cast %56 : vector<1x256x512xbf16> to vector<256x512xbf16>
    %cst_32 = arith.constant dense<0.000000e+00> : vector<8x512xf32>
    %58 = tpu.matmul %55, %57, %cst_32 {dimension_numbers = #tpu.dot_dimension_numbers<[1], [0], [0], [1], [0, 0, 1, 1], [], []>} : vector<8x256xbf16>, vector<256x512xbf16>, vector<8x512xf32> -> vector<8x512xf32>
    %59 = arith.addf %53, %58 : vector<8x512xf32>
    %60 = vector.extract_strided_slice %10 {offsets = [8, 0, 0], sizes = [1, 8, 256], strides = [1, 1, 1]} : vector<16x8x256xbf16> to vector<1x8x256xbf16>
    %61 = vector.shape_cast %60 : vector<1x8x256xbf16> to vector<8x256xbf16>
    %c8 = arith.constant 8 : index
    %c0_33 = arith.constant 0 : index
    %c0_34 = arith.constant 0 : index
    %62 = vector.load %arg4[%c8, %c0_33, %c0_34] : memref<16x256x512xbf16, #tpu.memory_space<vmem>>, vector<1x256x512xbf16>
    %63 = vector.shape_cast %62 : vector<1x256x512xbf16> to vector<256x512xbf16>
    %cst_35 = arith.constant dense<0.000000e+00> : vector<8x512xf32>
    %64 = tpu.matmul %61, %63, %cst_35 {dimension_numbers = #tpu.dot_dimension_numbers<[1], [0], [0], [1], [0, 0, 1, 1], [], []>} : vector<8x256xbf16>, vector<256x512xbf16>, vector<8x512xf32> -> vector<8x512xf32>
    %65 = arith.addf %59, %64 : vector<8x512xf32>
    %66 = vector.extract_strided_slice %10 {offsets = [9, 0, 0], sizes = [1, 8, 256], strides = [1, 1, 1]} : vector<16x8x256xbf16> to vector<1x8x256xbf16>
    %67 = vector.shape_cast %66 : vector<1x8x256xbf16> to vector<8x256xbf16>
    %c9 = arith.constant 9 : index
    %c0_36 = arith.constant 0 : index
    %c0_37 = arith.constant 0 : index
    %68 = vector.load %arg4[%c9, %c0_36, %c0_37] : memref<16x256x512xbf16, #tpu.memory_space<vmem>>, vector<1x256x512xbf16>
    %69 = vector.shape_cast %68 : vector<1x256x512xbf16> to vector<256x512xbf16>
    %cst_38 = arith.constant dense<0.000000e+00> : vector<8x512xf32>
    %70 = tpu.matmul %67, %69, %cst_38 {dimension_numbers = #tpu.dot_dimension_numbers<[1], [0], [0], [1], [0, 0, 1, 1], [], []>} : vector<8x256xbf16>, vector<256x512xbf16>, vector<8x512xf32> -> vector<8x512xf32>
    %71 = arith.addf %65, %70 : vector<8x512xf32>
    %72 = vector.extract_strided_slice %10 {offsets = [10, 0, 0], sizes = [1, 8, 256], strides = [1, 1, 1]} : vector<16x8x256xbf16> to vector<1x8x256xbf16>
    %73 = vector.shape_cast %72 : vector<1x8x256xbf16> to vector<8x256xbf16>
    %c10 = arith.constant 10 : index
    %c0_39 = arith.constant 0 : index
    %c0_40 = arith.constant 0 : index
    %74 = vector.load %arg4[%c10, %c0_39, %c0_40] : memref<16x256x512xbf16, #tpu.memory_space<vmem>>, vector<1x256x512xbf16>
    %75 = vector.shape_cast %74 : vector<1x256x512xbf16> to vector<256x512xbf16>
    %cst_41 = arith.constant dense<0.000000e+00> : vector<8x512xf32>
    %76 = tpu.matmul %73, %75, %cst_41 {dimension_numbers = #tpu.dot_dimension_numbers<[1], [0], [0], [1], [0, 0, 1, 1], [], []>} : vector<8x256xbf16>, vector<256x512xbf16>, vector<8x512xf32> -> vector<8x512xf32>
    %77 = arith.addf %71, %76 : vector<8x512xf32>
    %78 = vector.extract_strided_slice %10 {offsets = [11, 0, 0], sizes = [1, 8, 256], strides = [1, 1, 1]} : vector<16x8x256xbf16> to vector<1x8x256xbf16>
    %79 = vector.shape_cast %78 : vector<1x8x256xbf16> to vector<8x256xbf16>
    %c11 = arith.constant 11 : index
    %c0_42 = arith.constant 0 : index
    %c0_43 = arith.constant 0 : index
    %80 = vector.load %arg4[%c11, %c0_42, %c0_43] : memref<16x256x512xbf16, #tpu.memory_space<vmem>>, vector<1x256x512xbf16>
    %81 = vector.shape_cast %80 : vector<1x256x512xbf16> to vector<256x512xbf16>
    %cst_44 = arith.constant dense<0.000000e+00> : vector<8x512xf32>
    %82 = tpu.matmul %79, %81, %cst_44 {dimension_numbers = #tpu.dot_dimension_numbers<[1], [0], [0], [1], [0, 0, 1, 1], [], []>} : vector<8x256xbf16>, vector<256x512xbf16>, vector<8x512xf32> -> vector<8x512xf32>
    %83 = arith.addf %77, %82 : vector<8x512xf32>
    %84 = vector.extract_strided_slice %10 {offsets = [12, 0, 0], sizes = [1, 8, 256], strides = [1, 1, 1]} : vector<16x8x256xbf16> to vector<1x8x256xbf16>
    %85 = vector.shape_cast %84 : vector<1x8x256xbf16> to vector<8x256xbf16>
    %c12 = arith.constant 12 : index
    %c0_45 = arith.constant 0 : index
    %c0_46 = arith.constant 0 : index
    %86 = vector.load %arg4[%c12, %c0_45, %c0_46] : memref<16x256x512xbf16, #tpu.memory_space<vmem>>, vector<1x256x512xbf16>
    %87 = vector.shape_cast %86 : vector<1x256x512xbf16> to vector<256x512xbf16>
    %cst_47 = arith.constant dense<0.000000e+00> : vector<8x512xf32>
    %88 = tpu.matmul %85, %87, %cst_47 {dimension_numbers = #tpu.dot_dimension_numbers<[1], [0], [0], [1], [0, 0, 1, 1], [], []>} : vector<8x256xbf16>, vector<256x512xbf16>, vector<8x512xf32> -> vector<8x512xf32>
    %89 = arith.addf %83, %88 : vector<8x512xf32>
    %90 = vector.extract_strided_slice %10 {offsets = [13, 0, 0], sizes = [1, 8, 256], strides = [1, 1, 1]} : vector<16x8x256xbf16> to vector<1x8x256xbf16>
    %91 = vector.shape_cast %90 : vector<1x8x256xbf16> to vector<8x256xbf16>
    %c13 = arith.constant 13 : index
    %c0_48 = arith.constant 0 : index
    %c0_49 = arith.constant 0 : index
    %92 = vector.load %arg4[%c13, %c0_48, %c0_49] : memref<16x256x512xbf16, #tpu.memory_space<vmem>>, vector<1x256x512xbf16>
    %93 = vector.shape_cast %92 : vector<1x256x512xbf16> to vector<256x512xbf16>
    %cst_50 = arith.constant dense<0.000000e+00> : vector<8x512xf32>
    %94 = tpu.matmul %91, %93, %cst_50 {dimension_numbers = #tpu.dot_dimension_numbers<[1], [0], [0], [1], [0, 0, 1, 1], [], []>} : vector<8x256xbf16>, vector<256x512xbf16>, vector<8x512xf32> -> vector<8x512xf32>
    %95 = arith.addf %89, %94 : vector<8x512xf32>
    %96 = vector.extract_strided_slice %10 {offsets = [14, 0, 0], sizes = [1, 8, 256], strides = [1, 1, 1]} : vector<16x8x256xbf16> to vector<1x8x256xbf16>
    %97 = vector.shape_cast %96 : vector<1x8x256xbf16> to vector<8x256xbf16>
    %c14 = arith.constant 14 : index
    %c0_51 = arith.constant 0 : index
    %c0_52 = arith.constant 0 : index
    %98 = vector.load %arg4[%c14, %c0_51, %c0_52] : memref<16x256x512xbf16, #tpu.memory_space<vmem>>, vector<1x256x512xbf16>
    %99 = vector.shape_cast %98 : vector<1x256x512xbf16> to vector<256x512xbf16>
    %cst_53 = arith.constant dense<0.000000e+00> : vector<8x512xf32>
    %100 = tpu.matmul %97, %99, %cst_53 {dimension_numbers = #tpu.dot_dimension_numbers<[1], [0], [0], [1], [0, 0, 1, 1], [], []>} : vector<8x256xbf16>, vector<256x512xbf16>, vector<8x512xf32> -> vector<8x512xf32>
    %101 = arith.addf %95, %100 : vector<8x512xf32>
    %102 = vector.extract_strided_slice %10 {offsets = [15, 0, 0], sizes = [1, 8, 256], strides = [1, 1, 1]} : vector<16x8x256xbf16> to vector<1x8x256xbf16>
    %103 = vector.shape_cast %102 : vector<1x8x256xbf16> to vector<8x256xbf16>
    %c15 = arith.constant 15 : index
    %c0_54 = arith.constant 0 : index
    %c0_55 = arith.constant 0 : index
    %104 = vector.load %arg4[%c15, %c0_54, %c0_55] : memref<16x256x512xbf16, #tpu.memory_space<vmem>>, vector<1x256x512xbf16>
    %105 = vector.shape_cast %104 : vector<1x256x512xbf16> to vector<256x512xbf16>
    %cst_56 = arith.constant dense<0.000000e+00> : vector<8x512xf32>
    %106 = tpu.matmul %103, %105, %cst_56 {dimension_numbers = #tpu.dot_dimension_numbers<[1], [0], [0], [1], [0, 0, 1, 1], [], []>} : vector<8x256xbf16>, vector<256x512xbf16>, vector<8x512xf32> -> vector<8x512xf32>
    %107 = arith.addf %101, %106 : vector<8x512xf32>
    %c0_57 = arith.constant 0 : index
    %c0_58 = arith.constant 0 : index
    %108 = vector.load %arg5[%c0_57, %c0_58] : memref<1x512xf32, #tpu.memory_space<vmem>>, vector<1x512xf32>
    %109 = vector.broadcast %108 : vector<1x512xf32> to vector<8x512xf32>
    %110 = arith.addf %107, %109 : vector<8x512xf32>
    %cst_59 = arith.constant 0.000000e+00 : f32
    %111 = vector.broadcast %cst_59 : f32 to vector<8x512xf32>
    %112 = arith.maximumf %110, %111 : vector<8x512xf32>
    %113 = arith.truncf %112 : vector<8x512xf32> to vector<8x512xbf16>
    %c0_60 = arith.constant 0 : index
    %c0_61 = arith.constant 0 : index
    %114 = vector.load %arg6[%c0_60, %c0_61] : memref<512x128xbf16, #tpu.memory_space<vmem>>, vector<512x128xbf16>
    %cst_62 = arith.constant dense<0.000000e+00> : vector<8x128xf32>
    %115 = tpu.matmul %113, %114, %cst_62 {dimension_numbers = #tpu.dot_dimension_numbers<[1], [0], [0], [1], [0, 0, 1, 1], [], []>} : vector<8x512xbf16>, vector<512x128xbf16>, vector<8x128xf32> -> vector<8x128xf32>
    %c0_63 = arith.constant 0 : index
    %c0_64 = arith.constant 0 : index
    %116 = vector.load %arg7[%c0_63, %c0_64] : memref<1x128xf32, #tpu.memory_space<vmem>>, vector<1x128xf32>
    %117 = vector.broadcast %116 : vector<1x128xf32> to vector<8x128xf32>
    %118 = arith.addf %115, %117 : vector<8x128xf32>
    %c0_65 = arith.constant 0 : index
    %c0_66 = arith.constant 0 : index
    %119 = vector.load %arg8[%c0_65, %c0_66] : memref<8x128xf32, #tpu.memory_space<vmem>>, vector<8x128xf32>
    tpu.vector_store %arg8[%c0_65, %c0_66], %118 {strides = array<i32>} : memref<8x128xf32, #tpu.memory_space<vmem>>, vector<8x128xf32>,
    return
  }
  func.func @transform_0(%arg0: i32) -> (i32, i32, i32) {
    %c0_i32 = arith.constant 0 : i32
    %c0_i32_0 = arith.constant 0 : i32
    %c0_i32_1 = arith.constant 0 : i32
    return %c0_i32, %arg0, %c0_i32_0 : i32, i32, i32
  }
  func.func @transform_1(%arg0: i32) -> (i32, i32) {
    %c0_i32 = arith.constant 0 : i32
    %c0_i32_0 = arith.constant 0 : i32
    %c0_i32_1 = arith.constant 0 : i32
    return %c0_i32, %c0_i32_0 : i32, i32
  }
  func.func @transform_2(%arg0: i32) -> (i32, i32) {
    %c0_i32 = arith.constant 0 : i32
    %c0_i32_0 = arith.constant 0 : i32
    %c0_i32_1 = arith.constant 0 : i32
    return %c0_i32, %c0_i32_0 : i32, i32
  }
  func.func @transform_3(%arg0: i32) -> (i32, i32, i32) {
    %c0_i32 = arith.constant 0 : i32
    %c0_i32_0 = arith.constant 0 : i32
    %c0_i32_1 = arith.constant 0 : i32
    %c0_i32_2 = arith.constant 0 : i32
    return %c0_i32, %c0_i32_0, %c0_i32_1 : i32, i32, i32
  }
  func.func @transform_4(%arg0: i32) -> (i32, i32) {
    %c0_i32 = arith.constant 0 : i32
    %c0_i32_0 = arith.constant 0 : i32
    %c0_i32_1 = arith.constant 0 : i32
    return %c0_i32, %c0_i32_0 : i32, i32
  }
  func.func @transform_5(%arg0: i32) -> (i32, i32) {
    %c0_i32 = arith.constant 0 : i32
    %c0_i32_0 = arith.constant 0 : i32
    %c0_i32_1 = arith.constant 0 : i32
    return %c0_i32, %c0_i32_0 : i32, i32
  }
  func.func @transform_6(%arg0: i32) -> (i32, i32) {
    %c0_i32 = arith.constant 0 : i32
    %c0_i32_0 = arith.constant 0 : i32
    %c0_i32_1 = arith.constant 0 : i32
    return %c0_i32, %c0_i32_0 : i32, i32
  }
  func.func @transform_7(%arg0: i32) -> (i32, i32) {
    %c0_i32 = arith.constant 0 : i32
    %c0_i32_0 = arith.constant 0 : i32
    return %arg0, %c0_i32 : i32, i32
  }
}

</mosaic_0001>

<bundles_post_ra>
// kernel: forward.1
= control target key start
LH: loop header
LB: loop body
LE: loop exit
PB: predicated region body
PF: predicated region fallthrough
CT: control target
= control target key end

     0   :  { %12 = vsyncpa [#allocation3], 0  ;;  %s16931_s0 = inlined_call_operand.vmem [shape: bf16[16,8,2048], index: 0, kind: input, shape index: {}]   ;;  %s16932_s1 = inlined_call_operand.vmem [shape: bf16[2048,256], index: 1, kind: input, shape index: {}]   ;;  %s16933_s2 = inlined_call_operand.hbm [shape: f32[1,256], index: 2, kind: input, shape index: {}]   ;;  %s16934_s3 = inlined_call_operand.hbm [shape: bf16[16,256,512], index: 3, kind: input, shape index: {}]   ;;  %s16935_s4 = inlined_call_operand.hbm [shape: f32[1,512], index: 4, kind: input, shape index: {}]   ;;  %s16936_s5 = inlined_call_operand.hbm [shape: bf16[512,128], index: 5, kind: input, shape index: {}]   ;;  %s16937_s6 = inlined_call_operand.hbm [shape: f32[1,128], index: 6, kind: input, shape index: {}]   ;;  %s16938_s7 = inlined_call_operand.vmem [shape: f32[8,128], index: 7, kind: output, shape index: {}]  }
   0x1   :  { %13 = vsyncpa [#allocation5], 0 }
   0x2   :  { %14 = vsyncpa [#allocation8], 0  ;;  %s14997_s24 = smov [#allocation4]  }
   0x3   :  { %s34_s25 = sshll.u32 %s14997_s24, 4  ;;  %s35_s25 = int_to_ptr.vmem [resolvable:$true] %s34_s25 }
   0x4   :  { %s14899_s26 = scalar_lea.vmem %s35_s25, 131072  ;;  %p14904_p1 = scmp.lt.s32.totalorder %s35_s25, %s35_s25 }
   0x5   :  { %p14900_p0 = scmp.ne.s32.totalorder %s35_s25, %s14899_s26  ;;  %p14905_p2 = scmp.lt.s32.totalorder %s14899_s26, %s14899_s26 }
   0x7   :  { %p14906_p3 = por %p14905_p2, %p14904_p1 }
   0x9   :  { %p14907_p4 = pnand %p14906_p3, %p14900_p0 }
   0xb   :  { %14910 = shalt.err (!%p14907_p4)
}
   0xc   :  { %s14998_s27 = smov 256   ;;  %s14999_s28 = smov 16  }
   0xd   :  { %40 = dma.hbm_to_vmem [thread:$0]  %s16934_s3, 131072, %s35_s25, [#allocation5], %s14998_s27, %s14998_s27, %s14999_s28  }
   0xe   :  { %s15000_s8 = smov [#allocation7]  }
   0xf   :  { %s56_s9 = sshll.u32 %s15000_s8, 4  ;;  %s57_s9 = int_to_ptr.vmem [resolvable:$true] %s56_s9 }
  0x10   :  { %s14919_s10 = scalar_lea.vmem %s57_s9, 4096  ;;  %p14924_p6 = scmp.lt.s32.totalorder %s57_s9, %s57_s9 }
  0x11   :  { %p14920_p5 = scmp.ne.s32.totalorder %s57_s9, %s14919_s10  ;;  %p14925_p7 = scmp.lt.s32.totalorder %s14919_s10, %s14919_s10 }
  0x13   :  { %p14926_p8 = por %p14925_p7, %p14924_p6 }
  0x15   :  { %p14927_p9 = pnand %p14926_p8, %p14920_p5 }
  0x17   :  { %14930 = shalt.err (!%p14927_p9)
}
  0x18   :  { %s15001_s11 = smov 64   ;;  %s15002_s12 = smov 4  }
  0x19   :  { %62 = dma.hbm_to_vmem [thread:$0]  %s16936_s5, 4096, %s57_s9, [#allocation8], %s15001_s11, %s15001_s11, %s15002_s12  }
  0x1a   :  { %s15003_s15 = smov [#allocation2]   ;;  %s15004_s17 = smov [#allocation6]  }
  0x1b   :  { %s25_s16 = sshll.u32 %s15003_s15, 4  ;;  %s47_s3 = sshll.u32 %s15004_s17, 4  ;;  %s26_s16 = int_to_ptr.vmem [resolvable:$true] %s25_s16  ;;  %s48_s3 = int_to_ptr.vmem [resolvable:$true] %s47_s3 }
  0x1c   :  { %s14939_s18 = scalar_lea.vmem %s26_s16, 32  ;;  %p14944_p11 = scmp.lt.s32.totalorder %s26_s16, %s26_s16 }
  0x1d   :  { %p14940_p10 = scmp.ne.s32.totalorder %s26_s16, %s14939_s18  ;;  %p14945_p12 = scmp.lt.s32.totalorder %s14939_s18, %s14939_s18 }
  0x1f   :  { %p14946_p13 = por %p14945_p12, %p14944_p11 }
  0x21   :  { %p14947_p0 = pnand %p14946_p13, %p14940_p10 }
  0x23   :  { %14950 = shalt.err (!%p14947_p0)
}
  0x24   :  { %28 = dma.hbm_to_vmem [thread:$0]  %s16933_s2, 32, %s26_s16, [#allocation3]  }
  0x25   :  { %s14959_s21 = scalar_lea.vmem %s48_s3, 64  ;;  %p14964_p2 = scmp.lt.s32.totalorder %s48_s3, %s48_s3 }
  0x26   :  { %p14960_p1 = scmp.ne.s32.totalorder %s48_s3, %s14959_s21  ;;  %p14965_p3 = scmp.lt.s32.totalorder %s14959_s21, %s14959_s21 }
  0x28   :  { %p14966_p4 = por %p14965_p3, %p14964_p2 }
  0x2a   :  { %p14967_p5 = pnand %p14966_p4, %p14960_p1 }
  0x2c   :  { %14970 = shalt.err (!%p14967_p5)
}
  0x2d   :  { %50 = dma.hbm_to_vmem [thread:$0]  %s16935_s4, 64, %s48_s3, [#allocation5]  }
  0x2e   :  { %s15005_s23 = smov [#allocation9]  }
  0x2f   :  { %s69_s24 = sshll.u32 %s15005_s23, 4  ;;  %s70_s24 = int_to_ptr.vmem [resolvable:$true] %s69_s24 }
  0x30   :  { %s14979_s25 = scalar_lea.vmem %s70_s24, 16  ;;  %s14983_s26 = scalar_lea.vmem %s70_s24, 32 }
  0x31   :  { %p14980_p6 = scmp.ne.s32.totalorder %s70_s24, %s14979_s25  ;;  %p14984_p7 = scmp.lt.s32.totalorder %s70_s24, %s70_s24 }
  0x32   :  { %p14985_p8 = scmp.lt.s32.totalorder %s14983_s26, %s14979_s25 }
  0x34   :  { %p14986_p9 = por %p14985_p8, %p14984_p7 }
  0x36   :  { %p14987_p10 = pnand %p14986_p9, %p14980_p6 }
  0x38   :  { %14990 = shalt.err (!%p14987_p10)
}
  0x39   :  { %72 = dma.hbm_to_vmem [thread:$0]  %s16937_s6, 16, %s70_s24, [#allocation8]  }
  0x3a   :  { %14991 = dma.done.wait [#allocation3], 32  }
  0x3b   :  { %14992 = vsyncadd [#allocation3], 4294967264 }
  0x3c   :  { %14993 = dma.done.wait [#allocation5], 131136  }
  0x3d   :  { %14994 = vsyncadd [#allocation5], 4294836160 }
  0x3e   :  { %14995 = dma.done.wait [#allocation8], 4112  }
  0x3f   :  { %14996 = vsyncadd [#allocation8], 4294963184  ;;  %v12939_v0 = vld [vmem:[%s16932_s1 + $0x74] ss:$8 sps:$4 sm:$0xff]   ;;  %v12943_v2 = vld [vmem:[%s16932_s1 + $0x70] ss:$8 sps:$4 sm:$0xff]  }
  0x40   :  { %v12941_v1 = vld [vmem:[%s16932_s1 + $0x174] ss:$8 sps:$4 sm:$0xff]   ;;  %2405 = vmatprep.subr.bf16.mxu0 %v12939_v0  ;;  %v12944_v3 = vld [vmem:[%s16932_s1 + $0x170] ss:$8 sps:$4 sm:$0xff]   ;;  %v12945_v4 = vld [vmem:[%s16932_s1 + $0x64] ss:$8 sps:$4 sm:$0xff]  }
  0x41   :  { %2518 = vmatprep.subr.bf16.mxu1 %v12941_v1  ;;  %2406 = vmatpush1.bf16.msra.mxu0 %v12943_v2  ;;  %v12947_v5 = vld [vmem:[%s16932_s1 + $0x164] ss:$8 sps:$4 sm:$0xff]   ;;  %v12949_v6 = vld [vmem:[%s16932_s1 + $0x60] ss:$8 sps:$4 sm:$0xff]   ;;  %v12951_v8 = vld [vmem:[%s16932_s1 + $0x54] ss:$8 sps:$4 sm:$0xff]  }
  0x42   :  { %2519 = vmatpush1.bf16.msra.mxu1 %v12944_v3  ;;  %2407 = vmatprep.subr.bf16.mxu0 %v12945_v4  ;;  %v12950_v7 = vld [vmem:[%s16932_s1 + $0x160] ss:$8 sps:$4 sm:$0xff]   ;;  %v12953_v9 = vld [vmem:[%s16932_s1 + $0x154] ss:$8 sps:$4 sm:$0xff]   ;;  %v12955_v10 = vld [vmem:[%s16932_s1 + $0x50] ss:$8 sps:$4 sm:$0xff]  }
  0x43   :  { %2520 = vmatprep.subr.bf16.mxu1 %v12947_v5  ;;  %v12956_v11 = vld [vmem:[%s16932_s1 + $0x150] ss:$8 sps:$4 sm:$0xff]   ;;  %v12957_v12 = vld [vmem:[%s16932_s1 + $0x44] ss:$8 sps:$4 sm:$0xff]   ;;  %v12961_v14 = vld [vmem:[%s16932_s1 + $0x40] ss:$8 sps:$4 sm:$0xff]  }
  0x44   :  { %v12959_v13 = vld [vmem:[%s16932_s1 + $0x144] ss:$8 sps:$4 sm:$0xff]   ;;  %v12962_v15 = vld [vmem:[%s16932_s1 + $0x140] ss:$8 sps:$4 sm:$0xff]   ;;  %v12963_v16 = vld [vmem:[%s16932_s1 + $0x34] ss:$8 sps:$4 sm:$0xff]  }
  0x45   :  { %2408 = vmatpush1.bf16.msra.mxu0 %v12949_v6  ;;  %v12965_v17 = vld [vmem:[%s16932_s1 + $0x134] ss:$8 sps:$4 sm:$0xff]   ;;  %v12967_v18 = vld [vmem:[%s16932_s1 + $0x30] ss:$8 sps:$4 sm:$0xff]   ;;  %v12969_v20 = vld [vmem:[%s16932_s1 + $0x24] ss:$8 sps:$4 sm:$0xff]  }
  0x46   :  { %2521 = vmatpush1.bf16.msra.mxu1 %v12950_v7  ;;  %2409 = vmatprep.subr.bf16.mxu0 %v12951_v8  ;;  %v12968_v19 = vld [vmem:[%s16932_s1 + $0x130] ss:$8 sps:$4 sm:$0xff]   ;;  %v12971_v21 = vld [vmem:[%s16932_s1 + $0x124] ss:$8 sps:$4 sm:$0xff]   ;;  %v12973_v22 = vld [vmem:[%s16932_s1 + $0x20] ss:$8 sps:$4 sm:$0xff]  }
  0x47   :  { %2522 = vmatprep.subr.bf16.mxu1 %v12953_v9  ;;  %v12974_v23 = vld [vmem:[%s16932_s1 + $0x120] ss:$8 sps:$4 sm:$0xff]   ;;  %v12975_v24 = vld [vmem:[%s16932_s1 + $0x14] ss:$8 sps:$4 sm:$0xff]   ;;  %v12979_v26 = vld [vmem:[%s16932_s1 + $0x10] ss:$8 sps:$4 sm:$0xff]  }
  0x48   :  { %v12977_v25 = vld [vmem:[%s16932_s1 + $0x114] ss:$8 sps:$4 sm:$0xff]   ;;  %v12980_v27 = vld [vmem:[%s16932_s1 + $0x110] ss:$8 sps:$4 sm:$0xff]   ;;  %v12981_v28 = vld [vmem:[%s16932_s1 + $0x4] ss:$8 sps:$4 sm:$0xff]  }
  0x49   :  { %2410 = vmatpush1.bf16.msra.mxu0 %v12955_v10  ;;  %v12983_v29 = vld [vmem:[%s16932_s1 + $0x104] ss:$8 sps:$4 sm:$0xff]   ;;  %v12985_v30 = vld [vmem:[%s16932_s1] ss:$8 sps:$4 sm:$0xff]   ;;  %v12987_v32 = vld [vmem:[%s16932_s1 + $0xf4] ss:$8 sps:$4 sm:$0xff]  }
  0x4a   :  { %2523 = vmatpush1.bf16.msra.mxu1 %v12956_v11  ;;  %2411 = vmatprep.subr.bf16.mxu0 %v12957_v12  ;;  %v12986_v31 = vld [vmem:[%s16932_s1 + $0x100] ss:$8 sps:$4 sm:$0xff]   ;;  %v12989_v33 = vld [vmem:[%s16932_s1 + $0x1f4] ss:$8 sps:$4 sm:$0xff]   ;;  %v12991_v34 = vld [vmem:[%s16932_s1 + $0xf0] ss:$8 sps:$4 sm:$0xff]  }
  0x4b   :  { %2524 = vmatprep.subr.bf16.mxu1 %v12959_v13  ;;  %v12992_v35 = vld [vmem:[%s16932_s1 + $0x1f0] ss:$8 sps:$4 sm:$0xff]   ;;  %v12993_v36 = vld [vmem:[%s16932_s1 + $0xe4] ss:$8 sps:$4 sm:$0xff]   ;;  %v12997_v38 = vld [vmem:[%s16932_s1 + $0xe0] ss:$8 sps:$4 sm:$0xff]  }
  0x4c   :  { %v12995_v37 = vld [vmem:[%s16932_s1 + $0x1e4] ss:$8 sps:$4 sm:$0xff]   ;;  %v12998_v39 = vld [vmem:[%s16932_s1 + $0x1e0] ss:$8 sps:$4 sm:$0xff]   ;;  %v12999_v40 = vld [vmem:[%s16932_s1 + $0xd4] ss:$8 sps:$4 sm:$0xff]  }
  0x4d   :  { %2412 = vmatpush1.bf16.msra.mxu0 %v12961_v14  ;;  %v13001_v41 = vld [vmem:[%s16932_s1 + $0x1d4] ss:$8 sps:$4 sm:$0xff]   ;;  %v13003_v42 = vld [vmem:[%s16932_s1 + $0xd0] ss:$8 sps:$4 sm:$0xff]   ;;  %v13005_v44 = vld [vmem:[%s16932_s1 + $0xc4] ss:$8 sps:$4 sm:$0xff]  }
  0x4e   :  { %2525 = vmatpush1.bf16.msra.mxu1 %v12962_v15  ;;  %2413 = vmatprep.subr.bf16.mxu0 %v12963_v16  ;;  %v13004_v43 = vld [vmem:[%s16932_s1 + $0x1d0] ss:$8 sps:$4 sm:$0xff]   ;;  %v13007_v45 = vld [vmem:[%s16932_s1 + $0x1c4] ss:$8 sps:$4 sm:$0xff]   ;;  %v13009_v46 = vld [vmem:[%s16932_s1 + $0xc0] ss:$8 sps:$4 sm:$0xff]  }
  0x4f   :  { %2526 = vmatprep.subr.bf16.mxu1 %v12965_v17  ;;  %v13010_v47 = vld [vmem:[%s16932_s1 + $0x1c0] ss:$8 sps:$4 sm:$0xff]   ;;  %v13011_v52 = vld [vmem:[%s16932_s1 + $0xb4] ss:$8 sps:$4 sm:$0xff]   ;;  %v13015_v56 = vld [vmem:[%s16932_s1 + $0xb0] ss:$8 sps:$4 sm:$0xff]  }
  0x50   :  { %v89_v48 = vld [vmem:[%s16931_s0] sm:$0xff]  ;;  %v90_v50 = vld [vmem:[%s16931_s0 + $0x8] sm:$0xff]  ;;  %v13013_v54 = vld [vmem:[%s16932_s1 + $0x1b4] ss:$8 sps:$4 sm:$0xff]  }
  0x51   :  { %2414 = vmatpush1.bf16.msra.mxu0 %v12967_v18  ;;  %v97_v49 = vld [vmem:[%s16931_s0 + $0x40] sm:$0xff]  ;;  %v98_v51 = vld [vmem:[%s16931_s0 + $0x48] sm:$0xff]  ;;  %v13016_v57 = vld [vmem:[%s16932_s1 + $0x1b0] ss:$8 sps:$4 sm:$0xff]  }
  0x52   :  { %2527 = vmatpush1.bf16.msra.mxu1 %v12968_v19  ;;  %2415 = vmatprep.subr.bf16.mxu0 %v12969_v20  ;;  %v11382_v53 = vcombine.high %v89_v48, %v97_v49  ;;  %v11384_v55 = vcombine.high %v90_v50, %v98_v51  ;;  %v13017_v58 = vld [vmem:[%s16932_s1 + $0xa4] ss:$8 sps:$4 sm:$0xff]   ;;  %v13021_v60 = vld [vmem:[%s16932_s1 + $0xa0] ss:$8 sps:$4 sm:$0xff]   ;;  %v13023_v62 = vld [vmem:[%s16932_s1 + $0x94] ss:$8 sps:$4 sm:$0xff]   ;;  %v11381_v11 = vcombine.low %v89_v48, %v97_v49 }
  0x53   :  { %2528 = vmatprep.subr.bf16.mxu1 %v12971_v21  ;;  %v13019_v59 = vld [vmem:[%s16932_s1 + $0x1a4] ss:$8 sps:$4 sm:$0xff]   ;;  %v13022_v61 = vld [vmem:[%s16932_s1 + $0x1a0] ss:$8 sps:$4 sm:$0xff]   ;;  %v13025_v63 = vld [vmem:[%s16932_s1 + $0x194] ss:$8 sps:$4 sm:$0xff]   ;;  %v11383_v12 = vcombine.low %v90_v50, %v98_v51 }
  0x54   :  { %2437 = vmatprep.mubr.bf16.mxu0 %v11382_v53  ;;  %2550 = vmatprep.mubr.bf16.mxu1 %v11384_v55  ;;  %v13027_v0 = vld [vmem:[%s16932_s1 + $0x90] ss:$8 sps:$4 sm:$0xff]   ;;  %v13029_v2 = vld [vmem:[%s16932_s1 + $0x84] ss:$8 sps:$4 sm:$0xff]   ;;  %v13033_v4 = vld [vmem:[%s16932_s1 + $0x80] ss:$8 sps:$4 sm:$0xff]  }
  0x55   :  { %2416 = vmatpush1.bf16.msra.mxu0 %v12973_v22  ;;  %v13028_v1 = vld [vmem:[%s16932_s1 + $0x190] ss:$8 sps:$4 sm:$0xff]   ;;  %v13031_v3 = vld [vmem:[%s16932_s1 + $0x184] ss:$8 sps:$4 sm:$0xff]   ;;  %v13034_v5 = vld [vmem:[%s16932_s1 + $0x180] ss:$8 sps:$4 sm:$0xff]  }
  0x56   :  { %2529 = vmatpush1.bf16.msra.mxu1 %v12974_v23  ;;  %2417 = vmatprep.subr.bf16.mxu0 %v12975_v24  ;;  %v13037_v6 = vld [vmem:[%s16932_s1 + $0x274] ss:$8 sps:$4 sm:$0xff]   ;;  %v13035_v8 = vld [vmem:[%s16932_s1 + $0x270] ss:$8 sps:$4 sm:$0xff]   ;;  %v105_v10 = vld [vmem:[%s16931_s0 + $0x80] sm:$0xff] }
  0x57   :  { %2530 = vmatprep.subr.bf16.mxu1 %v12977_v25  ;;  %v13040_v7 = vld [vmem:[%s16932_s1 + $0x374] ss:$8 sps:$4 sm:$0xff]   ;;  %v13038_v9 = vld [vmem:[%s16932_s1 + $0x370] ss:$8 sps:$4 sm:$0xff]   ;;  %v113_v13 = vld [vmem:[%s16931_s0 + $0xc0] sm:$0xff] }
  0x58   :  { %v106_v14 = vld [vmem:[%s16931_s0 + $0x88] sm:$0xff]  ;;  %v11398_v18 = vcombine.high %v105_v10, %v113_v13  ;;  %v13049_v22 = vld [vmem:[%s16932_s1 + $0x254] ss:$8 sps:$4 sm:$0xff]   ;;  %v13047_v24 = vld [vmem:[%s16932_s1 + $0x250] ss:$8 sps:$4 sm:$0xff]  }
  0x59   :  { %2418 = vmatpush1.bf16.msra.mxu0 %v12979_v26  ;;  %v114_v15 = vld [vmem:[%s16931_s0 + $0xc8] sm:$0xff]  ;;  %v13052_v23 = vld [vmem:[%s16932_s1 + $0x354] ss:$8 sps:$4 sm:$0xff]   ;;  %v13050_v25 = vld [vmem:[%s16932_s1 + $0x350] ss:$8 sps:$4 sm:$0xff]  }
  0x5a   :  { %2531 = vmatpush1.bf16.msra.mxu1 %v12980_v27  ;;  %2419 = vmatprep.subr.bf16.mxu0 %v12981_v28  ;;  %v13043_v16 = vld [vmem:[%s16932_s1 + $0x264] ss:$8 sps:$4 sm:$0xff]   ;;  %v11400_v19 = vcombine.high %v106_v14, %v114_v15  ;;  %v13041_v20 = vld [vmem:[%s16932_s1 + $0x260] ss:$8 sps:$4 sm:$0xff]   ;;  %v11397_v28 = vcombine.low %v105_v10, %v113_v13  ;;  %v13076_v55 = vld [vmem:[%s16932_s1 + $0x314] ss:$8 sps:$4 sm:$0xff]  }
  0x5b   :  { %2532 = vmatprep.subr.bf16.mxu1 %v12983_v29  ;;  %v13046_v17 = vld [vmem:[%s16932_s1 + $0x364] ss:$8 sps:$4 sm:$0xff]   ;;  %v13044_v21 = vld [vmem:[%s16932_s1 + $0x360] ss:$8 sps:$4 sm:$0xff]   ;;  %v11399_v29 = vcombine.low %v106_v14, %v114_v15  ;;  %v13083_v14 = vld [vmem:[%s16932_s1 + $0x2f0] ss:$8 sps:$4 sm:$0xff]  }
  0x5c   :  { %v121_v26 = vld [vmem:[%s16931_s0 + $0x100] sm:$0xff]  ;;  %v178_v13 = vld [vmem:[%s16931_s0 + $0x2c8] sm:$0xff]  ;;  %v13086_v15 = vld [vmem:[%s16932_s1 + $0x3f0] ss:$8 sps:$4 sm:$0xff]  }
  0x5d   :  { %2420 = vmatpush1.bf16.msra.mxu0 %v12985_v30  ;;  %v129_v27 = vld [vmem:[%s16931_s0 + $0x140] sm:$0xff]  ;;  %v122_v30 = vld [vmem:[%s16931_s0 + $0x108] sm:$0xff] }
  0x5e   :  { %2533 = vmatpush1.bf16.msra.mxu1 %v12986_v31  ;;  %2421 = vmatprep.subr.bf16.mxu0 %v12987_v32  ;;  %v130_v31 = vld [vmem:[%s16931_s0 + $0x148] sm:$0xff] }
  0x5f   :  { %2534 = vmatprep.subr.bf16.mxu1 %v12989_v33  ;;  %v13055_v32 = vld [vmem:[%s16932_s1 + $0x244] ss:$8 sps:$4 sm:$0xff]   ;;  %v13068_v53 = vld [vmem:[%s16932_s1 + $0x320] ss:$8 sps:$4 sm:$0xff]  }
  0x60   :  { %v13058_v33 = vld [vmem:[%s16932_s1 + $0x344] ss:$8 sps:$4 sm:$0xff]  }
  0x61   :  { %2422 = vmatpush2.bf16.msra.mxu0 %v12991_v34  ;;  %v11414_v34 = vcombine.high %v121_v26, %v129_v27  ;;  %v13067_v48 = vld [vmem:[%s16932_s1 + $0x224] ss:$8 sps:$4 sm:$0xff]  }
  0x62   :  { %2535 = vmatpush2.bf16.msra.mxu1 %v12992_v35  ;;  %2423 = vmatprep.subr.bf16.mxu0 %v12993_v36  ;;  %v11416_v35 = vcombine.high %v122_v30, %v130_v31  ;;  %v13053_v36 = vld [vmem:[%s16932_s1 + $0x240] ss:$8 sps:$4 sm:$0xff]   ;;  %v13070_v49 = vld [vmem:[%s16932_s1 + $0x324] ss:$8 sps:$4 sm:$0xff]  }
  0x63   :  { %2536 = vmatprep.subr.bf16.mxu1 %v12995_v37  ;;  %v13056_v37 = vld [vmem:[%s16932_s1 + $0x340] ss:$8 sps:$4 sm:$0xff]  }
  0x65   :  { %2424 = vmatpush2.bf16.msra.mxu0 %v12997_v38  ;;  %v13061_v38 = vld [vmem:[%s16932_s1 + $0x234] ss:$8 sps:$4 sm:$0xff]  }
  0x66   :  { %2537 = vmatpush2.bf16.msra.mxu1 %v12998_v39  ;;  %2425 = vmatprep.subr.bf16.mxu0 %v12999_v40  ;;  %v13064_v39 = vld [vmem:[%s16932_s1 + $0x334] ss:$8 sps:$4 sm:$0xff]   ;;  %v13059_v40 = vld [vmem:[%s16932_s1 + $0x230] ss:$8 sps:$4 sm:$0xff]  }
  0x67   :  { %2538 = vmatprep.subr.bf16.mxu1 %v13001_v41  ;;  %v13062_v41 = vld [vmem:[%s16932_s1 + $0x330] ss:$8 sps:$4 sm:$0xff]  }
  0x69   :  { %2426 = vmatpush2.bf16.msra.mxu0 %v13003_v42  ;;  %v137_v42 = vld [vmem:[%s16931_s0 + $0x180] sm:$0xff] }
  0x6a   :  { %2539 = vmatpush2.bf16.msra.mxu1 %v13004_v43  ;;  %2427 = vmatprep.subr.bf16.mxu0 %v13005_v44  ;;  %v145_v43 = vld [vmem:[%s16931_s0 + $0x1c0] sm:$0xff]  ;;  %v11413_v44 = vcombine.low %v121_v26, %v129_v27 }
  0x6b   :  { %2540 = vmatprep.subr.bf16.mxu1 %v13007_v45  ;;  %v11415_v45 = vcombine.low %v122_v30, %v130_v31  ;;  %v11430_v50 = vcombine.high %v137_v42, %v145_v43  ;;  %v185_v26 = vld [vmem:[%s16931_s0 + $0x300] sm:$0xff]  ;;  %v186_v30 = vld [vmem:[%s16931_s0 + $0x308] sm:$0xff] }
  0x6c   :  { %v194_v31 = vld [vmem:[%s16931_s0 + $0x348] sm:$0xff] }
  0x6d   :  { %2428 = vmatpush2.bf16.msra.mxu0 %v13009_v46  ;;  %v138_v46 = vld [vmem:[%s16931_s0 + $0x188] sm:$0xff] }
  0x6e   :  { %2541 = vmatpush2.bf16.msra.mxu1 %v13010_v47  ;;  %2429 = vmatprep.subr.bf16.mxu0 %v13011_v52  ;;  %v146_v47 = vld [vmem:[%s16931_s0 + $0x1c8] sm:$0xff] }
  0x6f   :  { %2542 = vmatprep.subr.bf16.mxu1 %v13013_v54  ;;  %v11432_v51 = vcombine.high %v138_v46, %v146_v47  ;;  %v13065_v52 = vld [vmem:[%s16932_s1 + $0x220] ss:$8 sps:$4 sm:$0xff]   ;;  %v13073_v54 = vld [vmem:[%s16932_s1 + $0x214] ss:$8 sps:$4 sm:$0xff]  }
  0x71   :  { %2430 = vmatpush2.bf16.msra.mxu0 %v13015_v56  ;;  %v13071_v56 = vld [vmem:[%s16932_s1 + $0x210] ss:$8 sps:$4 sm:$0xff]  }
  0x72   :  { %2543 = vmatpush2.bf16.msra.mxu1 %v13016_v57  ;;  %2431 = vmatprep.subr.bf16.mxu0 %v13017_v58  ;;  %v153_v57 = vld [vmem:[%s16931_s0 + $0x200] sm:$0xff] }
  0x73   :  { %2544 = vmatprep.subr.bf16.mxu1 %v13019_v59  ;;  %v161_v58 = vld [vmem:[%s16931_s0 + $0x240] sm:$0xff]  ;;  %v11429_v59 = vcombine.low %v137_v42, %v145_v43 }
  0x74   :  { %v11445_v10 = vcombine.low %v153_v57, %v161_v58  ;;  %v201_v42 = vld [vmem:[%s16931_s0 + $0x380] sm:$0xff] }
  0x75   :  { %2432 = vmatpush2.bf16.msra.mxu0 %v13021_v60  ;;  %v11431_v60 = vcombine.low %v138_v46, %v146_v47  ;;  %v209_v43 = vld [vmem:[%s16931_s0 + $0x3c0] sm:$0xff]  ;;  %v202_v46 = vld [vmem:[%s16931_s0 + $0x388] sm:$0xff] }
  0x76   :  { %2545 = vmatpush2.bf16.msra.mxu1 %v13022_v61  ;;  %2433 = vmatprep.subr.bf16.mxu0 %v13023_v62  ;;  %v154_v61 = vld [vmem:[%s16931_s0 + $0x208] sm:$0xff] }
  0x77   :  { %2546 = vmatprep.subr.bf16.mxu1 %v13025_v63  ;;  %v162_v62 = vld [vmem:[%s16931_s0 + $0x248] sm:$0xff]  ;;  %v13074_v63 = vld [vmem:[%s16932_s1 + $0x310] ss:$8 sps:$4 sm:$0xff]  }
  0x78   :  { %v210_v47 = vld [vmem:[%s16931_s0 + $0x3c8] sm:$0xff] }
  0x79   :  { %2434 = vmatpush2.bf16.msra.mxu0 %v13027_v0  ;;  %v13079_v0 = vld [vmem:[%s16932_s1 + $0x204] ss:$8 sps:$4 sm:$0xff]  }
  0x7a   :  { %2547 = vmatpush2.bf16.msra.mxu1 %v13028_v1  ;;  %2435 = vmatprep.subr.bf16.mxu0 %v13029_v2  ;;  %v13082_v1 = vld [vmem:[%s16932_s1 + $0x304] ss:$8 sps:$4 sm:$0xff]   ;;  %v11446_v2 = vcombine.high %v153_v57, %v161_v58  ;;  %v13122_v57 = vld [vmem:[%s16932_s1 + $0x390] ss:$8 sps:$4 sm:$0xff]  }
  0x7b   :  { %2548 = vmatprep.subr.bf16.mxu1 %v13031_v3  ;;  %v11448_v3 = vcombine.high %v154_v61, %v162_v62  ;;  %v91_v58 = vld [vmem:[%s16931_s0 + $0x10] sm:$0xff] }
  0x7d   :  { %2436 = vmatpush2.bf16.msra.mxu0 %v13033_v4  ;;  %v13077_v4 = vld [vmem:[%s16932_s1 + $0x200] ss:$8 sps:$4 sm:$0xff]  }
  0x7e   :  { %2549 = vmatpush2.bf16.msra.mxu1 %v13034_v5  ;;  %2631 = vmatprep.subr.bf16.mxu0 %v13037_v6  ;;  %v13080_v5 = vld [vmem:[%s16932_s1 + $0x300] ss:$8 sps:$4 sm:$0xff]   ;;  %v13085_v6 = vld [vmem:[%s16932_s1 + $0x2f4] ss:$8 sps:$4 sm:$0xff]  }
  0x7f   :  { %2744 = vmatprep.subr.bf16.mxu1 %v13040_v7  ;;  %v13088_v7 = vld [vmem:[%s16932_s1 + $0x3f4] ss:$8 sps:$4 sm:$0xff]  }
  0x80   :  { %2438 = vmatmul.mubr.bf16.vlgmr.msra.gmra.mxu0 %v11381_v11  ;;  %v11447_v11 = vcombine.low %v154_v61, %v162_v62  ;;  %v11495_v61 = vcombine.low %v202_v46, %v210_v47  ;;  %v92_v62 = vld [vmem:[%s16931_s0 + $0x18] sm:$0xff] }
  0x81   :  { %2551 = vmatmul.mubr.bf16.vlgmr.msra.gmra.mxu1 %v11383_v12  ;;  %2632 = vmatpush1.bf16.msra.mxu0 %v13035_v8  ;;  %v169_v8 = vld [vmem:[%s16931_s0 + $0x280] sm:$0xff]  ;;  %v170_v12 = vld [vmem:[%s16931_s0 + $0x288] sm:$0xff] }
  0x82   :  { %2745 = vmatpush1.bf16.msra.mxu1 %v13038_v9  ;;  %2633 = vmatprep.subr.bf16.mxu0 %v13043_v16  ;;  %v177_v9 = vld [vmem:[%s16931_s0 + $0x2c0] sm:$0xff] }
  0x83   :  { %2746 = vmatprep.subr.bf16.mxu1 %v13046_v17  ;;  %2447 = vmatprep.mubr.bf16.mxu0 %v11398_v18  ;;  %v13091_v16 = vld [vmem:[%s16932_s1 + $0x2e4] ss:$8 sps:$4 sm:$0xff]   ;;  %v11462_v18 = vcombine.high %v169_v8, %v177_v9  ;;  %v11461_v27 = vcombine.low %v169_v8, %v177_v9  ;;  %v13131_v8 = vld [vmem:[%s16932_s1 + $0x470] ss:$8 sps:$4 sm:$0xff]  }
  0x84   :  { %2560 = vmatprep.mubr.bf16.mxu1 %v11400_v19  ;;  %v13094_v17 = vld [vmem:[%s16932_s1 + $0x3e4] ss:$8 sps:$4 sm:$0xff]   ;;  %v11464_v19 = vcombine.high %v170_v12, %v178_v13  ;;  %v107_v9 = vld [vmem:[%s16931_s0 + $0x90] sm:$0xff] }
  0x85   :  { %2634 = vmatpush1.bf16.msra.mxu0 %v13041_v20  ;;  %v13089_v20 = vld [vmem:[%s16932_s1 + $0x2e0] ss:$8 sps:$4 sm:$0xff]  }
  0x86   :  { %2747 = vmatpush1.bf16.msra.mxu1 %v13044_v21  ;;  %2635 = vmatprep.subr.bf16.mxu0 %v13049_v22  ;;  %v13092_v21 = vld [vmem:[%s16932_s1 + $0x3e0] ss:$8 sps:$4 sm:$0xff]   ;;  %v13097_v22 = vld [vmem:[%s16932_s1 + $0x2d4] ss:$8 sps:$4 sm:$0xff]  }
  0x87   :  { %2748 = vmatprep.subr.bf16.mxu1 %v13052_v23  ;;  %v13100_v23 = vld [vmem:[%s16932_s1 + $0x3d4] ss:$8 sps:$4 sm:$0xff]  }
  0x88   :  { %2448 = vmatmul.mubr.bf16.gmra.mxu0 %v11397_v28  ;;  %v11463_v28 = vcombine.low %v170_v12, %v178_v13  ;;  %v108_v13 = vld [vmem:[%s16931_s0 + $0x98] sm:$0xff] }
  0x89   :  { %2561 = vmatmul.mubr.bf16.gmra.mxu1 %v11399_v29  ;;  %2636 = vmatpush1.bf16.msra.mxu0 %v13047_v24  ;;  %v13095_v24 = vld [vmem:[%s16932_s1 + $0x2d0] ss:$8 sps:$4 sm:$0xff]   ;;  %v193_v29 = vld [vmem:[%s16931_s0 + $0x340] sm:$0xff] }
  0x8a   :  { %2749 = vmatpush1.bf16.msra.mxu1 %v13050_v25  ;;  %2637 = vmatprep.subr.bf16.mxu0 %v13055_v32  ;;  %v13098_v25 = vld [vmem:[%s16932_s1 + $0x3d0] ss:$8 sps:$4 sm:$0xff]   ;;  %v13103_v32 = vld [vmem:[%s16932_s1 + $0x2c4] ss:$8 sps:$4 sm:$0xff]  }
  0x8b   :  { %2750 = vmatprep.subr.bf16.mxu1 %v13058_v33  ;;  %2457 = vmatprep.mubr.bf16.mxu0 %v11414_v34  ;;  %v13106_v33 = vld [vmem:[%s16932_s1 + $0x3c4] ss:$8 sps:$4 sm:$0xff]   ;;  %v11478_v34 = vcombine.high %v185_v26, %v193_v29 }
  0x8c   :  { %2570 = vmatprep.mubr.bf16.mxu1 %v11416_v35  ;;  %v11480_v35 = vcombine.high %v186_v30, %v194_v31 }
  0x8d   :  { %2638 = vmatpush1.bf16.msra.mxu0 %v13053_v36  ;;  %v13101_v36 = vld [vmem:[%s16932_s1 + $0x2c0] ss:$8 sps:$4 sm:$0xff]  }
  0x8e   :  { %2751 = vmatpush1.bf16.msra.mxu1 %v13056_v37  ;;  %2639 = vmatprep.subr.bf16.mxu0 %v13061_v38  ;;  %v13104_v37 = vld [vmem:[%s16932_s1 + $0x3c0] ss:$8 sps:$4 sm:$0xff]   ;;  %v13109_v38 = vld [vmem:[%s16932_s1 + $0x2b4] ss:$8 sps:$4 sm:$0xff]  }
  0x8f   :  { %2752 = vmatprep.subr.bf16.mxu1 %v13064_v39  ;;  %v13112_v39 = vld [vmem:[%s16932_s1 + $0x3b4] ss:$8 sps:$4 sm:$0xff]  }
  0x90   :  { %2458 = vmatmul.mubr.bf16.gmra.mxu0 %v11413_v44  ;;  %v11477_v44 = vcombine.low %v185_v26, %v193_v29  ;;  %v132_v29 = vld [vmem:[%s16931_s0 + $0x158] sm:$0xff] }
  0x91   :  { %2571 = vmatmul.mubr.bf16.gmra.mxu1 %v11415_v45  ;;  %2640 = vmatpush1.bf16.msra.mxu0 %v13059_v40  ;;  %v13107_v40 = vld [vmem:[%s16932_s1 + $0x2b0] ss:$8 sps:$4 sm:$0xff]   ;;  %v11479_v45 = vcombine.low %v186_v30, %v194_v31 }
  0x92   :  { %2753 = vmatpush1.bf16.msra.mxu1 %v13062_v41  ;;  %2641 = vmatprep.subr.bf16.mxu0 %v13067_v48  ;;  %v13110_v41 = vld [vmem:[%s16932_s1 + $0x3b0] ss:$8 sps:$4 sm:$0xff]   ;;  %v13115_v48 = vld [vmem:[%s16932_s1 + $0x2a4] ss:$8 sps:$4 sm:$0xff]  }
  0x93   :  { %2754 = vmatprep.subr.bf16.mxu1 %v13070_v49  ;;  %2467 = vmatprep.mubr.bf16.mxu0 %v11430_v50  ;;  %v13118_v49 = vld [vmem:[%s16932_s1 + $0x3a4] ss:$8 sps:$4 sm:$0xff]   ;;  %v11494_v50 = vcombine.high %v201_v42, %v209_v43  ;;  %v13143_v30 = vld [vmem:[%s16932_s1 + $0x450] ss:$8 sps:$4 sm:$0xff]  }
  0x94   :  { %2580 = vmatprep.mubr.bf16.mxu1 %v11432_v51  ;;  %v11496_v51 = vcombine.high %v202_v46, %v210_v47  ;;  %v13146_v31 = vld [vmem:[%s16932_s1 + $0x550] ss:$8 sps:$4 sm:$0xff]  }
  0x95   :  { %2642 = vmatpush1.bf16.msra.mxu0 %v13065_v52  ;;  %v13113_v52 = vld [vmem:[%s16932_s1 + $0x2a0] ss:$8 sps:$4 sm:$0xff]   ;;  %v140_v46 = vld [vmem:[%s16931_s0 + $0x198] sm:$0xff] }
  0x96   :  { %2755 = vmatpush1.bf16.msra.mxu1 %v13068_v53  ;;  %2643 = vmatprep.subr.bf16.mxu0 %v13073_v54  ;;  %v13116_v53 = vld [vmem:[%s16932_s1 + $0x3a0] ss:$8 sps:$4 sm:$0xff]   ;;  %v13121_v54 = vld [vmem:[%s16932_s1 + $0x294] ss:$8 sps:$4 sm:$0xff]  }
  0x97   :  { %2756 = vmatprep.subr.bf16.mxu1 %v13076_v55  ;;  %v13124_v55 = vld [vmem:[%s16932_s1 + $0x394] ss:$8 sps:$4 sm:$0xff]  }
  0x98   :  { %2468 = vmatmul.mubr.bf16.gmra.mxu0 %v11429_v59  ;;  %v99_v59 = vld [vmem:[%s16931_s0 + $0x50] sm:$0xff]  ;;  %v148_v47 = vld [vmem:[%s16931_s0 + $0x1d8] sm:$0xff] }
  0x99   :  { %2581 = vmatmul.mubr.bf16.gmra.mxu1 %v11431_v60  ;;  %2644 = vmatpush1.bf16.msra.mxu0 %v13071_v56  ;;  %v13119_v56 = vld [vmem:[%s16932_s1 + $0x290] ss:$8 sps:$4 sm:$0xff]   ;;  %v11493_v60 = vcombine.low %v201_v42, %v209_v43 }
  0x9a   :  { %2757 = vmatpush1.bf16.msra.mxu1 %v13074_v63  ;;  %2645 = vmatprep.subr.bf16.mxu0 %v13079_v0  ;;  %v100_v63 = vld [vmem:[%s16931_s0 + $0x58] sm:$0xff]  ;;  %v13127_v0 = vld [vmem:[%s16932_s1 + $0x284] ss:$8 sps:$4 sm:$0xff]   ;;  %v139_v42 = vld [vmem:[%s16931_s0 + $0x190] sm:$0xff] }
  0x9b   :  { %2758 = vmatprep.subr.bf16.mxu1 %v13082_v1  ;;  %2477 = vmatprep.mubr.bf16.mxu0 %v11446_v2  ;;  %v13130_v1 = vld [vmem:[%s16932_s1 + $0x384] ss:$8 sps:$4 sm:$0xff]   ;;  %v11386_v2 = vcombine.high %v91_v58, %v99_v59  ;;  %v11387_v12 = vcombine.low %v92_v62, %v100_v63 }
  0x9c   :  { %2590 = vmatprep.mubr.bf16.mxu1 %v11448_v3  ;;  %v11388_v3 = vcombine.high %v92_v62, %v100_v63  ;;  %v156_v62 = vld [vmem:[%s16931_s0 + $0x218] sm:$0xff] }
  0x9d   :  { %2646 = vmatpush1.bf16.msra.mxu0 %v13077_v4  ;;  %v13125_v4 = vld [vmem:[%s16932_s1 + $0x280] ss:$8 sps:$4 sm:$0xff]   ;;  %v164_v63 = vld [vmem:[%s16931_s0 + $0x258] sm:$0xff] }
  0x9e   :  { %2759 = vmatpush1.bf16.msra.mxu1 %v13080_v5  ;;  %2647 = vmatprep.subr.bf16.mxu0 %v13085_v6  ;;  %v13128_v5 = vld [vmem:[%s16932_s1 + $0x380] ss:$8 sps:$4 sm:$0xff]   ;;  %v13133_v6 = vld [vmem:[%s16932_s1 + $0x474] ss:$8 sps:$4 sm:$0xff]  }
  0x9f   :  { %2760 = vmatprep.subr.bf16.mxu1 %v13088_v7  ;;  %v13136_v7 = vld [vmem:[%s16932_s1 + $0x574] ss:$8 sps:$4 sm:$0xff]  }
  0xa0   :  { %2478 = vmatmul.mubr.bf16.gmra.mxu0 %v11445_v10  ;;  %v115_v10 = vld [vmem:[%s16931_s0 + $0xd0] sm:$0xff] }
  0xa1   :  { %2591 = vmatmul.mubr.bf16.gmra.mxu1 %v11447_v11  ;;  %2648 = vmatpush2.bf16.msra.mxu0 %v13083_v14  ;;  %v11385_v11 = vcombine.low %v91_v58, %v99_v59  ;;  %v116_v14 = vld [vmem:[%s16931_s0 + $0xd8] sm:$0xff]  ;;  %v11401_v26 = vcombine.low %v107_v9, %v115_v10  ;;  %v155_v58 = vld [vmem:[%s16931_s0 + $0x210] sm:$0xff] }
  0xa2   :  { %2761 = vmatpush2.bf16.msra.mxu1 %v13086_v15  ;;  %2649 = vmatprep.subr.bf16.mxu0 %v13091_v16  ;;  %v13134_v15 = vld [vmem:[%s16932_s1 + $0x570] ss:$8 sps:$4 sm:$0xff]   ;;  %v13139_v16 = vld [vmem:[%s16932_s1 + $0x464] ss:$8 sps:$4 sm:$0xff]  }
  0xa3   :  { %2762 = vmatprep.subr.bf16.mxu1 %v13094_v17  ;;  %2487 = vmatprep.mubr.bf16.mxu0 %v11462_v18  ;;  %v13142_v17 = vld [vmem:[%s16932_s1 + $0x564] ss:$8 sps:$4 sm:$0xff]   ;;  %v11402_v18 = vcombine.high %v107_v9, %v115_v10  ;;  %v163_v59 = vld [vmem:[%s16931_s0 + $0x250] sm:$0xff] }
  0xa4   :  { %2600 = vmatprep.mubr.bf16.mxu1 %v11464_v19  ;;  %v11404_v19 = vcombine.high %v108_v13, %v116_v14  ;;  %v13182_v9 = vld [vmem:[%s16932_s1 + $0x5f0] ss:$8 sps:$4 sm:$0xff]  }
  0xa5   :  { %2650 = vmatpush2.bf16.msra.mxu0 %v13089_v20  ;;  %v13137_v20 = vld [vmem:[%s16932_s1 + $0x460] ss:$8 sps:$4 sm:$0xff]   ;;  %v171_v10 = vld [vmem:[%s16931_s0 + $0x290] sm:$0xff] }
  0xa6   :  { %2763 = vmatpush2.bf16.msra.mxu1 %v13092_v21  ;;  %2651 = vmatprep.subr.bf16.mxu0 %v13097_v22  ;;  %v13140_v21 = vld [vmem:[%s16932_s1 + $0x560] ss:$8 sps:$4 sm:$0xff]   ;;  %v13145_v22 = vld [vmem:[%s16932_s1 + $0x454] ss:$8 sps:$4 sm:$0xff]  }
  0xa7   :  { %2764 = vmatprep.subr.bf16.mxu1 %v13100_v23  ;;  %v13148_v23 = vld [vmem:[%s16932_s1 + $0x554] ss:$8 sps:$4 sm:$0xff]  }
  0xa8   :  { %2488 = vmatmul.mubr.bf16.gmra.mxu0 %v11461_v27  ;;  %v11403_v27 = vcombine.low %v108_v13, %v116_v14  ;;  %v11451_v13 = vcombine.low %v156_v62, %v164_v63  ;;  %v172_v14 = vld [vmem:[%s16931_s0 + $0x298] sm:$0xff] }
  0xa9   :  { %2601 = vmatmul.mubr.bf16.gmra.mxu1 %v11463_v28  ;;  %2652 = vmatpush2.bf16.msra.mxu0 %v13095_v24  ;;  %v123_v24 = vld [vmem:[%s16931_s0 + $0x110] sm:$0xff]  ;;  %v124_v28 = vld [vmem:[%s16931_s0 + $0x118] sm:$0xff] }
  0xaa   :  { %2765 = vmatpush2.bf16.msra.mxu1 %v13098_v25  ;;  %2653 = vmatprep.subr.bf16.mxu0 %v13103_v32  ;;  %v131_v25 = vld [vmem:[%s16931_s0 + $0x150] sm:$0xff]  ;;  %v13151_v32 = vld [vmem:[%s16932_s1 + $0x444] ss:$8 sps:$4 sm:$0xff]  }
  0xab   :  { %2766 = vmatprep.subr.bf16.mxu1 %v13106_v33  ;;  %2497 = vmatprep.mubr.bf16.mxu0 %v11478_v34  ;;  %v13154_v33 = vld [vmem:[%s16932_s1 + $0x544] ss:$8 sps:$4 sm:$0xff]   ;;  %v11418_v34 = vcombine.high %v123_v24, %v131_v25  ;;  %v11417_v43 = vcombine.low %v123_v24, %v131_v25  ;;  %v13191_v24 = vld [vmem:[%s16932_s1 + $0x4d0] ss:$8 sps:$4 sm:$0xff]  }
  0xac   :  { %2610 = vmatprep.mubr.bf16.mxu1 %v11480_v35  ;;  %v11420_v35 = vcombine.high %v124_v28, %v132_v29  ;;  %v187_v25 = vld [vmem:[%s16931_s0 + $0x310] sm:$0xff] }
  0xad   :  { %2654 = vmatpush2.bf16.msra.mxu0 %v13101_v36  ;;  %v13149_v36 = vld [vmem:[%s16932_s1 + $0x440] ss:$8 sps:$4 sm:$0xff]  }
  0xae   :  { %2767 = vmatpush2.bf16.msra.mxu1 %v13104_v37  ;;  %2655 = vmatprep.subr.bf16.mxu0 %v13109_v38  ;;  %v13152_v37 = vld [vmem:[%s16932_s1 + $0x540] ss:$8 sps:$4 sm:$0xff]   ;;  %v13157_v38 = vld [vmem:[%s16932_s1 + $0x434] ss:$8 sps:$4 sm:$0xff]  }
  0xaf   :  { %2768 = vmatprep.subr.bf16.mxu1 %v13112_v39  ;;  %v13160_v39 = vld [vmem:[%s16932_s1 + $0x534] ss:$8 sps:$4 sm:$0xff]  }
  0xb0   :  { %2498 = vmatmul.mubr.bf16.gmra.mxu0 %v11477_v44  ;;  %v11419_v44 = vcombine.low %v124_v28, %v132_v29  ;;  %v188_v29 = vld [vmem:[%s16931_s0 + $0x318] sm:$0xff] }
  0xb1   :  { %2611 = vmatmul.mubr.bf16.gmra.mxu1 %v11479_v45  ;;  %2656 = vmatpush2.bf16.msra.mxu0 %v13107_v40  ;;  %v13155_v40 = vld [vmem:[%s16932_s1 + $0x430] ss:$8 sps:$4 sm:$0xff]  }
  0xb2   :  { %2769 = vmatpush2.bf16.msra.mxu1 %v13110_v41  ;;  %2657 = vmatprep.subr.bf16.mxu0 %v13115_v48  ;;  %v13158_v41 = vld [vmem:[%s16932_s1 + $0x530] ss:$8 sps:$4 sm:$0xff]   ;;  %v13163_v48 = vld [vmem:[%s16932_s1 + $0x424] ss:$8 sps:$4 sm:$0xff]  }
  0xb3   :  { %2770 = vmatprep.subr.bf16.mxu1 %v13118_v49  ;;  %2507 = vmatprep.mubr.bf16.mxu0 %v11494_v50  ;;  %v147_v45 = vld [vmem:[%s16931_s0 + $0x1d0] sm:$0xff]  ;;  %v13166_v49 = vld [vmem:[%s16932_s1 + $0x524] ss:$8 sps:$4 sm:$0xff]  }
  0xb4   :  { %2620 = vmatprep.mubr.bf16.mxu1 %v11496_v51  ;;  %v11434_v50 = vcombine.high %v139_v42, %v147_v45  ;;  %v11436_v51 = vcombine.high %v140_v46, %v148_v47 }
  0xb5   :  { %2658 = vmatpush2.bf16.msra.mxu0 %v13113_v52  ;;  %v13161_v52 = vld [vmem:[%s16932_s1 + $0x420] ss:$8 sps:$4 sm:$0xff]  }
  0xb6   :  { %2771 = vmatpush2.bf16.msra.mxu1 %v13116_v53  ;;  %2659 = vmatprep.subr.bf16.mxu0 %v13121_v54  ;;  %v13164_v53 = vld [vmem:[%s16932_s1 + $0x520] ss:$8 sps:$4 sm:$0xff]   ;;  %v13169_v54 = vld [vmem:[%s16932_s1 + $0x414] ss:$8 sps:$4 sm:$0xff]  }
  0xb7   :  { %2772 = vmatprep.subr.bf16.mxu1 %v13124_v55  ;;  %v13172_v55 = vld [vmem:[%s16932_s1 + $0x514] ss:$8 sps:$4 sm:$0xff]  }
  0xb8   :  { %2508 = vmatmul.mubr.bf16.gmra.mxu0 %v11493_v60  ;;  %v11433_v60 = vcombine.low %v139_v42, %v147_v45  ;;  %v212_v45 = vld [vmem:[%s16931_s0 + $0x3d8] sm:$0xff] }
  0xb9   :  { %2621 = vmatmul.mubr.bf16.gmra.mxu1 %v11495_v61  ;;  %2660 = vmatpush2.bf16.msra.mxu0 %v13119_v56  ;;  %v13167_v56 = vld [vmem:[%s16932_s1 + $0x410] ss:$8 sps:$4 sm:$0xff]   ;;  %v11435_v61 = vcombine.low %v140_v46, %v148_v47 }
  0xba   :  { %2773 = vmatpush2.bf16.msra.mxu1 %v13122_v57  ;;  %2661 = vmatprep.subr.bf16.mxu0 %v13127_v0  ;;  %v13170_v57 = vld [vmem:[%s16932_s1 + $0x510] ss:$8 sps:$4 sm:$0xff]   ;;  %v13175_v0 = vld [vmem:[%s16932_s1 + $0x404] ss:$8 sps:$4 sm:$0xff]  }
  0xbb   :  { %2774 = vmatprep.subr.bf16.mxu1 %v13130_v1  ;;  %2663 = vmatprep.mubr.bf16.mxu0 %v11386_v2  ;;  %v13178_v1 = vld [vmem:[%s16932_s1 + $0x504] ss:$8 sps:$4 sm:$0xff]   ;;  %v11450_v2 = vcombine.high %v155_v58, %v163_v59  ;;  %v13203_v46 = vld [vmem:[%s16932_s1 + $0x4b0] ss:$8 sps:$4 sm:$0xff]  }
  0xbc   :  { %2776 = vmatprep.mubr.bf16.mxu1 %v11388_v3  ;;  %v11452_v3 = vcombine.high %v156_v62, %v164_v63  ;;  %v13206_v47 = vld [vmem:[%s16932_s1 + $0x5b0] ss:$8 sps:$4 sm:$0xff]   ;;  %v94_v62 = vld [vmem:[%s16931_s0 + $0x28] sm:$0xff] }
  0xbd   :  { %2662 = vmatpush2.bf16.msra.mxu0 %v13125_v4  ;;  %v13173_v4 = vld [vmem:[%s16932_s1 + $0x400] ss:$8 sps:$4 sm:$0xff]  }
  0xbe   :  { %2775 = vmatpush2.bf16.msra.mxu1 %v13128_v5  ;;  %2857 = vmatprep.subr.bf16.mxu0 %v13133_v6  ;;  %v13176_v5 = vld [vmem:[%s16932_s1 + $0x500] ss:$8 sps:$4 sm:$0xff]   ;;  %v13181_v6 = vld [vmem:[%s16932_s1 + $0x4f4] ss:$8 sps:$4 sm:$0xff]  }
  0xbf   :  { %2970 = vmatprep.subr.bf16.mxu1 %v13136_v7  ;;  %v13184_v7 = vld [vmem:[%s16932_s1 + $0x5f4] ss:$8 sps:$4 sm:$0xff]   ;;  %v102_v63 = vld [vmem:[%s16931_s0 + $0x68] sm:$0xff] }
  0xc0   :  { %2664 = vmatmul.mubr.bf16.vlgmr.msra.gmra.mxu0 %v11385_v11  ;;  %v179_v11 = vld [vmem:[%s16931_s0 + $0x2d0] sm:$0xff] }
  0xc1   :  { %2777 = vmatmul.mubr.bf16.vlgmr.msra.gmra.mxu1 %v11387_v12  ;;  %2858 = vmatpush1.bf16.msra.mxu0 %v13131_v8  ;;  %v13179_v8 = vld [vmem:[%s16932_s1 + $0x4f0] ss:$8 sps:$4 sm:$0xff]   ;;  %v11449_v12 = vcombine.low %v155_v58, %v163_v59  ;;  %v93_v58 = vld [vmem:[%s16931_s0 + $0x20] sm:$0xff] }
  0xc2   :  { %2971 = vmatpush1.bf16.msra.mxu1 %v13134_v15  ;;  %2859 = vmatprep.subr.bf16.mxu0 %v13139_v16  ;;  %v180_v15 = vld [vmem:[%s16931_s0 + $0x2d8] sm:$0xff]  ;;  %v13187_v16 = vld [vmem:[%s16932_s1 + $0x4e4] ss:$8 sps:$4 sm:$0xff]  }
  0xc3   :  { %2972 = vmatprep.subr.bf16.mxu1 %v13142_v17  ;;  %2673 = vmatprep.mubr.bf16.mxu0 %v11402_v18  ;;  %v13190_v17 = vld [vmem:[%s16932_s1 + $0x5e4] ss:$8 sps:$4 sm:$0xff]   ;;  %v11466_v18 = vcombine.high %v171_v10, %v179_v11  ;;  %v11467_v28 = vcombine.low %v172_v14, %v180_v15 }
  0xc4   :  { %2786 = vmatprep.mubr.bf16.mxu1 %v11404_v19  ;;  %v11468_v19 = vcombine.high %v172_v14, %v180_v15  ;;  %v110_v14 = vld [vmem:[%s16931_s0 + $0xa8] sm:$0xff] }
  0xc5   :  { %2860 = vmatpush1.bf16.msra.mxu0 %v13137_v20  ;;  %v13185_v20 = vld [vmem:[%s16932_s1 + $0x4e0] ss:$8 sps:$4 sm:$0xff]  }
  0xc6   :  { %2973 = vmatpush1.bf16.msra.mxu1 %v13140_v21  ;;  %2861 = vmatprep.subr.bf16.mxu0 %v13145_v22  ;;  %v13188_v21 = vld [vmem:[%s16932_s1 + $0x5e0] ss:$8 sps:$4 sm:$0xff]   ;;  %v13193_v22 = vld [vmem:[%s16932_s1 + $0x4d4] ss:$8 sps:$4 sm:$0xff]  }
  0xc7   :  { %2974 = vmatprep.subr.bf16.mxu1 %v13148_v23  ;;  %v13196_v23 = vld [vmem:[%s16932_s1 + $0x5d4] ss:$8 sps:$4 sm:$0xff]   ;;  %v118_v15 = vld [vmem:[%s16931_s0 + $0xe8] sm:$0xff] }
  0xc8   :  { %2674 = vmatmul.mubr.bf16.gmra.mxu0 %v11401_v26  ;;  %v195_v26 = vld [vmem:[%s16931_s0 + $0x350] sm:$0xff] }
  0xc9   :  { %2787 = vmatmul.mubr.bf16.gmra.mxu1 %v11403_v27  ;;  %2862 = vmatpush1.bf16.msra.mxu0 %v13143_v30  ;;  %v11465_v27 = vcombine.low %v171_v10, %v179_v11  ;;  %v196_v30 = vld [vmem:[%s16931_s0 + $0x358] sm:$0xff]  ;;  %v11481_v42 = vcombine.low %v187_v25, %v195_v26  ;;  %v109_v10 = vld [vmem:[%s16931_s0 + $0xa0] sm:$0xff] }
  0xca   :  { %2975 = vmatpush1.bf16.msra.mxu1 %v13146_v31  ;;  %2863 = vmatprep.subr.bf16.mxu0 %v13151_v32  ;;  %v13194_v31 = vld [vmem:[%s16932_s1 + $0x5d0] ss:$8 sps:$4 sm:$0xff]   ;;  %v13199_v32 = vld [vmem:[%s16932_s1 + $0x4c4] ss:$8 sps:$4 sm:$0xff]  }
  0xcb   :  { %2976 = vmatprep.subr.bf16.mxu1 %v13154_v33  ;;  %2683 = vmatprep.mubr.bf16.mxu0 %v11418_v34  ;;  %v13202_v33 = vld [vmem:[%s16932_s1 + $0x5c4] ss:$8 sps:$4 sm:$0xff]   ;;  %v11482_v34 = vcombine.high %v187_v25, %v195_v26  ;;  %v13242_v25 = vld [vmem:[%s16932_s1 + $0x750] ss:$8 sps:$4 sm:$0xff]  }
  0xcc   :  { %2796 = vmatprep.mubr.bf16.mxu1 %v11420_v35  ;;  %v11484_v35 = vcombine.high %v188_v29, %v196_v30  ;;  %v117_v11 = vld [vmem:[%s16931_s0 + $0xe0] sm:$0xff] }
  0xcd   :  { %2864 = vmatpush1.bf16.msra.mxu0 %v13149_v36  ;;  %v13197_v36 = vld [vmem:[%s16932_s1 + $0x4c0] ss:$8 sps:$4 sm:$0xff]  }
  0xce   :  { %2977 = vmatpush1.bf16.msra.mxu1 %v13152_v37  ;;  %2865 = vmatprep.subr.bf16.mxu0 %v13157_v38  ;;  %v13200_v37 = vld [vmem:[%s16932_s1 + $0x5c0] ss:$8 sps:$4 sm:$0xff]   ;;  %v13205_v38 = vld [vmem:[%s16932_s1 + $0x4b4] ss:$8 sps:$4 sm:$0xff]  }
  0xcf   :  { %2978 = vmatprep.subr.bf16.mxu1 %v13160_v39  ;;  %v13208_v39 = vld [vmem:[%s16932_s1 + $0x5b4] ss:$8 sps:$4 sm:$0xff]   ;;  %v125_v26 = vld [vmem:[%s16931_s0 + $0x120] sm:$0xff] }
  0xd0   :  { %2684 = vmatmul.mubr.bf16.gmra.mxu0 %v11417_v43  ;;  %v11483_v43 = vcombine.low %v188_v29, %v196_v30  ;;  %v11407_v29 = vcombine.low %v110_v14, %v118_v15  ;;  %v126_v30 = vld [vmem:[%s16931_s0 + $0x128] sm:$0xff] }
  0xd1   :  { %2797 = vmatmul.mubr.bf16.gmra.mxu1 %v11419_v44  ;;  %2866 = vmatpush1.bf16.msra.mxu0 %v13155_v40  ;;  %v203_v40 = vld [vmem:[%s16931_s0 + $0x390] sm:$0xff]  ;;  %v204_v44 = vld [vmem:[%s16931_s0 + $0x398] sm:$0xff] }
  0xd2   :  { %2979 = vmatpush1.bf16.msra.mxu1 %v13158_v41  ;;  %2867 = vmatprep.subr.bf16.mxu0 %v13163_v48  ;;  %v211_v41 = vld [vmem:[%s16931_s0 + $0x3d0] sm:$0xff]  ;;  %v13211_v48 = vld [vmem:[%s16932_s1 + $0x4a4] ss:$8 sps:$4 sm:$0xff]  }
  0xd3   :  { %2980 = vmatprep.subr.bf16.mxu1 %v13166_v49  ;;  %2693 = vmatprep.mubr.bf16.mxu0 %v11434_v50  ;;  %v13214_v49 = vld [vmem:[%s16932_s1 + $0x5a4] ss:$8 sps:$4 sm:$0xff]   ;;  %v11498_v50 = vcombine.high %v203_v40, %v211_v41  ;;  %v11497_v59 = vcombine.low %v203_v40, %v211_v41 }
  0xd4   :  { %2806 = vmatprep.mubr.bf16.mxu1 %v11436_v51  ;;  %v11500_v51 = vcombine.high %v204_v44, %v212_v45  ;;  %v141_v40 = vld [vmem:[%s16931_s0 + $0x1a0] sm:$0xff] }
  0xd5   :  { %2868 = vmatpush1.bf16.msra.mxu0 %v13161_v52  ;;  %v13209_v52 = vld [vmem:[%s16932_s1 + $0x4a0] ss:$8 sps:$4 sm:$0xff]  }
  0xd6   :  { %2981 = vmatpush1.bf16.msra.mxu1 %v13164_v53  ;;  %2869 = vmatprep.subr.bf16.mxu0 %v13169_v54  ;;  %v13212_v53 = vld [vmem:[%s16932_s1 + $0x5a0] ss:$8 sps:$4 sm:$0xff]   ;;  %v13217_v54 = vld [vmem:[%s16932_s1 + $0x494] ss:$8 sps:$4 sm:$0xff]  }
  0xd7   :  { %2982 = vmatprep.subr.bf16.mxu1 %v13172_v55  ;;  %v13220_v55 = vld [vmem:[%s16932_s1 + $0x594] ss:$8 sps:$4 sm:$0xff]  }
  0xd8   :  { %2694 = vmatmul.mubr.bf16.gmra.mxu0 %v11433_v60  ;;  %v11499_v60 = vcombine.low %v204_v44, %v212_v45  ;;  %v142_v44 = vld [vmem:[%s16931_s0 + $0x1a8] sm:$0xff] }
  0xd9   :  { %2807 = vmatmul.mubr.bf16.gmra.mxu1 %v11435_v61  ;;  %2870 = vmatpush1.bf16.msra.mxu0 %v13167_v56  ;;  %v13215_v56 = vld [vmem:[%s16932_s1 + $0x490] ss:$8 sps:$4 sm:$0xff]   ;;  %v101_v61 = vld [vmem:[%s16931_s0 + $0x60] sm:$0xff]  ;;  %v150_v45 = vld [vmem:[%s16931_s0 + $0x1e8] sm:$0xff] }
  0xda   :  { %2983 = vmatpush1.bf16.msra.mxu1 %v13170_v57  ;;  %2871 = vmatprep.subr.bf16.mxu0 %v13175_v0  ;;  %v13218_v57 = vld [vmem:[%s16932_s1 + $0x590] ss:$8 sps:$4 sm:$0xff]   ;;  %v13223_v0 = vld [vmem:[%s16932_s1 + $0x484] ss:$8 sps:$4 sm:$0xff]  }
  0xdb   :  { %2984 = vmatprep.subr.bf16.mxu1 %v13178_v1  ;;  %2703 = vmatprep.mubr.bf16.mxu0 %v11450_v2  ;;  %v13226_v1 = vld [vmem:[%s16932_s1 + $0x584] ss:$8 sps:$4 sm:$0xff]   ;;  %v11390_v2 = vcombine.high %v93_v58, %v101_v61 }
  0xdc   :  { %2816 = vmatprep.mubr.bf16.mxu1 %v11452_v3  ;;  %v11392_v3 = vcombine.high %v94_v62, %v102_v63 }
  0xdd   :  { %2872 = vmatpush1.bf16.msra.mxu0 %v13173_v4  ;;  %v13221_v4 = vld [vmem:[%s16932_s1 + $0x480] ss:$8 sps:$4 sm:$0xff]  }
  0xde   :  { %2985 = vmatpush1.bf16.msra.mxu1 %v13176_v5  ;;  %2873 = vmatprep.subr.bf16.mxu0 %v13181_v6  ;;  %v13224_v5 = vld [vmem:[%s16932_s1 + $0x580] ss:$8 sps:$4 sm:$0xff]   ;;  %v13229_v6 = vld [vmem:[%s16932_s1 + $0x674] ss:$8 sps:$4 sm:$0xff]  }
  0xdf   :  { %2986 = vmatprep.subr.bf16.mxu1 %v13184_v7  ;;  %v13232_v7 = vld [vmem:[%s16932_s1 + $0x774] ss:$8 sps:$4 sm:$0xff]  }
  0xe0   :  { %2704 = vmatmul.mubr.bf16.gmra.mxu0 %v11449_v12  ;;  %v11389_v12 = vcombine.low %v93_v58, %v101_v61  ;;  %v158_v58 = vld [vmem:[%s16931_s0 + $0x228] sm:$0xff]  ;;  %v13266_v61 = vld [vmem:[%s16932_s1 + $0x710] ss:$8 sps:$4 sm:$0xff]  }
  0xe1   :  { %2817 = vmatmul.mubr.bf16.gmra.mxu1 %v11451_v13  ;;  %2874 = vmatpush2.bf16.msra.mxu0 %v13179_v8  ;;  %v13227_v8 = vld [vmem:[%s16932_s1 + $0x670] ss:$8 sps:$4 sm:$0xff]   ;;  %v11391_v13 = vcombine.low %v94_v62, %v102_v63  ;;  %v11439_v63 = vcombine.low %v142_v44, %v150_v45 }
  0xe2   :  { %2987 = vmatpush2.bf16.msra.mxu1 %v13182_v9  ;;  %2875 = vmatprep.subr.bf16.mxu0 %v13187_v16  ;;  %v13230_v9 = vld [vmem:[%s16932_s1 + $0x770] ss:$8 sps:$4 sm:$0xff]   ;;  %v13235_v16 = vld [vmem:[%s16932_s1 + $0x664] ss:$8 sps:$4 sm:$0xff]  }
  0xe3   :  { %2988 = vmatprep.subr.bf16.mxu1 %v13190_v17  ;;  %2713 = vmatprep.mubr.bf16.mxu0 %v11466_v18  ;;  %v13238_v17 = vld [vmem:[%s16932_s1 + $0x764] ss:$8 sps:$4 sm:$0xff]   ;;  %v11406_v18 = vcombine.high %v109_v10, %v117_v11 }
  0xe4   :  { %2826 = vmatprep.mubr.bf16.mxu1 %v11468_v19  ;;  %v11408_v19 = vcombine.high %v110_v14, %v118_v15 }
  0xe5   :  { %2876 = vmatpush2.bf16.msra.mxu0 %v13185_v20  ;;  %v13233_v20 = vld [vmem:[%s16932_s1 + $0x660] ss:$8 sps:$4 sm:$0xff]  }
  0xe6   :  { %2989 = vmatpush2.bf16.msra.mxu1 %v13188_v21  ;;  %2877 = vmatprep.subr.bf16.mxu0 %v13193_v22  ;;  %v13236_v21 = vld [vmem:[%s16932_s1 + $0x760] ss:$8 sps:$4 sm:$0xff]   ;;  %v13241_v22 = vld [vmem:[%s16932_s1 + $0x654] ss:$8 sps:$4 sm:$0xff]  }
  0xe7   :  { %2990 = vmatprep.subr.bf16.mxu1 %v13196_v23  ;;  %v13244_v23 = vld [vmem:[%s16932_s1 + $0x754] ss:$8 sps:$4 sm:$0xff]  }
  0xe8   :  { %2714 = vmatmul.mubr.bf16.gmra.mxu0 %v11465_v27  ;;  %v133_v27 = vld [vmem:[%s16931_s0 + $0x160] sm:$0xff] }
  0xe9   :  { %2827 = vmatmul.mubr.bf16.gmra.mxu1 %v11467_v28  ;;  %2878 = vmatpush2.bf16.msra.mxu0 %v13191_v24  ;;  %v13239_v24 = vld [vmem:[%s16932_s1 + $0x650] ss:$8 sps:$4 sm:$0xff]   ;;  %v11405_v28 = vcombine.low %v109_v10, %v117_v11  ;;  %v11421_v41 = vcombine.low %v125_v26, %v133_v27  ;;  %v174_v10 = vld [vmem:[%s16931_s0 + $0x2a8] sm:$0xff] }
  0xea   :  { %2991 = vmatpush2.bf16.msra.mxu1 %v13194_v31  ;;  %2879 = vmatprep.subr.bf16.mxu0 %v13199_v32  ;;  %v134_v31 = vld [vmem:[%s16931_s0 + $0x168] sm:$0xff] }
  0xeb   :  { %2992 = vmatprep.subr.bf16.mxu1 %v13202_v33  ;;  %2723 = vmatprep.mubr.bf16.mxu0 %v11482_v34  ;;  %v13247_v32 = vld [vmem:[%s16932_s1 + $0x644] ss:$8 sps:$4 sm:$0xff]   ;;  %v11422_v34 = vcombine.high %v125_v26, %v133_v27 }
  0xec   :  { %2836 = vmatprep.mubr.bf16.mxu1 %v11484_v35  ;;  %v13250_v33 = vld [vmem:[%s16932_s1 + $0x744] ss:$8 sps:$4 sm:$0xff]   ;;  %v11424_v35 = vcombine.high %v126_v30, %v134_v31 }
  0xed   :  { %2880 = vmatpush2.bf16.msra.mxu0 %v13197_v36  ;;  %v13245_v36 = vld [vmem:[%s16932_s1 + $0x640] ss:$8 sps:$4 sm:$0xff]  }
  0xee   :  { %2993 = vmatpush2.bf16.msra.mxu1 %v13200_v37  ;;  %2881 = vmatprep.subr.bf16.mxu0 %v13205_v38  ;;  %v13248_v37 = vld [vmem:[%s16932_s1 + $0x740] ss:$8 sps:$4 sm:$0xff]   ;;  %v13253_v38 = vld [vmem:[%s16932_s1 + $0x634] ss:$8 sps:$4 sm:$0xff]  }
  0xef   :  { %2994 = vmatprep.subr.bf16.mxu1 %v13208_v39  ;;  %v13256_v39 = vld [vmem:[%s16932_s1 + $0x734] ss:$8 sps:$4 sm:$0xff]   ;;  %v182_v11 = vld [vmem:[%s16931_s0 + $0x2e8] sm:$0xff] }
  0xf0   :  { %2724 = vmatmul.mubr.bf16.gmra.mxu0 %v11481_v42  ;;  %v11423_v42 = vcombine.low %v126_v30, %v134_v31  ;;  %v190_v26 = vld [vmem:[%s16931_s0 + $0x328] sm:$0xff]  ;;  %v11471_v31 = vcombine.low %v174_v10, %v182_v11 }
  0xf1   :  { %2837 = vmatmul.mubr.bf16.gmra.mxu1 %v11483_v43  ;;  %2882 = vmatpush2.bf16.msra.mxu0 %v13203_v46  ;;  %v149_v43 = vld [vmem:[%s16931_s0 + $0x1e0] sm:$0xff]  ;;  %v13251_v46 = vld [vmem:[%s16932_s1 + $0x630] ss:$8 sps:$4 sm:$0xff]   ;;  %v198_v27 = vld [vmem:[%s16931_s0 + $0x368] sm:$0xff] }
  0xf2   :  { %2995 = vmatpush2.bf16.msra.mxu1 %v13206_v47  ;;  %2883 = vmatprep.subr.bf16.mxu0 %v13211_v48  ;;  %v13254_v47 = vld [vmem:[%s16932_s1 + $0x730] ss:$8 sps:$4 sm:$0xff]   ;;  %v13259_v48 = vld [vmem:[%s16932_s1 + $0x624] ss:$8 sps:$4 sm:$0xff]   ;;  %v11437_v62 = vcombine.low %v141_v40, %v149_v43 }
  0xf3   :  { %2996 = vmatprep.subr.bf16.mxu1 %v13214_v49  ;;  %2733 = vmatprep.mubr.bf16.mxu0 %v11498_v50  ;;  %v13262_v49 = vld [vmem:[%s16932_s1 + $0x724] ss:$8 sps:$4 sm:$0xff]   ;;  %v11438_v50 = vcombine.high %v141_v40, %v149_v43 }
  0xf4   :  { %2846 = vmatprep.mubr.bf16.mxu1 %v11500_v51  ;;  %v11440_v51 = vcombine.high %v142_v44, %v150_v45  ;;  %v205_v40 = vld [vmem:[%s16931_s0 + $0x3a0] sm:$0xff]  ;;  %v214_v43 = vld [vmem:[%s16931_s0 + $0x3e8] sm:$0xff]  ;;  %v13299_v44 = vld [vmem:[%s16932_s1 + $0x6b0] ss:$8 sps:$4 sm:$0xff]  }
  0xf5   :  { %2884 = vmatpush2.bf16.msra.mxu0 %v13209_v52  ;;  %v13257_v52 = vld [vmem:[%s16932_s1 + $0x620] ss:$8 sps:$4 sm:$0xff]   ;;  %v13302_v45 = vld [vmem:[%s16932_s1 + $0x7b0] ss:$8 sps:$4 sm:$0xff]  }
  0xf6   :  { %2997 = vmatpush2.bf16.msra.mxu1 %v13212_v53  ;;  %2885 = vmatprep.subr.bf16.mxu0 %v13217_v54  ;;  %v13260_v53 = vld [vmem:[%s16932_s1 + $0x720] ss:$8 sps:$4 sm:$0xff]   ;;  %v13265_v54 = vld [vmem:[%s16932_s1 + $0x614] ss:$8 sps:$4 sm:$0xff]  }
  0xf7   :  { %2998 = vmatprep.subr.bf16.mxu1 %v13220_v55  ;;  %v13268_v55 = vld [vmem:[%s16932_s1 + $0x714] ss:$8 sps:$4 sm:$0xff]  }
  0xf8   :  { %2734 = vmatmul.mubr.bf16.gmra.mxu0 %v11497_v59  ;;  %v166_v59 = vld [vmem:[%s16931_s0 + $0x268] sm:$0xff] }
  0xf9   :  { %2847 = vmatmul.mubr.bf16.gmra.mxu1 %v11499_v60  ;;  %2886 = vmatpush2.bf16.msra.mxu0 %v13215_v56  ;;  %v157_v56 = vld [vmem:[%s16931_s0 + $0x220] sm:$0xff]  ;;  %v13263_v60 = vld [vmem:[%s16932_s1 + $0x610] ss:$8 sps:$4 sm:$0xff]   ;;  %v11455_v15 = vcombine.low %v158_v58, %v166_v59 }
  0xfa   :  { %2999 = vmatpush2.bf16.msra.mxu1 %v13218_v57  ;;  %2887 = vmatprep.subr.bf16.mxu0 %v13223_v0  ;;  %v165_v57 = vld [vmem:[%s16931_s0 + $0x260] sm:$0xff] }
  0xfb   :  { %3000 = vmatprep.subr.bf16.mxu1 %v13226_v1  ;;  %2889 = vmatprep.mubr.bf16.mxu0 %v11390_v2  ;;  %v13271_v0 = vld [vmem:[%s16932_s1 + $0x604] ss:$8 sps:$4 sm:$0xff]   ;;  %v13269_v2 = vld [vmem:[%s16932_s1 + $0x600] ss:$8 sps:$4 sm:$0xff]   ;;  %v11453_v14 = vcombine.low %v157_v56, %v165_v57 }
  0xfc   :  { %3002 = vmatprep.mubr.bf16.mxu1 %v11392_v3  ;;  %v13274_v1 = vld [vmem:[%s16932_s1 + $0x704] ss:$8 sps:$4 sm:$0xff]   ;;  %v13272_v3 = vld [vmem:[%s16932_s1 + $0x700] ss:$8 sps:$4 sm:$0xff]  }
  0xfd   :  { %2888 = vmatpush2.bf16.msra.mxu0 %v13221_v4  ;;  %v11454_v4 = vcombine.high %v157_v56, %v165_v57  ;;  %v475_v56 = vlaneseq  ;;  %v95_v57 = vld [vmem:[%s16931_s0 + $0x30] sm:$0xff] }
  0xfe   :  { %3001 = vmatpush2.bf16.msra.mxu1 %v13224_v5  ;;  %3083 = vmatprep.subr.bf16.mxu0 %v13229_v6  ;;  %v11456_v5 = vcombine.high %v158_v58, %v166_v59  ;;  %v13277_v6 = vld [vmem:[%s16932_s1 + $0x6f4] ss:$8 sps:$4 sm:$0xff]  }
  0xff   :  { %3196 = vmatprep.subr.bf16.mxu1 %v13232_v7  ;;  %v13280_v7 = vld [vmem:[%s16932_s1 + $0x7f4] ss:$8 sps:$4 sm:$0xff]  }
 0x100   :  { %2890 = vmatmul.mubr.bf16.vlgmr.msra.gmra.mxu0 %v11389_v12  ;;  %v13275_v12 = vld [vmem:[%s16932_s1 + $0x6f0] ss:$8 sps:$4 sm:$0xff]  }
 0x101   :  { %3003 = vmatmul.mubr.bf16.vlgmr.msra.gmra.mxu1 %v11391_v13  ;;  %3084 = vmatpush1.bf16.msra.mxu0 %v13227_v8  ;;  %v173_v8 = vld [vmem:[%s16931_s0 + $0x2a0] sm:$0xff]  ;;  %v13278_v13 = vld [vmem:[%s16932_s1 + $0x7f0] ss:$8 sps:$4 sm:$0xff]  }
 0x102   :  { %3197 = vmatpush1.bf16.msra.mxu1 %v13230_v9  ;;  %3085 = vmatprep.subr.bf16.mxu0 %v13235_v16  ;;  %v181_v9 = vld [vmem:[%s16931_s0 + $0x2e0] sm:$0xff]  ;;  %v103_v58 = vld [vmem:[%s16931_s0 + $0x70] sm:$0xff]  ;;  %v96_v59 = vld [vmem:[%s16931_s0 + $0x38] sm:$0xff] }
 0x103   :  { %3198 = vmatprep.subr.bf16.mxu1 %v13238_v17  ;;  %2899 = vmatprep.mubr.bf16.mxu0 %v11406_v18  ;;  %v13283_v16 = vld [vmem:[%s16932_s1 + $0x6e4] ss:$8 sps:$4 sm:$0xff]   ;;  %v13281_v18 = vld [vmem:[%s16932_s1 + $0x6e0] ss:$8 sps:$4 sm:$0xff]   ;;  %v11469_v30 = vcombine.low %v173_v8, %v181_v9 }
 0x104   :  { %3012 = vmatprep.mubr.bf16.mxu1 %v11408_v19  ;;  %v13286_v17 = vld [vmem:[%s16932_s1 + $0x7e4] ss:$8 sps:$4 sm:$0xff]   ;;  %v13284_v19 = vld [vmem:[%s16932_s1 + $0x7e0] ss:$8 sps:$4 sm:$0xff]  }
 0x105   :  { %3086 = vmatpush1.bf16.msra.mxu0 %v13233_v20  ;;  %v11470_v20 = vcombine.high %v173_v8, %v181_v9  ;;  %v473_v8 = vld [vmem:[#allocation2] sm:$0x3]  ;;  %v111_v9 = vld [vmem:[%s16931_s0 + $0xb0] sm:$0xff] }
 0x106   :  { %3199 = vmatpush1.bf16.msra.mxu1 %v13236_v21  ;;  %3087 = vmatprep.subr.bf16.mxu0 %v13241_v22  ;;  %v11472_v21 = vcombine.high %v174_v10, %v182_v11  ;;  %v13289_v22 = vld [vmem:[%s16932_s1 + $0x6d4] ss:$8 sps:$4 sm:$0xff]  }
 0x107   :  { %3200 = vmatprep.subr.bf16.mxu1 %v13244_v23  ;;  %v13292_v23 = vld [vmem:[%s16932_s1 + $0x7d4] ss:$8 sps:$4 sm:$0xff]  }
 0x108   :  { %2900 = vmatmul.mubr.bf16.gmra.mxu0 %v11405_v28  ;;  %v13287_v28 = vld [vmem:[%s16932_s1 + $0x6d0] ss:$8 sps:$4 sm:$0xff]  }
 0x109   :  { %3013 = vmatmul.mubr.bf16.gmra.mxu1 %v11407_v29  ;;  %3088 = vmatpush1.bf16.msra.mxu0 %v13239_v24  ;;  %v189_v24 = vld [vmem:[%s16931_s0 + $0x320] sm:$0xff]  ;;  %v13290_v29 = vld [vmem:[%s16932_s1 + $0x7d0] ss:$8 sps:$4 sm:$0xff]  }
 0x10a   :  { %3201 = vmatpush1.bf16.msra.mxu1 %v13242_v25  ;;  %3089 = vmatprep.subr.bf16.mxu0 %v13247_v32  ;;  %v197_v25 = vld [vmem:[%s16931_s0 + $0x360] sm:$0xff]  ;;  %v119_v10 = vld [vmem:[%s16931_s0 + $0xf0] sm:$0xff]  ;;  %v112_v11 = vld [vmem:[%s16931_s0 + $0xb8] sm:$0xff] }
 0x10b   :  { %3202 = vmatprep.subr.bf16.mxu1 %v13250_v33  ;;  %2909 = vmatprep.mubr.bf16.mxu0 %v11422_v34  ;;  %v13295_v32 = vld [vmem:[%s16932_s1 + $0x6c4] ss:$8 sps:$4 sm:$0xff]   ;;  %v13293_v34 = vld [vmem:[%s16932_s1 + $0x6c0] ss:$8 sps:$4 sm:$0xff]  }
 0x10c   :  { %3022 = vmatprep.mubr.bf16.mxu1 %v11424_v35  ;;  %v13298_v33 = vld [vmem:[%s16932_s1 + $0x7c4] ss:$8 sps:$4 sm:$0xff]   ;;  %v13296_v35 = vld [vmem:[%s16932_s1 + $0x7c0] ss:$8 sps:$4 sm:$0xff]  }
 0x10d   :  { %3090 = vmatpush1.bf16.msra.mxu0 %v13245_v36  ;;  %v11486_v36 = vcombine.high %v189_v24, %v197_v25 }
 0x10e   :  { %3203 = vmatpush1.bf16.msra.mxu1 %v13248_v37  ;;  %3091 = vmatprep.subr.bf16.mxu0 %v13253_v38  ;;  %v11488_v37 = vcombine.high %v190_v26, %v198_v27  ;;  %v13301_v38 = vld [vmem:[%s16932_s1 + $0x6b4] ss:$8 sps:$4 sm:$0xff]  }
 0x10f   :  { %3204 = vmatprep.subr.bf16.mxu1 %v13256_v39  ;;  %v13304_v39 = vld [vmem:[%s16932_s1 + $0x7b4] ss:$8 sps:$4 sm:$0xff]  }
 0x110   :  { %2910 = vmatmul.mubr.bf16.gmra.mxu0 %v11421_v41  ;;  %v213_v41 = vld [vmem:[%s16931_s0 + $0x3e0] sm:$0xff] }
 0x111   :  { %3023 = vmatmul.mubr.bf16.gmra.mxu1 %v11423_v42  ;;  %3092 = vmatpush1.bf16.msra.mxu0 %v13251_v46  ;;  %v206_v42 = vld [vmem:[%s16931_s0 + $0x3a8] sm:$0xff]  ;;  %v11485_v46 = vcombine.low %v189_v24, %v197_v25  ;;  %v135_v24 = vld [vmem:[%s16931_s0 + $0x170] sm:$0xff]  ;;  %v128_v25 = vld [vmem:[%s16931_s0 + $0x138] sm:$0xff] }
 0x112   :  { %3205 = vmatpush1.bf16.msra.mxu1 %v13254_v47  ;;  %3093 = vmatprep.subr.bf16.mxu0 %v13259_v48  ;;  %v11487_v47 = vcombine.low %v190_v26, %v198_v27  ;;  %v13307_v48 = vld [vmem:[%s16932_s1 + $0x6a4] ss:$8 sps:$4 sm:$0xff]   ;;  %v136_v26 = vld [vmem:[%s16931_s0 + $0x178] sm:$0xff] }
 0x113   :  { %3206 = vmatprep.subr.bf16.mxu1 %v13262_v49  ;;  %2919 = vmatprep.mubr.bf16.mxu0 %v11438_v50  ;;  %v13310_v49 = vld [vmem:[%s16932_s1 + $0x7a4] ss:$8 sps:$4 sm:$0xff]   ;;  %v13305_v50 = vld [vmem:[%s16932_s1 + $0x6a0] ss:$8 sps:$4 sm:$0xff]  }
 0x114   :  { %3032 = vmatprep.mubr.bf16.mxu1 %v11440_v51  ;;  %v13308_v51 = vld [vmem:[%s16932_s1 + $0x7a0] ss:$8 sps:$4 sm:$0xff]  }
 0x115   :  { %3094 = vmatpush1.bf16.msra.mxu0 %v13257_v52  ;;  %v11502_v52 = vcombine.high %v205_v40, %v213_v41 }
 0x116   :  { %3207 = vmatpush1.bf16.msra.mxu1 %v13260_v53  ;;  %3095 = vmatprep.subr.bf16.mxu0 %v13265_v54  ;;  %v11504_v53 = vcombine.high %v206_v42, %v214_v43  ;;  %v13313_v54 = vld [vmem:[%s16932_s1 + $0x694] ss:$8 sps:$4 sm:$0xff]  }
 0x117   :  { %3208 = vmatprep.subr.bf16.mxu1 %v13268_v55  ;;  %v13316_v55 = vld [vmem:[%s16932_s1 + $0x794] ss:$8 sps:$4 sm:$0xff]  }
 0x118   :  { %2920 = vmatmul.mubr.bf16.gmra.mxu0 %v11437_v62  ;;  %v13314_v62 = vld [vmem:[%s16932_s1 + $0x790] ss:$8 sps:$4 sm:$0xff]  }
 0x119   :  { %3033 = vmatmul.mubr.bf16.gmra.mxu1 %v11439_v63  ;;  %3096 = vmatpush1.bf16.msra.mxu0 %v13263_v60  ;;  %v104_v60 = vld [vmem:[%s16931_s0 + $0x78] sm:$0xff]  ;;  %v11501_v63 = vcombine.low %v205_v40, %v213_v41 }
 0x11a   :  { %3209 = vmatpush1.bf16.msra.mxu1 %v13266_v61  ;;  %3097 = vmatprep.subr.bf16.mxu0 %v13271_v0  ;;  %v13311_v61 = vld [vmem:[%s16932_s1 + $0x690] ss:$8 sps:$4 sm:$0xff]   ;;  %v11503_v0 = vcombine.low %v206_v42, %v214_v43 }
 0x11b   :  { %3210 = vmatprep.subr.bf16.mxu1 %v13274_v1  ;;  %2929 = vmatprep.mubr.bf16.mxu0 %v11454_v4  ;;  %v13319_v1 = vld [vmem:[%s16932_s1 + $0x684] ss:$8 sps:$4 sm:$0xff]   ;;  %v13317_v4 = vld [vmem:[%s16932_s1 + $0x680] ss:$8 sps:$4 sm:$0xff]  }
 0x11c   :  { %3042 = vmatprep.mubr.bf16.mxu1 %v11456_v5  ;;  %v13320_v5 = vld [vmem:[%s16932_s1 + $0x780] ss:$8 sps:$4 sm:$0xff]  }
 0x11d   :  { %3098 = vmatpush1.bf16.msra.mxu0 %v13269_v2  ;;  %v13322_v2 = vld [vmem:[%s16932_s1 + $0x784] ss:$8 sps:$4 sm:$0xff]  }
 0x11e   :  { %3211 = vmatpush1.bf16.msra.mxu1 %v13272_v3  ;;  %3099 = vmatprep.subr.bf16.mxu0 %v13277_v6  ;;  %v16123_v3 = vshrl.u32 %v475_v56, 7  ;;  %v11394_v6 = vcombine.high %v95_v57, %v103_v58 }
 0x11f   :  { %3212 = vmatprep.subr.bf16.mxu1 %v13280_v7  ;;  %v11396_v7 = vcombine.high %v96_v59, %v104_v60 }
 0x120   :  { %2930 = vmatmul.mubr.bf16.gmra.mxu0 %v11453_v14  ;;  %16943 = vst [vmem:[#allocation13_spill] sm:$0xff] %v16123_v3  ;;  %v16939_v14 = vsub.s32 1, %v16123_v3 }
 0x121   :  { %3043 = vmatmul.mubr.bf16.gmra.mxu1 %v11455_v15  ;;  %3100 = vmatpush2.bf16.msra.mxu0 %v13275_v12  ;;  %v120_v12 = vld [vmem:[%s16931_s0 + $0xf8] sm:$0xff]  ;;  %v11393_v15 = vcombine.low %v95_v57, %v103_v58 }
 0x122   :  { %3213 = vmatpush2.bf16.msra.mxu1 %v13278_v13  ;;  %3101 = vmatprep.subr.bf16.mxu0 %v13283_v16  ;;  %v16940_v13 = vsub.s32 0, %v16123_v3  ;;  %v11395_v16 = vcombine.low %v96_v59, %v104_v60  ;;  %v11427_v59 = vcombine.low %v128_v25, %v136_v26 }
 0x123   :  { %3214 = vmatprep.subr.bf16.mxu1 %v13286_v17  ;;  %2939 = vmatprep.mubr.bf16.mxu0 %v11470_v20  ;;  %v16151_v20 = vrot.slane %v473_v8, %v16939_v14 }
 0x124   :  { %3052 = vmatprep.mubr.bf16.mxu1 %v11472_v21  ;;  %v16147_v17 = vrot.slane %v473_v8, %v16940_v13 }
 0x125   :  { %3102 = vmatpush2.bf16.msra.mxu0 %v13281_v18  ;;  %v11410_v18 = vcombine.high %v111_v9, %v119_v10 }
 0x126   :  { %3215 = vmatpush2.bf16.msra.mxu1 %v13284_v19  ;;  %3103 = vmatprep.subr.bf16.mxu0 %v13289_v22  ;;  %v11412_v19 = vcombine.high %v112_v11, %v120_v12 }
 0x127   :  { %3216 = vmatprep.subr.bf16.mxu1 %v13292_v23  ;;  %v127_v23 = vld [vmem:[%s16931_s0 + $0x130] sm:$0xff] }
 0x128   :  { %2940 = vmatmul.mubr.bf16.gmra.mxu0 %v11469_v30  ;;  %v11425_v58 = vcombine.low %v127_v23, %v135_v24 }
 0x129   :  { %3053 = vmatmul.mubr.bf16.gmra.mxu1 %v11471_v31  ;;  %3104 = vmatpush2.bf16.msra.mxu0 %v13287_v28 }
 0x12a   :  { %3217 = vmatpush2.bf16.msra.mxu1 %v13290_v29  ;;  %3105 = vmatprep.subr.bf16.mxu0 %v13295_v32 }
 0x12b   :  { %3218 = vmatprep.subr.bf16.mxu1 %v13298_v33  ;;  %2949 = vmatprep.mubr.bf16.mxu0 %v11486_v36 }
 0x12c   :  { %3062 = vmatprep.mubr.bf16.mxu1 %v11488_v37 }
 0x12d   :  { %3106 = vmatpush2.bf16.msra.mxu0 %v13293_v34  ;;  %v11409_v34 = vcombine.low %v111_v9, %v119_v10 }
 0x12e   :  { %3219 = vmatpush2.bf16.msra.mxu1 %v13296_v35  ;;  %3107 = vmatprep.subr.bf16.mxu0 %v13301_v38  ;;  %v11411_v35 = vcombine.low %v112_v11, %v120_v12  ;;  %v11426_v38 = vcombine.high %v127_v23, %v135_v24  ;;  %v16214_v11 = vld [vmem:[%s16931_s0 + $0x230] sm:$0xff] }
 0x12f   :  { %3220 = vmatprep.subr.bf16.mxu1 %v13304_v39  ;;  %v11428_v39 = vcombine.high %v128_v25, %v136_v26  ;;  %v16219_v12 = vld [vmem:[%s16931_s0 + $0x270] sm:$0xff]  ;;  %v13332_v26 = vld [vmem:[#allocation4 + $0x2c8] ss:$16 sps:$4 sm:$0xff]  }
 0x130   :  { %2950 = vmatmul.mubr.bf16.gmra.mxu0 %v11485_v46  ;;  %v16178_v46 = vld [vmem:[%s16931_s0 + $0x1b0] sm:$0xff] }
 0x131   :  { %3063 = vmatmul.mubr.bf16.gmra.mxu1 %v11487_v47  ;;  %3108 = vmatpush2.bf16.msra.mxu0 %v13299_v44  ;;  %v16183_v47 = vld [vmem:[%s16931_s0 + $0x1f0] sm:$0xff] }
 0x132   :  { %3221 = vmatpush2.bf16.msra.mxu1 %v13302_v45  ;;  %3109 = vmatprep.subr.bf16.mxu0 %v13307_v48  ;;  %v16188_v48 = vld [vmem:[%s16931_s0 + $0x1b8] sm:$0xff]  ;;  %v13329_v25 = vld [vmem:[#allocation4 + $0x2c0] ss:$16 sps:$4 sm:$0xff]  }
 0x133   :  { %3222 = vmatprep.subr.bf16.mxu1 %v13310_v49  ;;  %2959 = vmatprep.mubr.bf16.mxu0 %v11502_v52  ;;  %v16193_v49 = vld [vmem:[%s16931_s0 + $0x1f8] sm:$0xff] }
 0x134   :  { %3072 = vmatprep.mubr.bf16.mxu1 %v11504_v53 }
 0x135   :  { %3110 = vmatpush2.bf16.msra.mxu0 %v13305_v50 }
 0x136   :  { %3223 = vmatpush2.bf16.msra.mxu1 %v13308_v51  ;;  %3111 = vmatprep.subr.bf16.mxu0 %v13313_v54 }
 0x137   :  { %3224 = vmatprep.subr.bf16.mxu1 %v13316_v55 }
 0x138   :  { %2960 = vmatmul.mubr.bf16.gmra.mxu0 %v11501_v63  ;;  %v11444_v63 = vcombine.high %v16188_v48, %v16193_v49 }
 0x139   :  { %3073 = vmatmul.mubr.bf16.gmra.mxu1 %v11503_v0  ;;  %3112 = vmatpush2.bf16.msra.mxu0 %v13311_v61  ;;  %v13325_v0 = vld [vmem:[#allocation4 + $0x2e4] ss:$16 sps:$4 sm:$0xff]  }
 0x13a   :  { %3225 = vmatpush2.bf16.msra.mxu1 %v13314_v62  ;;  %3113 = vmatprep.subr.bf16.mxu0 %v13319_v1  ;;  %v11442_v62 = vcombine.high %v16178_v46, %v16183_v47  ;;  %v13328_v1 = vld [vmem:[#allocation4 + $0x2ec] ss:$16 sps:$4 sm:$0xff]  }
 0x13b   :  { %3226 = vmatprep.subr.bf16.mxu1 %v13322_v2  ;;  %3115 = vmatprep.mubr.bf16.mxu0 %v11394_v6  ;;  %v13326_v6 = vld [vmem:[#allocation4 + $0x2e8] ss:$16 sps:$4 sm:$0xff]  }
 0x13c   :  { %3228 = vmatprep.mubr.bf16.mxu1 %v11396_v7 }
 0x13d   :  { %3114 = vmatpush2.bf16.msra.mxu0 %v13317_v4 }
 0x13e   :  { %3227 = vmatpush2.bf16.msra.mxu1 %v13320_v5  ;;  %v13323_v5 = vld [vmem:[#allocation4 + $0x2e0] ss:$16 sps:$4 sm:$0xff]   ;;  %3858 = vmatprep.subr.bf16.mxu0 %v13325_v0  ;;  %v13344_v0 = vld [vmem:[#allocation4 + $0x288] ss:$16 sps:$4 sm:$0xff]  }
 0x13f   :  { %3899 = vmatprep.subr.bf16.mxu1 %v13328_v1 }
 0x140   :  { %v2439_v21 = vpop.f32.mrf.mxu0  ;;  %3116 = vmatmul.mubr.bf16.vlgmr.msra.gmra.mxu0 %v11393_v15  ;;  %v16224_v15 = vld [vmem:[%s16931_s0 + $0x238] sm:$0xff] }
 0x141   :  { %v2552_v22 = vpop.f32.mrf.mxu1  ;;  %3229 = vmatmul.mubr.bf16.vlgmr.msra.gmra.mxu1 %v11395_v16  ;;  %v2440_v27 = vadd.f32 %v2439_v21, %v16147_v17  ;;  %3125 = vmatprep.mubr.bf16.mxu0 %v11410_v18  ;;  %v16229_v16 = vld [vmem:[%s16931_s0 + $0x278] sm:$0xff] }
 0x142   :  { %3238 = vmatprep.mubr.bf16.mxu1 %v11412_v19  ;;  %v2441_v28 = vpop.f32.mrf.mxu0  ;;  %v13331_v21 = vld [vmem:[#allocation4 + $0x2c4] ss:$16 sps:$4 sm:$0xff]   ;;  %3859 = vmatpush1.bf16.msra.mxu0 %v13323_v5 }
 0x143   :  { %v2554_v29 = vpop.f32.mrf.mxu1  ;;  %v16166_v30 = vadd.f32 %v2552_v22, %v2440_v27  ;;  %v2442_v31 = vadd.f32 %v2441_v28, %v16151_v20  ;;  %v13334_v22 = vld [vmem:[#allocation4 + $0x2cc] ss:$16 sps:$4 sm:$0xff]   ;;  %3900 = vmatpush1.bf16.msra.mxu1 %v13326_v6  ;;  %3860 = vmatprep.subr.bf16.mxu0 %v13331_v21  ;;  %v11457_v6 = vcombine.low %v16214_v11, %v16219_v12 }
 0x144   :  { %v2443_v32 = vpop.f32.mrf.mxu0  ;;  %3901 = vmatprep.subr.bf16.mxu1 %v13334_v22  ;;  %v13349_v22 = vld [vmem:[#allocation4 + $0x264] ss:$16 sps:$4 sm:$0xff]  }
 0x145   :  { %v2556_v33 = vpop.f32.mrf.mxu1  ;;  %v16169_v36 = vadd.f32 %v2554_v29, %v2442_v31  ;;  %v2444_v37 = vadd.f32 %v2443_v32, %v16147_v17  ;;  %v11441_v32 = vcombine.low %v16178_v46, %v16183_v47 }
 0x146   :  { %v2445_v40 = vpop.f32.mrf.mxu0  ;;  %3861 = vmatpush1.bf16.msra.mxu0 %v13329_v25 }
 0x147   :  { %v2558_v41 = vpop.f32.mrf.mxu1  ;;  %v16172_v42 = vadd.f32 %v2556_v33, %v2444_v37  ;;  %v2446_v43 = vadd.f32 %v2445_v40, %v16151_v20  ;;  %v11443_v33 = vcombine.low %v16188_v48, %v16193_v49  ;;  %v11458_v37 = vcombine.high %v16214_v11, %v16219_v12  ;;  %v13340_v40 = vld [vmem:[#allocation4 + $0x2ac] ss:$16 sps:$4 sm:$0xff]   ;;  %3902 = vmatpush1.bf16.msra.mxu1 %v13332_v26  ;;  %v13347_v11 = vld [vmem:[#allocation4 + $0x260] ss:$16 sps:$4 sm:$0xff]   ;;  %v13350_v12 = vld [vmem:[#allocation4 + $0x268] ss:$16 sps:$4 sm:$0xff]  }
 0x148   :  { %v2449_v44 = vpop.f32.mrf.mxu0  ;;  %3126 = vmatmul.mubr.bf16.gmra.mxu0 %v11409_v34  ;;  %3903 = vmatprep.subr.bf16.mxu1 %v13340_v40 }
 0x149   :  { %v2562_v45 = vpop.f32.mrf.mxu1  ;;  %3239 = vmatmul.mubr.bf16.gmra.mxu1 %v11411_v35  ;;  %v16195_v50 = vadd.f32 %v2558_v41, %v2446_v43  ;;  %v2450_v51 = vadd.f32 %v2449_v44, %v16147_v17  ;;  %3135 = vmatprep.mubr.bf16.mxu0 %v11426_v38  ;;  %v11460_v38 = vcombine.high %v16224_v15, %v16229_v16  ;;  %v13335_v44 = vld [vmem:[#allocation4 + $0x2a0] ss:$16 sps:$4 sm:$0xff]  }
 0x14a   :  { %3248 = vmatprep.mubr.bf16.mxu1 %v11428_v39  ;;  %v2451_v52 = vpop.f32.mrf.mxu0  ;;  %v13337_v39 = vld [vmem:[#allocation4 + $0x2a4] ss:$16 sps:$4 sm:$0xff]  }
 0x14b   :  { %v2564_v53 = vpop.f32.mrf.mxu1  ;;  %v16198_v54 = vadd.f32 %v2562_v45, %v2450_v51  ;;  %v2452_v55 = vadd.f32 %v2451_v52, %v16151_v20  ;;  %v13338_v45 = vld [vmem:[#allocation4 + $0x2a8] ss:$16 sps:$4 sm:$0xff]   ;;  %3862 = vmatprep.subr.bf16.mxu0 %v13337_v39  ;;  %v16254_v51 = vld [vmem:[%s16931_s0 + $0x2b0] sm:$0xff] }
 0x14c   :  { %v2453_v56 = vpop.f32.mrf.mxu0  ;;  %v16259_v52 = vld [vmem:[%s16931_s0 + $0x2f0] sm:$0xff]  ;;  %3863 = vmatpush1.bf16.msra.mxu0 %v13335_v44  ;;  %3904 = vmatpush1.bf16.msra.mxu1 %v13338_v45  ;;  %v13356_v44 = vld [vmem:[#allocation4 + $0x248] ss:$16 sps:$4 sm:$0xff]  }
 0x14d   :  { %v2566_v57 = vpop.f32.mrf.mxu1  ;;  %v16201_v60 = vadd.f32 %v2564_v53, %v2452_v55  ;;  %v2454_v61 = vadd.f32 %v2453_v56, %v16147_v17  ;;  %v16264_v53 = vld [vmem:[%s16931_s0 + $0x2b8] sm:$0xff] }
 0x14e   :  { %v2455_v2 = vpop.f32.mrf.mxu0  ;;  %v16269_v55 = vld [vmem:[%s16931_s0 + $0x2f8] sm:$0xff] }
 0x14f   :  { %v2568_v4 = vpop.f32.mrf.mxu1  ;;  %v16208_v7 = vadd.f32 %v2566_v57, %v2454_v61  ;;  %v2456_v8 = vadd.f32 %v2455_v2, %v16151_v20  ;;  %v11476_v21 = vcombine.high %v16264_v53, %v16269_v55  ;;  %v13358_v39 = vld [vmem:[#allocation4 + $0x24c] ss:$16 sps:$4 sm:$0xff]  }
 0x150   :  { %v2459_v9 = vpop.f32.mrf.mxu0  ;;  %3136 = vmatmul.mubr.bf16.gmra.mxu0 %v11425_v58  ;;  %v13343_v58 = vld [vmem:[#allocation4 + $0x284] ss:$16 sps:$4 sm:$0xff]  }
 0x151   :  { %v2572_v10 = vpop.f32.mrf.mxu1  ;;  %3249 = vmatmul.mubr.bf16.gmra.mxu1 %v11427_v59  ;;  %v16231_v18 = vadd.f32 %v2568_v4, %v2456_v8  ;;  %v2460_v19 = vadd.f32 %v2459_v9, %v16147_v17  ;;  %3145 = vmatprep.mubr.bf16.mxu0 %v11442_v62  ;;  %v13346_v59 = vld [vmem:[#allocation4 + $0x28c] ss:$16 sps:$4 sm:$0xff]   ;;  %v11459_v8 = vcombine.low %v16224_v15, %v16229_v16 }
 0x152   :  { %3258 = vmatprep.mubr.bf16.mxu1 %v11444_v63  ;;  %v2461_v23 = vpop.f32.mrf.mxu0  ;;  %v13341_v63 = vld [vmem:[#allocation4 + $0x280] ss:$16 sps:$4 sm:$0xff]   ;;  %3864 = vmatprep.subr.bf16.mxu0 %v13343_v58  ;;  %v11475_v58 = vcombine.low %v16264_v53, %v16269_v55 }
 0x153   :  { %16944 = vst [vmem:[#allocation14_spill] sm:$0xff] %v16231_v18  ;;  %v2574_v24 = vpop.f32.mrf.mxu1  ;;  %v16234_v27 = vadd.f32 %v2572_v10, %v2460_v19  ;;  %v2462_v28 = vadd.f32 %v2461_v23, %v16151_v20  ;;  %3905 = vmatprep.subr.bf16.mxu1 %v13346_v59  ;;  %v11474_v19 = vcombine.high %v16254_v51, %v16259_v52  ;;  %v13352_v23 = vld [vmem:[#allocation4 + $0x26c] ss:$16 sps:$4 sm:$0xff]  }
 0x154   :  { %v2463_v29 = vpop.f32.mrf.mxu0  ;;  %3865 = vmatpush1.bf16.msra.mxu0 %v13341_v63  ;;  %3906 = vmatpush1.bf16.msra.mxu1 %v13344_v0  ;;  %v13361_v0 = vld [vmem:[#allocation4 + $0x224] ss:$16 sps:$4 sm:$0xff]  }
 0x155   :  { %v2576_v31 = vpop.f32.mrf.mxu1  ;;  %v16241_v34 = vadd.f32 %v2574_v24, %v2462_v28  ;;  %v2464_v35 = vadd.f32 %v2463_v29, %v16147_v17  ;;  %3866 = vmatprep.subr.bf16.mxu0 %v13349_v22  ;;  %3907 = vmatprep.subr.bf16.mxu1 %v13352_v23  ;;  %v16294_v29 = vld [vmem:[%s16931_s0 + $0x330] sm:$0xff] }
 0x156   :  { %v2465_v41 = vpop.f32.mrf.mxu0  ;;  %v13367_v23 = vld [vmem:[#allocation4 + $0x204] ss:$16 sps:$4 sm:$0xff]  }
 0x157   :  { %v2578_v43 = vpop.f32.mrf.mxu1  ;;  %v16248_v46 = vadd.f32 %v2576_v31, %v2464_v35  ;;  %v2466_v47 = vadd.f32 %v2465_v41, %v16151_v20  ;;  %v16299_v31 = vld [vmem:[%s16931_s0 + $0x370] sm:$0xff] }
 0x158   :  { %v2469_v48 = vpop.f32.mrf.mxu0  ;;  %3146 = vmatmul.mubr.bf16.gmra.mxu0 %v11441_v32  ;;  %v16304_v32 = vld [vmem:[%s16931_s0 + $0x338] sm:$0xff]  ;;  %3908 = vmatpush1.bf16.msra.mxu1 %v13350_v12  ;;  %v13365_v12 = vld [vmem:[#allocation4 + $0x200] ss:$16 sps:$4 sm:$0xff]  }
 0x159   :  { %v2582_v49 = vpop.f32.mrf.mxu1  ;;  %3259 = vmatmul.mubr.bf16.gmra.mxu1 %v11443_v33  ;;  %v16271_v56 = vadd.f32 %v2578_v43, %v2466_v47  ;;  %v2470_v57 = vadd.f32 %v2469_v48, %v16147_v17  ;;  %3155 = vmatprep.mubr.bf16.mxu0 %v11458_v37  ;;  %v16309_v33 = vld [vmem:[%s16931_s0 + $0x378] sm:$0xff]  ;;  %v13353_v43 = vld [vmem:[#allocation4 + $0x240] ss:$16 sps:$4 sm:$0xff]  }
 0x15a   :  { %3268 = vmatprep.mubr.bf16.mxu1 %v11460_v38  ;;  %v2471_v61 = vpop.f32.mrf.mxu0  ;;  %v13355_v38 = vld [vmem:[#allocation4 + $0x244] ss:$16 sps:$4 sm:$0xff]   ;;  %3867 = vmatpush1.bf16.msra.mxu0 %v13347_v11  ;;  %v11492_v63 = vcombine.high %v16304_v32, %v16309_v33 }
 0x15b   :  { %v2584_v62 = vpop.f32.mrf.mxu1  ;;  %v16274_v1 = vadd.f32 %v2582_v49, %v2470_v57  ;;  %v2472_v2 = vadd.f32 %v2471_v61, %v16151_v20  ;;  %3868 = vmatprep.subr.bf16.mxu0 %v13355_v38  ;;  %3909 = vmatprep.subr.bf16.mxu1 %v13358_v39  ;;  %v11473_v57 = vcombine.low %v16254_v51, %v16259_v52  ;;  %v13359_v51 = vld [vmem:[#allocation4 + $0x220] ss:$16 sps:$4 sm:$0xff]   ;;  %v13362_v52 = vld [vmem:[#allocation4 + $0x228] ss:$16 sps:$4 sm:$0xff]  }
 0x15c   :  { %v2473_v4 = vpop.f32.mrf.mxu0  ;;  %3910 = vmatpush1.bf16.msra.mxu1 %v13356_v44  ;;  %v11489_v39 = vcombine.low %v16294_v29, %v16299_v31 }
 0x15d   :  { %v2586_v5 = vpop.f32.mrf.mxu1  ;;  %v16281_v9 = vadd.f32 %v2584_v62, %v2472_v2  ;;  %v2474_v10 = vadd.f32 %v2473_v4, %v16147_v17  ;;  %v11490_v62 = vcombine.high %v16294_v29, %v16299_v31  ;;  %v13364_v2 = vld [vmem:[#allocation4 + $0x22c] ss:$16 sps:$4 sm:$0xff]   ;;  %v13371_v29 = vld [vmem:[#allocation4 + $0x3e0] ss:$16 sps:$4 sm:$0xff]   ;;  %v13374_v31 = vld [vmem:[#allocation4 + $0x3e8] ss:$16 sps:$4 sm:$0xff]  }
 0x15e   :  { %v2475_v24 = vpop.f32.mrf.mxu0  ;;  %3869 = vmatpush1.bf16.msra.mxu0 %v13353_v43  ;;  %3911 = vmatprep.subr.bf16.mxu1 %v13364_v2 }
 0x15f   :  { %v2588_v25 = vpop.f32.mrf.mxu1  ;;  %v16288_v26 = vadd.f32 %v2586_v5, %v2474_v10  ;;  %v2476_v15 = vadd.f32 %v2475_v24, %v16151_v20  ;;  %3870 = vmatprep.subr.bf16.mxu0 %v13361_v0  ;;  %v16342_v10 = vld [vmem:[%s16931_s0 + $0x3f0] sm:$0xff] }
 0x160   :  { %v2479_v16 = vpop.f32.mrf.mxu0  ;;  %3156 = vmatmul.mubr.bf16.gmra.mxu0 %v11457_v6  ;;  %v13370_v24 = vld [vmem:[#allocation4 + $0x20c] ss:$16 sps:$4 sm:$0xff]   ;;  %3912 = vmatpush1.bf16.msra.mxu1 %v13362_v52  ;;  %v13377_v52 = vld [vmem:[#allocation4 + $0x3c0] ss:$16 sps:$4 sm:$0xff]  }
 0x161   :  { %v2592_v28 = vpop.f32.mrf.mxu1  ;;  %3269 = vmatmul.mubr.bf16.gmra.mxu1 %v11459_v8  ;;  %v16311_v35 = vadd.f32 %v2588_v25, %v2476_v15  ;;  %v2480_v37 = vadd.f32 %v2479_v16, %v16147_v17  ;;  %3165 = vmatprep.mubr.bf16.mxu0 %v11474_v19  ;;  %v16337_v8 = vld [vmem:[%s16931_s0 + $0x3b0] sm:$0xff]  ;;  %v16347_v19 = vld [vmem:[%s16931_s0 + $0x3b8] sm:$0xff] }
 0x162   :  { %3278 = vmatprep.mubr.bf16.mxu1 %v11476_v21  ;;  %v2481_v40 = vpop.f32.mrf.mxu0  ;;  %v16352_v21 = vld [vmem:[%s16931_s0 + $0x3f8] sm:$0xff]  ;;  %3871 = vmatpush1.bf16.msra.mxu0 %v13359_v51  ;;  %v11506_v44 = vcombine.high %v16337_v8, %v16342_v10 }
 0x163   :  { %v2594_v41 = vpop.f32.mrf.mxu1  ;;  %v16314_v45 = vadd.f32 %v2592_v28, %v2480_v37  ;;  %v2482_v47 = vadd.f32 %v2481_v40, %v16151_v20  ;;  %v13368_v15 = vld [vmem:[#allocation4 + $0x208] ss:$16 sps:$4 sm:$0xff]   ;;  %3872 = vmatprep.subr.bf16.mxu0 %v13367_v23  ;;  %3913 = vmatprep.subr.bf16.mxu1 %v13370_v24  ;;  %v11491_v40 = vcombine.low %v16304_v32, %v16309_v33  ;;  %v13382_v0 = vld [vmem:[#allocation4 + $0x3cc] ss:$16 sps:$4 sm:$0xff]  }
 0x164   :  { %v2483_v48 = vpop.f32.mrf.mxu0  ;;  %3914 = vmatpush1.bf16.msra.mxu1 %v13368_v15 }
 0x165   :  { %v2596_v49 = vpop.f32.mrf.mxu1  ;;  %v16321_v59 = vadd.f32 %v2594_v41, %v2482_v47  ;;  %v2484_v61 = vadd.f32 %v2483_v48, %v16147_v17  ;;  %v11508_v47 = vcombine.high %v16347_v19, %v16352_v21  ;;  %v13373_v48 = vld [vmem:[#allocation4 + $0x3e4] ss:$16 sps:$4 sm:$0xff]  }
 0x166   :  { %v16328_v4 = vpop.f32.mrf.mxu0  ;;  %3873 = vmatpush1.bf16.msra.mxu0 %v13365_v12 }
 0x167   :  { %16945 = vst [vmem:[#allocation15_spill] sm:$0xff] %v16328_v4  ;;  %v16330_v5 = vpop.f32.mrf.mxu1  ;;  %v16332_v53 = vadd.f32 %v2596_v49, %v2484_v61  ;;  %v13376_v49 = vld [vmem:[#allocation4 + $0x3ec] ss:$16 sps:$4 sm:$0xff]   ;;  %3874 = vmatprep.subr.bf16.mxu0 %v13373_v48 }
 0x168   :  { %16946 = vst [vmem:[#allocation16_spill] sm:$0xff] %v16330_v5  ;;  %v2489_v55 = vpop.f32.mrf.mxu0  ;;  %3166 = vmatmul.mubr.bf16.gmra.mxu0 %v11473_v57  ;;  %3915 = vmatprep.subr.bf16.mxu1 %v13376_v49 }
 0x169   :  { %v2602_v6 = vpop.f32.mrf.mxu1  ;;  %3279 = vmatmul.mubr.bf16.gmra.mxu1 %v11475_v58  ;;  %v2490_v22 = vadd.f32 %v2489_v55, %v16147_v17  ;;  %3175 = vmatprep.mubr.bf16.mxu0 %v11490_v62  ;;  %v13380_v55 = vld [vmem:[#allocation4 + $0x3c8] ss:$16 sps:$4 sm:$0xff]  }
 0x16a   :  { %3288 = vmatprep.mubr.bf16.mxu1 %v11492_v63  ;;  %v2491_v25 = vpop.f32.mrf.mxu0  ;;  %v13379_v63 = vld [vmem:[#allocation4 + $0x3c4] ss:$16 sps:$4 sm:$0xff]   ;;  %3875 = vmatpush2.bf16.msra.mxu0 %v13371_v29  ;;  %v13389_v29 = vld [vmem:[#allocation4 + $0x380] ss:$16 sps:$4 sm:$0xff]  }
 0x16b   :  { %v2604_v11 = vpop.f32.mrf.mxu1  ;;  %v16355_v16 = vadd.f32 %v2602_v6, %v2490_v22  ;;  %v2492_v28 = vadd.f32 %v2491_v25, %v16151_v20  ;;  %3916 = vmatpush2.bf16.msra.mxu1 %v13374_v31  ;;  %3876 = vmatprep.subr.bf16.mxu0 %v13379_v63  ;;  %v11505_v25 = vcombine.low %v16337_v8, %v16342_v10  ;;  %v13392_v31 = vld [vmem:[#allocation4 + $0x388] ss:$16 sps:$4 sm:$0xff]  }
 0x16c   :  { %v2493_v37 = vpop.f32.mrf.mxu0  ;;  %3917 = vmatprep.subr.bf16.mxu1 %v13382_v0 }
 0x16d   :  { %v2606_v38 = vpop.f32.mrf.mxu1  ;;  %v16362_v41 = vadd.f32 %v2604_v11, %v2492_v28  ;;  %v2494_v43 = vadd.f32 %v2493_v37, %v16147_v17  ;;  %v11507_v11 = vcombine.low %v16347_v19, %v16352_v21  ;;  %v13385_v28 = vld [vmem:[#allocation4 + $0x3a4] ss:$16 sps:$4 sm:$0xff]   ;;  %v13388_v37 = vld [vmem:[#allocation4 + $0x3ac] ss:$16 sps:$4 sm:$0xff]  }
 0x16e   :  { %v16369_v57 = vpop.f32.mrf.mxu0  ;;  %3877 = vmatpush2.bf16.msra.mxu0 %v13377_v52  ;;  %v13391_v21 = vld [vmem:[#allocation4 + $0x384] ss:$16 sps:$4 sm:$0xff]   ;;  %v13400_v52 = vld [vmem:[#allocation4 + $0x36c] ss:$16 sps:$4 sm:$0xff]  }
 0x16f   :  { %v16371_v58 = vpop.f32.mrf.mxu1  ;;  %v16373_v32 = vadd.f32 %v2606_v38, %v2494_v43  ;;  %3918 = vmatpush2.bf16.msra.mxu1 %v13380_v55  ;;  %v13386_v43 = vld [vmem:[#allocation4 + $0x3a8] ss:$16 sps:$4 sm:$0xff]   ;;  %3878 = vmatprep.subr.bf16.mxu0 %v13385_v28 }
 0x170   :  { %v2499_v33 = vpop.f32.mrf.mxu0  ;;  %3176 = vmatmul.mubr.bf16.gmra.mxu0 %v11489_v39  ;;  %3919 = vmatprep.subr.bf16.mxu1 %v13388_v37  ;;  %v13403_v37 = vld [vmem:[#allocation4 + $0x344] ss:$16 sps:$4 sm:$0xff]  }
 0x171   :  { %v2612_v61 = vpop.f32.mrf.mxu1  ;;  %3289 = vmatmul.mubr.bf16.gmra.mxu1 %v11491_v40  ;;  %v2500_v62 = vadd.f32 %v2499_v33, %v16147_v17  ;;  %3185 = vmatprep.mubr.bf16.mxu0 %v11506_v44  ;;  %v13383_v40 = vld [vmem:[#allocation4 + $0x3a0] ss:$16 sps:$4 sm:$0xff]  }
 0x172   :  { %3298 = vmatprep.mubr.bf16.mxu1 %v11508_v47  ;;  %v2501_v2 = vpop.f32.mrf.mxu0  ;;  %v13394_v47 = vld [vmem:[#allocation4 + $0x38c] ss:$16 sps:$4 sm:$0xff]   ;;  %3879 = vmatpush2.bf16.msra.mxu0 %v13383_v40 }
 0x173   :  { %v2614_v51 = vpop.f32.mrf.mxu1  ;;  %v16376_v6 = vadd.f32 %v2612_v61, %v2500_v62  ;;  %v2502_v22 = vadd.f32 %v2501_v2, %v16151_v20  ;;  %3920 = vmatpush2.bf16.msra.mxu1 %v13386_v43  ;;  %3880 = vmatprep.subr.bf16.mxu0 %v13391_v21 }
 0x174   :  { %v2503_v23 = vpop.f32.mrf.mxu0  ;;  %3921 = vmatprep.subr.bf16.mxu1 %v13394_v47 }
 0x175   :  { %v2616_v24 = vpop.f32.mrf.mxu1  ;;  %v16383_v12 = vadd.f32 %v2614_v51, %v2502_v22  ;;  %v2504_v15 = vadd.f32 %v2503_v23, %v16147_v17  ;;  %v13397_v51 = vld [vmem:[#allocation4 + $0x364] ss:$16 sps:$4 sm:$0xff]   ;;  %v13395_v23 = vld [vmem:[#allocation4 + $0x360] ss:$16 sps:$4 sm:$0xff]  }
 0x176   :  { %v16386_v38 = vpop.f32.mrf.mxu0  ;;  %3881 = vmatpush2.bf16.msra.mxu0 %v13389_v29  ;;  %v13409_v29 = vld [vmem:[#allocation4 + $0x324] ss:$16 sps:$4 sm:$0xff]  }
 0x177   :  { %v16388_v39 = vpop.f32.mrf.mxu1  ;;  %v16390_v44 = vadd.f32 %v2616_v24, %v2504_v15  ;;  %3922 = vmatpush2.bf16.msra.mxu1 %v13392_v31  ;;  %v13398_v24 = vld [vmem:[#allocation4 + $0x368] ss:$16 sps:$4 sm:$0xff]   ;;  %3882 = vmatprep.subr.bf16.mxu0 %v13397_v51  ;;  %v13412_v31 = vld [vmem:[#allocation4 + $0x32c] ss:$16 sps:$4 sm:$0xff]  }
 0x178   :  { %v2509_v8 = vpop.f32.mrf.mxu0  ;;  %3186 = vmatmul.mubr.bf16.gmra.mxu0 %v11505_v25  ;;  %3923 = vmatprep.subr.bf16.mxu1 %v13400_v52 }
 0x179   :  { %v2622_v10 = vpop.f32.mrf.mxu1  ;;  %3299 = vmatmul.mubr.bf16.gmra.mxu1 %v11507_v11  ;;  %v2510_v19 = vadd.f32 %v2509_v8, %v16147_v17  ;;  %v13401_v8 = vld [vmem:[#allocation4 + $0x340] ss:$16 sps:$4 sm:$0xff]  }
 0x17a   :  { %v2511_v48 = vpop.f32.mrf.mxu0  ;;  %3883 = vmatpush2.bf16.msra.mxu0 %v13395_v23 }
 0x17b   :  { %v2624_v49 = vpop.f32.mrf.mxu1  ;;  %v16393_v33 = vadd.f32 %v2622_v10, %v2510_v19  ;;  %v2512_v61 = vadd.f32 %v2511_v48, %v16151_v20  ;;  %3924 = vmatpush2.bf16.msra.mxu1 %v13398_v24  ;;  %v13404_v10 = vld [vmem:[#allocation4 + $0x348] ss:$16 sps:$4 sm:$0xff]   ;;  %3884 = vmatprep.subr.bf16.mxu0 %v13403_v37  ;;  %v13415_v24 = vld [vmem:[#allocation4 + $0x304] ss:$16 sps:$4 sm:$0xff]  }
 0x17c   :  { %v2513_v62 = vpop.f32.mrf.mxu0  ;;  %v13416_v37 = vld [vmem:[#allocation4 + $0x308] ss:$16 sps:$4 sm:$0xff]  }
 0x17d   :  { %v2626_v63 = vpop.f32.mrf.mxu1  ;;  %v16396_v0 = vadd.f32 %v2624_v49, %v2512_v61  ;;  %v2514_v2 = vadd.f32 %v2513_v62, %v16147_v17  ;;  %v13406_v17 = vld [vmem:[#allocation4 + $0x34c] ss:$16 sps:$4 sm:$0xff]  }
 0x17e   :  { %v16399_v55 = vpop.f32.mrf.mxu0  ;;  %3925 = vmatprep.subr.bf16.mxu1 %v13406_v17  ;;  %3885 = vmatpush2.bf16.msra.mxu0 %v13401_v8 }
 0x17f   :  { %v16401_v22 = vpop.f32.mrf.mxu1  ;;  %v16403_v25 = vadd.f32 %v2626_v63, %v2514_v2  ;;  %3926 = vmatpush2.bf16.msra.mxu1 %v13404_v10  ;;  %v13407_v63 = vld [vmem:[#allocation4 + $0x320] ss:$16 sps:$4 sm:$0xff]   ;;  %v13410_v2 = vld [vmem:[#allocation4 + $0x328] ss:$16 sps:$4 sm:$0xff]   ;;  %3886 = vmatprep.subr.bf16.mxu0 %v13409_v29 }
 0x180   :  { %v2665_v11 = vpop.f32.mrf.mxu0  ;;  %3927 = vmatprep.subr.bf16.mxu1 %v13412_v31 }
 0x181   :  { %v2778_v15 = vpop.f32.mrf.mxu1  ;;  %v2666_v28 = vadd.f32 %v2665_v11, %v16166_v30 }
 0x182   :  { %v2667_v40 = vpop.f32.mrf.mxu0  ;;  %3887 = vmatpush2.bf16.msra.mxu0 %v13407_v63 }
 0x183   :  { %v2780_v43 = vpop.f32.mrf.mxu1  ;;  %v16406_v19 = vadd.f32 %v2778_v15, %v2666_v28  ;;  %v2668_v21 = vadd.f32 %v2667_v40, %v16169_v36  ;;  %3928 = vmatpush2.bf16.msra.mxu1 %v13410_v2  ;;  %v13413_v28 = vld [vmem:[#allocation4 + $0x300] ss:$16 sps:$4 sm:$0xff]   ;;  %3888 = vmatprep.subr.bf16.mxu0 %v13415_v24 }
 0x184   :  { %v2669_v47 = vpop.f32.mrf.mxu0 }
 0x185   :  { %v2782_v48 = vpop.f32.mrf.mxu1  ;;  %v16409_v49 = vadd.f32 %v2780_v43, %v2668_v21  ;;  %v2670_v30 = vadd.f32 %v2669_v47, %v16172_v42  ;;  %v13418_v42 = vld [vmem:[#allocation4 + $0x30c] ss:$16 sps:$4 sm:$0xff]   ;;  %v13421_v21 = vld [vmem:[#allocation4 + $0xe4] ss:$16 sps:$4 sm:$0xff]  }
 0x186   :  { %v16412_v61 = vpop.f32.mrf.mxu0  ;;  %3929 = vmatprep.subr.bf16.mxu1 %v13418_v42  ;;  %v13424_v47 = vld [vmem:[#allocation4 + $0xec] ss:$16 sps:$4 sm:$0xff]   ;;  %3889 = vmatpush2.bf16.msra.mxu0 %v13413_v28 }
 0x187   :  { %v16414_v62 = vpop.f32.mrf.mxu1  ;;  %v16416_v51 = vadd.f32 %v2782_v48, %v2670_v30  ;;  %3930 = vmatpush2.bf16.msra.mxu1 %v13416_v37  ;;  %4264 = vmatprep.subr.bf16.mxu0 %v13421_v21 }
 0x188   :  { %v2675_v36 = vpop.f32.mrf.mxu0  ;;  %4305 = vmatprep.subr.bf16.mxu1 %v13424_v47 }
 0x189   :  { %v2788_v52 = vpop.f32.mrf.mxu1  ;;  %v2676_v23 = vadd.f32 %v2675_v36, %v16198_v54 }
 0x18a   :  { %v2677_v11 = vpop.f32.mrf.mxu0 }
 0x18b   :  { %v2790_v15 = vpop.f32.mrf.mxu1  ;;  %v16419_v17 = vadd.f32 %v2788_v52, %v2676_v23  ;;  %v2678_v40 = vadd.f32 %v2677_v11, %v16201_v60 }
 0x18c   :  { %v2679_v43 = vpop.f32.mrf.mxu0 }
 0x18d   :  { %v2792_v8 = vpop.f32.mrf.mxu1  ;;  %v16422_v10 = vadd.f32 %v2790_v15, %v2678_v40  ;;  %v2680_v54 = vadd.f32 %v2679_v43, %v16208_v7 }
 0x18e   :  { %v16425_v48 = vpop.f32.mrf.mxu0 }
 0x18f   :  { %16947 = vst [vmem:[#allocation17_spill] sm:$0xff] %v16425_v48  ;;  %v16427_v30 = vpop.f32.mrf.mxu1  ;;  %v16429_v29 = vadd.f32 %v2792_v8, %v2680_v54 }
 0x190   :  { %16948 = vst [vmem:[#allocation18_spill] sm:$0xff] %v16427_v30  ;;  %v2685_v60 = vpop.f32.mrf.mxu0 }
 0x191   :  { %v2798_v31 = vpop.f32.mrf.mxu1  ;;  %v2686_v63 = vadd.f32 %v2685_v60, %v16234_v27 }
 0x192   :  { %v2687_v2 = vpop.f32.mrf.mxu0 }
 0x193   :  { %v2800_v36 = vpop.f32.mrf.mxu1  ;;  %v16432_v52 = vadd.f32 %v2798_v31, %v2686_v63  ;;  %v2688_v7 = vadd.f32 %v2687_v2, %v16241_v34 }
 0x194   :  { %v2689_v23 = vpop.f32.mrf.mxu0 }
 0x195   :  { %v2802_v24 = vpop.f32.mrf.mxu1  ;;  %v16435_v42 = vadd.f32 %v2800_v36, %v2688_v7  ;;  %v2690_v11 = vadd.f32 %v2689_v23, %v16248_v46 }
 0x196   :  { %v16438_v15 = vpop.f32.mrf.mxu0 }
 0x197   :  { %v16440_v28 = vpop.f32.mrf.mxu1  ;;  %v16442_v37 = vadd.f32 %v2802_v24, %v2690_v11 }
 0x198   :  { %v2695_v40 = vpop.f32.mrf.mxu0 }
 0x199   :  { %v2808_v27 = vpop.f32.mrf.mxu1  ;;  %v2696_v43 = vadd.f32 %v2695_v40, %v16274_v1 }
 0x19a   :  { %v2697_v8 = vpop.f32.mrf.mxu0 }
 0x19b   :  { %v2810_v54 = vpop.f32.mrf.mxu1  ;;  %v16445_v21 = vadd.f32 %v2808_v27, %v2696_v43  ;;  %v2698_v34 = vadd.f32 %v2697_v8, %v16281_v9 }
 0x19c   :  { %v2699_v47 = vpop.f32.mrf.mxu0 }
 0x19d   :  { %v2812_v60 = vpop.f32.mrf.mxu1  ;;  %v16448_v31 = vadd.f32 %v2810_v54, %v2698_v34  ;;  %v2700_v46 = vadd.f32 %v2699_v47, %v16288_v26 }
 0x19e   :  { %v16451_v63 = vpop.f32.mrf.mxu0 }
 0x19f   :  { %16949 = vst [vmem:[#allocation19_spill] sm:$0xff] %v16451_v63  ;;  %v16453_v2 = vpop.f32.mrf.mxu1  ;;  %v16455_v36 = vadd.f32 %v2812_v60, %v2700_v46 }
 0x1a0   :  { %16950 = vst [vmem:[#allocation20_spill] sm:$0xff] %v16453_v2  ;;  %v2705_v7 = vpop.f32.mrf.mxu0 }
 0x1a1   :  { %v2818_v1 = vpop.f32.mrf.mxu1  ;;  %v2706_v23 = vadd.f32 %v2705_v7, %v16314_v45 }
 0x1a2   :  { %v2707_v24 = vpop.f32.mrf.mxu0 }
 0x1a3   :  { %v2820_v11 = vpop.f32.mrf.mxu1  ;;  %v16458_v40 = vadd.f32 %v2818_v1, %v2706_v23  ;;  %v2708_v9 = vadd.f32 %v2707_v24, %v16321_v59 }
 0x1a4   :  { %v2709_v27 = vpop.f32.mrf.mxu0 }
 0x1a5   :  { %v2822_v43 = vpop.f32.mrf.mxu1  ;;  %v16461_v8 = vadd.f32 %v2820_v11, %v2708_v9  ;;  %v2710_v26 = vadd.f32 %v2709_v27, %v16332_v53 }
 0x1a6   :  { %v16464_v54 = vpop.f32.mrf.mxu0 }
 0x1a7   :  { %16951 = vst [vmem:[#allocation21_spill] sm:$0xff] %v16464_v54  ;;  %v16466_v34 = vpop.f32.mrf.mxu1  ;;  %v16468_v47 = vadd.f32 %v2822_v43, %v2710_v26 }
 0x1a8   :  { %16952 = vst [vmem:[#allocation22_spill] sm:$0xff] %v16466_v34  ;;  %v2715_v60 = vpop.f32.mrf.mxu0 }
 0x1a9   :  { %v2828_v45 = vpop.f32.mrf.mxu1  ;;  %v2716_v46 = vadd.f32 %v2715_v60, %v16355_v16 }
 0x1aa   :  { %v2717_v7 = vpop.f32.mrf.mxu0 }
 0x1ab   :  { %v2830_v1 = vpop.f32.mrf.mxu1  ;;  %v16471_v23 = vadd.f32 %v2828_v45, %v2716_v46  ;;  %v2718_v59 = vadd.f32 %v2717_v7, %v16362_v41 }
 0x1ac   :  { %v2719_v24 = vpop.f32.mrf.mxu0 }
 0x1ad   :  { %v2832_v11 = vpop.f32.mrf.mxu1  ;;  %v16474_v9 = vadd.f32 %v2830_v1, %v2718_v59  ;;  %v2720_v53 = vadd.f32 %v2719_v24, %v16373_v32 }
 0x1ae   :  { %v16477_v27 = vpop.f32.mrf.mxu0 }
 0x1af   :  { %v16479_v43 = vpop.f32.mrf.mxu1  ;;  %v16481_v26 = vadd.f32 %v2832_v11, %v2720_v53 }
 0x1b0   :  { %v2725_v14 = vpop.f32.mrf.mxu0 }
 0x1b1   :  { %v2838_v16 = vpop.f32.mrf.mxu1  ;;  %v2726_v60 = vadd.f32 %v2725_v14, %v16376_v6 }
 0x1b2   :  { %v2727_v45 = vpop.f32.mrf.mxu0 }
 0x1b3   :  { %v2840_v46 = vpop.f32.mrf.mxu1  ;;  %v16484_v13 = vadd.f32 %v2838_v16, %v2726_v60  ;;  %v2728_v41 = vadd.f32 %v2727_v45, %v16383_v12 }
 0x1b4   :  { %v2729_v7 = vpop.f32.mrf.mxu0 }
 0x1b5   :  { %v2842_v1 = vpop.f32.mrf.mxu1  ;;  %v16487_v59 = vadd.f32 %v2840_v46, %v2728_v41  ;;  %v2730_v32 = vadd.f32 %v2729_v7, %v16390_v44 }
 0x1b6   :  { %v16490_v24 = vpop.f32.mrf.mxu0 }
 0x1b7   :  { %v16492_v11 = vpop.f32.mrf.mxu1  ;;  %v16494_v53 = vadd.f32 %v2842_v1, %v2730_v32 }
 0x1b8   :  { %v2735_v3 = vpop.f32.mrf.mxu0 }
 0x1b9   :  { %v2848_v14 = vpop.f32.mrf.mxu1  ;;  %v2736_v6 = vadd.f32 %v2735_v3, %v16393_v33 }
 0x1ba   :  { %v2737_v16 = vpop.f32.mrf.mxu0 }
 0x1bb   :  { %v2850_v60 = vpop.f32.mrf.mxu1  ;;  %v16497_v30 = vadd.f32 %v2848_v14, %v2736_v6  ;;  %v2738_v12 = vadd.f32 %v2737_v16, %v16396_v0 }
 0x1bc   :  { %v2739_v45 = vpop.f32.mrf.mxu0 }
 0x1bd   :  { %v2852_v46 = vpop.f32.mrf.mxu1  ;;  %v16500_v41 = vadd.f32 %v2850_v60, %v2738_v12  ;;  %v2740_v44 = vadd.f32 %v2739_v45, %v16403_v25 }
 0x1be   :  { %v16503_v7 = vpop.f32.mrf.mxu0 }
 0x1bf   :  { %v16505_v1 = vpop.f32.mrf.mxu1  ;;  %v16507_v32 = vadd.f32 %v2852_v46, %v2740_v44 }
 0x1c0   :  { %v2891_v48 = vpop.f32.mrf.mxu0 }
 0x1c1   :  { %v3004_v3 = vpop.f32.mrf.mxu1  ;;  %v2892_v33 = vadd.f32 %v2891_v48, %v16406_v19 }
 0x1c2   :  { %v2893_v14 = vpop.f32.mrf.mxu0 }
 0x1c3   :  { %v3006_v6 = vpop.f32.mrf.mxu1  ;;  %v16510_v18 = vadd.f32 %v3004_v3, %v2892_v33  ;;  %v2894_v0 = vadd.f32 %v2893_v14, %v16409_v49 }
 0x1c4   :  { %v16513_v16 = vpop.f32.mrf.mxu0 }
 0x1c5   :  { %v16515_v60 = vpop.f32.mrf.mxu1  ;;  %v16517_v25 = vadd.f32 %v3006_v6, %v2894_v0 }
 0x1c6   :  { %v16519_v12 = vpop.f32.mrf.mxu0 }
 0x1c7   :  { %v16521_v45 = vpop.f32.mrf.mxu1 }
 0x1c8   :  { %v2901_v46 = vpop.f32.mrf.mxu0 }
 0x1c9   :  { %v3014_v44 = vpop.f32.mrf.mxu1  ;;  %v2902_v19 = vadd.f32 %v2901_v46, %v16419_v17 }
 0x1ca   :  { %v2903_v48 = vpop.f32.mrf.mxu0 }
 0x1cb   :  { %v3016_v34 = vpop.f32.mrf.mxu1  ;;  %v16524_v3 = vadd.f32 %v3014_v44, %v2902_v19  ;;  %v2904_v49 = vadd.f32 %v2903_v48, %v16422_v10 }
 0x1cc   :  { %v2905_v33 = vpop.f32.mrf.mxu0 }
 0x1cd   :  { %v3018_v14 = vpop.f32.mrf.mxu1  ;;  %v16527_v54 = vadd.f32 %v3016_v34, %v2904_v49  ;;  %v2906_v6 = vadd.f32 %v2905_v33, %v16429_v29 }
 0x1ce   :  { %v16530_v0 = vpop.f32.mrf.mxu0 }
 0x1cf   :  { %16953 = vst [vmem:[#allocation23_spill] sm:$0xff] %v16527_v54  ;;  %16954 = vst [vmem:[#allocation24_spill] sm:$0xff] %v16530_v0  ;;  %v16532_v5 = vpop.f32.mrf.mxu1  ;;  %v16534_v2 = vadd.f32 %v3018_v14, %v2906_v6 }
 0x1d0   :  { %16955 = vst [vmem:[#allocation25_spill] sm:$0xff] %v16532_v5  ;;  %v2911_v4 = vpop.f32.mrf.mxu0 }
 0x1d1   :  { %v3024_v17 = vpop.f32.mrf.mxu1  ;;  %v2912_v46 = vadd.f32 %v2911_v4, %v16432_v52 }
 0x1d2   :  { %v2913_v44 = vpop.f32.mrf.mxu0 }
 0x1d3   :  { %v3026_v19 = vpop.f32.mrf.mxu1  ;;  %v16537_v63 = vadd.f32 %v3024_v17, %v2912_v46  ;;  %v2914_v10 = vadd.f32 %v2913_v44, %v16435_v42 }
 0x1d4   :  { %v2915_v34 = vpop.f32.mrf.mxu0 }
 0x1d5   :  { %v3028_v48 = vpop.f32.mrf.mxu1  ;;  %v16540_v49 = vadd.f32 %v3026_v19, %v2914_v10  ;;  %v2916_v29 = vadd.f32 %v2915_v34, %v16442_v37 }
 0x1d6   :  { %v16543_v33 = vpop.f32.mrf.mxu0 }
 0x1d7   :  { %16956 = vst [vmem:[#allocation26_spill] sm:$0xff] %v16540_v49  ;;  %v16545_v14 = vpop.f32.mrf.mxu1  ;;  %v16547_v6 = vadd.f32 %v3028_v48, %v2916_v29 }
 0x1d8   :  { %v2921_v5 = vpop.f32.mrf.mxu0 }
 0x1d9   :  { %v3034_v4 = vpop.f32.mrf.mxu1  ;;  %v2922_v52 = vadd.f32 %v2921_v5, %v16445_v21 }
 0x1da   :  { %v2923_v17 = vpop.f32.mrf.mxu0 }
 0x1db   :  { %v3036_v46 = vpop.f32.mrf.mxu1  ;;  %v16550_v0 = vadd.f32 %v3034_v4, %v2922_v52  ;;  %v2924_v42 = vadd.f32 %v2923_v17, %v16448_v31  ;;  %v2496_v31 = vadd.f32 %v16369_v57, %v16151_v20 }
 0x1dc   :  { %v2925_v44 = vpop.f32.mrf.mxu0 }
 0x1dd   :  { %v3038_v19 = vpop.f32.mrf.mxu1  ;;  %v16553_v10 = vadd.f32 %v3036_v46, %v2924_v42  ;;  %v2926_v37 = vadd.f32 %v2925_v44, %v16455_v36 }
 0x1de   :  { %v16556_v34 = vpop.f32.mrf.mxu0 }
 0x1df   :  { %v16558_v48 = vpop.f32.mrf.mxu1  ;;  %v16560_v29 = vadd.f32 %v3038_v19, %v2926_v37 }
 0x1e0   :  { %v2931_v49 = vpop.f32.mrf.mxu0 }
 0x1e1   :  { %16957 = vst [vmem:[#allocation27_spill] sm:$0xff] %v16560_v29  ;;  %v3044_v5 = vpop.f32.mrf.mxu1  ;;  %v2932_v21 = vadd.f32 %v2931_v49, %v16458_v40  ;;  %v2609_v40 = vadd.f32 %v16371_v58, %v2496_v31 }
 0x1e2   :  { %v2933_v4 = vpop.f32.mrf.mxu0 }
 0x1e3   :  { %v3046_v52 = vpop.f32.mrf.mxu1  ;;  %v16565_v17 = vadd.f32 %v3044_v5, %v2932_v21  ;;  %v2934_v46 = vadd.f32 %v2933_v4, %v16461_v8  ;;  %v2722_v5 = vadd.f32 %v16477_v27, %v2609_v40 }
 0x1e4   :  { %v2935_v36 = vpop.f32.mrf.mxu0 }
 0x1e5   :  { %v3048_v42 = vpop.f32.mrf.mxu1  ;;  %v16568_v44 = vadd.f32 %v3046_v52, %v2934_v46  ;;  %v2936_v19 = vadd.f32 %v2935_v36, %v16468_v47  ;;  %v2506_v52 = vadd.f32 %v16386_v38, %v16151_v20  ;;  %v2835_v58 = vadd.f32 %v16479_v43, %v2722_v5 }
 0x1e6   :  { %v16571_v37 = vpop.f32.mrf.mxu0 }
 0x1e7   :  { %v16573_v54 = vpop.f32.mrf.mxu1  ;;  %v16576_v49 = vadd.f32 %v3048_v42, %v2936_v19 }
 0x1e8   :  { %16958 = vst [vmem:[#allocation28_spill] sm:$0xff] %v16573_v54  ;;  %v2941_v29 = vpop.f32.mrf.mxu0 }
 0x1e9   :  { %v3054_v57 = vpop.f32.mrf.mxu1  ;;  %v2942_v8 = vadd.f32 %v2941_v29, %v16471_v23  ;;  %v2619_v23 = vadd.f32 %v16388_v39, %v2506_v52 }
 0x1ea   :  { %v2943_v21 = vpop.f32.mrf.mxu0 }
 0x1eb   :  { %v3056_v4 = vpop.f32.mrf.mxu1  ;;  %v16582_v47 = vadd.f32 %v3054_v57, %v2942_v8  ;;  %v2944_v46 = vadd.f32 %v2943_v21, %v16474_v9  ;;  %v2732_v8 = vadd.f32 %v16490_v24, %v2619_v23 }
 0x1ec   :  { %v2945_v36 = vpop.f32.mrf.mxu0 }
 0x1ed   :  { %v3058_v54 = vpop.f32.mrf.mxu1  ;;  %v16586_v31 = vadd.f32 %v3056_v4, %v2944_v46  ;;  %v2946_v42 = vadd.f32 %v2945_v36, %v16481_v26  ;;  %v2516_v26 = vadd.f32 %v16399_v55, %v16151_v20  ;;  %v2845_v46 = vadd.f32 %v16492_v11, %v2732_v8 }
 0x1ee   :  { %v2947_v27 = vpop.f32.mrf.mxu0 }
 0x1ef   :  { %v3060_v19 = vpop.f32.mrf.mxu1  ;;  %v16590_v29 = vadd.f32 %v3058_v54, %v2946_v42  ;;  %v2948_v40 = vadd.f32 %v2947_v27, %v2835_v58 }
 0x1f0   :  { %v2951_v38 = vpop.f32.mrf.mxu0 }
 0x1f1   :  { %v3064_v57 = vpop.f32.mrf.mxu1  ;;  %v16593_v9 = vadd.f32 %v3060_v19, %v2948_v40  ;;  %v2952_v21 = vadd.f32 %v2951_v38, %v16484_v13  ;;  %v2629_v13 = vadd.f32 %v16401_v22, %v2516_v26 }
 0x1f2   :  { %v2953_v43 = vpop.f32.mrf.mxu0 }
 0x1f3   :  { %v3066_v5 = vpop.f32.mrf.mxu1  ;;  %v16598_v4 = vadd.f32 %v3064_v57, %v2952_v21  ;;  %v2954_v39 = vadd.f32 %v2953_v43, %v16487_v59  ;;  %v2742_v40 = vadd.f32 %v16503_v7, %v2629_v13 }
 0x1f4   :  { %v2955_v54 = vpop.f32.mrf.mxu0 }
 0x1f5   :  { %v3068_v52 = vpop.f32.mrf.mxu1  ;;  %v16602_v36 = vadd.f32 %v3066_v5, %v2954_v39  ;;  %v2956_v24 = vadd.f32 %v2955_v54, %v16494_v53  ;;  %v2672_v53 = vadd.f32 %v16412_v61, %v16195_v50  ;;  %v2855_v5 = vadd.f32 %v16505_v1, %v2742_v40 }
 0x1f6   :  { %v2957_v58 = vpop.f32.mrf.mxu0 }
 0x1f7   :  { %v3070_v42 = vpop.f32.mrf.mxu1  ;;  %v16606_v27 = vadd.f32 %v3068_v52, %v2956_v24  ;;  %v2958_v19 = vadd.f32 %v2957_v58, %v2845_v46  ;;  %v2896_v52 = vadd.f32 %v16513_v16, %v16416_v51 }
 0x1f8   :  { %v2961_v55 = vpop.f32.mrf.mxu0 }
 0x1f9   :  { %v3074_v23 = vpop.f32.mrf.mxu1  ;;  %v16609_v59 = vadd.f32 %v3070_v42, %v2958_v19  ;;  %v2962_v38 = vadd.f32 %v2961_v55, %v16497_v30  ;;  %v2785_v30 = vadd.f32 %v16414_v62, %v2672_v53  ;;  %v3009_v13 = vadd.f32 %v16515_v60, %v2896_v52 }
 0x1fa   :  { %v2963_v11 = vpop.f32.mrf.mxu0 }
 0x1fb   :  { %v3076_v57 = vpop.f32.mrf.mxu1  ;;  %v16614_v8 = vadd.f32 %v3074_v23, %v2962_v38  ;;  %v2964_v22 = vadd.f32 %v2963_v11, %v16500_v41  ;;  %v2898_v24 = vadd.f32 %v16519_v12, %v2785_v30 }
 0x1fc   :  { %v2965_v21 = vpop.f32.mrf.mxu0 }
 0x1fd   :  { %v3078_v43 = vpop.f32.mrf.mxu1  ;;  %v16618_v26 = vadd.f32 %v3076_v57, %v2964_v22  ;;  %v2966_v7 = vadd.f32 %v2965_v21, %v16507_v32  ;;  %v3011_v55 = vadd.f32 %v16521_v45, %v2898_v24  ;;  %v13430_v24 = vld [vmem:[#allocation4 + $0xcc] ss:$16 sps:$4 sm:$0xff]  }
 0x1fe   :  { %v2967_v39 = vpop.f32.mrf.mxu0 }
 0x1ff   :  { %v3080_v54 = vpop.f32.mrf.mxu1  ;;  %v16624_v50 = vadd.f32 %v3078_v43, %v2966_v7  ;;  %v2968_v61 = vadd.f32 %v2967_v39, %v2855_v5  ;;  %v13419_v39 = vld [vmem:[#allocation4 + $0xe0] ss:$16 sps:$4 sm:$0xff]  }
 0x200   :  { %v3117_v46 = vpop.f32.mrf.mxu0 }
 0x201   :  { %v3230_v41 = vpop.f32.mrf.mxu1  ;;  %v16627_v58 = vadd.f32 %v3080_v54, %v2968_v61  ;;  %v3118_v1 = vadd.f32 %v3117_v46, %v16510_v18  ;;  %v13422_v54 = vld [vmem:[#allocation4 + $0xe8] ss:$16 sps:$4 sm:$0xff]  }
 0x202   :  { %v3119_v42 = vpop.f32.mrf.mxu0 }
 0x203   :  { %v3232_v32 = vpop.f32.mrf.mxu1  ;;  %v16631_v19 = vadd.f32 %v3230_v41, %v3118_v1  ;;  %v3120_v62 = vadd.f32 %v3119_v42, %v16517_v25  ;;  %v2692_v25 = vadd.f32 %v16438_v15, %v16271_v56 }
 0x204   :  { %v3121_v51 = vpop.f32.mrf.mxu0 }
 0x205   :  { %v3234_v16 = vpop.f32.mrf.mxu1  ;;  %v3122_v23 = vadd.f32 %v3121_v51, %v3009_v13  ;;  %v3233_v57 = vadd.f32 %v3232_v32, %v3120_v62  ;;  %v2805_v56 = vadd.f32 %v16440_v28, %v2692_v25  ;;  %v13425_v13 = vld [vmem:[#allocation4 + $0xc0] ss:$16 sps:$4 sm:$0xff]   ;;  %v13428_v62 = vld [vmem:[#allocation4 + $0xc8] ss:$16 sps:$4 sm:$0xff]  }
 0x206   :  { %v3123_v40 = vpop.f32.mrf.mxu0 }
 0x207   :  { %v3236_v38 = vpop.f32.mrf.mxu1  ;;  %v3235_v12 = vadd.f32 %v3234_v16, %v3122_v23  ;;  %v3124_v11 = vadd.f32 %v3123_v40, %v3011_v55  ;;  %v3310_v30 = vmax.f32 %v3233_v57, 0.0  ;;  %v13433_v55 = vld [vmem:[#allocation4 + $0xa4] ss:$16 sps:$4 sm:$0xff]   ;;  %v13436_v23 = vld [vmem:[#allocation4 + $0xac] ss:$16 sps:$4 sm:$0xff]   ;;  %v2918_v40 = vadd.f32 %v16543_v33, %v2805_v56 }
 0x208   :  { %v3127_v53 = vpop.f32.mrf.mxu0 }
 0x209   :  { %v3240_v18 = vpop.f32.mrf.mxu1  ;;  %v3237_v22 = vadd.f32 %v3236_v38, %v3124_v11  ;;  %v3128_v21 = vadd.f32 %v3127_v53, %v16524_v3  ;;  %v3311_v60 = vmax.f32 %v3235_v12, 0.0  ;;  %v13427_v3 = vld [vmem:[#allocation4 + $0xc4] ss:$16 sps:$4 sm:$0xff]   ;;  %v12857_v51 = vpack.c.bf16 %v3310_v30, %v3310_v30  ;;  %v13442_v30 = vld [vmem:[#allocation4 + $0x8c] ss:$16 sps:$4 sm:$0xff]  }
 0x20a   :  { %v16636_v43 = vpop.f32.mrf.mxu0  ;;  %v16959_v11 = vld [vmem:[#allocation19_spill] sm:$0xff]  ;;  %v3031_v25 = vadd.f32 %v16545_v14, %v2918_v40 }
 0x20b   :  { %v16638_v5 = vpop.f32.mrf.mxu1  ;;  %v3312_v45 = vmax.f32 %v3237_v22, 0.0  ;;  %v16642_v7 = vadd.f32 %v3240_v18, %v3128_v21  ;;  %v12854_v1 = vpack.c.bf16 %v3311_v60, %v3311_v60  ;;  %v2702_v57 = vadd.f32 %v16959_v11, %v16311_v35  ;;  %v16960_v18 = vld [vmem:[#allocation15_spill] sm:$0xff]  ;;  %v13431_v21 = vld [vmem:[#allocation4 + $0xa0] ss:$16 sps:$4 sm:$0xff]  }
 0x20c   :  { %v3131_v52 = vpop.f32.mrf.mxu0  ;;  %v2486_v33 = vadd.f32 %v16960_v18, %v16151_v20  ;;  %v13434_v60 = vld [vmem:[#allocation4 + $0xa8] ss:$16 sps:$4 sm:$0xff]  }
 0x20d   :  { %v3244_v61 = vpop.f32.mrf.mxu1  ;;  %v12855_v46 = vpack.c.bf16 %v3312_v45, %v3312_v45  ;;  %v3132_v41 = vadd.f32 %v3131_v52, %v16534_v2  ;;  %v16961_v52 = vld [vmem:[#allocation20_spill] sm:$0xff] }
 0x20e   :  { %v16645_v42 = vpop.f32.mrf.mxu0 }
 0x20f   :  { %v16647_v32 = vpop.f32.mrf.mxu1  ;;  %v16650_v15 = vadd.f32 %v3244_v61, %v3132_v41  ;;  %3890 = vmatprep.mubr.bf16.mxu0 %v12855_v46  ;;  %3931 = vmatprep.mubr.bf16.mxu1 %v12855_v46  ;;  %v2815_v61 = vadd.f32 %v16961_v52, %v2702_v57  ;;  %v13437_v41 = vld [vmem:[#allocation4 + $0x80] ss:$16 sps:$4 sm:$0xff]  }
 0x210   :  { %v3137_v16 = vpop.f32.mrf.mxu0  ;;  %3891 = vmatmul.mubr.bf16.vlgmr.msra.gmra.mxu0 %v12854_v1  ;;  %3932 = vmatmul.mubr.bf16.vlgmr.msra.gmra.mxu1 %v12854_v1  ;;  %v13443_v57 = vld [vmem:[#allocation4 + $0x60] ss:$16 sps:$4 sm:$0xff]  }
 0x211   :  { %v3250_v2 = vpop.f32.mrf.mxu1  ;;  %v3138_v38 = vadd.f32 %v3137_v16, %v16537_v63  ;;  %4265 = vmatpush1.bf16.msra.mxu0 %v13419_v39  ;;  %4306 = vmatpush1.bf16.msra.mxu1 %v13422_v54  ;;  %v13439_v54 = vld [vmem:[#allocation4 + $0x84] ss:$16 sps:$4 sm:$0xff]   ;;  %v13449_v52 = vld [vmem:[#allocation4 + $0x40] ss:$16 sps:$4 sm:$0xff]  }
 0x212   :  { %4296 = vmatprep.mubr.bf16.mxu0 %v12857_v51  ;;  %4337 = vmatprep.mubr.bf16.mxu1 %v12857_v51  ;;  %v16654_v28 = vpop.f32.mrf.mxu0 }
 0x213   :  { %v16656_v12 = vpop.f32.mrf.mxu1  ;;  %v16660_v53 = vadd.f32 %v3250_v2, %v3138_v38  ;;  %4266 = vmatprep.subr.bf16.mxu0 %v13427_v3  ;;  %4307 = vmatprep.subr.bf16.mxu1 %v13430_v24  ;;  %v13440_v3 = vld [vmem:[#allocation4 + $0x88] ss:$16 sps:$4 sm:$0xff]   ;;  %v16962_v24 = vld [vmem:[#allocation16_spill] sm:$0xff] }
 0x214   :  { %v3141_v22 = vpop.f32.mrf.mxu0  ;;  %v2599_v1 = vadd.f32 %v16962_v24, %v2486_v33  ;;  %v13445_v2 = vld [vmem:[#allocation4 + $0x64] ss:$16 sps:$4 sm:$0xff]  }
 0x215   :  { %v3254_v63 = vpop.f32.mrf.mxu1  ;;  %v3142_v45 = vadd.f32 %v3141_v22, %v16547_v6  ;;  %4267 = vmatpush1.bf16.msra.mxu0 %v13425_v13  ;;  %4308 = vmatpush1.bf16.msra.mxu1 %v13428_v62  ;;  %v2928_v6 = vadd.f32 %v16556_v34, %v2815_v61  ;;  %v13446_v34 = vld [vmem:[#allocation4 + $0x68] ss:$16 sps:$4 sm:$0xff]  }
 0x216   :  { %v3143_v39 = vpop.f32.mrf.mxu0  ;;  %4268 = vmatprep.subr.bf16.mxu0 %v13433_v55  ;;  %4309 = vmatprep.subr.bf16.mxu1 %v13436_v23  ;;  %v13448_v55 = vld [vmem:[#allocation4 + $0x6c] ss:$16 sps:$4 sm:$0xff]   ;;  %v13452_v61 = vld [vmem:[#allocation4 + $0x48] ss:$16 sps:$4 sm:$0xff]  }
 0x217   :  { %v3256_v35 = vpop.f32.mrf.mxu1  ;;  %v3144_v46 = vadd.f32 %v3143_v39, %v3031_v25  ;;  %v16667_v20 = vadd.f32 %v3254_v63, %v3142_v45  ;;  %v16963_v23 = vld [vmem:[#allocation21_spill] sm:$0xff]  ;;  %v3041_v33 = vadd.f32 %v16558_v48, %v2928_v6  ;;  %v16964_v22 = vld [vmem:[#allocation27_spill] sm:$0xff]  ;;  %v16965_v39 = vld [vmem:[#allocation22_spill] sm:$0xff] }
 0x218   :  { %v3147_v14 = vpop.f32.mrf.mxu0  ;;  %v2712_v40 = vadd.f32 %v16963_v23, %v2599_v1  ;;  %v13451_v45 = vld [vmem:[#allocation4 + $0x44] ss:$16 sps:$4 sm:$0xff]   ;;  %v13460_v6 = vld [vmem:[#allocation4 + $0x2c] ss:$16 sps:$4 sm:$0xff]  }
 0x219   :  { %v3260_v56 = vpop.f32.mrf.mxu1  ;;  %v3148_v13 = vadd.f32 %v3147_v14, %v16550_v0  ;;  %v16672_v62 = vadd.f32 %v3256_v35, %v3144_v46  ;;  %4269 = vmatpush1.bf16.msra.mxu0 %v13431_v21  ;;  %4310 = vmatpush1.bf16.msra.mxu1 %v13434_v60  ;;  %v16966_v23 = vld [vmem:[#allocation28_spill] sm:$0xff] }
 0x21a   :  { %v3149_v51 = vpop.f32.mrf.mxu0  ;;  %4270 = vmatprep.subr.bf16.mxu0 %v13439_v54  ;;  %4311 = vmatprep.subr.bf16.mxu1 %v13442_v30  ;;  %v2825_v35 = vadd.f32 %v16965_v39, %v2712_v40 }
 0x21b   :  { %v3262_v16 = vpop.f32.mrf.mxu1  ;;  %v3150_v38 = vadd.f32 %v3149_v51, %v16553_v10  ;;  %v16676_v11 = vadd.f32 %v3260_v56, %v3148_v13  ;;  %v13454_v10 = vld [vmem:[#allocation4 + $0x4c] ss:$16 sps:$4 sm:$0xff]   ;;  %v13457_v56 = vld [vmem:[#allocation4 + $0x24] ss:$16 sps:$4 sm:$0xff]  }
 0x21c   :  { %v3151_v18 = vpop.f32.mrf.mxu0  ;;  %v2938_v24 = vadd.f32 %v16571_v37, %v2825_v35  ;;  %v13469_v35 = vld [vmem:[#allocation4 + $0x1e4] ss:$16 sps:$4 sm:$0xff]  }
 0x21d   :  { %v3264_v0 = vpop.f32.mrf.mxu1  ;;  %v3152_v63 = vadd.f32 %v3151_v18, %v16964_v22  ;;  %v16680_v21 = vadd.f32 %v3262_v16, %v3150_v38  ;;  %4271 = vmatpush1.bf16.msra.mxu0 %v13437_v41  ;;  %4312 = vmatpush1.bf16.msra.mxu1 %v13440_v3  ;;  %v13455_v16 = vld [vmem:[#allocation4 + $0x20] ss:$16 sps:$4 sm:$0xff]   ;;  %v13463_v18 = vld [vmem:[#allocation4 + $0x4] ss:$16 sps:$4 sm:$0xff]  }
 0x21e   :  { %v3153_v60 = vpop.f32.mrf.mxu0  ;;  %4272 = vmatprep.subr.bf16.mxu0 %v13445_v2  ;;  %4313 = vmatprep.subr.bf16.mxu1 %v13448_v55  ;;  %v13458_v2 = vld [vmem:[#allocation4 + $0x28] ss:$16 sps:$4 sm:$0xff]   ;;  %v13461_v22 = vld [vmem:[#allocation4] ss:$16 sps:$4 sm:$0xff]  }
 0x21f   :  { %v3266_v25 = vpop.f32.mrf.mxu1  ;;  %v3154_v54 = vadd.f32 %v3153_v60, %v3041_v33  ;;  %v16683_v30 = vadd.f32 %v3264_v0, %v3152_v63  ;;  %v13464_v63 = vld [vmem:[#allocation4 + $0x8] ss:$16 sps:$4 sm:$0xff]  }
 0x220   :  { %v3157_v48 = vpop.f32.mrf.mxu0 }
 0x221   :  { %v3270_v46 = vpop.f32.mrf.mxu1  ;;  %v3158_v41 = vadd.f32 %v3157_v48, %v16565_v17  ;;  %v16687_v3 = vadd.f32 %v3266_v25, %v3154_v54  ;;  %4273 = vmatpush1.bf16.msra.mxu0 %v13443_v57  ;;  %4314 = vmatpush1.bf16.msra.mxu1 %v13446_v34  ;;  %v3051_v17 = vadd.f32 %v16966_v23, %v2938_v24  ;;  %v13472_v54 = vld [vmem:[#allocation4 + $0x1ec] ss:$16 sps:$4 sm:$0xff]   ;;  %v13467_v48 = vld [vmem:[#allocation4 + $0x1e0] ss:$16 sps:$4 sm:$0xff]  }
 0x222   :  { %v3159_v1 = vpop.f32.mrf.mxu0  ;;  %4274 = vmatprep.subr.bf16.mxu0 %v13451_v45  ;;  %4315 = vmatprep.subr.bf16.mxu1 %v13454_v10 }
 0x223   :  { %v3272_v14 = vpop.f32.mrf.mxu1  ;;  %v3160_v13 = vadd.f32 %v3159_v1, %v16568_v44  ;;  %v16690_v51 = vadd.f32 %v3270_v46, %v3158_v41  ;;  %v13466_v44 = vld [vmem:[#allocation4 + $0xc] ss:$16 sps:$4 sm:$0xff]   ;;  %v13470_v46 = vld [vmem:[#allocation4 + $0x1e8] ss:$16 sps:$4 sm:$0xff]  }
 0x224   :  { %v3161_v55 = vpop.f32.mrf.mxu0 }
 0x225   :  { %v3274_v37 = vpop.f32.mrf.mxu1  ;;  %v3162_v40 = vadd.f32 %v3161_v55, %v16576_v49  ;;  %v16694_v38 = vadd.f32 %v3272_v14, %v3160_v13  ;;  %4275 = vmatpush1.bf16.msra.mxu0 %v13449_v52  ;;  %4316 = vmatpush1.bf16.msra.mxu1 %v13452_v61  ;;  %v13478_v13 = vld [vmem:[#allocation4 + $0x1cc] ss:$16 sps:$4 sm:$0xff]   ;;  %v13476_v55 = vld [vmem:[#allocation4 + $0x1c8] ss:$16 sps:$4 sm:$0xff]  }
 0x226   :  { %v3163_v57 = vpop.f32.mrf.mxu0  ;;  %4276 = vmatprep.subr.bf16.mxu0 %v13457_v56  ;;  %4317 = vmatprep.subr.bf16.mxu1 %v13460_v6  ;;  %v13475_v6 = vld [vmem:[#allocation4 + $0x1c4] ss:$16 sps:$4 sm:$0xff]  }
 0x227   :  { %v3276_v34 = vpop.f32.mrf.mxu1  ;;  %v3164_v0 = vadd.f32 %v3163_v57, %v3051_v17  ;;  %v16696_v33 = vadd.f32 %v3274_v37, %v3162_v40 }
 0x228   :  { %v3167_v60 = vpop.f32.mrf.mxu0 }
 0x229   :  { %v3280_v25 = vpop.f32.mrf.mxu1  ;;  %v3168_v45 = vadd.f32 %v3167_v60, %v16582_v47  ;;  %v16699_v49 = vadd.f32 %v3276_v34, %v3164_v0  ;;  %4277 = vmatpush1.bf16.msra.mxu0 %v13455_v16  ;;  %4318 = vmatpush1.bf16.msra.mxu1 %v13458_v2  ;;  %v13473_v2 = vld [vmem:[#allocation4 + $0x1c0] ss:$16 sps:$4 sm:$0xff]   ;;  %v13481_v34 = vld [vmem:[#allocation4 + $0x1a4] ss:$16 sps:$4 sm:$0xff]  }
 0x22a   :  { %v3169_v10 = vpop.f32.mrf.mxu0  ;;  %4278 = vmatprep.subr.bf16.mxu0 %v13463_v18  ;;  %4319 = vmatprep.subr.bf16.mxu1 %v13466_v44  ;;  %v13484_v18 = vld [vmem:[#allocation4 + $0x1ac] ss:$16 sps:$4 sm:$0xff]   ;;  %v13479_v0 = vld [vmem:[#allocation4 + $0x1a0] ss:$16 sps:$4 sm:$0xff]  }
 0x22b   :  { %v3282_v39 = vpop.f32.mrf.mxu1  ;;  %v3170_v52 = vadd.f32 %v3169_v10, %v16586_v31  ;;  %v16702_v61 = vadd.f32 %v3280_v25, %v3168_v45 }
 0x22c   :  { %v3171_v24 = vpop.f32.mrf.mxu0 }
 0x22d   :  { %v3284_v41 = vpop.f32.mrf.mxu1  ;;  %v3172_v47 = vadd.f32 %v3171_v24, %v16590_v29  ;;  %v16705_v1 = vadd.f32 %v3282_v39, %v3170_v52  ;;  %4279 = vmatpush1.bf16.msra.mxu0 %v13461_v22  ;;  %4320 = vmatpush1.bf16.msra.mxu1 %v13464_v63  ;;  %v13482_v22 = vld [vmem:[#allocation4 + $0x1a8] ss:$16 sps:$4 sm:$0xff]   ;;  %v13487_v39 = vld [vmem:[#allocation4 + $0x184] ss:$16 sps:$4 sm:$0xff]   ;;  %v13485_v52 = vld [vmem:[#allocation4 + $0x180] ss:$16 sps:$4 sm:$0xff]  }
 0x22e   :  { %v3173_v14 = vpop.f32.mrf.mxu0  ;;  %4280 = vmatprep.subr.bf16.mxu0 %v13469_v35  ;;  %4321 = vmatprep.subr.bf16.mxu1 %v13472_v54  ;;  %v13490_v35 = vld [vmem:[#allocation4 + $0x18c] ss:$16 sps:$4 sm:$0xff]  }
 0x22f   :  { %v3286_v56 = vpop.f32.mrf.mxu1  ;;  %v3174_v31 = vadd.f32 %v3173_v14, %v16593_v9  ;;  %v16708_v16 = vadd.f32 %v3284_v41, %v3172_v47 }
 0x230   :  { %v3177_v37 = vpop.f32.mrf.mxu0 }
 0x231   :  { %v3290_v23 = vpop.f32.mrf.mxu1  ;;  %v3178_v29 = vadd.f32 %v3177_v37, %v16598_v4  ;;  %v16711_v17 = vadd.f32 %v3286_v56, %v3174_v31  ;;  %4281 = vmatpush2.bf16.msra.mxu0 %v13467_v48  ;;  %4322 = vmatpush2.bf16.msra.mxu1 %v13470_v46  ;;  %v13488_v48 = vld [vmem:[#allocation4 + $0x188] ss:$16 sps:$4 sm:$0xff]   ;;  %v13493_v56 = vld [vmem:[#allocation4 + $0x164] ss:$16 sps:$4 sm:$0xff]   ;;  %v13491_v31 = vld [vmem:[#allocation4 + $0x160] ss:$16 sps:$4 sm:$0xff]  }
 0x232   :  { %v3179_v40 = vpop.f32.mrf.mxu0  ;;  %4282 = vmatprep.subr.bf16.mxu0 %v13475_v6  ;;  %4323 = vmatprep.subr.bf16.mxu1 %v13478_v13  ;;  %v13496_v6 = vld [vmem:[#allocation4 + $0x16c] ss:$16 sps:$4 sm:$0xff]  }
 0x233   :  { %v3292_v57 = vpop.f32.mrf.mxu1  ;;  %v3180_v9 = vadd.f32 %v3179_v40, %v16602_v36  ;;  %v16714_v44 = vadd.f32 %v3290_v23, %v3178_v29  ;;  %v13499_v29 = vld [vmem:[#allocation4 + $0x144] ss:$16 sps:$4 sm:$0xff]   ;;  %v13502_v40 = vld [vmem:[#allocation4 + $0x14c] ss:$16 sps:$4 sm:$0xff]  }
 0x234   :  { %v3181_v63 = vpop.f32.mrf.mxu0 }
 0x235   :  { %v3294_v60 = vpop.f32.mrf.mxu1  ;;  %v3182_v4 = vadd.f32 %v3181_v63, %v16606_v27  ;;  %v16717_v25 = vadd.f32 %v3292_v57, %v3180_v9  ;;  %4283 = vmatpush2.bf16.msra.mxu0 %v13473_v2  ;;  %4324 = vmatpush2.bf16.msra.mxu1 %v13476_v55  ;;  %v13494_v2 = vld [vmem:[#allocation4 + $0x168] ss:$16 sps:$4 sm:$0xff]   ;;  %v13508_v9 = vld [vmem:[#allocation4 + $0x12c] ss:$16 sps:$4 sm:$0xff]  }
 0x236   :  { %v3183_v45 = vpop.f32.mrf.mxu0  ;;  %4284 = vmatprep.subr.bf16.mxu0 %v13481_v34  ;;  %4325 = vmatprep.subr.bf16.mxu1 %v13484_v18  ;;  %v13497_v34 = vld [vmem:[#allocation4 + $0x140] ss:$16 sps:$4 sm:$0xff]   ;;  %v13505_v18 = vld [vmem:[#allocation4 + $0x124] ss:$16 sps:$4 sm:$0xff]   ;;  %v13506_v63 = vld [vmem:[#allocation4 + $0x128] ss:$16 sps:$4 sm:$0xff]  }
 0x237   :  { %v3296_v10 = vpop.f32.mrf.mxu1  ;;  %v3184_v36 = vadd.f32 %v3183_v45, %v16609_v59  ;;  %v16720_v54 = vadd.f32 %v3294_v60, %v3182_v4  ;;  %v13511_v60 = vld [vmem:[#allocation4 + $0x104] ss:$16 sps:$4 sm:$0xff]   ;;  %v13514_v4 = vld [vmem:[#allocation4 + $0x10c] ss:$16 sps:$4 sm:$0xff]  }
 0x238   :  { %v3187_v46 = vpop.f32.mrf.mxu0 }
 0x239   :  { %v3300_v24 = vpop.f32.mrf.mxu1  ;;  %v3188_v27 = vadd.f32 %v3187_v46, %v16614_v8  ;;  %v16723_v41 = vadd.f32 %v3296_v10, %v3184_v36  ;;  %4285 = vmatpush2.bf16.msra.mxu0 %v13479_v0  ;;  %4326 = vmatpush2.bf16.msra.mxu1 %v13482_v22  ;;  %v16967_v0 = vld [vmem:[#allocation23_spill] sm:$0xff]  ;;  %v13503_v22 = vld [vmem:[#allocation4 + $0x120] ss:$16 sps:$4 sm:$0xff]  }
 0x23a   :  { %v3189_v47 = vpop.f32.mrf.mxu0  ;;  %4286 = vmatprep.subr.bf16.mxu0 %v13487_v39  ;;  %4327 = vmatprep.subr.bf16.mxu1 %v13490_v35  ;;  %v13509_v10 = vld [vmem:[#allocation4 + $0x100] ss:$16 sps:$4 sm:$0xff]   ;;  %v13512_v39 = vld [vmem:[#allocation4 + $0x108] ss:$16 sps:$4 sm:$0xff]   ;;  %v3309_v35 = vmax.f32 %v16631_v19, 0.0 }
 0x23b   :  { %v3302_v14 = vpop.f32.mrf.mxu1  ;;  %v3190_v59 = vadd.f32 %v3189_v47, %v16618_v26  ;;  %v16726_v13 = vadd.f32 %v3300_v24, %v3188_v27  ;;  %v13500_v26 = vld [vmem:[#allocation4 + $0x148] ss:$16 sps:$4 sm:$0xff]   ;;  %v13517_v36 = vld [vmem:[#allocation4 + $0x4e4] ss:$16 sps:$4 sm:$0xff]   ;;  %v13526_v27 = vld [vmem:[#allocation4 + $0x4cc] ss:$16 sps:$4 sm:$0xff]  }
 0x23c   :  { %v3191_v55 = vpop.f32.mrf.mxu0  ;;  %v13518_v46 = vld [vmem:[#allocation4 + $0x4e8] ss:$16 sps:$4 sm:$0xff]   ;;  %v13523_v24 = vld [vmem:[#allocation4 + $0x4c4] ss:$16 sps:$4 sm:$0xff]   ;;  %v12856_v47 = vpack.c.bf16 %v3309_v35, %v3309_v35 }
 0x23d   :  { %v3304_v37 = vpop.f32.mrf.mxu1  ;;  %v3192_v8 = vadd.f32 %v3191_v55, %v16624_v50  ;;  %v16729_v23 = vadd.f32 %v3302_v14, %v3190_v59  ;;  %4287 = vmatpush2.bf16.msra.mxu0 %v13485_v52  ;;  %4328 = vmatpush2.bf16.msra.mxu1 %v13488_v48  ;;  %v3130_v50 = vadd.f32 %v16636_v43, %v16967_v0  ;;  %v13520_v43 = vld [vmem:[#allocation4 + $0x4ec] ss:$16 sps:$4 sm:$0xff]   ;;  %v13515_v48 = vld [vmem:[#allocation4 + $0x4e0] ss:$16 sps:$4 sm:$0xff]   ;;  %v13524_v19 = vld [vmem:[#allocation4 + $0x4c8] ss:$16 sps:$4 sm:$0xff]  }
 0x23e   :  { %4288 = vmatprep.subr.bf16.mxu0 %v13493_v56  ;;  %4329 = vmatprep.subr.bf16.mxu1 %v13496_v6  ;;  %v13521_v14 = vld [vmem:[#allocation4 + $0x4c0] ss:$16 sps:$4 sm:$0xff]   ;;  %v13529_v56 = vld [vmem:[#allocation4 + $0x4a4] ss:$16 sps:$4 sm:$0xff]   ;;  %v13532_v6 = vld [vmem:[#allocation4 + $0x4ac] ss:$16 sps:$4 sm:$0xff]  }
 0x23f   :  { %v16731_v57 = vadd.f32 %v3304_v37, %v3192_v8  ;;  %v3243_v45 = vadd.f32 %v16638_v5, %v3130_v50  ;;  %v13527_v59 = vld [vmem:[#allocation4 + $0x4a0] ss:$16 sps:$4 sm:$0xff]   ;;  %v13538_v37 = vld [vmem:[#allocation4 + $0x48c] ss:$16 sps:$4 sm:$0xff]   ;;  %v13536_v8 = vld [vmem:[#allocation4 + $0x488] ss:$16 sps:$4 sm:$0xff]  }
 0x240   :  { %v13533_v55 = vld [vmem:[#allocation4 + $0x480] ss:$16 sps:$4 sm:$0xff]   ;;  %v13550_v0 = vld [vmem:[#allocation4 + $0x44c] ss:$16 sps:$4 sm:$0xff]   ;;  %v13548_v50 = vld [vmem:[#allocation4 + $0x448] ss:$16 sps:$4 sm:$0xff]  }
 0x241   :  { %4289 = vmatpush2.bf16.msra.mxu0 %v13491_v31  ;;  %4330 = vmatpush2.bf16.msra.mxu1 %v13494_v2  ;;  %v3314_v52 = vmax.f32 %v3243_v45, 0.0  ;;  %v13530_v31 = vld [vmem:[#allocation4 + $0x4a8] ss:$16 sps:$4 sm:$0xff]   ;;  %v13535_v2 = vld [vmem:[#allocation4 + $0x484] ss:$16 sps:$4 sm:$0xff]  }
 0x242   :  { %4290 = vmatprep.subr.bf16.mxu0 %v13499_v29  ;;  %4331 = vmatprep.subr.bf16.mxu1 %v13502_v40  ;;  %v13541_v29 = vld [vmem:[#allocation4 + $0x464] ss:$16 sps:$4 sm:$0xff]   ;;  %v13539_v40 = vld [vmem:[#allocation4 + $0x460] ss:$16 sps:$4 sm:$0xff]   ;;  %v13560_v35 = vld [vmem:[#allocation4 + $0x408] ss:$16 sps:$4 sm:$0xff]  }
 0x243   :  { %v12859_v5 = vpack.c.bf16 %v3314_v52, %v3314_v52  ;;  %v13559_v45 = vld [vmem:[#allocation4 + $0x404] ss:$16 sps:$4 sm:$0xff]   ;;  %v13568_v52 = vld [vmem:[#allocation4 + $0x5ec] ss:$16 sps:$4 sm:$0xff]  }
 0x245   :  { %4291 = vmatpush2.bf16.msra.mxu0 %v13497_v34  ;;  %4332 = vmatpush2.bf16.msra.mxu1 %v13500_v26  ;;  %v13544_v34 = vld [vmem:[#allocation4 + $0x46c] ss:$16 sps:$4 sm:$0xff]   ;;  %v13542_v26 = vld [vmem:[#allocation4 + $0x468] ss:$16 sps:$4 sm:$0xff]  }
 0x246   :  { %4292 = vmatprep.subr.bf16.mxu0 %v13505_v18  ;;  %4333 = vmatprep.subr.bf16.mxu1 %v13508_v9  ;;  %v13547_v18 = vld [vmem:[#allocation4 + $0x444] ss:$16 sps:$4 sm:$0xff]   ;;  %v13545_v9 = vld [vmem:[#allocation4 + $0x440] ss:$16 sps:$4 sm:$0xff]  }
 0x249   :  { %4293 = vmatpush2.bf16.msra.mxu0 %v13503_v22  ;;  %4334 = vmatpush2.bf16.msra.mxu1 %v13506_v63  ;;  %v13553_v22 = vld [vmem:[#allocation4 + $0x424] ss:$16 sps:$4 sm:$0xff]   ;;  %v13551_v63 = vld [vmem:[#allocation4 + $0x420] ss:$16 sps:$4 sm:$0xff]  }
 0x24a   :  { %4294 = vmatprep.subr.bf16.mxu0 %v13511_v60  ;;  %4335 = vmatprep.subr.bf16.mxu1 %v13514_v4  ;;  %v13556_v60 = vld [vmem:[#allocation4 + $0x42c] ss:$16 sps:$4 sm:$0xff]   ;;  %v13554_v4 = vld [vmem:[#allocation4 + $0x428] ss:$16 sps:$4 sm:$0xff]  }
 0x24d   :  { %4295 = vmatpush2.bf16.msra.mxu0 %v13509_v10  ;;  %4336 = vmatpush2.bf16.msra.mxu1 %v13512_v39  ;;  %v13557_v10 = vld [vmem:[#allocation4 + $0x400] ss:$16 sps:$4 sm:$0xff]   ;;  %v13562_v39 = vld [vmem:[#allocation4 + $0x40c] ss:$16 sps:$4 sm:$0xff]  }
 0x24e   :  { %4735 = vmatprep.subr.bf16.mxu0 %v13517_v36  ;;  %4776 = vmatprep.subr.bf16.mxu1 %v13520_v43  ;;  %v13565_v36 = vld [vmem:[#allocation4 + $0x5e4] ss:$16 sps:$4 sm:$0xff]   ;;  %v13563_v43 = vld [vmem:[#allocation4 + $0x5e0] ss:$16 sps:$4 sm:$0xff]  }
 0x250   :  { %4297 = vmatmul.mubr.bf16.vlgmr.msra.gmra.mxu0 %v12856_v47  ;;  %4338 = vmatmul.mubr.bf16.vlgmr.msra.gmra.mxu1 %v12856_v47  ;;  %v13572_v47 = vld [vmem:[#allocation4 + $0x5c8] ss:$16 sps:$4 sm:$0xff]  }
 0x251   :  { %4736 = vmatpush1.bf16.msra.mxu0 %v13515_v48  ;;  %4767 = vmatprep.mubr.bf16.mxu0 %v12859_v5  ;;  %v13566_v48 = vld [vmem:[#allocation4 + $0x5e8] ss:$16 sps:$4 sm:$0xff]  }
 0x252   :  { %4777 = vmatpush1.bf16.msra.mxu1 %v13518_v46  ;;  %4808 = vmatprep.mubr.bf16.mxu1 %v12859_v5  ;;  %v13571_v46 = vld [vmem:[#allocation4 + $0x5c4] ss:$16 sps:$4 sm:$0xff]  }
 0x253   :  { %4737 = vmatprep.subr.bf16.mxu0 %v13523_v24  ;;  %4778 = vmatprep.subr.bf16.mxu1 %v13526_v27  ;;  %v13569_v24 = vld [vmem:[#allocation4 + $0x5c0] ss:$16 sps:$4 sm:$0xff]   ;;  %v13574_v27 = vld [vmem:[#allocation4 + $0x5cc] ss:$16 sps:$4 sm:$0xff]   ;;  %v13577_v5 = vld [vmem:[#allocation4 + $0x5a4] ss:$16 sps:$4 sm:$0xff]  }
 0x255   :  { %4738 = vmatpush1.bf16.msra.mxu0 %v13521_v14  ;;  %v13575_v14 = vld [vmem:[#allocation4 + $0x5a0] ss:$16 sps:$4 sm:$0xff]  }
 0x256   :  { %4779 = vmatpush1.bf16.msra.mxu1 %v13524_v19  ;;  %4739 = vmatprep.subr.bf16.mxu0 %v13529_v56  ;;  %v13580_v19 = vld [vmem:[#allocation4 + $0x5ac] ss:$16 sps:$4 sm:$0xff]   ;;  %v13578_v56 = vld [vmem:[#allocation4 + $0x5a8] ss:$16 sps:$4 sm:$0xff]  }
 0x257   :  { %4780 = vmatprep.subr.bf16.mxu1 %v13532_v6  ;;  %v13583_v6 = vld [vmem:[#allocation4 + $0x584] ss:$16 sps:$4 sm:$0xff]  }
 0x259   :  { %4740 = vmatpush1.bf16.msra.mxu0 %v13527_v59  ;;  %v13581_v59 = vld [vmem:[#allocation4 + $0x580] ss:$16 sps:$4 sm:$0xff]  }
 0x25a   :  { %4781 = vmatpush1.bf16.msra.mxu1 %v13530_v31  ;;  %4741 = vmatprep.subr.bf16.mxu0 %v13535_v2  ;;  %v13586_v31 = vld [vmem:[#allocation4 + $0x58c] ss:$16 sps:$4 sm:$0xff]  }
 0x25b   :  { %4782 = vmatprep.subr.bf16.mxu1 %v13538_v37  ;;  %v16968_v2 = vld [vmem:[#allocation14_spill] sm:$0xff] }
 0x25d   :  { %4742 = vmatpush1.bf16.msra.mxu0 %v13533_v55  ;;  %v16969_v55 = vld [vmem:[#allocation17_spill] sm:$0xff] }
 0x25e   :  { %4783 = vmatpush1.bf16.msra.mxu1 %v13536_v8  ;;  %4743 = vmatprep.subr.bf16.mxu0 %v13541_v29  ;;  %v2682_v37 = vadd.f32 %v16969_v55, %v16968_v2  ;;  %v13584_v8 = vld [vmem:[#allocation4 + $0x588] ss:$16 sps:$4 sm:$0xff]   ;;  %v13589_v29 = vld [vmem:[#allocation4 + $0x564] ss:$16 sps:$4 sm:$0xff]   ;;  %v13617_v2 = vld [vmem:[#allocation4 + $0x6c0] ss:$16 sps:$4 sm:$0xff]  }
 0x25f   :  { %4784 = vmatprep.subr.bf16.mxu1 %v13544_v34  ;;  %v13592_v34 = vld [vmem:[#allocation4 + $0x56c] ss:$16 sps:$4 sm:$0xff]   ;;  %v13620_v55 = vld [vmem:[#allocation4 + $0x6c8] ss:$16 sps:$4 sm:$0xff]  }
 0x261   :  { %4744 = vmatpush1.bf16.msra.mxu0 %v13539_v40  ;;  %v13587_v40 = vld [vmem:[#allocation4 + $0x560] ss:$16 sps:$4 sm:$0xff]  }
 0x262   :  { %4785 = vmatpush1.bf16.msra.mxu1 %v13542_v26  ;;  %4745 = vmatprep.subr.bf16.mxu0 %v13547_v18  ;;  %v16970_v26 = vld [vmem:[#allocation18_spill] sm:$0xff] }
 0x263   :  { %4786 = vmatprep.subr.bf16.mxu1 %v13550_v0  ;;  %v2795_v18 = vadd.f32 %v16970_v26, %v2682_v37  ;;  %v13622_v37 = vld [vmem:[#allocation4 + $0x6cc] ss:$16 sps:$4 sm:$0xff]   ;;  %v13629_v26 = vld [vmem:[#allocation4 + $0x680] ss:$16 sps:$4 sm:$0xff]  }
 0x265   :  { %4746 = vmatpush1.bf16.msra.mxu0 %v13545_v9  ;;  %v16971_v9 = vld [vmem:[#allocation24_spill] sm:$0xff] }
 0x266   :  { %4787 = vmatpush1.bf16.msra.mxu1 %v13548_v50  ;;  %4747 = vmatprep.subr.bf16.mxu0 %v13553_v22  ;;  %v2908_v0 = vadd.f32 %v16971_v9, %v2795_v18  ;;  %v13590_v50 = vld [vmem:[#allocation4 + $0x568] ss:$16 sps:$4 sm:$0xff]   ;;  %v13595_v22 = vld [vmem:[#allocation4 + $0x544] ss:$16 sps:$4 sm:$0xff]   ;;  %v13634_v18 = vld [vmem:[#allocation4 + $0x68c] ss:$16 sps:$4 sm:$0xff]  }
 0x267   :  { %4788 = vmatprep.subr.bf16.mxu1 %v13556_v60  ;;  %v13598_v60 = vld [vmem:[#allocation4 + $0x54c] ss:$16 sps:$4 sm:$0xff]   ;;  %v13632_v9 = vld [vmem:[#allocation4 + $0x688] ss:$16 sps:$4 sm:$0xff]  }
 0x269   :  { %4748 = vmatpush1.bf16.msra.mxu0 %v13551_v63  ;;  %v13593_v63 = vld [vmem:[#allocation4 + $0x540] ss:$16 sps:$4 sm:$0xff]  }
 0x26a   :  { %4789 = vmatpush1.bf16.msra.mxu1 %v13554_v4  ;;  %4749 = vmatprep.subr.bf16.mxu0 %v13559_v45  ;;  %v16972_v4 = vld [vmem:[#allocation25_spill] sm:$0xff] }
 0x26b   :  { %4790 = vmatprep.subr.bf16.mxu1 %v13562_v39  ;;  %v3021_v45 = vadd.f32 %v16972_v4, %v2908_v0  ;;  %v13601_v39 = vld [vmem:[#allocation4 + $0x524] ss:$16 sps:$4 sm:$0xff]   ;;  %v13641_v4 = vld [vmem:[#allocation4 + $0x640] ss:$16 sps:$4 sm:$0xff]  }
 0x26c   :  { %v13637_v0 = vld [vmem:[#allocation4 + $0x664] ss:$16 sps:$4 sm:$0xff]  }
 0x26d   :  { %4750 = vmatpush1.bf16.msra.mxu0 %v13557_v10  ;;  %v13596_v10 = vld [vmem:[#allocation4 + $0x548] ss:$16 sps:$4 sm:$0xff]  }
 0x26e   :  { %4791 = vmatpush1.bf16.msra.mxu1 %v13560_v35  ;;  %4751 = vmatprep.subr.bf16.mxu0 %v13565_v36  ;;  %v13599_v35 = vld [vmem:[#allocation4 + $0x520] ss:$16 sps:$4 sm:$0xff]   ;;  %v13604_v36 = vld [vmem:[#allocation4 + $0x52c] ss:$16 sps:$4 sm:$0xff]  }
 0x26f   :  { %4792 = vmatprep.subr.bf16.mxu1 %v13568_v52  ;;  %v13602_v52 = vld [vmem:[#allocation4 + $0x528] ss:$16 sps:$4 sm:$0xff]  }
 0x271   :  { %4752 = vmatpush2.bf16.msra.mxu0 %v13563_v43  ;;  %v3134_v43 = vadd.f32 %v16645_v42, %v3021_v45  ;;  %v13611_v42 = vld [vmem:[#allocation4 + $0x6e0] ss:$16 sps:$4 sm:$0xff]   ;;  %v13646_v45 = vld [vmem:[#allocation4 + $0x64c] ss:$16 sps:$4 sm:$0xff]  }
 0x272   :  { %4793 = vmatpush2.bf16.msra.mxu1 %v13566_v48  ;;  %4753 = vmatprep.subr.bf16.mxu0 %v13571_v46  ;;  %v13607_v48 = vld [vmem:[#allocation4 + $0x504] ss:$16 sps:$4 sm:$0xff]   ;;  %v13605_v46 = vld [vmem:[#allocation4 + $0x500] ss:$16 sps:$4 sm:$0xff]  }
 0x273   :  { %4794 = vmatprep.subr.bf16.mxu1 %v13574_v27  ;;  %v3247_v27 = vadd.f32 %v16647_v32, %v3134_v43  ;;  %v13650_v43 = vld [vmem:[#allocation4 + $0x628] ss:$16 sps:$4 sm:$0xff]  }
 0x275   :  { %4754 = vmatpush2.bf16.msra.mxu0 %v13569_v24  ;;  %v13610_v24 = vld [vmem:[#allocation4 + $0x50c] ss:$16 sps:$4 sm:$0xff]  }
 0x276   :  { %4795 = vmatpush2.bf16.msra.mxu1 %v13572_v47  ;;  %4755 = vmatprep.subr.bf16.mxu0 %v13577_v5  ;;  %v13608_v47 = vld [vmem:[#allocation4 + $0x508] ss:$16 sps:$4 sm:$0xff]   ;;  %v3313_v5 = vmax.f32 %v16642_v7, 0.0  ;;  %v13625_v7 = vld [vmem:[#allocation4 + $0x6a4] ss:$16 sps:$4 sm:$0xff]  }
 0x277   :  { %4796 = vmatprep.subr.bf16.mxu1 %v13580_v19  ;;  %v13616_v19 = vld [vmem:[#allocation4 + $0x6ec] ss:$16 sps:$4 sm:$0xff]  }
 0x279   :  { %4756 = vmatpush2.bf16.msra.mxu0 %v13575_v14  ;;  %v13613_v14 = vld [vmem:[#allocation4 + $0x6e4] ss:$16 sps:$4 sm:$0xff]  }
 0x27a   :  { %4797 = vmatpush2.bf16.msra.mxu1 %v13578_v56  ;;  %4757 = vmatprep.subr.bf16.mxu0 %v13583_v6  ;;  %v3316_v56 = vmax.f32 %v3247_v27, 0.0  ;;  %v13614_v6 = vld [vmem:[#allocation4 + $0x6e8] ss:$16 sps:$4 sm:$0xff]   ;;  %v13661_v27 = vld [vmem:[#allocation4 + $0x7e4] ss:$16 sps:$4 sm:$0xff]  }
 0x27b   :  { %4798 = vmatprep.subr.bf16.mxu1 %v13586_v31  ;;  %v12858_v31 = vpack.c.bf16 %v3313_v5, %v3313_v5  ;;  %v13664_v5 = vld [vmem:[#allocation4 + $0x7ec] ss:$16 sps:$4 sm:$0xff]  }
 0x27c   :  { %v12861_v32 = vpack.c.bf16 %v3316_v56, %v3316_v56  ;;  %v13670_v56 = vld [vmem:[#allocation4 + $0x7cc] ss:$16 sps:$4 sm:$0xff]  }
 0x27d   :  { %4758 = vmatpush2.bf16.msra.mxu0 %v13581_v59  ;;  %v13619_v59 = vld [vmem:[#allocation4 + $0x6c4] ss:$16 sps:$4 sm:$0xff]  }
 0x27e   :  { %4799 = vmatpush2.bf16.msra.mxu1 %v13584_v8  ;;  %4759 = vmatprep.subr.bf16.mxu0 %v13589_v29  ;;  %v13628_v8 = vld [vmem:[#allocation4 + $0x6ac] ss:$16 sps:$4 sm:$0xff]   ;;  %v13623_v29 = vld [vmem:[#allocation4 + $0x6a0] ss:$16 sps:$4 sm:$0xff]  }
 0x27f   :  { %4800 = vmatprep.subr.bf16.mxu1 %v13592_v34  ;;  %v13631_v34 = vld [vmem:[#allocation4 + $0x684] ss:$16 sps:$4 sm:$0xff]  }
 0x281   :  { %4760 = vmatpush2.bf16.msra.mxu0 %v13587_v40  ;;  %v13626_v40 = vld [vmem:[#allocation4 + $0x6a8] ss:$16 sps:$4 sm:$0xff]  }
 0x282   :  { %4801 = vmatpush2.bf16.msra.mxu1 %v13590_v50  ;;  %4761 = vmatprep.subr.bf16.mxu0 %v13595_v22  ;;  %v13635_v50 = vld [vmem:[#allocation4 + $0x660] ss:$16 sps:$4 sm:$0xff]   ;;  %v13640_v22 = vld [vmem:[#allocation4 + $0x66c] ss:$16 sps:$4 sm:$0xff]  }
 0x283   :  { %4802 = vmatprep.subr.bf16.mxu1 %v13598_v60  ;;  %v13643_v60 = vld [vmem:[#allocation4 + $0x644] ss:$16 sps:$4 sm:$0xff]  }
 0x285   :  { %4762 = vmatpush2.bf16.msra.mxu0 %v13593_v63  ;;  %v13638_v63 = vld [vmem:[#allocation4 + $0x668] ss:$16 sps:$4 sm:$0xff]  }
 0x286   :  { %4803 = vmatpush2.bf16.msra.mxu1 %v13596_v10  ;;  %4763 = vmatprep.subr.bf16.mxu0 %v13601_v39  ;;  %v13644_v10 = vld [vmem:[#allocation4 + $0x648] ss:$16 sps:$4 sm:$0xff]   ;;  %v13649_v39 = vld [vmem:[#allocation4 + $0x624] ss:$16 sps:$4 sm:$0xff]  }
 0x287   :  { %4804 = vmatprep.subr.bf16.mxu1 %v13604_v36  ;;  %v13652_v36 = vld [vmem:[#allocation4 + $0x62c] ss:$16 sps:$4 sm:$0xff]  }
 0x289   :  { %4764 = vmatpush2.bf16.msra.mxu0 %v13599_v35  ;;  %v13647_v35 = vld [vmem:[#allocation4 + $0x620] ss:$16 sps:$4 sm:$0xff]  }
 0x28a   :  { %4805 = vmatpush2.bf16.msra.mxu1 %v13602_v52  ;;  %4765 = vmatprep.subr.bf16.mxu0 %v13607_v48  ;;  %v13655_v52 = vld [vmem:[#allocation4 + $0x604] ss:$16 sps:$4 sm:$0xff]   ;;  %v13653_v48 = vld [vmem:[#allocation4 + $0x600] ss:$16 sps:$4 sm:$0xff]  }
 0x28b   :  { %4806 = vmatprep.subr.bf16.mxu1 %v13610_v24  ;;  %v13656_v24 = vld [vmem:[#allocation4 + $0x608] ss:$16 sps:$4 sm:$0xff]  }
 0x28d   :  { %4766 = vmatpush2.bf16.msra.mxu0 %v13605_v46  ;;  %v13658_v46 = vld [vmem:[#allocation4 + $0x60c] ss:$16 sps:$4 sm:$0xff]  }
 0x28e   :  { %4807 = vmatpush2.bf16.msra.mxu1 %v13608_v47  ;;  %5210 = vmatprep.subr.bf16.mxu0 %v13613_v14  ;;  %v13659_v47 = vld [vmem:[#allocation4 + $0x7e0] ss:$16 sps:$4 sm:$0xff]   ;;  %v13662_v14 = vld [vmem:[#allocation4 + $0x7e8] ss:$16 sps:$4 sm:$0xff]  }
 0x28f   :  { %5251 = vmatprep.subr.bf16.mxu1 %v13616_v19  ;;  %v13667_v19 = vld [vmem:[#allocation4 + $0x7c4] ss:$16 sps:$4 sm:$0xff]  }
 0x290   :  { %4768 = vmatmul.mubr.bf16.vlgmr.msra.gmra.mxu0 %v12858_v31 }
 0x291   :  { %4809 = vmatmul.mubr.bf16.vlgmr.msra.gmra.mxu1 %v12858_v31  ;;  %5211 = vmatpush1.bf16.msra.mxu0 %v13611_v42  ;;  %v13665_v42 = vld [vmem:[#allocation4 + $0x7c0] ss:$16 sps:$4 sm:$0xff]  }
 0x292   :  { %5242 = vmatprep.mubr.bf16.mxu0 %v12861_v32  ;;  %5252 = vmatpush1.bf16.msra.mxu1 %v13614_v6  ;;  %v13668_v6 = vld [vmem:[#allocation4 + $0x7c8] ss:$16 sps:$4 sm:$0xff]   ;;  %v13671_v31 = vld [vmem:[#allocation4 + $0x7a0] ss:$16 sps:$4 sm:$0xff]  }
 0x293   :  { %5283 = vmatprep.mubr.bf16.mxu1 %v12861_v32  ;;  %5212 = vmatprep.subr.bf16.mxu0 %v13619_v59  ;;  %v13673_v59 = vld [vmem:[#allocation4 + $0x7a4] ss:$16 sps:$4 sm:$0xff]   ;;  %v13674_v32 = vld [vmem:[#allocation4 + $0x7a8] ss:$16 sps:$4 sm:$0xff]  }
 0x294   :  { %5253 = vmatprep.subr.bf16.mxu1 %v13622_v37  ;;  %v13677_v37 = vld [vmem:[#allocation4 + $0x780] ss:$16 sps:$4 sm:$0xff]  }
 0x295   :  { %5213 = vmatpush1.bf16.msra.mxu0 %v13617_v2  ;;  %v13676_v2 = vld [vmem:[#allocation4 + $0x7ac] ss:$16 sps:$4 sm:$0xff]  }
 0x296   :  { %5254 = vmatpush1.bf16.msra.mxu1 %v13620_v55  ;;  %5214 = vmatprep.subr.bf16.mxu0 %v13625_v7  ;;  %v13679_v55 = vld [vmem:[#allocation4 + $0x784] ss:$16 sps:$4 sm:$0xff]   ;;  %v13682_v7 = vld [vmem:[#allocation4 + $0x78c] ss:$16 sps:$4 sm:$0xff]  }
 0x297   :  { %5255 = vmatprep.subr.bf16.mxu1 %v13628_v8  ;;  %v13680_v8 = vld [vmem:[#allocation4 + $0x788] ss:$16 sps:$4 sm:$0xff]  }
 0x299   :  { %5215 = vmatpush1.bf16.msra.mxu0 %v13623_v29  ;;  %v13685_v29 = vld [vmem:[#allocation4 + $0x764] ss:$16 sps:$4 sm:$0xff]  }
 0x29a   :  { %5256 = vmatpush1.bf16.msra.mxu1 %v13626_v40  ;;  %5216 = vmatprep.subr.bf16.mxu0 %v13631_v34  ;;  %v13683_v40 = vld [vmem:[#allocation4 + $0x760] ss:$16 sps:$4 sm:$0xff]   ;;  %v13688_v34 = vld [vmem:[#allocation4 + $0x76c] ss:$16 sps:$4 sm:$0xff]  }
 0x29b   :  { %5257 = vmatprep.subr.bf16.mxu1 %v13634_v18  ;;  %v13691_v18 = vld [vmem:[#allocation4 + $0x744] ss:$16 sps:$4 sm:$0xff]  }
 0x29d   :  { %5217 = vmatpush1.bf16.msra.mxu0 %v13629_v26  ;;  %v13686_v26 = vld [vmem:[#allocation4 + $0x768] ss:$16 sps:$4 sm:$0xff]  }
 0x29e   :  { %5258 = vmatpush1.bf16.msra.mxu1 %v13632_v9  ;;  %5218 = vmatprep.subr.bf16.mxu0 %v13637_v0  ;;  %v13689_v9 = vld [vmem:[#allocation4 + $0x740] ss:$16 sps:$4 sm:$0xff]   ;;  %v13694_v0 = vld [vmem:[#allocation4 + $0x74c] ss:$16 sps:$4 sm:$0xff]  }
 0x29f   :  { %5259 = vmatprep.subr.bf16.mxu1 %v13640_v22  ;;  %v13697_v22 = vld [vmem:[#allocation4 + $0x724] ss:$16 sps:$4 sm:$0xff]  }
 0x2a1   :  { %5219 = vmatpush1.bf16.msra.mxu0 %v13635_v50  ;;  %v13692_v50 = vld [vmem:[#allocation4 + $0x748] ss:$16 sps:$4 sm:$0xff]  }
 0x2a2   :  { %5260 = vmatpush1.bf16.msra.mxu1 %v13638_v63  ;;  %5220 = vmatprep.subr.bf16.mxu0 %v13643_v60  ;;  %v13695_v63 = vld [vmem:[#allocation4 + $0x720] ss:$16 sps:$4 sm:$0xff]   ;;  %v13700_v60 = vld [vmem:[#allocation4 + $0x72c] ss:$16 sps:$4 sm:$0xff]  }
 0x2a3   :  { %5261 = vmatprep.subr.bf16.mxu1 %v13646_v45 }
 0x2a5   :  { %5221 = vmatpush1.bf16.msra.mxu0 %v13641_v4  ;;  %v16973_v4 = vld [vmem:[#allocation26_spill] sm:$0xff] }
 0x2a6   :  { %5262 = vmatpush1.bf16.msra.mxu1 %v13644_v10  ;;  %5222 = vmatprep.subr.bf16.mxu0 %v13649_v39  ;;  %v3140_v45 = vadd.f32 %v16654_v28, %v16973_v4  ;;  %v13698_v10 = vld [vmem:[#allocation4 + $0x728] ss:$16 sps:$4 sm:$0xff]   ;;  %v13703_v39 = vld [vmem:[#allocation4 + $0x704] ss:$16 sps:$4 sm:$0xff]   ;;  %v13707_v28 = vld [vmem:[#allocation4 + $0x8e0] ss:$16 sps:$4 sm:$0xff]  }
 0x2a7   :  { %5263 = vmatprep.subr.bf16.mxu1 %v13652_v36  ;;  %v13706_v36 = vld [vmem:[#allocation4 + $0x70c] ss:$16 sps:$4 sm:$0xff]   ;;  %v13734_v4 = vld [vmem:[#allocation4 + $0x868] ss:$16 sps:$4 sm:$0xff]  }
 0x2a9   :  { %5223 = vmatpush1.bf16.msra.mxu0 %v13647_v35  ;;  %v13701_v35 = vld [vmem:[#allocation4 + $0x700] ss:$16 sps:$4 sm:$0xff]  }
 0x2aa   :  { %5264 = vmatpush1.bf16.msra.mxu1 %v13650_v43  ;;  %5224 = vmatprep.subr.bf16.mxu0 %v13655_v52  ;;  %v3253_v43 = vadd.f32 %v16656_v12, %v3140_v45  ;;  %v3315_v52 = vmax.f32 %v16650_v15, 0.0  ;;  %v13713_v15 = vld [vmem:[#allocation4 + $0x8c0] ss:$16 sps:$4 sm:$0xff]   ;;  %v13739_v45 = vld [vmem:[#allocation4 + $0x844] ss:$16 sps:$4 sm:$0xff]  }
 0x2ab   :  { %5265 = vmatprep.subr.bf16.mxu1 %v13658_v46  ;;  %v13709_v46 = vld [vmem:[#allocation4 + $0x8e4] ss:$16 sps:$4 sm:$0xff]  }
 0x2ad   :  { %5225 = vmatpush1.bf16.msra.mxu0 %v13653_v48  ;;  %v13704_v48 = vld [vmem:[#allocation4 + $0x708] ss:$16 sps:$4 sm:$0xff]  }
 0x2ae   :  { %5266 = vmatpush1.bf16.msra.mxu1 %v13656_v24  ;;  %5226 = vmatprep.subr.bf16.mxu0 %v13661_v27  ;;  %v13712_v24 = vld [vmem:[#allocation4 + $0x8ec] ss:$16 sps:$4 sm:$0xff]   ;;  %v3318_v27 = vmax.f32 %v3253_v43, 0.0  ;;  %v13743_v43 = vld [vmem:[#allocation4 + $0x820] ss:$16 sps:$4 sm:$0xff]  }
 0x2af   :  { %5267 = vmatprep.subr.bf16.mxu1 %v13664_v5  ;;  %v13715_v5 = vld [vmem:[#allocation4 + $0x8c4] ss:$16 sps:$4 sm:$0xff]  }
 0x2b0   :  { %v12863_v12 = vpack.c.bf16 %v3318_v27, %v3318_v27  ;;  %v13752_v27 = vld [vmem:[#allocation4 + $0x808] ss:$16 sps:$4 sm:$0xff]  }
 0x2b1   :  { %5227 = vmatpush2.bf16.msra.mxu0 %v13659_v47  ;;  %v13710_v47 = vld [vmem:[#allocation4 + $0x8e8] ss:$16 sps:$4 sm:$0xff]  }
 0x2b2   :  { %5268 = vmatpush2.bf16.msra.mxu1 %v13662_v14  ;;  %5228 = vmatprep.subr.bf16.mxu0 %v13667_v19  ;;  %v12860_v14 = vpack.c.bf16 %v3315_v52, %v3315_v52  ;;  %v16749_v19 = vpop.f32.mrf.mxu0  ;;  %v13748_v52 = vld [vmem:[#allocation4 + $0x82c] ss:$16 sps:$4 sm:$0xff]  }
 0x2b3   :  { %5269 = vmatprep.subr.bf16.mxu1 %v13670_v56 }
 0x2b5   :  { %5229 = vmatpush2.bf16.msra.mxu0 %v13665_v42  ;;  %v16751_v42 = vpop.f32.mrf.mxu1 }
 0x2b6   :  { %5270 = vmatpush2.bf16.msra.mxu1 %v13668_v6  ;;  %5230 = vmatprep.subr.bf16.mxu0 %v13673_v59  ;;  %v13716_v59 = vld [vmem:[#allocation4 + $0x8c8] ss:$16 sps:$4 sm:$0xff]  }
 0x2b7   :  { %5271 = vmatprep.subr.bf16.mxu1 %v13676_v2  ;;  %v13721_v2 = vld [vmem:[#allocation4 + $0x8a4] ss:$16 sps:$4 sm:$0xff]  }
 0x2b9   :  { %5231 = vmatpush2.bf16.msra.mxu0 %v13671_v31  ;;  %v13718_v31 = vld [vmem:[#allocation4 + $0x8cc] ss:$16 sps:$4 sm:$0xff]  }
 0x2ba   :  { %5272 = vmatpush2.bf16.msra.mxu1 %v13674_v32  ;;  %5232 = vmatprep.subr.bf16.mxu0 %v13679_v55  ;;  %v13724_v32 = vld [vmem:[#allocation4 + $0x8ac] ss:$16 sps:$4 sm:$0xff]  }
 0x2bb   :  { %5273 = vmatprep.subr.bf16.mxu1 %v13682_v7 }
 0x2bd   :  { %5233 = vmatpush2.bf16.msra.mxu0 %v13677_v37 }
 0x2be   :  { %5274 = vmatpush2.bf16.msra.mxu1 %v13680_v8  ;;  %5234 = vmatprep.subr.bf16.mxu0 %v13685_v29  ;;  %v13719_v29 = vld [vmem:[#allocation4 + $0x8a0] ss:$16 sps:$4 sm:$0xff]  }
 0x2bf   :  { %5275 = vmatprep.subr.bf16.mxu1 %v13688_v34  ;;  %v13727_v34 = vld [vmem:[#allocation4 + $0x884] ss:$16 sps:$4 sm:$0xff]  }
 0x2c1   :  { %5235 = vmatpush2.bf16.msra.mxu0 %v13683_v40  ;;  %v13722_v40 = vld [vmem:[#allocation4 + $0x8a8] ss:$16 sps:$4 sm:$0xff]  }
 0x2c2   :  { %5276 = vmatpush2.bf16.msra.mxu1 %v13686_v26  ;;  %5236 = vmatprep.subr.bf16.mxu0 %v13691_v18 }
 0x2c3   :  { %5277 = vmatprep.subr.bf16.mxu1 %v13694_v0  ;;  %v13725_v0 = vld [vmem:[#allocation4 + $0x880] ss:$16 sps:$4 sm:$0xff]  }
 0x2c5   :  { %5237 = vmatpush2.bf16.msra.mxu0 %v13689_v9  ;;  %v13730_v9 = vld [vmem:[#allocation4 + $0x88c] ss:$16 sps:$4 sm:$0xff]  }
 0x2c6   :  { %5278 = vmatpush2.bf16.msra.mxu1 %v13692_v50  ;;  %5238 = vmatprep.subr.bf16.mxu0 %v13697_v22  ;;  %v13728_v50 = vld [vmem:[#allocation4 + $0x888] ss:$16 sps:$4 sm:$0xff]   ;;  %v13733_v22 = vld [vmem:[#allocation4 + $0x864] ss:$16 sps:$4 sm:$0xff]  }
 0x2c7   :  { %5279 = vmatprep.subr.bf16.mxu1 %v13700_v60  ;;  %v13736_v60 = vld [vmem:[#allocation4 + $0x86c] ss:$16 sps:$4 sm:$0xff]  }
 0x2c9   :  { %5239 = vmatpush2.bf16.msra.mxu0 %v13695_v63  ;;  %v13731_v63 = vld [vmem:[#allocation4 + $0x860] ss:$16 sps:$4 sm:$0xff]  }
 0x2ca   :  { %5280 = vmatpush2.bf16.msra.mxu1 %v13698_v10  ;;  %5240 = vmatprep.subr.bf16.mxu0 %v13703_v39  ;;  %v13737_v10 = vld [vmem:[#allocation4 + $0x840] ss:$16 sps:$4 sm:$0xff]   ;;  %v13742_v39 = vld [vmem:[#allocation4 + $0x84c] ss:$16 sps:$4 sm:$0xff]  }
 0x2cb   :  { %5281 = vmatprep.subr.bf16.mxu1 %v13706_v36  ;;  %v13745_v36 = vld [vmem:[#allocation4 + $0x824] ss:$16 sps:$4 sm:$0xff]  }
 0x2cd   :  { %5241 = vmatpush2.bf16.msra.mxu0 %v13701_v35  ;;  %v13740_v35 = vld [vmem:[#allocation4 + $0x848] ss:$16 sps:$4 sm:$0xff]  }
 0x2ce   :  { %5282 = vmatpush2.bf16.msra.mxu1 %v13704_v48  ;;  %5685 = vmatprep.subr.bf16.mxu0 %v13709_v46  ;;  %v13746_v48 = vld [vmem:[#allocation4 + $0x828] ss:$16 sps:$4 sm:$0xff]   ;;  %v13751_v46 = vld [vmem:[#allocation4 + $0x804] ss:$16 sps:$4 sm:$0xff]  }
 0x2cf   :  { %5726 = vmatprep.subr.bf16.mxu1 %v13712_v24  ;;  %v13749_v24 = vld [vmem:[#allocation4 + $0x800] ss:$16 sps:$4 sm:$0xff]  }
 0x2d0   :  { %5243 = vmatmul.mubr.bf16.vlgmr.msra.gmra.mxu0 %v12860_v14  ;;  %v16753_v56 = vpop.f32.mrf.mxu0  ;;  %v16755_v6 = vpop.f32.mrf.mxu1 }
 0x2d1   :  { %5284 = vmatmul.mubr.bf16.vlgmr.msra.gmra.mxu1 %v12860_v14  ;;  %5686 = vmatpush1.bf16.msra.mxu0 %v13707_v28  ;;  %v13754_v28 = vld [vmem:[#allocation4 + $0x80c] ss:$16 sps:$4 sm:$0xff]  }
 0x2d2   :  { %5717 = vmatprep.mubr.bf16.mxu0 %v12863_v12  ;;  %5727 = vmatpush1.bf16.msra.mxu1 %v13710_v47  ;;  %v16757_v55 = vpop.f32.mrf.mxu0  ;;  %v16759_v37 = vpop.f32.mrf.mxu1  ;;  %v13757_v47 = vld [vmem:[#allocation4 + $0x9e4] ss:$16 sps:$4 sm:$0xff]   ;;  %v13760_v14 = vld [vmem:[#allocation4 + $0x9ec] ss:$16 sps:$4 sm:$0xff]  }
 0x2d3   :  { %5758 = vmatprep.mubr.bf16.mxu1 %v12863_v12  ;;  %5687 = vmatprep.subr.bf16.mxu0 %v13715_v5  ;;  %v13755_v5 = vld [vmem:[#allocation4 + $0x9e0] ss:$16 sps:$4 sm:$0xff]   ;;  %v13763_v12 = vld [vmem:[#allocation4 + $0x9c4] ss:$16 sps:$4 sm:$0xff]  }
 0x2d4   :  { %5728 = vmatprep.subr.bf16.mxu1 %v13718_v31  ;;  %v3896_v7 = vpop.f32.mrf.mxu0  ;;  %v3937_v8 = vpop.f32.mrf.mxu1  ;;  %v13766_v31 = vld [vmem:[#allocation4 + $0x9cc] ss:$16 sps:$4 sm:$0xff]  }
 0x2d5   :  { %5688 = vmatpush1.bf16.msra.mxu0 %v13713_v15  ;;  %v13758_v15 = vld [vmem:[#allocation4 + $0x9e8] ss:$16 sps:$4 sm:$0xff]   ;;  %v13767_v7 = vld [vmem:[#allocation4 + $0x9a0] ss:$16 sps:$4 sm:$0xff]   ;;  %v13772_v8 = vld [vmem:[#allocation4 + $0x9ac] ss:$16 sps:$4 sm:$0xff]  }
 0x2d6   :  { %5729 = vmatpush1.bf16.msra.mxu1 %v13716_v59  ;;  %v3897_v26 = vpop.f32.mrf.mxu0  ;;  %v3938_v18 = vpop.f32.mrf.mxu1  ;;  %5689 = vmatprep.subr.bf16.mxu0 %v13721_v2  ;;  %v13761_v59 = vld [vmem:[#allocation4 + $0x9c0] ss:$16 sps:$4 sm:$0xff]   ;;  %v13764_v2 = vld [vmem:[#allocation4 + $0x9c8] ss:$16 sps:$4 sm:$0xff]  }
 0x2d7   :  { %5730 = vmatprep.subr.bf16.mxu1 %v13724_v32  ;;  %v13769_v32 = vld [vmem:[#allocation4 + $0x9a4] ss:$16 sps:$4 sm:$0xff]   ;;  %v13778_v26 = vld [vmem:[#allocation4 + $0x98c] ss:$16 sps:$4 sm:$0xff]   ;;  %v13776_v18 = vld [vmem:[#allocation4 + $0x988] ss:$16 sps:$4 sm:$0xff]  }
 0x2d9   :  { %5690 = vmatpush1.bf16.msra.mxu0 %v13719_v29  ;;  %v13770_v29 = vld [vmem:[#allocation4 + $0x9a8] ss:$16 sps:$4 sm:$0xff]  }
 0x2da   :  { %5731 = vmatpush1.bf16.msra.mxu1 %v13722_v40  ;;  %5691 = vmatprep.subr.bf16.mxu0 %v13727_v34  ;;  %v13775_v40 = vld [vmem:[#allocation4 + $0x984] ss:$16 sps:$4 sm:$0xff]   ;;  %v13773_v34 = vld [vmem:[#allocation4 + $0x980] ss:$16 sps:$4 sm:$0xff]  }
 0x2db   :  { %5732 = vmatprep.subr.bf16.mxu1 %v13730_v9  ;;  %v13781_v9 = vld [vmem:[#allocation4 + $0x964] ss:$16 sps:$4 sm:$0xff]  }
 0x2dd   :  { %5692 = vmatpush1.bf16.msra.mxu0 %v13725_v0  ;;  %v13779_v0 = vld [vmem:[#allocation4 + $0x960] ss:$16 sps:$4 sm:$0xff]  }
 0x2de   :  { %5733 = vmatpush1.bf16.msra.mxu1 %v13728_v50  ;;  %5693 = vmatprep.subr.bf16.mxu0 %v13733_v22  ;;  %v13784_v50 = vld [vmem:[#allocation4 + $0x96c] ss:$16 sps:$4 sm:$0xff]   ;;  %v13782_v22 = vld [vmem:[#allocation4 + $0x968] ss:$16 sps:$4 sm:$0xff]  }
 0x2df   :  { %5734 = vmatprep.subr.bf16.mxu1 %v13736_v60  ;;  %v13785_v60 = vld [vmem:[#allocation4 + $0x940] ss:$16 sps:$4 sm:$0xff]  }
 0x2e1   :  { %5694 = vmatpush1.bf16.msra.mxu0 %v13731_v63  ;;  %v13787_v63 = vld [vmem:[#allocation4 + $0x944] ss:$16 sps:$4 sm:$0xff]  }
 0x2e2   :  { %5735 = vmatpush1.bf16.msra.mxu1 %v13734_v4  ;;  %5695 = vmatprep.subr.bf16.mxu0 %v13739_v45  ;;  %v13790_v4 = vld [vmem:[#allocation4 + $0x94c] ss:$16 sps:$4 sm:$0xff]   ;;  %v13788_v45 = vld [vmem:[#allocation4 + $0x948] ss:$16 sps:$4 sm:$0xff]  }
 0x2e3   :  { %5736 = vmatprep.subr.bf16.mxu1 %v13742_v39  ;;  %v13791_v39 = vld [vmem:[#allocation4 + $0x920] ss:$16 sps:$4 sm:$0xff]  }
 0x2e5   :  { %5696 = vmatpush1.bf16.msra.mxu0 %v13737_v10  ;;  %v13793_v10 = vld [vmem:[#allocation4 + $0x924] ss:$16 sps:$4 sm:$0xff]  }
 0x2e6   :  { %5737 = vmatpush1.bf16.msra.mxu1 %v13740_v35  ;;  %5697 = vmatprep.subr.bf16.mxu0 %v13745_v36  ;;  %v13796_v35 = vld [vmem:[#allocation4 + $0x92c] ss:$16 sps:$4 sm:$0xff]   ;;  %v3317_v36 = vmax.f32 %v16660_v53, 0.0  ;;  %v13811_v53 = vld [vmem:[#allocation4 + $0xac4] ss:$16 sps:$4 sm:$0xff]  }
 0x2e7   :  { %5738 = vmatprep.subr.bf16.mxu1 %v13748_v52  ;;  %v13794_v52 = vld [vmem:[#allocation4 + $0x928] ss:$16 sps:$4 sm:$0xff]  }
 0x2e9   :  { %5698 = vmatpush1.bf16.msra.mxu0 %v13743_v43  ;;  %v3320_v43 = vmax.f32 %v16672_v62, 0.0  ;;  %v13809_v62 = vld [vmem:[#allocation4 + $0xac0] ss:$16 sps:$4 sm:$0xff]  }
 0x2ea   :  { %5739 = vmatpush1.bf16.msra.mxu1 %v13746_v48  ;;  %5699 = vmatprep.subr.bf16.mxu0 %v13751_v46  ;;  %v13799_v48 = vld [vmem:[#allocation4 + $0x904] ss:$16 sps:$4 sm:$0xff]   ;;  %v13797_v46 = vld [vmem:[#allocation4 + $0x900] ss:$16 sps:$4 sm:$0xff]  }
 0x2eb   :  { %5740 = vmatprep.subr.bf16.mxu1 %v13754_v28  ;;  %v13800_v28 = vld [vmem:[#allocation4 + $0x908] ss:$16 sps:$4 sm:$0xff]  }
 0x2ed   :  { %5700 = vmatpush1.bf16.msra.mxu0 %v13749_v24  ;;  %v13802_v24 = vld [vmem:[#allocation4 + $0x90c] ss:$16 sps:$4 sm:$0xff]  }
 0x2ee   :  { %5741 = vmatpush1.bf16.msra.mxu1 %v13752_v27  ;;  %5701 = vmatprep.subr.bf16.mxu0 %v13757_v47  ;;  %v13805_v27 = vld [vmem:[#allocation4 + $0xae4] ss:$16 sps:$4 sm:$0xff]   ;;  %v13808_v47 = vld [vmem:[#allocation4 + $0xaec] ss:$16 sps:$4 sm:$0xff]  }
 0x2ef   :  { %5742 = vmatprep.subr.bf16.mxu1 %v13760_v14  ;;  %v13806_v14 = vld [vmem:[#allocation4 + $0xae8] ss:$16 sps:$4 sm:$0xff]  }
 0x2f1   :  { %5702 = vmatpush2.bf16.msra.mxu0 %v13755_v5  ;;  %v13803_v5 = vld [vmem:[#allocation4 + $0xae0] ss:$16 sps:$4 sm:$0xff]  }
 0x2f2   :  { %5743 = vmatpush2.bf16.msra.mxu1 %v13758_v15  ;;  %5703 = vmatprep.subr.bf16.mxu0 %v13763_v12  ;;  %v12862_v15 = vpack.c.bf16 %v3317_v36, %v3317_v36  ;;  %v12865_v12 = vpack.c.bf16 %v3320_v43, %v3320_v43  ;;  %v13835_v36 = vld [vmem:[#allocation4 + $0xa44] ss:$16 sps:$4 sm:$0xff]   ;;  %v13838_v43 = vld [vmem:[#allocation4 + $0xa4c] ss:$16 sps:$4 sm:$0xff]  }
 0x2f3   :  { %5744 = vmatprep.subr.bf16.mxu1 %v13766_v31 }
 0x2f5   :  { %5704 = vmatpush2.bf16.msra.mxu0 %v13761_v59 }
 0x2f6   :  { %5745 = vmatpush2.bf16.msra.mxu1 %v13764_v2  ;;  %5705 = vmatprep.subr.bf16.mxu0 %v13769_v32  ;;  %v13812_v2 = vld [vmem:[#allocation4 + $0xac8] ss:$16 sps:$4 sm:$0xff]   ;;  %v13814_v32 = vld [vmem:[#allocation4 + $0xacc] ss:$16 sps:$4 sm:$0xff]  }
 0x2f7   :  { %5746 = vmatprep.subr.bf16.mxu1 %v13772_v8 }
 0x2f9   :  { %5706 = vmatpush2.bf16.msra.mxu0 %v13767_v7 }
 0x2fa   :  { %5747 = vmatpush2.bf16.msra.mxu1 %v13770_v29  ;;  %5707 = vmatprep.subr.bf16.mxu0 %v13775_v40  ;;  %v13817_v29 = vld [vmem:[#allocation4 + $0xaa4] ss:$16 sps:$4 sm:$0xff]   ;;  %v13820_v40 = vld [vmem:[#allocation4 + $0xaac] ss:$16 sps:$4 sm:$0xff]  }
 0x2fb   :  { %5748 = vmatprep.subr.bf16.mxu1 %v13778_v26 }
 0x2fd   :  { %5708 = vmatpush2.bf16.msra.mxu0 %v13773_v34 }
 0x2fe   :  { %5749 = vmatpush2.bf16.msra.mxu1 %v13776_v18  ;;  %5709 = vmatprep.subr.bf16.mxu0 %v13781_v9 }
 0x2ff   :  { %5750 = vmatprep.subr.bf16.mxu1 %v13784_v50 }
 0x301   :  { %5710 = vmatpush2.bf16.msra.mxu0 %v13779_v0 }
 0x302   :  { %5751 = vmatpush2.bf16.msra.mxu1 %v13782_v22  ;;  %5711 = vmatprep.subr.bf16.mxu0 %v13787_v63  ;;  %v13818_v63 = vld [vmem:[#allocation4 + $0xaa8] ss:$16 sps:$4 sm:$0xff]  }
 0x303   :  { %5752 = vmatprep.subr.bf16.mxu1 %v13790_v4  ;;  %v13826_v4 = vld [vmem:[#allocation4 + $0xa8c] ss:$16 sps:$4 sm:$0xff]  }
 0x305   :  { %5712 = vmatpush2.bf16.msra.mxu0 %v13785_v60  ;;  %v13823_v60 = vld [vmem:[#allocation4 + $0xa84] ss:$16 sps:$4 sm:$0xff]  }
 0x306   :  { %5753 = vmatpush2.bf16.msra.mxu1 %v13788_v45  ;;  %5713 = vmatprep.subr.bf16.mxu0 %v13793_v10  ;;  %v13829_v45 = vld [vmem:[#allocation4 + $0xa64] ss:$16 sps:$4 sm:$0xff]   ;;  %v13832_v10 = vld [vmem:[#allocation4 + $0xa6c] ss:$16 sps:$4 sm:$0xff]  }
 0x307   :  { %5754 = vmatprep.subr.bf16.mxu1 %v13796_v35  ;;  %v13830_v35 = vld [vmem:[#allocation4 + $0xa68] ss:$16 sps:$4 sm:$0xff]  }
 0x309   :  { %5714 = vmatpush2.bf16.msra.mxu0 %v13791_v39  ;;  %v13827_v39 = vld [vmem:[#allocation4 + $0xa60] ss:$16 sps:$4 sm:$0xff]  }
 0x30a   :  { %5755 = vmatpush2.bf16.msra.mxu1 %v13794_v52  ;;  %5715 = vmatprep.subr.bf16.mxu0 %v13799_v48  ;;  %v13833_v52 = vld [vmem:[#allocation4 + $0xa40] ss:$16 sps:$4 sm:$0xff]   ;;  %v13836_v48 = vld [vmem:[#allocation4 + $0xa48] ss:$16 sps:$4 sm:$0xff]  }
 0x30b   :  { %5756 = vmatprep.subr.bf16.mxu1 %v13802_v24  ;;  %v13844_v24 = vld [vmem:[#allocation4 + $0xa2c] ss:$16 sps:$4 sm:$0xff]  }
 0x30d   :  { %5716 = vmatpush2.bf16.msra.mxu0 %v13797_v46  ;;  %v13841_v46 = vld [vmem:[#allocation4 + $0xa24] ss:$16 sps:$4 sm:$0xff]  }
 0x30e   :  { %5757 = vmatpush2.bf16.msra.mxu1 %v13800_v28  ;;  %6160 = vmatprep.subr.bf16.mxu0 %v13805_v27  ;;  %v13839_v28 = vld [vmem:[#allocation4 + $0xa20] ss:$16 sps:$4 sm:$0xff]   ;;  %v13842_v27 = vld [vmem:[#allocation4 + $0xa28] ss:$16 sps:$4 sm:$0xff]  }
 0x30f   :  { %6201 = vmatprep.subr.bf16.mxu1 %v13808_v47  ;;  %v13847_v47 = vld [vmem:[#allocation4 + $0xa04] ss:$16 sps:$4 sm:$0xff]  }
 0x310   :  { %v4298_v59 = vpop.f32.mrf.mxu0  ;;  %v4339_v31 = vpop.f32.mrf.mxu1  ;;  %5718 = vmatmul.mubr.bf16.vlgmr.msra.gmra.mxu0 %v12862_v15 }
 0x311   :  { %v16764_v7 = vadd.f32 %v4298_v59, %v16753_v56  ;;  %v16767_v8 = vadd.f32 %v4339_v31, %v16755_v6  ;;  %5759 = vmatmul.mubr.bf16.vlgmr.msra.gmra.mxu1 %v12862_v15  ;;  %6161 = vmatpush1.bf16.msra.mxu0 %v13803_v5  ;;  %v13815_v6 = vld [vmem:[#allocation4 + $0xaa0] ss:$16 sps:$4 sm:$0xff]   ;;  %v13850_v5 = vld [vmem:[#allocation4 + $0xa0c] ss:$16 sps:$4 sm:$0xff]   ;;  %v13853_v15 = vld [vmem:[#allocation4 + $0xbe4] ss:$16 sps:$4 sm:$0xff]  }
 0x312   :  { %6192 = vmatprep.mubr.bf16.mxu0 %v12865_v12  ;;  %6202 = vmatpush1.bf16.msra.mxu1 %v13806_v14  ;;  %v4300_v34 = vpop.f32.mrf.mxu0  ;;  %v4341_v26 = vpop.f32.mrf.mxu1  ;;  %v13845_v14 = vld [vmem:[#allocation4 + $0xa00] ss:$16 sps:$4 sm:$0xff]   ;;  %v13854_v59 = vld [vmem:[#allocation4 + $0xbe8] ss:$16 sps:$4 sm:$0xff]   ;;  %v13859_v31 = vld [vmem:[#allocation4 + $0xbc4] ss:$16 sps:$4 sm:$0xff]  }
 0x313   :  { %6233 = vmatprep.mubr.bf16.mxu1 %v12865_v12  ;;  %v16770_v18 = vadd.f32 %v4300_v34, %v16757_v55  ;;  %v16773_v9 = vadd.f32 %v4341_v26, %v16759_v37  ;;  %6162 = vmatprep.subr.bf16.mxu0 %v13811_v53  ;;  %v13821_v55 = vld [vmem:[#allocation4 + $0xa80] ss:$16 sps:$4 sm:$0xff]   ;;  %v13824_v37 = vld [vmem:[#allocation4 + $0xa88] ss:$16 sps:$4 sm:$0xff]   ;;  %v13868_v34 = vld [vmem:[#allocation4 + $0xbac] ss:$16 sps:$4 sm:$0xff]  }
 0x314   :  { %v4302_v56 = vpop.f32.mrf.mxu0  ;;  %v4343_v0 = vpop.f32.mrf.mxu1  ;;  %6203 = vmatprep.subr.bf16.mxu1 %v13814_v32  ;;  %v13848_v53 = vld [vmem:[#allocation4 + $0xa08] ss:$16 sps:$4 sm:$0xff]   ;;  %v13851_v12 = vld [vmem:[#allocation4 + $0xbe0] ss:$16 sps:$4 sm:$0xff]  }
 0x315   :  { %6163 = vmatpush1.bf16.msra.mxu0 %v13809_v62  ;;  %v13856_v62 = vld [vmem:[#allocation4 + $0xbec] ss:$16 sps:$4 sm:$0xff]   ;;  %v13857_v32 = vld [vmem:[#allocation4 + $0xbc0] ss:$16 sps:$4 sm:$0xff]   ;;  %v13866_v56 = vld [vmem:[#allocation4 + $0xba8] ss:$16 sps:$4 sm:$0xff]  }
 0x316   :  { %6204 = vmatpush1.bf16.msra.mxu1 %v13812_v2  ;;  %v4303_v50 = vpop.f32.mrf.mxu0  ;;  %v4344_v22 = vpop.f32.mrf.mxu1  ;;  %6164 = vmatprep.subr.bf16.mxu0 %v13817_v29  ;;  %v13862_v2 = vld [vmem:[#allocation4 + $0xbcc] ss:$16 sps:$4 sm:$0xff]   ;;  %v13860_v29 = vld [vmem:[#allocation4 + $0xbc8] ss:$16 sps:$4 sm:$0xff]   ;;  %v13863_v26 = vld [vmem:[#allocation4 + $0xba0] ss:$16 sps:$4 sm:$0xff]  }
 0x317   :  { %6205 = vmatprep.subr.bf16.mxu1 %v13820_v40  ;;  %v13865_v40 = vld [vmem:[#allocation4 + $0xba4] ss:$16 sps:$4 sm:$0xff]   ;;  %v13869_v50 = vld [vmem:[#allocation4 + $0xb80] ss:$16 sps:$4 sm:$0xff]   ;;  %v13872_v22 = vld [vmem:[#allocation4 + $0xb88] ss:$16 sps:$4 sm:$0xff]  }
 0x318   :  { %v13871_v0 = vld [vmem:[#allocation4 + $0xb84] ss:$16 sps:$4 sm:$0xff]  }
 0x319   :  { %6165 = vmatpush1.bf16.msra.mxu0 %v13815_v6  ;;  %v13874_v6 = vld [vmem:[#allocation4 + $0xb8c] ss:$16 sps:$4 sm:$0xff]  }
 0x31a   :  { %6206 = vmatpush1.bf16.msra.mxu1 %v13818_v63  ;;  %6166 = vmatprep.subr.bf16.mxu0 %v13823_v60  ;;  %v13877_v63 = vld [vmem:[#allocation4 + $0xb64] ss:$16 sps:$4 sm:$0xff]   ;;  %v13880_v60 = vld [vmem:[#allocation4 + $0xb6c] ss:$16 sps:$4 sm:$0xff]  }
 0x31b   :  { %6207 = vmatprep.subr.bf16.mxu1 %v13826_v4  ;;  %v13875_v4 = vld [vmem:[#allocation4 + $0xb60] ss:$16 sps:$4 sm:$0xff]  }
 0x31d   :  { %6167 = vmatpush1.bf16.msra.mxu0 %v13821_v55  ;;  %v13878_v55 = vld [vmem:[#allocation4 + $0xb68] ss:$16 sps:$4 sm:$0xff]  }
 0x31e   :  { %6208 = vmatpush1.bf16.msra.mxu1 %v13824_v37  ;;  %6168 = vmatprep.subr.bf16.mxu0 %v13829_v45  ;;  %v13883_v37 = vld [vmem:[#allocation4 + $0xb44] ss:$16 sps:$4 sm:$0xff]   ;;  %v13886_v45 = vld [vmem:[#allocation4 + $0xb4c] ss:$16 sps:$4 sm:$0xff]  }
 0x31f   :  { %6209 = vmatprep.subr.bf16.mxu1 %v13832_v10  ;;  %v13881_v10 = vld [vmem:[#allocation4 + $0xb40] ss:$16 sps:$4 sm:$0xff]  }
 0x321   :  { %6169 = vmatpush1.bf16.msra.mxu0 %v13827_v39  ;;  %v13884_v39 = vld [vmem:[#allocation4 + $0xb48] ss:$16 sps:$4 sm:$0xff]  }
 0x322   :  { %6210 = vmatpush1.bf16.msra.mxu1 %v13830_v35  ;;  %6170 = vmatprep.subr.bf16.mxu0 %v13835_v36  ;;  %v13889_v35 = vld [vmem:[#allocation4 + $0xb24] ss:$16 sps:$4 sm:$0xff]   ;;  %v13892_v36 = vld [vmem:[#allocation4 + $0xb2c] ss:$16 sps:$4 sm:$0xff]  }
 0x323   :  { %6211 = vmatprep.subr.bf16.mxu1 %v13838_v43  ;;  %v13887_v43 = vld [vmem:[#allocation4 + $0xb20] ss:$16 sps:$4 sm:$0xff]  }
 0x325   :  { %6171 = vmatpush1.bf16.msra.mxu0 %v13833_v52  ;;  %v13890_v52 = vld [vmem:[#allocation4 + $0xb28] ss:$16 sps:$4 sm:$0xff]  }
 0x326   :  { %6212 = vmatpush1.bf16.msra.mxu1 %v13836_v48  ;;  %6172 = vmatprep.subr.bf16.mxu0 %v13841_v46  ;;  %v13895_v48 = vld [vmem:[#allocation4 + $0xb04] ss:$16 sps:$4 sm:$0xff]   ;;  %v13898_v46 = vld [vmem:[#allocation4 + $0xb0c] ss:$16 sps:$4 sm:$0xff]  }
 0x327   :  { %6213 = vmatprep.subr.bf16.mxu1 %v13844_v24  ;;  %v13893_v24 = vld [vmem:[#allocation4 + $0xb00] ss:$16 sps:$4 sm:$0xff]  }
 0x329   :  { %6173 = vmatpush1.bf16.msra.mxu0 %v13839_v28  ;;  %v3319_v28 = vmax.f32 %v16667_v20, 0.0  ;;  %v13910_v20 = vld [vmem:[#allocation4 + $0xccc] ss:$16 sps:$4 sm:$0xff]  }
 0x32a   :  { %6214 = vmatpush1.bf16.msra.mxu1 %v13842_v27  ;;  %6174 = vmatprep.subr.bf16.mxu0 %v13847_v47  ;;  %v13896_v27 = vld [vmem:[#allocation4 + $0xb08] ss:$16 sps:$4 sm:$0xff]   ;;  %v13901_v47 = vld [vmem:[#allocation4 + $0xce4] ss:$16 sps:$4 sm:$0xff]  }
 0x32b   :  { %6215 = vmatprep.subr.bf16.mxu1 %v13850_v5  ;;  %v13904_v5 = vld [vmem:[#allocation4 + $0xcec] ss:$16 sps:$4 sm:$0xff]  }
 0x32d   :  { %6175 = vmatpush1.bf16.msra.mxu0 %v13845_v14  ;;  %v3322_v14 = vmax.f32 %v16680_v21, 0.0 }
 0x32e   :  { %6216 = vmatpush1.bf16.msra.mxu1 %v13848_v53  ;;  %6176 = vmatprep.subr.bf16.mxu0 %v13853_v15  ;;  %v13899_v53 = vld [vmem:[#allocation4 + $0xce0] ss:$16 sps:$4 sm:$0xff]   ;;  %v12864_v15 = vpack.c.bf16 %v3319_v28, %v3319_v28 }
 0x32f   :  { %6217 = vmatprep.subr.bf16.mxu1 %v13856_v62  ;;  %v13902_v62 = vld [vmem:[#allocation4 + $0xce8] ss:$16 sps:$4 sm:$0xff]   ;;  %v13935_v28 = vld [vmem:[#allocation4 + $0xc20] ss:$16 sps:$4 sm:$0xff]  }
 0x331   :  { %6177 = vmatpush2.bf16.msra.mxu0 %v13851_v12  ;;  %v13907_v12 = vld [vmem:[#allocation4 + $0xcc4] ss:$16 sps:$4 sm:$0xff]  }
 0x332   :  { %6218 = vmatpush2.bf16.msra.mxu1 %v13854_v59  ;;  %6178 = vmatprep.subr.bf16.mxu0 %v13859_v31  ;;  %v12867_v59 = vpack.c.bf16 %v3322_v14, %v3322_v14  ;;  %v13941_v14 = vld [vmem:[#allocation4 + $0xc00] ss:$16 sps:$4 sm:$0xff]  }
 0x333   :  { %6219 = vmatprep.subr.bf16.mxu1 %v13862_v2 }
 0x335   :  { %6179 = vmatpush2.bf16.msra.mxu0 %v13857_v32 }
 0x336   :  { %6220 = vmatpush2.bf16.msra.mxu1 %v13860_v29  ;;  %6180 = vmatprep.subr.bf16.mxu0 %v13865_v40  ;;  %v13905_v29 = vld [vmem:[#allocation4 + $0xcc0] ss:$16 sps:$4 sm:$0xff]  }
 0x337   :  { %6221 = vmatprep.subr.bf16.mxu1 %v13868_v34  ;;  %v13908_v34 = vld [vmem:[#allocation4 + $0xcc8] ss:$16 sps:$4 sm:$0xff]  }
 0x339   :  { %6181 = vmatpush2.bf16.msra.mxu0 %v13863_v26  ;;  %v13913_v26 = vld [vmem:[#allocation4 + $0xca4] ss:$16 sps:$4 sm:$0xff]  }
 0x33a   :  { %6222 = vmatpush2.bf16.msra.mxu1 %v13866_v56  ;;  %6182 = vmatprep.subr.bf16.mxu0 %v13871_v0 }
 0x33b   :  { %6223 = vmatprep.subr.bf16.mxu1 %v13874_v6 }
 0x33d   :  { %6183 = vmatpush2.bf16.msra.mxu0 %v13869_v50 }
 0x33e   :  { %6224 = vmatpush2.bf16.msra.mxu1 %v13872_v22  ;;  %6184 = vmatprep.subr.bf16.mxu0 %v13877_v63 }
 0x33f   :  { %6225 = vmatprep.subr.bf16.mxu1 %v13880_v60  ;;  %v13914_v60 = vld [vmem:[#allocation4 + $0xca8] ss:$16 sps:$4 sm:$0xff]  }
 0x341   :  { %6185 = vmatpush2.bf16.msra.mxu0 %v13875_v4  ;;  %v13919_v4 = vld [vmem:[#allocation4 + $0xc84] ss:$16 sps:$4 sm:$0xff]  }
 0x342   :  { %6226 = vmatpush2.bf16.msra.mxu1 %v13878_v55  ;;  %6186 = vmatprep.subr.bf16.mxu0 %v13883_v37  ;;  %v13917_v37 = vld [vmem:[#allocation4 + $0xc80] ss:$16 sps:$4 sm:$0xff]  }
 0x343   :  { %6227 = vmatprep.subr.bf16.mxu1 %v13886_v45  ;;  %v13920_v45 = vld [vmem:[#allocation4 + $0xc88] ss:$16 sps:$4 sm:$0xff]  }
 0x345   :  { %6187 = vmatpush2.bf16.msra.mxu0 %v13881_v10  ;;  %v13928_v10 = vld [vmem:[#allocation4 + $0xc6c] ss:$16 sps:$4 sm:$0xff]  }
 0x346   :  { %6228 = vmatpush2.bf16.msra.mxu1 %v13884_v39  ;;  %6188 = vmatprep.subr.bf16.mxu0 %v13889_v35  ;;  %v13923_v39 = vld [vmem:[#allocation4 + $0xc60] ss:$16 sps:$4 sm:$0xff]   ;;  %v13926_v35 = vld [vmem:[#allocation4 + $0xc68] ss:$16 sps:$4 sm:$0xff]  }
 0x347   :  { %6229 = vmatprep.subr.bf16.mxu1 %v13892_v36  ;;  %v13931_v36 = vld [vmem:[#allocation4 + $0xc44] ss:$16 sps:$4 sm:$0xff]  }
 0x349   :  { %6189 = vmatpush2.bf16.msra.mxu0 %v13887_v43  ;;  %v13934_v43 = vld [vmem:[#allocation4 + $0xc4c] ss:$16 sps:$4 sm:$0xff]  }
 0x34a   :  { %6230 = vmatpush2.bf16.msra.mxu1 %v13890_v52  ;;  %6190 = vmatprep.subr.bf16.mxu0 %v13895_v48  ;;  %v13929_v52 = vld [vmem:[#allocation4 + $0xc40] ss:$16 sps:$4 sm:$0xff]   ;;  %v13932_v48 = vld [vmem:[#allocation4 + $0xc48] ss:$16 sps:$4 sm:$0xff]  }
 0x34b   :  { %6231 = vmatprep.subr.bf16.mxu1 %v13898_v46  ;;  %v13937_v46 = vld [vmem:[#allocation4 + $0xc24] ss:$16 sps:$4 sm:$0xff]  }
 0x34d   :  { %6191 = vmatpush2.bf16.msra.mxu0 %v13893_v24  ;;  %v13940_v24 = vld [vmem:[#allocation4 + $0xc2c] ss:$16 sps:$4 sm:$0xff]  }
 0x34e   :  { %6232 = vmatpush2.bf16.msra.mxu1 %v13896_v27  ;;  %6635 = vmatprep.subr.bf16.mxu0 %v13901_v47  ;;  %v13938_v27 = vld [vmem:[#allocation4 + $0xc28] ss:$16 sps:$4 sm:$0xff]   ;;  %v13943_v47 = vld [vmem:[#allocation4 + $0xc04] ss:$16 sps:$4 sm:$0xff]  }
 0x34f   :  { %6676 = vmatprep.subr.bf16.mxu1 %v13904_v5  ;;  %v13946_v5 = vld [vmem:[#allocation4 + $0xc0c] ss:$16 sps:$4 sm:$0xff]  }
 0x350   :  { %v4769_v31 = vpop.f32.mrf.mxu0  ;;  %6193 = vmatmul.mubr.bf16.vlgmr.msra.gmra.mxu0 %v12864_v15 }
 0x351   :  { %v16778_v2 = vadd.f32 %v4769_v31, %v16764_v7  ;;  %v4810_v32 = vpop.f32.mrf.mxu1  ;;  %6234 = vmatmul.mubr.bf16.vlgmr.msra.gmra.mxu1 %v12864_v15  ;;  %6636 = vmatpush1.bf16.msra.mxu0 %v13899_v53  ;;  %v13916_v7 = vld [vmem:[#allocation4 + $0xcac] ss:$16 sps:$4 sm:$0xff]   ;;  %v13944_v53 = vld [vmem:[#allocation4 + $0xc08] ss:$16 sps:$4 sm:$0xff]   ;;  %v13949_v15 = vld [vmem:[#allocation4 + $0xde4] ss:$16 sps:$4 sm:$0xff]  }
 0x352   :  { %v16781_v21 = vadd.f32 %v4810_v32, %v16767_v8  ;;  %6667 = vmatprep.mubr.bf16.mxu0 %v12867_v59  ;;  %6677 = vmatpush1.bf16.msra.mxu1 %v13902_v62  ;;  %v4771_v40 = vpop.f32.mrf.mxu0  ;;  %v13911_v8 = vld [vmem:[#allocation4 + $0xca0] ss:$16 sps:$4 sm:$0xff]   ;;  %v13952_v62 = vld [vmem:[#allocation4 + $0xdec] ss:$16 sps:$4 sm:$0xff]   ;;  %v13955_v31 = vld [vmem:[#allocation4 + $0xdc4] ss:$16 sps:$4 sm:$0xff]  }
 0x353   :  { %6708 = vmatprep.mubr.bf16.mxu1 %v12867_v59  ;;  %v16784_v56 = vadd.f32 %v4771_v40, %v16770_v18  ;;  %v4812_v0 = vpop.f32.mrf.mxu1  ;;  %6637 = vmatprep.subr.bf16.mxu0 %v13907_v12  ;;  %v13922_v18 = vld [vmem:[#allocation4 + $0xc8c] ss:$16 sps:$4 sm:$0xff]   ;;  %v13947_v12 = vld [vmem:[#allocation4 + $0xde0] ss:$16 sps:$4 sm:$0xff]   ;;  %v13950_v59 = vld [vmem:[#allocation4 + $0xde8] ss:$16 sps:$4 sm:$0xff]  }
 0x354   :  { %v16787_v6 = vadd.f32 %v4812_v0, %v16773_v9  ;;  %v4773_v50 = vpop.f32.mrf.mxu0  ;;  %6678 = vmatprep.subr.bf16.mxu1 %v13910_v20  ;;  %v13925_v9 = vld [vmem:[#allocation4 + $0xc64] ss:$16 sps:$4 sm:$0xff]   ;;  %v13958_v20 = vld [vmem:[#allocation4 + $0xdcc] ss:$16 sps:$4 sm:$0xff]   ;;  %v13953_v32 = vld [vmem:[#allocation4 + $0xdc0] ss:$16 sps:$4 sm:$0xff]  }
 0x355   :  { %v4814_v22 = vpop.f32.mrf.mxu1  ;;  %6638 = vmatpush1.bf16.msra.mxu0 %v13905_v29  ;;  %v13956_v29 = vld [vmem:[#allocation4 + $0xdc8] ss:$16 sps:$4 sm:$0xff]   ;;  %v13961_v40 = vld [vmem:[#allocation4 + $0xda4] ss:$16 sps:$4 sm:$0xff]   ;;  %v13970_v50 = vld [vmem:[#allocation4 + $0xd8c] ss:$16 sps:$4 sm:$0xff]  }
 0x356   :  { %6679 = vmatpush1.bf16.msra.mxu1 %v13908_v34  ;;  %v4774_v63 = vpop.f32.mrf.mxu0  ;;  %6639 = vmatprep.subr.bf16.mxu0 %v13913_v26  ;;  %v13964_v34 = vld [vmem:[#allocation4 + $0xdac] ss:$16 sps:$4 sm:$0xff]   ;;  %v13959_v26 = vld [vmem:[#allocation4 + $0xda0] ss:$16 sps:$4 sm:$0xff]   ;;  %v13962_v0 = vld [vmem:[#allocation4 + $0xda8] ss:$16 sps:$4 sm:$0xff]  }
 0x357   :  { %v4815_v55 = vpop.f32.mrf.mxu1  ;;  %6680 = vmatprep.subr.bf16.mxu1 %v13916_v7  ;;  %v13967_v7 = vld [vmem:[#allocation4 + $0xd84] ss:$16 sps:$4 sm:$0xff]   ;;  %v13965_v22 = vld [vmem:[#allocation4 + $0xd80] ss:$16 sps:$4 sm:$0xff]  }
 0x358   :  { %v13973_v63 = vld [vmem:[#allocation4 + $0xd64] ss:$16 sps:$4 sm:$0xff]   ;;  %v13974_v55 = vld [vmem:[#allocation4 + $0xd68] ss:$16 sps:$4 sm:$0xff]  }
 0x359   :  { %6640 = vmatpush1.bf16.msra.mxu0 %v13911_v8  ;;  %v13968_v8 = vld [vmem:[#allocation4 + $0xd88] ss:$16 sps:$4 sm:$0xff]  }
 0x35a   :  { %6681 = vmatpush1.bf16.msra.mxu1 %v13914_v60  ;;  %6641 = vmatprep.subr.bf16.mxu0 %v13919_v4  ;;  %v13976_v60 = vld [vmem:[#allocation4 + $0xd6c] ss:$16 sps:$4 sm:$0xff]   ;;  %v13971_v4 = vld [vmem:[#allocation4 + $0xd60] ss:$16 sps:$4 sm:$0xff]  }
 0x35b   :  { %6682 = vmatprep.subr.bf16.mxu1 %v13922_v18  ;;  %v13979_v18 = vld [vmem:[#allocation4 + $0xd44] ss:$16 sps:$4 sm:$0xff]  }
 0x35d   :  { %6642 = vmatpush1.bf16.msra.mxu0 %v13917_v37  ;;  %v13982_v37 = vld [vmem:[#allocation4 + $0xd4c] ss:$16 sps:$4 sm:$0xff]  }
 0x35e   :  { %6683 = vmatpush1.bf16.msra.mxu1 %v13920_v45  ;;  %6643 = vmatprep.subr.bf16.mxu0 %v13925_v9  ;;  %v13977_v45 = vld [vmem:[#allocation4 + $0xd40] ss:$16 sps:$4 sm:$0xff]   ;;  %v13980_v9 = vld [vmem:[#allocation4 + $0xd48] ss:$16 sps:$4 sm:$0xff]  }
 0x35f   :  { %6684 = vmatprep.subr.bf16.mxu1 %v13928_v10  ;;  %v13985_v10 = vld [vmem:[#allocation4 + $0xd24] ss:$16 sps:$4 sm:$0xff]  }
 0x361   :  { %6644 = vmatpush1.bf16.msra.mxu0 %v13923_v39  ;;  %v13988_v39 = vld [vmem:[#allocation4 + $0xd2c] ss:$16 sps:$4 sm:$0xff]  }
 0x362   :  { %6685 = vmatpush1.bf16.msra.mxu1 %v13926_v35  ;;  %6645 = vmatprep.subr.bf16.mxu0 %v13931_v36  ;;  %v13983_v35 = vld [vmem:[#allocation4 + $0xd20] ss:$16 sps:$4 sm:$0xff]   ;;  %v13986_v36 = vld [vmem:[#allocation4 + $0xd28] ss:$16 sps:$4 sm:$0xff]  }
 0x363   :  { %6686 = vmatprep.subr.bf16.mxu1 %v13934_v43  ;;  %v13991_v43 = vld [vmem:[#allocation4 + $0xd04] ss:$16 sps:$4 sm:$0xff]  }
 0x365   :  { %6646 = vmatpush1.bf16.msra.mxu0 %v13929_v52  ;;  %v13994_v52 = vld [vmem:[#allocation4 + $0xd0c] ss:$16 sps:$4 sm:$0xff]  }
 0x366   :  { %6687 = vmatpush1.bf16.msra.mxu1 %v13932_v48  ;;  %6647 = vmatprep.subr.bf16.mxu0 %v13937_v46  ;;  %v13989_v48 = vld [vmem:[#allocation4 + $0xd00] ss:$16 sps:$4 sm:$0xff]   ;;  %v3321_v46 = vmax.f32 %v16676_v11, 0.0  ;;  %v14006_v11 = vld [vmem:[#allocation4 + $0xecc] ss:$16 sps:$4 sm:$0xff]  }
 0x367   :  { %6688 = vmatprep.subr.bf16.mxu1 %v13940_v24  ;;  %v13992_v24 = vld [vmem:[#allocation4 + $0xd08] ss:$16 sps:$4 sm:$0xff]  }
 0x369   :  { %6648 = vmatpush1.bf16.msra.mxu0 %v13935_v28  ;;  %v13997_v28 = vld [vmem:[#allocation4 + $0xee4] ss:$16 sps:$4 sm:$0xff]  }
 0x36a   :  { %6689 = vmatpush1.bf16.msra.mxu1 %v13938_v27  ;;  %6649 = vmatprep.subr.bf16.mxu0 %v13943_v47  ;;  %v14000_v27 = vld [vmem:[#allocation4 + $0xeec] ss:$16 sps:$4 sm:$0xff]   ;;  %v3324_v47 = vmax.f32 %v16687_v3, 0.0 }
 0x36b   :  { %6690 = vmatprep.subr.bf16.mxu1 %v13946_v5  ;;  %v13995_v5 = vld [vmem:[#allocation4 + $0xee0] ss:$16 sps:$4 sm:$0xff]  }
 0x36d   :  { %6650 = vmatpush1.bf16.msra.mxu0 %v13941_v14  ;;  %v12866_v14 = vpack.c.bf16 %v3321_v46, %v3321_v46  ;;  %v14039_v46 = vld [vmem:[#allocation4 + $0xe04] ss:$16 sps:$4 sm:$0xff]  }
 0x36e   :  { %6691 = vmatpush1.bf16.msra.mxu1 %v13944_v53  ;;  %6651 = vmatprep.subr.bf16.mxu0 %v13949_v15  ;;  %v13998_v53 = vld [vmem:[#allocation4 + $0xee8] ss:$16 sps:$4 sm:$0xff]   ;;  %v14003_v15 = vld [vmem:[#allocation4 + $0xec4] ss:$16 sps:$4 sm:$0xff]  }
 0x36f   :  { %6692 = vmatprep.subr.bf16.mxu1 %v13952_v62  ;;  %v12869_v62 = vpack.c.bf16 %v3324_v47, %v3324_v47  ;;  %v14045_v47 = vld [vmem:[#allocation4 + $0xfe4] ss:$16 sps:$4 sm:$0xff]  }
 0x371   :  { %6652 = vmatpush2.bf16.msra.mxu0 %v13947_v12 }
 0x372   :  { %6693 = vmatpush2.bf16.msra.mxu1 %v13950_v59  ;;  %6653 = vmatprep.subr.bf16.mxu0 %v13955_v31 }
 0x373   :  { %6694 = vmatprep.subr.bf16.mxu1 %v13958_v20  ;;  %v14001_v20 = vld [vmem:[#allocation4 + $0xec0] ss:$16 sps:$4 sm:$0xff]  }
 0x375   :  { %6654 = vmatpush2.bf16.msra.mxu0 %v13953_v32 }
 0x376   :  { %6695 = vmatpush2.bf16.msra.mxu1 %v13956_v29  ;;  %6655 = vmatprep.subr.bf16.mxu0 %v13961_v40  ;;  %v14004_v29 = vld [vmem:[#allocation4 + $0xec8] ss:$16 sps:$4 sm:$0xff]   ;;  %v14009_v40 = vld [vmem:[#allocation4 + $0xea4] ss:$16 sps:$4 sm:$0xff]  }
 0x377   :  { %6696 = vmatprep.subr.bf16.mxu1 %v13964_v34 }
 0x379   :  { %6656 = vmatpush2.bf16.msra.mxu0 %v13959_v26 }
 0x37a   :  { %6697 = vmatpush2.bf16.msra.mxu1 %v13962_v0  ;;  %6657 = vmatprep.subr.bf16.mxu0 %v13967_v7 }
 0x37b   :  { %6698 = vmatprep.subr.bf16.mxu1 %v13970_v50 }
 0x37d   :  { %6658 = vmatpush2.bf16.msra.mxu0 %v13965_v22 }
 0x37e   :  { %6699 = vmatpush2.bf16.msra.mxu1 %v13968_v8  ;;  %6659 = vmatprep.subr.bf16.mxu0 %v13973_v63  ;;  %v14010_v8 = vld [vmem:[#allocation4 + $0xea8] ss:$16 sps:$4 sm:$0xff]   ;;  %v14015_v63 = vld [vmem:[#allocation4 + $0xe84] ss:$16 sps:$4 sm:$0xff]  }
 0x37f   :  { %6700 = vmatprep.subr.bf16.mxu1 %v13976_v60 }
 0x381   :  { %6660 = vmatpush2.bf16.msra.mxu0 %v13971_v4  ;;  %v14013_v4 = vld [vmem:[#allocation4 + $0xe80] ss:$16 sps:$4 sm:$0xff]  }
 0x382   :  { %6701 = vmatpush2.bf16.msra.mxu1 %v13974_v55  ;;  %6661 = vmatprep.subr.bf16.mxu0 %v13979_v18  ;;  %v14016_v55 = vld [vmem:[#allocation4 + $0xe88] ss:$16 sps:$4 sm:$0xff]   ;;  %v14024_v18 = vld [vmem:[#allocation4 + $0xe6c] ss:$16 sps:$4 sm:$0xff]  }
 0x383   :  { %6702 = vmatprep.subr.bf16.mxu1 %v13982_v37  ;;  %v14019_v37 = vld [vmem:[#allocation4 + $0xe60] ss:$16 sps:$4 sm:$0xff]  }
 0x385   :  { %6662 = vmatpush2.bf16.msra.mxu0 %v13977_v45  ;;  %v14022_v45 = vld [vmem:[#allocation4 + $0xe68] ss:$16 sps:$4 sm:$0xff]  }
 0x386   :  { %6703 = vmatpush2.bf16.msra.mxu1 %v13980_v9  ;;  %6663 = vmatprep.subr.bf16.mxu0 %v13985_v10  ;;  %v14027_v9 = vld [vmem:[#allocation4 + $0xe44] ss:$16 sps:$4 sm:$0xff]   ;;  %v14030_v10 = vld [vmem:[#allocation4 + $0xe4c] ss:$16 sps:$4 sm:$0xff]  }
 0x387   :  { %6704 = vmatprep.subr.bf16.mxu1 %v13988_v39  ;;  %v14025_v39 = vld [vmem:[#allocation4 + $0xe40] ss:$16 sps:$4 sm:$0xff]  }
 0x389   :  { %6664 = vmatpush2.bf16.msra.mxu0 %v13983_v35  ;;  %v14028_v35 = vld [vmem:[#allocation4 + $0xe48] ss:$16 sps:$4 sm:$0xff]  }
 0x38a   :  { %6705 = vmatpush2.bf16.msra.mxu1 %v13986_v36  ;;  %6665 = vmatprep.subr.bf16.mxu0 %v13991_v43  ;;  %v14033_v36 = vld [vmem:[#allocation4 + $0xe24] ss:$16 sps:$4 sm:$0xff]   ;;  %v14036_v43 = vld [vmem:[#allocation4 + $0xe2c] ss:$16 sps:$4 sm:$0xff]  }
 0x38b   :  { %6706 = vmatprep.subr.bf16.mxu1 %v13994_v52  ;;  %v14031_v52 = vld [vmem:[#allocation4 + $0xe20] ss:$16 sps:$4 sm:$0xff]  }
 0x38d   :  { %6666 = vmatpush2.bf16.msra.mxu0 %v13989_v48  ;;  %v14034_v48 = vld [vmem:[#allocation4 + $0xe28] ss:$16 sps:$4 sm:$0xff]  }
 0x38e   :  { %6707 = vmatpush2.bf16.msra.mxu1 %v13992_v24  ;;  %7110 = vmatprep.subr.bf16.mxu0 %v13997_v28  ;;  %v14042_v24 = vld [vmem:[#allocation4 + $0xe0c] ss:$16 sps:$4 sm:$0xff]   ;;  %v14037_v28 = vld [vmem:[#allocation4 + $0xe00] ss:$16 sps:$4 sm:$0xff]  }
 0x38f   :  { %7151 = vmatprep.subr.bf16.mxu1 %v14000_v27  ;;  %v14040_v27 = vld [vmem:[#allocation4 + $0xe08] ss:$16 sps:$4 sm:$0xff]  }
 0x390   :  { %v5244_v12 = vpop.f32.mrf.mxu0  ;;  %6668 = vmatmul.mubr.bf16.vlgmr.msra.gmra.mxu0 %v12866_v14 }
 0x391   :  { %v16792_v59 = vadd.f32 %v5244_v12, %v16778_v2  ;;  %v5285_v31 = vpop.f32.mrf.mxu1  ;;  %6709 = vmatmul.mubr.bf16.vlgmr.msra.gmra.mxu1 %v12866_v14  ;;  %7111 = vmatpush1.bf16.msra.mxu0 %v13995_v5  ;;  %v14012_v2 = vld [vmem:[#allocation4 + $0xeac] ss:$16 sps:$4 sm:$0xff]   ;;  %v14043_v14 = vld [vmem:[#allocation4 + $0xfe0] ss:$16 sps:$4 sm:$0xff]  }
 0x392   :  { %v16795_v3 = vadd.f32 %v5285_v31, %v16781_v21  ;;  %7142 = vmatprep.mubr.bf16.mxu0 %v12869_v62  ;;  %7152 = vmatpush1.bf16.msra.mxu1 %v13998_v53  ;;  %v5246_v32 = vpop.f32.mrf.mxu0  ;;  %v14007_v21 = vld [vmem:[#allocation4 + $0xea0] ss:$16 sps:$4 sm:$0xff]   ;;  %v14048_v5 = vld [vmem:[#allocation4 + $0xfec] ss:$16 sps:$4 sm:$0xff]   ;;  %v14046_v53 = vld [vmem:[#allocation4 + $0xfe8] ss:$16 sps:$4 sm:$0xff]  }
 0x393   :  { %7183 = vmatprep.mubr.bf16.mxu1 %v12869_v62  ;;  %v16798_v34 = vadd.f32 %v5246_v32, %v16784_v56  ;;  %v5287_v26 = vpop.f32.mrf.mxu1  ;;  %7112 = vmatprep.subr.bf16.mxu0 %v14003_v15  ;;  %v14018_v56 = vld [vmem:[#allocation4 + $0xe8c] ss:$16 sps:$4 sm:$0xff]   ;;  %v14051_v15 = vld [vmem:[#allocation4 + $0xfc4] ss:$16 sps:$4 sm:$0xff]   ;;  %v14049_v12 = vld [vmem:[#allocation4 + $0xfc0] ss:$16 sps:$4 sm:$0xff]  }
 0x394   :  { %v16801_v0 = vadd.f32 %v5287_v26, %v16787_v6  ;;  %v5248_v7 = vpop.f32.mrf.mxu0  ;;  %7153 = vmatprep.subr.bf16.mxu1 %v14006_v11  ;;  %v14021_v6 = vld [vmem:[#allocation4 + $0xe64] ss:$16 sps:$4 sm:$0xff]   ;;  %v14054_v62 = vld [vmem:[#allocation4 + $0xfcc] ss:$16 sps:$4 sm:$0xff]   ;;  %v14052_v11 = vld [vmem:[#allocation4 + $0xfc8] ss:$16 sps:$4 sm:$0xff]  }
 0x395   :  { %v5289_v50 = vpop.f32.mrf.mxu1  ;;  %7113 = vmatpush1.bf16.msra.mxu0 %v14001_v20  ;;  %v14057_v31 = vld [vmem:[#allocation4 + $0xfa4] ss:$16 sps:$4 sm:$0xff]   ;;  %v14060_v20 = vld [vmem:[#allocation4 + $0xfac] ss:$16 sps:$4 sm:$0xff]   ;;  %v14055_v32 = vld [vmem:[#allocation4 + $0xfa0] ss:$16 sps:$4 sm:$0xff]  }
 0x396   :  { %7154 = vmatpush1.bf16.msra.mxu1 %v14004_v29  ;;  %v5249_v22 = vpop.f32.mrf.mxu0  ;;  %7114 = vmatprep.subr.bf16.mxu0 %v14009_v40  ;;  %v14058_v29 = vld [vmem:[#allocation4 + $0xfa8] ss:$16 sps:$4 sm:$0xff]   ;;  %v14063_v40 = vld [vmem:[#allocation4 + $0xf84] ss:$16 sps:$4 sm:$0xff]   ;;  %v14066_v26 = vld [vmem:[#allocation4 + $0xf8c] ss:$16 sps:$4 sm:$0xff]  }
 0x397   :  { %v5290_v60 = vpop.f32.mrf.mxu1  ;;  %7155 = vmatprep.subr.bf16.mxu1 %v14012_v2  ;;  %v14061_v2 = vld [vmem:[#allocation4 + $0xf80] ss:$16 sps:$4 sm:$0xff]   ;;  %v14064_v7 = vld [vmem:[#allocation4 + $0xf88] ss:$16 sps:$4 sm:$0xff]   ;;  %v14069_v50 = vld [vmem:[#allocation4 + $0xf64] ss:$16 sps:$4 sm:$0xff]  }
 0x398   :  { %v14067_v22 = vld [vmem:[#allocation4 + $0xf60] ss:$16 sps:$4 sm:$0xff]   ;;  %v14078_v60 = vld [vmem:[#allocation4 + $0xf4c] ss:$16 sps:$4 sm:$0xff]  }
 0x399   :  { %7115 = vmatpush1.bf16.msra.mxu0 %v14007_v21  ;;  %v14072_v21 = vld [vmem:[#allocation4 + $0xf6c] ss:$16 sps:$4 sm:$0xff]  }
 0x39a   :  { %7156 = vmatpush1.bf16.msra.mxu1 %v14010_v8  ;;  %7116 = vmatprep.subr.bf16.mxu0 %v14015_v63  ;;  %v14070_v8 = vld [vmem:[#allocation4 + $0xf68] ss:$16 sps:$4 sm:$0xff]   ;;  %v14075_v63 = vld [vmem:[#allocation4 + $0xf44] ss:$16 sps:$4 sm:$0xff]  }
 0x39b   :  { %7157 = vmatprep.subr.bf16.mxu1 %v14018_v56  ;;  %v14073_v56 = vld [vmem:[#allocation4 + $0xf40] ss:$16 sps:$4 sm:$0xff]  }
 0x39d   :  { %7117 = vmatpush1.bf16.msra.mxu0 %v14013_v4  ;;  %v14076_v4 = vld [vmem:[#allocation4 + $0xf48] ss:$16 sps:$4 sm:$0xff]  }
 0x39e   :  { %7158 = vmatpush1.bf16.msra.mxu1 %v14016_v55  ;;  %7118 = vmatprep.subr.bf16.mxu0 %v14021_v6  ;;  %v14081_v55 = vld [vmem:[#allocation4 + $0xf24] ss:$16 sps:$4 sm:$0xff]   ;;  %v14084_v6 = vld [vmem:[#allocation4 + $0xf2c] ss:$16 sps:$4 sm:$0xff]  }
 0x39f   :  { %7159 = vmatprep.subr.bf16.mxu1 %v14024_v18  ;;  %v14079_v18 = vld [vmem:[#allocation4 + $0xf20] ss:$16 sps:$4 sm:$0xff]  }
 0x3a1   :  { %7119 = vmatpush1.bf16.msra.mxu0 %v14019_v37  ;;  %v14082_v37 = vld [vmem:[#allocation4 + $0xf28] ss:$16 sps:$4 sm:$0xff]  }
 0x3a2   :  { %7160 = vmatpush1.bf16.msra.mxu1 %v14022_v45  ;;  %7120 = vmatprep.subr.bf16.mxu0 %v14027_v9  ;;  %v14087_v45 = vld [vmem:[#allocation4 + $0xf04] ss:$16 sps:$4 sm:$0xff]   ;;  %v14090_v9 = vld [vmem:[#allocation4 + $0xf0c] ss:$16 sps:$4 sm:$0xff]  }
 0x3a3   :  { %7161 = vmatprep.subr.bf16.mxu1 %v14030_v10  ;;  %v14085_v10 = vld [vmem:[#allocation4 + $0xf00] ss:$16 sps:$4 sm:$0xff]  }
 0x3a5   :  { %7121 = vmatpush1.bf16.msra.mxu0 %v14025_v39  ;;  %v3323_v39 = vmax.f32 %v16683_v30, 0.0  ;;  %v14102_v30 = vld [vmem:[#allocation4 + $0x10cc] ss:$16 sps:$4 sm:$0xff]  }
 0x3a6   :  { %7162 = vmatpush1.bf16.msra.mxu1 %v14028_v35  ;;  %7122 = vmatprep.subr.bf16.mxu0 %v14033_v36  ;;  %v14088_v35 = vld [vmem:[#allocation4 + $0xf08] ss:$16 sps:$4 sm:$0xff]   ;;  %v14093_v36 = vld [vmem:[#allocation4 + $0x10e4] ss:$16 sps:$4 sm:$0xff]  }
 0x3a7   :  { %7163 = vmatprep.subr.bf16.mxu1 %v14036_v43  ;;  %v14096_v43 = vld [vmem:[#allocation4 + $0x10ec] ss:$16 sps:$4 sm:$0xff]  }
 0x3a9   :  { %7123 = vmatpush1.bf16.msra.mxu0 %v14031_v52  ;;  %v3326_v52 = vmax.f32 %v16694_v38, 0.0 }
 0x3aa   :  { %7164 = vmatpush1.bf16.msra.mxu1 %v14034_v48  ;;  %7124 = vmatprep.subr.bf16.mxu0 %v14039_v46  ;;  %v14091_v48 = vld [vmem:[#allocation4 + $0x10e0] ss:$16 sps:$4 sm:$0xff]   ;;  %v12868_v46 = vpack.c.bf16 %v3323_v39, %v3323_v39 }
 0x3ab   :  { %7165 = vmatprep.subr.bf16.mxu1 %v14042_v24  ;;  %v14094_v24 = vld [vmem:[#allocation4 + $0x10e8] ss:$16 sps:$4 sm:$0xff]   ;;  %v14133_v39 = vld [vmem:[#allocation4 + $0x1000] ss:$16 sps:$4 sm:$0xff]  }
 0x3ad   :  { %7125 = vmatpush1.bf16.msra.mxu0 %v14037_v28  ;;  %v14099_v28 = vld [vmem:[#allocation4 + $0x10c4] ss:$16 sps:$4 sm:$0xff]  }
 0x3ae   :  { %7166 = vmatpush1.bf16.msra.mxu1 %v14040_v27  ;;  %7126 = vmatprep.subr.bf16.mxu0 %v14045_v47  ;;  %v12871_v27 = vpack.c.bf16 %v3326_v52, %v3326_v52  ;;  %v14139_v52 = vld [vmem:[#allocation4 + $0x11e0] ss:$16 sps:$4 sm:$0xff]  }
 0x3af   :  { %7167 = vmatprep.subr.bf16.mxu1 %v14048_v5 }
 0x3b1   :  { %7127 = vmatpush2.bf16.msra.mxu0 %v14043_v14 }
 0x3b2   :  { %7168 = vmatpush2.bf16.msra.mxu1 %v14046_v53  ;;  %7128 = vmatprep.subr.bf16.mxu0 %v14051_v15  ;;  %v14097_v53 = vld [vmem:[#allocation4 + $0x10c0] ss:$16 sps:$4 sm:$0xff]  }
 0x3b3   :  { %7169 = vmatprep.subr.bf16.mxu1 %v14054_v62  ;;  %v14100_v62 = vld [vmem:[#allocation4 + $0x10c8] ss:$16 sps:$4 sm:$0xff]  }
 0x3b5   :  { %7129 = vmatpush2.bf16.msra.mxu0 %v14049_v12  ;;  %v14105_v12 = vld [vmem:[#allocation4 + $0x10a4] ss:$16 sps:$4 sm:$0xff]  }
 0x3b6   :  { %7170 = vmatpush2.bf16.msra.mxu1 %v14052_v11  ;;  %7130 = vmatprep.subr.bf16.mxu0 %v14057_v31 }
 0x3b7   :  { %7171 = vmatprep.subr.bf16.mxu1 %v14060_v20 }
 0x3b9   :  { %7131 = vmatpush2.bf16.msra.mxu0 %v14055_v32 }
 0x3ba   :  { %7172 = vmatpush2.bf16.msra.mxu1 %v14058_v29  ;;  %7132 = vmatprep.subr.bf16.mxu0 %v14063_v40 }
 0x3bb   :  { %7173 = vmatprep.subr.bf16.mxu1 %v14066_v26  ;;  %v14106_v26 = vld [vmem:[#allocation4 + $0x10a8] ss:$16 sps:$4 sm:$0xff]  }
 0x3bd   :  { %7133 = vmatpush2.bf16.msra.mxu0 %v14061_v2  ;;  %v14111_v2 = vld [vmem:[#allocation4 + $0x1084] ss:$16 sps:$4 sm:$0xff]  }
 0x3be   :  { %7174 = vmatpush2.bf16.msra.mxu1 %v14064_v7  ;;  %7134 = vmatprep.subr.bf16.mxu0 %v14069_v50  ;;  %v14109_v50 = vld [vmem:[#allocation4 + $0x1080] ss:$16 sps:$4 sm:$0xff]  }
 0x3bf   :  { %7175 = vmatprep.subr.bf16.mxu1 %v14072_v21  ;;  %v14112_v21 = vld [vmem:[#allocation4 + $0x1088] ss:$16 sps:$4 sm:$0xff]  }
 0x3c1   :  { %7135 = vmatpush2.bf16.msra.mxu0 %v14067_v22  ;;  %v14120_v22 = vld [vmem:[#allocation4 + $0x106c] ss:$16 sps:$4 sm:$0xff]  }
 0x3c2   :  { %7176 = vmatpush2.bf16.msra.mxu1 %v14070_v8  ;;  %7136 = vmatprep.subr.bf16.mxu0 %v14075_v63  ;;  %v14115_v8 = vld [vmem:[#allocation4 + $0x1060] ss:$16 sps:$4 sm:$0xff]   ;;  %v14118_v63 = vld [vmem:[#allocation4 + $0x1068] ss:$16 sps:$4 sm:$0xff]  }
 0x3c3   :  { %7177 = vmatprep.subr.bf16.mxu1 %v14078_v60  ;;  %v14123_v60 = vld [vmem:[#allocation4 + $0x1044] ss:$16 sps:$4 sm:$0xff]  }
 0x3c5   :  { %7137 = vmatpush2.bf16.msra.mxu0 %v14073_v56  ;;  %v14126_v56 = vld [vmem:[#allocation4 + $0x104c] ss:$16 sps:$4 sm:$0xff]  }
 0x3c6   :  { %7178 = vmatpush2.bf16.msra.mxu1 %v14076_v4  ;;  %7138 = vmatprep.subr.bf16.mxu0 %v14081_v55  ;;  %v14121_v4 = vld [vmem:[#allocation4 + $0x1040] ss:$16 sps:$4 sm:$0xff]   ;;  %v14124_v55 = vld [vmem:[#allocation4 + $0x1048] ss:$16 sps:$4 sm:$0xff]  }
 0x3c7   :  { %7179 = vmatprep.subr.bf16.mxu1 %v14084_v6  ;;  %v14129_v6 = vld [vmem:[#allocation4 + $0x1024] ss:$16 sps:$4 sm:$0xff]  }
 0x3c9   :  { %7139 = vmatpush2.bf16.msra.mxu0 %v14079_v18  ;;  %v14132_v18 = vld [vmem:[#allocation4 + $0x102c] ss:$16 sps:$4 sm:$0xff]  }
 0x3ca   :  { %7180 = vmatpush2.bf16.msra.mxu1 %v14082_v37  ;;  %7140 = vmatprep.subr.bf16.mxu0 %v14087_v45  ;;  %v14127_v37 = vld [vmem:[#allocation4 + $0x1020] ss:$16 sps:$4 sm:$0xff]   ;;  %v14130_v45 = vld [vmem:[#allocation4 + $0x1028] ss:$16 sps:$4 sm:$0xff]  }
 0x3cb   :  { %7181 = vmatprep.subr.bf16.mxu1 %v14090_v9  ;;  %v14135_v9 = vld [vmem:[#allocation4 + $0x1004] ss:$16 sps:$4 sm:$0xff]  }
 0x3cd   :  { %7141 = vmatpush2.bf16.msra.mxu0 %v14085_v10  ;;  %v14138_v10 = vld [vmem:[#allocation4 + $0x100c] ss:$16 sps:$4 sm:$0xff]  }
 0x3ce   :  { %7182 = vmatpush2.bf16.msra.mxu1 %v14088_v35  ;;  %7585 = vmatprep.subr.bf16.mxu0 %v14093_v36  ;;  %v14136_v35 = vld [vmem:[#allocation4 + $0x1008] ss:$16 sps:$4 sm:$0xff]   ;;  %v14141_v36 = vld [vmem:[#allocation4 + $0x11e4] ss:$16 sps:$4 sm:$0xff]  }
 0x3cf   :  { %7626 = vmatprep.subr.bf16.mxu1 %v14096_v43  ;;  %v14144_v43 = vld [vmem:[#allocation4 + $0x11ec] ss:$16 sps:$4 sm:$0xff]  }
 0x3d0   :  { %v5719_v47 = vpop.f32.mrf.mxu0  ;;  %7143 = vmatmul.mubr.bf16.vlgmr.msra.gmra.mxu0 %v12868_v46 }
 0x3d1   :  { %v16806_v5 = vadd.f32 %v5719_v47, %v16792_v59  ;;  %v5760_v14 = vpop.f32.mrf.mxu1  ;;  %7184 = vmatmul.mubr.bf16.vlgmr.msra.gmra.mxu1 %v12868_v46  ;;  %7586 = vmatpush1.bf16.msra.mxu0 %v14091_v48  ;;  %v14108_v59 = vld [vmem:[#allocation4 + $0x10ac] ss:$16 sps:$4 sm:$0xff]   ;;  %v14142_v48 = vld [vmem:[#allocation4 + $0x11e8] ss:$16 sps:$4 sm:$0xff]   ;;  %v14147_v46 = vld [vmem:[#allocation4 + $0x11c4] ss:$16 sps:$4 sm:$0xff]  }
 0x3d2   :  { %v16809_v38 = vadd.f32 %v5760_v14, %v16795_v3  ;;  %7617 = vmatprep.mubr.bf16.mxu0 %v12871_v27  ;;  %7627 = vmatpush1.bf16.msra.mxu1 %v14094_v24  ;;  %v5721_v15 = vpop.f32.mrf.mxu0  ;;  %v14103_v3 = vld [vmem:[#allocation4 + $0x10a0] ss:$16 sps:$4 sm:$0xff]   ;;  %v14150_v24 = vld [vmem:[#allocation4 + $0x11cc] ss:$16 sps:$4 sm:$0xff]   ;;  %v14153_v47 = vld [vmem:[#allocation4 + $0x11a4] ss:$16 sps:$4 sm:$0xff]  }
 0x3d3   :  { %7658 = vmatprep.mubr.bf16.mxu1 %v12871_v27  ;;  %v16812_v11 = vadd.f32 %v5721_v15, %v16798_v34  ;;  %v5762_v31 = vpop.f32.mrf.mxu1  ;;  %7587 = vmatprep.subr.bf16.mxu0 %v14099_v28  ;;  %v14114_v34 = vld [vmem:[#allocation4 + $0x108c] ss:$16 sps:$4 sm:$0xff]   ;;  %v14145_v28 = vld [vmem:[#allocation4 + $0x11c0] ss:$16 sps:$4 sm:$0xff]   ;;  %v14148_v27 = vld [vmem:[#allocation4 + $0x11c8] ss:$16 sps:$4 sm:$0xff]  }
 0x3d4   :  { %v16815_v20 = vadd.f32 %v5762_v31, %v16801_v0  ;;  %v5723_v32 = vpop.f32.mrf.mxu0  ;;  %7628 = vmatprep.subr.bf16.mxu1 %v14102_v30  ;;  %v14117_v0 = vld [vmem:[#allocation4 + $0x1064] ss:$16 sps:$4 sm:$0xff]   ;;  %v14156_v30 = vld [vmem:[#allocation4 + $0x11ac] ss:$16 sps:$4 sm:$0xff]   ;;  %v14151_v14 = vld [vmem:[#allocation4 + $0x11a0] ss:$16 sps:$4 sm:$0xff]  }
 0x3d5   :  { %v5764_v29 = vpop.f32.mrf.mxu1  ;;  %7588 = vmatpush1.bf16.msra.mxu0 %v14097_v53  ;;  %v14154_v53 = vld [vmem:[#allocation4 + $0x11a8] ss:$16 sps:$4 sm:$0xff]   ;;  %v14159_v15 = vld [vmem:[#allocation4 + $0x1184] ss:$16 sps:$4 sm:$0xff]   ;;  %v14168_v32 = vld [vmem:[#allocation4 + $0x116c] ss:$16 sps:$4 sm:$0xff]  }
 0x3d6   :  { %7629 = vmatpush1.bf16.msra.mxu1 %v14100_v62  ;;  %v5724_v40 = vpop.f32.mrf.mxu0  ;;  %7589 = vmatprep.subr.bf16.mxu0 %v14105_v12  ;;  %v14162_v62 = vld [vmem:[#allocation4 + $0x118c] ss:$16 sps:$4 sm:$0xff]   ;;  %v14157_v12 = vld [vmem:[#allocation4 + $0x1180] ss:$16 sps:$4 sm:$0xff]   ;;  %v14160_v31 = vld [vmem:[#allocation4 + $0x1188] ss:$16 sps:$4 sm:$0xff]  }
 0x3d7   :  { %v5765_v7 = vpop.f32.mrf.mxu1  ;;  %7630 = vmatprep.subr.bf16.mxu1 %v14108_v59  ;;  %v14165_v59 = vld [vmem:[#allocation4 + $0x1164] ss:$16 sps:$4 sm:$0xff]   ;;  %v14163_v29 = vld [vmem:[#allocation4 + $0x1160] ss:$16 sps:$4 sm:$0xff]  }
 0x3d8   :  { %v14171_v40 = vld [vmem:[#allocation4 + $0x1144] ss:$16 sps:$4 sm:$0xff]   ;;  %v14172_v7 = vld [vmem:[#allocation4 + $0x1148] ss:$16 sps:$4 sm:$0xff]  }
 0x3d9   :  { %7590 = vmatpush1.bf16.msra.mxu0 %v14103_v3  ;;  %v14166_v3 = vld [vmem:[#allocation4 + $0x1168] ss:$16 sps:$4 sm:$0xff]  }
 0x3da   :  { %7631 = vmatpush1.bf16.msra.mxu1 %v14106_v26  ;;  %7591 = vmatprep.subr.bf16.mxu0 %v14111_v2  ;;  %v14174_v26 = vld [vmem:[#allocation4 + $0x114c] ss:$16 sps:$4 sm:$0xff]   ;;  %v14169_v2 = vld [vmem:[#allocation4 + $0x1140] ss:$16 sps:$4 sm:$0xff]  }
 0x3db   :  { %7632 = vmatprep.subr.bf16.mxu1 %v14114_v34  ;;  %v14177_v34 = vld [vmem:[#allocation4 + $0x1124] ss:$16 sps:$4 sm:$0xff]  }
 0x3dd   :  { %7592 = vmatpush1.bf16.msra.mxu0 %v14109_v50  ;;  %v14180_v50 = vld [vmem:[#allocation4 + $0x112c] ss:$16 sps:$4 sm:$0xff]  }
 0x3de   :  { %7633 = vmatpush1.bf16.msra.mxu1 %v14112_v21  ;;  %7593 = vmatprep.subr.bf16.mxu0 %v14117_v0  ;;  %v14175_v21 = vld [vmem:[#allocation4 + $0x1120] ss:$16 sps:$4 sm:$0xff]   ;;  %v14178_v0 = vld [vmem:[#allocation4 + $0x1128] ss:$16 sps:$4 sm:$0xff]  }
 0x3df   :  { %7634 = vmatprep.subr.bf16.mxu1 %v14120_v22  ;;  %v14183_v22 = vld [vmem:[#allocation4 + $0x1104] ss:$16 sps:$4 sm:$0xff]  }
 0x3e1   :  { %7594 = vmatpush1.bf16.msra.mxu0 %v14115_v8  ;;  %v14186_v8 = vld [vmem:[#allocation4 + $0x110c] ss:$16 sps:$4 sm:$0xff]  }
 0x3e2   :  { %7635 = vmatpush1.bf16.msra.mxu1 %v14118_v63  ;;  %7595 = vmatprep.subr.bf16.mxu0 %v14123_v60  ;;  %v14181_v63 = vld [vmem:[#allocation4 + $0x1100] ss:$16 sps:$4 sm:$0xff]   ;;  %v3325_v60 = vmax.f32 %v16690_v51, 0.0  ;;  %v14198_v51 = vld [vmem:[#allocation4 + $0x12cc] ss:$16 sps:$4 sm:$0xff]  }
 0x3e3   :  { %7636 = vmatprep.subr.bf16.mxu1 %v14126_v56  ;;  %v14184_v56 = vld [vmem:[#allocation4 + $0x1108] ss:$16 sps:$4 sm:$0xff]  }
 0x3e5   :  { %7596 = vmatpush1.bf16.msra.mxu0 %v14121_v4  ;;  %v14189_v4 = vld [vmem:[#allocation4 + $0x12e4] ss:$16 sps:$4 sm:$0xff]  }
 0x3e6   :  { %7637 = vmatpush1.bf16.msra.mxu1 %v14124_v55  ;;  %7597 = vmatprep.subr.bf16.mxu0 %v14129_v6  ;;  %v14192_v55 = vld [vmem:[#allocation4 + $0x12ec] ss:$16 sps:$4 sm:$0xff]   ;;  %v3328_v6 = vmax.f32 %v16699_v49, 0.0 }
 0x3e7   :  { %7638 = vmatprep.subr.bf16.mxu1 %v14132_v18  ;;  %v14187_v18 = vld [vmem:[#allocation4 + $0x12e0] ss:$16 sps:$4 sm:$0xff]  }
 0x3e9   :  { %7598 = vmatpush1.bf16.msra.mxu0 %v14127_v37  ;;  %v12870_v37 = vpack.c.bf16 %v3325_v60, %v3325_v60  ;;  %v14237_v60 = vld [vmem:[#allocation4 + $0x13e4] ss:$16 sps:$4 sm:$0xff]  }
 0x3ea   :  { %7639 = vmatpush1.bf16.msra.mxu1 %v14130_v45  ;;  %7599 = vmatprep.subr.bf16.mxu0 %v14135_v9  ;;  %v14190_v45 = vld [vmem:[#allocation4 + $0x12e8] ss:$16 sps:$4 sm:$0xff]   ;;  %v14195_v9 = vld [vmem:[#allocation4 + $0x12c4] ss:$16 sps:$4 sm:$0xff]  }
 0x3eb   :  { %7640 = vmatprep.subr.bf16.mxu1 %v14138_v10  ;;  %v12873_v10 = vpack.c.bf16 %v3328_v6, %v3328_v6  ;;  %v14243_v6 = vld [vmem:[#allocation4 + $0x13c4] ss:$16 sps:$4 sm:$0xff]  }
 0x3ed   :  { %7600 = vmatpush1.bf16.msra.mxu0 %v14133_v39 }
 0x3ee   :  { %7641 = vmatpush1.bf16.msra.mxu1 %v14136_v35  ;;  %7601 = vmatprep.subr.bf16.mxu0 %v14141_v36 }
 0x3ef   :  { %7642 = vmatprep.subr.bf16.mxu1 %v14144_v43  ;;  %v14193_v43 = vld [vmem:[#allocation4 + $0x12c0] ss:$16 sps:$4 sm:$0xff]  }
 0x3f1   :  { %7602 = vmatpush2.bf16.msra.mxu0 %v14139_v52 }
 0x3f2   :  { %7643 = vmatpush2.bf16.msra.mxu1 %v14142_v48  ;;  %7603 = vmatprep.subr.bf16.mxu0 %v14147_v46  ;;  %v14196_v48 = vld [vmem:[#allocation4 + $0x12c8] ss:$16 sps:$4 sm:$0xff]   ;;  %v14201_v46 = vld [vmem:[#allocation4 + $0x12a4] ss:$16 sps:$4 sm:$0xff]  }
 0x3f3   :  { %7644 = vmatprep.subr.bf16.mxu1 %v14150_v24 }
 0x3f5   :  { %7604 = vmatpush2.bf16.msra.mxu0 %v14145_v28 }
 0x3f6   :  { %7645 = vmatpush2.bf16.msra.mxu1 %v14148_v27  ;;  %7605 = vmatprep.subr.bf16.mxu0 %v14153_v47 }
 0x3f7   :  { %7646 = vmatprep.subr.bf16.mxu1 %v14156_v30 }
 0x3f9   :  { %7606 = vmatpush2.bf16.msra.mxu0 %v14151_v14 }
 0x3fa   :  { %7647 = vmatpush2.bf16.msra.mxu1 %v14154_v53  ;;  %7607 = vmatprep.subr.bf16.mxu0 %v14159_v15  ;;  %v14202_v53 = vld [vmem:[#allocation4 + $0x12a8] ss:$16 sps:$4 sm:$0xff]   ;;  %v14207_v15 = vld [vmem:[#allocation4 + $0x1284] ss:$16 sps:$4 sm:$0xff]  }
 0x3fb   :  { %7648 = vmatprep.subr.bf16.mxu1 %v14162_v62 }
 0x3fd   :  { %7608 = vmatpush2.bf16.msra.mxu0 %v14157_v12  ;;  %v14205_v12 = vld [vmem:[#allocation4 + $0x1280] ss:$16 sps:$4 sm:$0xff]  }
 0x3fe   :  { %7649 = vmatpush2.bf16.msra.mxu1 %v14160_v31  ;;  %7609 = vmatprep.subr.bf16.mxu0 %v14165_v59  ;;  %v14208_v31 = vld [vmem:[#allocation4 + $0x1288] ss:$16 sps:$4 sm:$0xff]   ;;  %v14216_v59 = vld [vmem:[#allocation4 + $0x126c] ss:$16 sps:$4 sm:$0xff]  }
 0x3ff   :  { %7650 = vmatprep.subr.bf16.mxu1 %v14168_v32  ;;  %v14211_v32 = vld [vmem:[#allocation4 + $0x1260] ss:$16 sps:$4 sm:$0xff]  }
 0x401   :  { %7610 = vmatpush2.bf16.msra.mxu0 %v14163_v29  ;;  %v14214_v29 = vld [vmem:[#allocation4 + $0x1268] ss:$16 sps:$4 sm:$0xff]  }
 0x402   :  { %7651 = vmatpush2.bf16.msra.mxu1 %v14166_v3  ;;  %7611 = vmatprep.subr.bf16.mxu0 %v14171_v40  ;;  %v14219_v3 = vld [vmem:[#allocation4 + $0x1244] ss:$16 sps:$4 sm:$0xff]   ;;  %v14222_v40 = vld [vmem:[#allocation4 + $0x124c] ss:$16 sps:$4 sm:$0xff]  }
 0x403   :  { %7652 = vmatprep.subr.bf16.mxu1 %v14174_v26  ;;  %v14217_v26 = vld [vmem:[#allocation4 + $0x1240] ss:$16 sps:$4 sm:$0xff]  }
 0x405   :  { %7612 = vmatpush2.bf16.msra.mxu0 %v14169_v2  ;;  %v14220_v2 = vld [vmem:[#allocation4 + $0x1248] ss:$16 sps:$4 sm:$0xff]  }
 0x406   :  { %7653 = vmatpush2.bf16.msra.mxu1 %v14172_v7  ;;  %7613 = vmatprep.subr.bf16.mxu0 %v14177_v34  ;;  %v14225_v7 = vld [vmem:[#allocation4 + $0x1224] ss:$16 sps:$4 sm:$0xff]   ;;  %v14228_v34 = vld [vmem:[#allocation4 + $0x122c] ss:$16 sps:$4 sm:$0xff]  }
 0x407   :  { %7654 = vmatprep.subr.bf16.mxu1 %v14180_v50  ;;  %v14223_v50 = vld [vmem:[#allocation4 + $0x1220] ss:$16 sps:$4 sm:$0xff]  }
 0x409   :  { %7614 = vmatpush2.bf16.msra.mxu0 %v14175_v21  ;;  %v14226_v21 = vld [vmem:[#allocation4 + $0x1228] ss:$16 sps:$4 sm:$0xff]  }
 0x40a   :  { %7655 = vmatpush2.bf16.msra.mxu1 %v14178_v0  ;;  %7615 = vmatprep.subr.bf16.mxu0 %v14183_v22  ;;  %v14231_v0 = vld [vmem:[#allocation4 + $0x1204] ss:$16 sps:$4 sm:$0xff]   ;;  %v14234_v22 = vld [vmem:[#allocation4 + $0x120c] ss:$16 sps:$4 sm:$0xff]  }
 0x40b   :  { %7656 = vmatprep.subr.bf16.mxu1 %v14186_v8  ;;  %v14229_v8 = vld [vmem:[#allocation4 + $0x1200] ss:$16 sps:$4 sm:$0xff]  }
 0x40d   :  { %7616 = vmatpush2.bf16.msra.mxu0 %v14181_v63  ;;  %v14232_v63 = vld [vmem:[#allocation4 + $0x1208] ss:$16 sps:$4 sm:$0xff]  }
 0x40e   :  { %7657 = vmatpush2.bf16.msra.mxu1 %v14184_v56  ;;  %8060 = vmatprep.subr.bf16.mxu0 %v14189_v4  ;;  %v14240_v56 = vld [vmem:[#allocation4 + $0x13ec] ss:$16 sps:$4 sm:$0xff]   ;;  %v14235_v4 = vld [vmem:[#allocation4 + $0x13e0] ss:$16 sps:$4 sm:$0xff]  }
 0x40f   :  { %8101 = vmatprep.subr.bf16.mxu1 %v14192_v55  ;;  %v14238_v55 = vld [vmem:[#allocation4 + $0x13e8] ss:$16 sps:$4 sm:$0xff]  }
 0x410   :  { %v6194_v39 = vpop.f32.mrf.mxu0  ;;  %7618 = vmatmul.mubr.bf16.vlgmr.msra.gmra.mxu0 %v12870_v37 }
 0x411   :  { %v16820_v35 = vadd.f32 %v6194_v39, %v16806_v5  ;;  %v6235_v36 = vpop.f32.mrf.mxu1  ;;  %7659 = vmatmul.mubr.bf16.vlgmr.msra.gmra.mxu1 %v12870_v37  ;;  %8061 = vmatpush1.bf16.msra.mxu0 %v14187_v18  ;;  %v14204_v5 = vld [vmem:[#allocation4 + $0x12ac] ss:$16 sps:$4 sm:$0xff]   ;;  %v14241_v37 = vld [vmem:[#allocation4 + $0x13c0] ss:$16 sps:$4 sm:$0xff]  }
 0x412   :  { %v16823_v49 = vadd.f32 %v6235_v36, %v16809_v38  ;;  %8092 = vmatprep.mubr.bf16.mxu0 %v12873_v10  ;;  %8102 = vmatpush1.bf16.msra.mxu1 %v14190_v45  ;;  %v6196_v52 = vpop.f32.mrf.mxu0  ;;  %v14199_v38 = vld [vmem:[#allocation4 + $0x12a0] ss:$16 sps:$4 sm:$0xff]   ;;  %v14246_v18 = vld [vmem:[#allocation4 + $0x13cc] ss:$16 sps:$4 sm:$0xff]   ;;  %v14244_v45 = vld [vmem:[#allocation4 + $0x13c8] ss:$16 sps:$4 sm:$0xff]  }
 0x413   :  { %8133 = vmatprep.mubr.bf16.mxu1 %v12873_v10  ;;  %v16826_v24 = vadd.f32 %v6196_v52, %v16812_v11  ;;  %v6237_v28 = vpop.f32.mrf.mxu1  ;;  %8062 = vmatprep.subr.bf16.mxu0 %v14195_v9  ;;  %v14210_v11 = vld [vmem:[#allocation4 + $0x128c] ss:$16 sps:$4 sm:$0xff]   ;;  %v14249_v9 = vld [vmem:[#allocation4 + $0x13a4] ss:$16 sps:$4 sm:$0xff]   ;;  %v14247_v39 = vld [vmem:[#allocation4 + $0x13a0] ss:$16 sps:$4 sm:$0xff]  }
 0x414   :  { %v16829_v27 = vadd.f32 %v6237_v28, %v16815_v20  ;;  %v6198_v47 = vpop.f32.mrf.mxu0  ;;  %8103 = vmatprep.subr.bf16.mxu1 %v14198_v51  ;;  %v14213_v20 = vld [vmem:[#allocation4 + $0x1264] ss:$16 sps:$4 sm:$0xff]   ;;  %v14252_v10 = vld [vmem:[#allocation4 + $0x13ac] ss:$16 sps:$4 sm:$0xff]   ;;  %v14250_v51 = vld [vmem:[#allocation4 + $0x13a8] ss:$16 sps:$4 sm:$0xff]  }
 0x415   :  { %v6239_v30 = vpop.f32.mrf.mxu1  ;;  %8063 = vmatpush1.bf16.msra.mxu0 %v14193_v43  ;;  %v14255_v36 = vld [vmem:[#allocation4 + $0x1384] ss:$16 sps:$4 sm:$0xff]   ;;  %v14258_v43 = vld [vmem:[#allocation4 + $0x138c] ss:$16 sps:$4 sm:$0xff]   ;;  %v14253_v52 = vld [vmem:[#allocation4 + $0x1380] ss:$16 sps:$4 sm:$0xff]  }
 0x416   :  { %8104 = vmatpush1.bf16.msra.mxu1 %v14196_v48  ;;  %v6199_v14 = vpop.f32.mrf.mxu0  ;;  %8064 = vmatprep.subr.bf16.mxu0 %v14201_v46  ;;  %v14256_v48 = vld [vmem:[#allocation4 + $0x1388] ss:$16 sps:$4 sm:$0xff]   ;;  %v14261_v46 = vld [vmem:[#allocation4 + $0x1364] ss:$16 sps:$4 sm:$0xff]   ;;  %v14264_v28 = vld [vmem:[#allocation4 + $0x136c] ss:$16 sps:$4 sm:$0xff]  }
 0x417   :  { %v6240_v62 = vpop.f32.mrf.mxu1  ;;  %8105 = vmatprep.subr.bf16.mxu1 %v14204_v5  ;;  %v14259_v5 = vld [vmem:[#allocation4 + $0x1360] ss:$16 sps:$4 sm:$0xff]   ;;  %v14262_v47 = vld [vmem:[#allocation4 + $0x1368] ss:$16 sps:$4 sm:$0xff]   ;;  %v14267_v30 = vld [vmem:[#allocation4 + $0x1344] ss:$16 sps:$4 sm:$0xff]  }
 0x418   :  { %v14265_v14 = vld [vmem:[#allocation4 + $0x1340] ss:$16 sps:$4 sm:$0xff]   ;;  %v14276_v62 = vld [vmem:[#allocation4 + $0x132c] ss:$16 sps:$4 sm:$0xff]  }
 0x419   :  { %8065 = vmatpush1.bf16.msra.mxu0 %v14199_v38  ;;  %v14270_v38 = vld [vmem:[#allocation4 + $0x134c] ss:$16 sps:$4 sm:$0xff]  }
 0x41a   :  { %8106 = vmatpush1.bf16.msra.mxu1 %v14202_v53  ;;  %8066 = vmatprep.subr.bf16.mxu0 %v14207_v15  ;;  %v14268_v53 = vld [vmem:[#allocation4 + $0x1348] ss:$16 sps:$4 sm:$0xff]   ;;  %v14273_v15 = vld [vmem:[#allocation4 + $0x1324] ss:$16 sps:$4 sm:$0xff]  }
 0x41b   :  { %8107 = vmatprep.subr.bf16.mxu1 %v14210_v11  ;;  %v14271_v11 = vld [vmem:[#allocation4 + $0x1320] ss:$16 sps:$4 sm:$0xff]  }
 0x41d   :  { %8067 = vmatpush1.bf16.msra.mxu0 %v14205_v12  ;;  %v14274_v12 = vld [vmem:[#allocation4 + $0x1328] ss:$16 sps:$4 sm:$0xff]  }
 0x41e   :  { %8108 = vmatpush1.bf16.msra.mxu1 %v14208_v31  ;;  %8068 = vmatprep.subr.bf16.mxu0 %v14213_v20  ;;  %v14279_v31 = vld [vmem:[#allocation4 + $0x1304] ss:$16 sps:$4 sm:$0xff]   ;;  %v14282_v20 = vld [vmem:[#allocation4 + $0x130c] ss:$16 sps:$4 sm:$0xff]  }
 0x41f   :  { %8109 = vmatprep.subr.bf16.mxu1 %v14216_v59  ;;  %v14277_v59 = vld [vmem:[#allocation4 + $0x1300] ss:$16 sps:$4 sm:$0xff]  }
 0x421   :  { %8069 = vmatpush1.bf16.msra.mxu0 %v14211_v32  ;;  %v3327_v32 = vmax.f32 %v16696_v33, 0.0  ;;  %v14294_v33 = vld [vmem:[#allocation4 + $0x14cc] ss:$16 sps:$4 sm:$0xff]  }
 0x422   :  { %8110 = vmatpush1.bf16.msra.mxu1 %v14214_v29  ;;  %8070 = vmatprep.subr.bf16.mxu0 %v14219_v3  ;;  %v14280_v29 = vld [vmem:[#allocation4 + $0x1308] ss:$16 sps:$4 sm:$0xff]   ;;  %v14285_v3 = vld [vmem:[#allocation4 + $0x14e4] ss:$16 sps:$4 sm:$0xff]  }
 0x423   :  { %8111 = vmatprep.subr.bf16.mxu1 %v14222_v40  ;;  %v14288_v40 = vld [vmem:[#allocation4 + $0x14ec] ss:$16 sps:$4 sm:$0xff]  }
 0x425   :  { %8071 = vmatpush1.bf16.msra.mxu0 %v14217_v26  ;;  %v3330_v26 = vmax.f32 %v16705_v1, 0.0 }
 0x426   :  { %8112 = vmatpush1.bf16.msra.mxu1 %v14220_v2  ;;  %8072 = vmatprep.subr.bf16.mxu0 %v14225_v7  ;;  %v14283_v2 = vld [vmem:[#allocation4 + $0x14e0] ss:$16 sps:$4 sm:$0xff]   ;;  %v12872_v7 = vpack.c.bf16 %v3327_v32, %v3327_v32 }
 0x427   :  { %8113 = vmatprep.subr.bf16.mxu1 %v14228_v34  ;;  %v14286_v34 = vld [vmem:[#allocation4 + $0x14e8] ss:$16 sps:$4 sm:$0xff]   ;;  %v14331_v32 = vld [vmem:[#allocation4 + $0x15e0] ss:$16 sps:$4 sm:$0xff]  }
 0x429   :  { %8073 = vmatpush1.bf16.msra.mxu0 %v14223_v50  ;;  %v14291_v50 = vld [vmem:[#allocation4 + $0x14c4] ss:$16 sps:$4 sm:$0xff]  }
 0x42a   :  { %8114 = vmatpush1.bf16.msra.mxu1 %v14226_v21  ;;  %8074 = vmatprep.subr.bf16.mxu0 %v14231_v0  ;;  %v12875_v21 = vpack.c.bf16 %v3330_v26, %v3330_v26  ;;  %v14337_v26 = vld [vmem:[#allocation4 + $0x15c0] ss:$16 sps:$4 sm:$0xff]  }
 0x42b   :  { %8115 = vmatprep.subr.bf16.mxu1 %v14234_v22 }
 0x42d   :  { %8075 = vmatpush1.bf16.msra.mxu0 %v14229_v8 }
 0x42e   :  { %8116 = vmatpush1.bf16.msra.mxu1 %v14232_v63  ;;  %8076 = vmatprep.subr.bf16.mxu0 %v14237_v60  ;;  %v14289_v63 = vld [vmem:[#allocation4 + $0x14c0] ss:$16 sps:$4 sm:$0xff]  }
 0x42f   :  { %8117 = vmatprep.subr.bf16.mxu1 %v14240_v56  ;;  %v14292_v56 = vld [vmem:[#allocation4 + $0x14c8] ss:$16 sps:$4 sm:$0xff]  }
 0x431   :  { %8077 = vmatpush2.bf16.msra.mxu0 %v14235_v4  ;;  %v14297_v4 = vld [vmem:[#allocation4 + $0x14a4] ss:$16 sps:$4 sm:$0xff]  }
 0x432   :  { %8118 = vmatpush2.bf16.msra.mxu1 %v14238_v55  ;;  %8078 = vmatprep.subr.bf16.mxu0 %v14243_v6 }
 0x433   :  { %8119 = vmatprep.subr.bf16.mxu1 %v14246_v18 }
 0x435   :  { %8079 = vmatpush2.bf16.msra.mxu0 %v14241_v37 }
 0x436   :  { %8120 = vmatpush2.bf16.msra.mxu1 %v14244_v45  ;;  %8080 = vmatprep.subr.bf16.mxu0 %v14249_v9 }
 0x437   :  { %8121 = vmatprep.subr.bf16.mxu1 %v14252_v10  ;;  %v14298_v10 = vld [vmem:[#allocation4 + $0x14a8] ss:$16 sps:$4 sm:$0xff]  }
 0x439   :  { %8081 = vmatpush2.bf16.msra.mxu0 %v14247_v39  ;;  %v14303_v39 = vld [vmem:[#allocation4 + $0x1484] ss:$16 sps:$4 sm:$0xff]  }
 0x43a   :  { %8122 = vmatpush2.bf16.msra.mxu1 %v14250_v51  ;;  %8082 = vmatprep.subr.bf16.mxu0 %v14255_v36  ;;  %v14301_v36 = vld [vmem:[#allocation4 + $0x1480] ss:$16 sps:$4 sm:$0xff]  }
 0x43b   :  { %8123 = vmatprep.subr.bf16.mxu1 %v14258_v43  ;;  %v14304_v43 = vld [vmem:[#allocation4 + $0x1488] ss:$16 sps:$4 sm:$0xff]  }
 0x43d   :  { %8083 = vmatpush2.bf16.msra.mxu0 %v14253_v52  ;;  %v14312_v52 = vld [vmem:[#allocation4 + $0x146c] ss:$16 sps:$4 sm:$0xff]  }
 0x43e   :  { %8124 = vmatpush2.bf16.msra.mxu1 %v14256_v48  ;;  %8084 = vmatprep.subr.bf16.mxu0 %v14261_v46  ;;  %v14307_v48 = vld [vmem:[#allocation4 + $0x1460] ss:$16 sps:$4 sm:$0xff]   ;;  %v14310_v46 = vld [vmem:[#allocation4 + $0x1468] ss:$16 sps:$4 sm:$0xff]  }
 0x43f   :  { %8125 = vmatprep.subr.bf16.mxu1 %v14264_v28  ;;  %v14315_v28 = vld [vmem:[#allocation4 + $0x1444] ss:$16 sps:$4 sm:$0xff]  }
 0x441   :  { %8085 = vmatpush2.bf16.msra.mxu0 %v14259_v5  ;;  %v14318_v5 = vld [vmem:[#allocation4 + $0x144c] ss:$16 sps:$4 sm:$0xff]  }
 0x442   :  { %8126 = vmatpush2.bf16.msra.mxu1 %v14262_v47  ;;  %8086 = vmatprep.subr.bf16.mxu0 %v14267_v30  ;;  %v14313_v47 = vld [vmem:[#allocation4 + $0x1440] ss:$16 sps:$4 sm:$0xff]   ;;  %v14316_v30 = vld [vmem:[#allocation4 + $0x1448] ss:$16 sps:$4 sm:$0xff]  }
 0x443   :  { %8127 = vmatprep.subr.bf16.mxu1 %v14270_v38  ;;  %v14321_v38 = vld [vmem:[#allocation4 + $0x1424] ss:$16 sps:$4 sm:$0xff]  }
 0x445   :  { %8087 = vmatpush2.bf16.msra.mxu0 %v14265_v14  ;;  %v14324_v14 = vld [vmem:[#allocation4 + $0x142c] ss:$16 sps:$4 sm:$0xff]  }
 0x446   :  { %8128 = vmatpush2.bf16.msra.mxu1 %v14268_v53  ;;  %8088 = vmatprep.subr.bf16.mxu0 %v14273_v15  ;;  %v14319_v53 = vld [vmem:[#allocation4 + $0x1420] ss:$16 sps:$4 sm:$0xff]   ;;  %v14322_v15 = vld [vmem:[#allocation4 + $0x1428] ss:$16 sps:$4 sm:$0xff]  }
 0x447   :  { %8129 = vmatprep.subr.bf16.mxu1 %v14276_v62  ;;  %v14327_v62 = vld [vmem:[#allocation4 + $0x1404] ss:$16 sps:$4 sm:$0xff]  }
 0x449   :  { %8089 = vmatpush2.bf16.msra.mxu0 %v14271_v11  ;;  %v14330_v11 = vld [vmem:[#allocation4 + $0x140c] ss:$16 sps:$4 sm:$0xff]  }
 0x44a   :  { %8130 = vmatpush2.bf16.msra.mxu1 %v14274_v12  ;;  %8090 = vmatprep.subr.bf16.mxu0 %v14279_v31  ;;  %v14325_v12 = vld [vmem:[#allocation4 + $0x1400] ss:$16 sps:$4 sm:$0xff]   ;;  %v14328_v31 = vld [vmem:[#allocation4 + $0x1408] ss:$16 sps:$4 sm:$0xff]  }
 0x44b   :  { %8131 = vmatprep.subr.bf16.mxu1 %v14282_v20  ;;  %v14333_v20 = vld [vmem:[#allocation4 + $0x15e4] ss:$16 sps:$4 sm:$0xff]  }
 0x44d   :  { %8091 = vmatpush2.bf16.msra.mxu0 %v14277_v59  ;;  %v14336_v59 = vld [vmem:[#allocation4 + $0x15ec] ss:$16 sps:$4 sm:$0xff]  }
 0x44e   :  { %8132 = vmatpush2.bf16.msra.mxu1 %v14280_v29  ;;  %8535 = vmatprep.subr.bf16.mxu0 %v14285_v3  ;;  %v14334_v29 = vld [vmem:[#allocation4 + $0x15e8] ss:$16 sps:$4 sm:$0xff]   ;;  %v14339_v3 = vld [vmem:[#allocation4 + $0x15c4] ss:$16 sps:$4 sm:$0xff]  }
 0x44f   :  { %8576 = vmatprep.subr.bf16.mxu1 %v14288_v40  ;;  %v14342_v40 = vld [vmem:[#allocation4 + $0x15cc] ss:$16 sps:$4 sm:$0xff]  }
 0x450   :  { %v6669_v0 = vpop.f32.mrf.mxu0  ;;  %8093 = vmatmul.mubr.bf16.vlgmr.msra.gmra.mxu0 %v12872_v7 }
 0x451   :  { %v16834_v22 = vadd.f32 %v6669_v0, %v16820_v35  ;;  %v6710_v8 = vpop.f32.mrf.mxu1  ;;  %8134 = vmatmul.mubr.bf16.vlgmr.msra.gmra.mxu1 %v12872_v7  ;;  %8536 = vmatpush1.bf16.msra.mxu0 %v14283_v2  ;;  %v14300_v35 = vld [vmem:[#allocation4 + $0x14ac] ss:$16 sps:$4 sm:$0xff]   ;;  %v14340_v2 = vld [vmem:[#allocation4 + $0x15c8] ss:$16 sps:$4 sm:$0xff]   ;;  %v14345_v7 = vld [vmem:[#allocation4 + $0x15a4] ss:$16 sps:$4 sm:$0xff]  }
 0x452   :  { %v16837_v1 = vadd.f32 %v6710_v8, %v16823_v49  ;;  %8567 = vmatprep.mubr.bf16.mxu0 %v12875_v21  ;;  %8577 = vmatpush1.bf16.msra.mxu1 %v14286_v34  ;;  %v6671_v60 = vpop.f32.mrf.mxu0  ;;  %v14295_v49 = vld [vmem:[#allocation4 + $0x14a0] ss:$16 sps:$4 sm:$0xff]   ;;  %v14348_v34 = vld [vmem:[#allocation4 + $0x15ac] ss:$16 sps:$4 sm:$0xff]   ;;  %v14351_v0 = vld [vmem:[#allocation4 + $0x1584] ss:$16 sps:$4 sm:$0xff]  }
 0x453   :  { %8608 = vmatprep.mubr.bf16.mxu1 %v12875_v21  ;;  %v16840_v55 = vadd.f32 %v6671_v60, %v16826_v24  ;;  %v6712_v6 = vpop.f32.mrf.mxu1  ;;  %8537 = vmatprep.subr.bf16.mxu0 %v14291_v50  ;;  %v14306_v24 = vld [vmem:[#allocation4 + $0x148c] ss:$16 sps:$4 sm:$0xff]   ;;  %v14343_v50 = vld [vmem:[#allocation4 + $0x15a0] ss:$16 sps:$4 sm:$0xff]   ;;  %v14346_v21 = vld [vmem:[#allocation4 + $0x15a8] ss:$16 sps:$4 sm:$0xff]  }
 0x454   :  { %v16843_v18 = vadd.f32 %v6712_v6, %v16829_v27  ;;  %v6673_v37 = vpop.f32.mrf.mxu0  ;;  %8578 = vmatprep.subr.bf16.mxu1 %v14294_v33  ;;  %v14309_v27 = vld [vmem:[#allocation4 + $0x1464] ss:$16 sps:$4 sm:$0xff]   ;;  %v14354_v33 = vld [vmem:[#allocation4 + $0x158c] ss:$16 sps:$4 sm:$0xff]   ;;  %v14349_v8 = vld [vmem:[#allocation4 + $0x1580] ss:$16 sps:$4 sm:$0xff]  }
 0x455   :  { %v6714_v45 = vpop.f32.mrf.mxu1  ;;  %8538 = vmatpush1.bf16.msra.mxu0 %v14289_v63  ;;  %v14352_v63 = vld [vmem:[#allocation4 + $0x1588] ss:$16 sps:$4 sm:$0xff]   ;;  %v14357_v60 = vld [vmem:[#allocation4 + $0x1564] ss:$16 sps:$4 sm:$0xff]   ;;  %v14366_v37 = vld [vmem:[#allocation4 + $0x154c] ss:$16 sps:$4 sm:$0xff]  }
 0x456   :  { %8579 = vmatpush1.bf16.msra.mxu1 %v14292_v56  ;;  %v6674_v9 = vpop.f32.mrf.mxu0  ;;  %8539 = vmatprep.subr.bf16.mxu0 %v14297_v4  ;;  %v14360_v56 = vld [vmem:[#allocation4 + $0x156c] ss:$16 sps:$4 sm:$0xff]   ;;  %v14355_v4 = vld [vmem:[#allocation4 + $0x1560] ss:$16 sps:$4 sm:$0xff]   ;;  %v14358_v6 = vld [vmem:[#allocation4 + $0x1568] ss:$16 sps:$4 sm:$0xff]  }
 0x457   :  { %v6715_v51 = vpop.f32.mrf.mxu1  ;;  %8580 = vmatprep.subr.bf16.mxu1 %v14300_v35  ;;  %v14363_v35 = vld [vmem:[#allocation4 + $0x1544] ss:$16 sps:$4 sm:$0xff]   ;;  %v14361_v45 = vld [vmem:[#allocation4 + $0x1540] ss:$16 sps:$4 sm:$0xff]  }
 0x458   :  { %v14369_v9 = vld [vmem:[#allocation4 + $0x1524] ss:$16 sps:$4 sm:$0xff]   ;;  %v14370_v51 = vld [vmem:[#allocation4 + $0x1528] ss:$16 sps:$4 sm:$0xff]  }
 0x459   :  { %8540 = vmatpush1.bf16.msra.mxu0 %v14295_v49  ;;  %v14364_v49 = vld [vmem:[#allocation4 + $0x1548] ss:$16 sps:$4 sm:$0xff]  }
 0x45a   :  { %8581 = vmatpush1.bf16.msra.mxu1 %v14298_v10  ;;  %8541 = vmatprep.subr.bf16.mxu0 %v14303_v39  ;;  %v14372_v10 = vld [vmem:[#allocation4 + $0x152c] ss:$16 sps:$4 sm:$0xff]   ;;  %v14367_v39 = vld [vmem:[#allocation4 + $0x1520] ss:$16 sps:$4 sm:$0xff]  }
 0x45b   :  { %8582 = vmatprep.subr.bf16.mxu1 %v14306_v24  ;;  %v14375_v24 = vld [vmem:[#allocation4 + $0x1504] ss:$16 sps:$4 sm:$0xff]  }
 0x45d   :  { %8542 = vmatpush1.bf16.msra.mxu0 %v14301_v36  ;;  %v14378_v36 = vld [vmem:[#allocation4 + $0x150c] ss:$16 sps:$4 sm:$0xff]  }
 0x45e   :  { %8583 = vmatpush1.bf16.msra.mxu1 %v14304_v43  ;;  %8543 = vmatprep.subr.bf16.mxu0 %v14309_v27  ;;  %v14373_v43 = vld [vmem:[#allocation4 + $0x1500] ss:$16 sps:$4 sm:$0xff]   ;;  %v3329_v27 = vmax.f32 %v16702_v61, 0.0  ;;  %v14390_v61 = vld [vmem:[#allocation4 + $0x16cc] ss:$16 sps:$4 sm:$0xff]  }
 0x45f   :  { %8584 = vmatprep.subr.bf16.mxu1 %v14312_v52  ;;  %v14376_v52 = vld [vmem:[#allocation4 + $0x1508] ss:$16 sps:$4 sm:$0xff]  }
 0x461   :  { %8544 = vmatpush1.bf16.msra.mxu0 %v14307_v48  ;;  %v14381_v48 = vld [vmem:[#allocation4 + $0x16e4] ss:$16 sps:$4 sm:$0xff]  }
 0x462   :  { %8585 = vmatpush1.bf16.msra.mxu1 %v14310_v46  ;;  %8545 = vmatprep.subr.bf16.mxu0 %v14315_v28  ;;  %v14384_v46 = vld [vmem:[#allocation4 + $0x16ec] ss:$16 sps:$4 sm:$0xff]   ;;  %v3332_v28 = vmax.f32 %v16711_v17, 0.0 }
 0x463   :  { %8586 = vmatprep.subr.bf16.mxu1 %v14318_v5  ;;  %v14379_v5 = vld [vmem:[#allocation4 + $0x16e0] ss:$16 sps:$4 sm:$0xff]  }
 0x465   :  { %8546 = vmatpush1.bf16.msra.mxu0 %v14313_v47  ;;  %v12874_v47 = vpack.c.bf16 %v3329_v27, %v3329_v27  ;;  %v14435_v27 = vld [vmem:[#allocation4 + $0x17c4] ss:$16 sps:$4 sm:$0xff]  }
 0x466   :  { %8587 = vmatpush1.bf16.msra.mxu1 %v14316_v30  ;;  %8547 = vmatprep.subr.bf16.mxu0 %v14321_v38  ;;  %v14382_v30 = vld [vmem:[#allocation4 + $0x16e8] ss:$16 sps:$4 sm:$0xff]   ;;  %v14387_v38 = vld [vmem:[#allocation4 + $0x16c4] ss:$16 sps:$4 sm:$0xff]  }
 0x467   :  { %8588 = vmatprep.subr.bf16.mxu1 %v14324_v14  ;;  %v12877_v14 = vpack.c.bf16 %v3332_v28, %v3332_v28  ;;  %v14441_v28 = vld [vmem:[#allocation4 + $0x17a4] ss:$16 sps:$4 sm:$0xff]  }
 0x469   :  { %8548 = vmatpush1.bf16.msra.mxu0 %v14319_v53 }
 0x46a   :  { %8589 = vmatpush1.bf16.msra.mxu1 %v14322_v15  ;;  %8549 = vmatprep.subr.bf16.mxu0 %v14327_v62 }
 0x46b   :  { %8590 = vmatprep.subr.bf16.mxu1 %v14330_v11  ;;  %v14385_v11 = vld [vmem:[#allocation4 + $0x16c0] ss:$16 sps:$4 sm:$0xff]  }
 0x46d   :  { %8550 = vmatpush1.bf16.msra.mxu0 %v14325_v12 }
 0x46e   :  { %8591 = vmatpush1.bf16.msra.mxu1 %v14328_v31  ;;  %8551 = vmatprep.subr.bf16.mxu0 %v14333_v20  ;;  %v14388_v31 = vld [vmem:[#allocation4 + $0x16c8] ss:$16 sps:$4 sm:$0xff]   ;;  %v14393_v20 = vld [vmem:[#allocation4 + $0x16a4] ss:$16 sps:$4 sm:$0xff]  }
 0x46f   :  { %8592 = vmatprep.subr.bf16.mxu1 %v14336_v59 }
 0x471   :  { %8552 = vmatpush2.bf16.msra.mxu0 %v14331_v32 }
 0x472   :  { %8593 = vmatpush2.bf16.msra.mxu1 %v14334_v29  ;;  %8553 = vmatprep.subr.bf16.mxu0 %v14339_v3 }
 0x473   :  { %8594 = vmatprep.subr.bf16.mxu1 %v14342_v40 }
 0x475   :  { %8554 = vmatpush2.bf16.msra.mxu0 %v14337_v26 }
 0x476   :  { %8595 = vmatpush2.bf16.msra.mxu1 %v14340_v2  ;;  %8555 = vmatprep.subr.bf16.mxu0 %v14345_v7  ;;  %v14394_v2 = vld [vmem:[#allocation4 + $0x16a8] ss:$16 sps:$4 sm:$0xff]   ;;  %v14399_v7 = vld [vmem:[#allocation4 + $0x1684] ss:$16 sps:$4 sm:$0xff]  }
 0x477   :  { %8596 = vmatprep.subr.bf16.mxu1 %v14348_v34 }
 0x479   :  { %8556 = vmatpush2.bf16.msra.mxu0 %v14343_v50  ;;  %v14397_v50 = vld [vmem:[#allocation4 + $0x1680] ss:$16 sps:$4 sm:$0xff]  }
 0x47a   :  { %8597 = vmatpush2.bf16.msra.mxu1 %v14346_v21  ;;  %8557 = vmatprep.subr.bf16.mxu0 %v14351_v0  ;;  %v14400_v21 = vld [vmem:[#allocation4 + $0x1688] ss:$16 sps:$4 sm:$0xff]   ;;  %v14408_v0 = vld [vmem:[#allocation4 + $0x166c] ss:$16 sps:$4 sm:$0xff]  }
 0x47b   :  { %8598 = vmatprep.subr.bf16.mxu1 %v14354_v33  ;;  %v14403_v33 = vld [vmem:[#allocation4 + $0x1660] ss:$16 sps:$4 sm:$0xff]  }
 0x47d   :  { %8558 = vmatpush2.bf16.msra.mxu0 %v14349_v8  ;;  %v14406_v8 = vld [vmem:[#allocation4 + $0x1668] ss:$16 sps:$4 sm:$0xff]  }
 0x47e   :  { %8599 = vmatpush2.bf16.msra.mxu1 %v14352_v63  ;;  %8559 = vmatprep.subr.bf16.mxu0 %v14357_v60  ;;  %v14411_v63 = vld [vmem:[#allocation4 + $0x1644] ss:$16 sps:$4 sm:$0xff]   ;;  %v14414_v60 = vld [vmem:[#allocation4 + $0x164c] ss:$16 sps:$4 sm:$0xff]  }
 0x47f   :  { %8600 = vmatprep.subr.bf16.mxu1 %v14360_v56  ;;  %v14409_v56 = vld [vmem:[#allocation4 + $0x1640] ss:$16 sps:$4 sm:$0xff]  }
 0x481   :  { %8560 = vmatpush2.bf16.msra.mxu0 %v14355_v4  ;;  %v14412_v4 = vld [vmem:[#allocation4 + $0x1648] ss:$16 sps:$4 sm:$0xff]  }
 0x482   :  { %8601 = vmatpush2.bf16.msra.mxu1 %v14358_v6  ;;  %8561 = vmatprep.subr.bf16.mxu0 %v14363_v35  ;;  %v14417_v6 = vld [vmem:[#allocation4 + $0x1624] ss:$16 sps:$4 sm:$0xff]   ;;  %v14420_v35 = vld [vmem:[#allocation4 + $0x162c] ss:$16 sps:$4 sm:$0xff]  }
 0x483   :  { %8602 = vmatprep.subr.bf16.mxu1 %v14366_v37  ;;  %v14415_v37 = vld [vmem:[#allocation4 + $0x1620] ss:$16 sps:$4 sm:$0xff]  }
 0x485   :  { %8562 = vmatpush2.bf16.msra.mxu0 %v14361_v45  ;;  %v14418_v45 = vld [vmem:[#allocation4 + $0x1628] ss:$16 sps:$4 sm:$0xff]  }
 0x486   :  { %8603 = vmatpush2.bf16.msra.mxu1 %v14364_v49  ;;  %8563 = vmatprep.subr.bf16.mxu0 %v14369_v9  ;;  %v14423_v49 = vld [vmem:[#allocation4 + $0x1604] ss:$16 sps:$4 sm:$0xff]   ;;  %v14426_v9 = vld [vmem:[#allocation4 + $0x160c] ss:$16 sps:$4 sm:$0xff]  }
 0x487   :  { %8604 = vmatprep.subr.bf16.mxu1 %v14372_v10  ;;  %v14421_v10 = vld [vmem:[#allocation4 + $0x1600] ss:$16 sps:$4 sm:$0xff]  }
 0x489   :  { %8564 = vmatpush2.bf16.msra.mxu0 %v14367_v39  ;;  %v14424_v39 = vld [vmem:[#allocation4 + $0x1608] ss:$16 sps:$4 sm:$0xff]  }
 0x48a   :  { %8605 = vmatpush2.bf16.msra.mxu1 %v14370_v51  ;;  %8565 = vmatprep.subr.bf16.mxu0 %v14375_v24  ;;  %v14429_v51 = vld [vmem:[#allocation4 + $0x17e4] ss:$16 sps:$4 sm:$0xff]   ;;  %v14432_v24 = vld [vmem:[#allocation4 + $0x17ec] ss:$16 sps:$4 sm:$0xff]  }
 0x48b   :  { %8606 = vmatprep.subr.bf16.mxu1 %v14378_v36  ;;  %v14427_v36 = vld [vmem:[#allocation4 + $0x17e0] ss:$16 sps:$4 sm:$0xff]  }
 0x48d   :  { %8566 = vmatpush2.bf16.msra.mxu0 %v14373_v43  ;;  %v14430_v43 = vld [vmem:[#allocation4 + $0x17e8] ss:$16 sps:$4 sm:$0xff]  }
 0x48e   :  { %8607 = vmatpush2.bf16.msra.mxu1 %v14376_v52  ;;  %9010 = vmatprep.subr.bf16.mxu0 %v14381_v48  ;;  %v14438_v52 = vld [vmem:[#allocation4 + $0x17cc] ss:$16 sps:$4 sm:$0xff]   ;;  %v14433_v48 = vld [vmem:[#allocation4 + $0x17c0] ss:$16 sps:$4 sm:$0xff]  }
 0x48f   :  { %9051 = vmatprep.subr.bf16.mxu1 %v14384_v46  ;;  %v14436_v46 = vld [vmem:[#allocation4 + $0x17c8] ss:$16 sps:$4 sm:$0xff]  }
 0x490   :  { %v7144_v53 = vpop.f32.mrf.mxu0  ;;  %8568 = vmatmul.mubr.bf16.vlgmr.msra.gmra.mxu0 %v12874_v47 }
 0x491   :  { %v16848_v15 = vadd.f32 %v7144_v53, %v16834_v22  ;;  %v7185_v62 = vpop.f32.mrf.mxu1  ;;  %8609 = vmatmul.mubr.bf16.vlgmr.msra.gmra.mxu1 %v12874_v47  ;;  %9011 = vmatpush1.bf16.msra.mxu0 %v14379_v5  ;;  %v14396_v22 = vld [vmem:[#allocation4 + $0x16ac] ss:$16 sps:$4 sm:$0xff]   ;;  %v14439_v47 = vld [vmem:[#allocation4 + $0x17a0] ss:$16 sps:$4 sm:$0xff]  }
 0x492   :  { %v16851_v17 = vadd.f32 %v7185_v62, %v16837_v1  ;;  %9042 = vmatprep.mubr.bf16.mxu0 %v12877_v14  ;;  %9052 = vmatpush1.bf16.msra.mxu1 %v14382_v30  ;;  %v7146_v12 = vpop.f32.mrf.mxu0  ;;  %v14391_v1 = vld [vmem:[#allocation4 + $0x16a0] ss:$16 sps:$4 sm:$0xff]   ;;  %v14444_v5 = vld [vmem:[#allocation4 + $0x17ac] ss:$16 sps:$4 sm:$0xff]   ;;  %v14442_v30 = vld [vmem:[#allocation4 + $0x17a8] ss:$16 sps:$4 sm:$0xff]  }
 0x493   :  { %9083 = vmatprep.mubr.bf16.mxu1 %v12877_v14  ;;  %v16854_v59 = vadd.f32 %v7146_v12, %v16840_v55  ;;  %v7187_v32 = vpop.f32.mrf.mxu1  ;;  %9012 = vmatprep.subr.bf16.mxu0 %v14387_v38  ;;  %v14402_v55 = vld [vmem:[#allocation4 + $0x168c] ss:$16 sps:$4 sm:$0xff]   ;;  %v14447_v38 = vld [vmem:[#allocation4 + $0x1784] ss:$16 sps:$4 sm:$0xff]   ;;  %v14445_v53 = vld [vmem:[#allocation4 + $0x1780] ss:$16 sps:$4 sm:$0xff]  }
 0x494   :  { %v16857_v29 = vadd.f32 %v7187_v32, %v16843_v18  ;;  %v7148_v3 = vpop.f32.mrf.mxu0  ;;  %9053 = vmatprep.subr.bf16.mxu1 %v14390_v61  ;;  %v14405_v18 = vld [vmem:[#allocation4 + $0x1664] ss:$16 sps:$4 sm:$0xff]   ;;  %v14450_v14 = vld [vmem:[#allocation4 + $0x178c] ss:$16 sps:$4 sm:$0xff]   ;;  %v14448_v61 = vld [vmem:[#allocation4 + $0x1788] ss:$16 sps:$4 sm:$0xff]  }
 0x495   :  { %v7189_v40 = vpop.f32.mrf.mxu1  ;;  %9013 = vmatpush1.bf16.msra.mxu0 %v14385_v11  ;;  %v14453_v62 = vld [vmem:[#allocation4 + $0x1764] ss:$16 sps:$4 sm:$0xff]   ;;  %v14456_v11 = vld [vmem:[#allocation4 + $0x176c] ss:$16 sps:$4 sm:$0xff]   ;;  %v14451_v12 = vld [vmem:[#allocation4 + $0x1760] ss:$16 sps:$4 sm:$0xff]  }
 0x496   :  { %9054 = vmatpush1.bf16.msra.mxu1 %v14388_v31  ;;  %v7149_v26 = vpop.f32.mrf.mxu0  ;;  %9014 = vmatprep.subr.bf16.mxu0 %v14393_v20  ;;  %v14454_v31 = vld [vmem:[#allocation4 + $0x1768] ss:$16 sps:$4 sm:$0xff]   ;;  %v14459_v20 = vld [vmem:[#allocation4 + $0x1744] ss:$16 sps:$4 sm:$0xff]   ;;  %v14462_v32 = vld [vmem:[#allocation4 + $0x174c] ss:$16 sps:$4 sm:$0xff]  }
 0x497   :  { %v7190_v34 = vpop.f32.mrf.mxu1  ;;  %9055 = vmatprep.subr.bf16.mxu1 %v14396_v22  ;;  %v14457_v22 = vld [vmem:[#allocation4 + $0x1740] ss:$16 sps:$4 sm:$0xff]   ;;  %v14460_v3 = vld [vmem:[#allocation4 + $0x1748] ss:$16 sps:$4 sm:$0xff]   ;;  %v14465_v40 = vld [vmem:[#allocation4 + $0x1724] ss:$16 sps:$4 sm:$0xff]  }
 0x498   :  { %v14463_v26 = vld [vmem:[#allocation4 + $0x1720] ss:$16 sps:$4 sm:$0xff]   ;;  %v14474_v34 = vld [vmem:[#allocation4 + $0x170c] ss:$16 sps:$4 sm:$0xff]  }
 0x499   :  { %9015 = vmatpush1.bf16.msra.mxu0 %v14391_v1  ;;  %v14468_v1 = vld [vmem:[#allocation4 + $0x172c] ss:$16 sps:$4 sm:$0xff]  }
 0x49a   :  { %9056 = vmatpush1.bf16.msra.mxu1 %v14394_v2  ;;  %9016 = vmatprep.subr.bf16.mxu0 %v14399_v7  ;;  %v14466_v2 = vld [vmem:[#allocation4 + $0x1728] ss:$16 sps:$4 sm:$0xff]   ;;  %v14471_v7 = vld [vmem:[#allocation4 + $0x1704] ss:$16 sps:$4 sm:$0xff]  }
 0x49b   :  { %9057 = vmatprep.subr.bf16.mxu1 %v14402_v55  ;;  %v14469_v55 = vld [vmem:[#allocation4 + $0x1700] ss:$16 sps:$4 sm:$0xff]  }
 0x49d   :  { %9017 = vmatpush1.bf16.msra.mxu0 %v14397_v50  ;;  %v3331_v50 = vmax.f32 %v16708_v16, 0.0  ;;  %v14486_v16 = vld [vmem:[#allocation4 + $0x18cc] ss:$16 sps:$4 sm:$0xff]  }
 0x49e   :  { %9058 = vmatpush1.bf16.msra.mxu1 %v14400_v21  ;;  %9018 = vmatprep.subr.bf16.mxu0 %v14405_v18  ;;  %v14472_v21 = vld [vmem:[#allocation4 + $0x1708] ss:$16 sps:$4 sm:$0xff]   ;;  %v14477_v18 = vld [vmem:[#allocation4 + $0x18e4] ss:$16 sps:$4 sm:$0xff]  }
 0x49f   :  { %9059 = vmatprep.subr.bf16.mxu1 %v14408_v0  ;;  %v14480_v0 = vld [vmem:[#allocation4 + $0x18ec] ss:$16 sps:$4 sm:$0xff]  }
 0x4a1   :  { %9019 = vmatpush1.bf16.msra.mxu0 %v14403_v33  ;;  %v3334_v33 = vmax.f32 %v16717_v25, 0.0 }
 0x4a2   :  { %9060 = vmatpush1.bf16.msra.mxu1 %v14406_v8  ;;  %9020 = vmatprep.subr.bf16.mxu0 %v14411_v63  ;;  %v14475_v8 = vld [vmem:[#allocation4 + $0x18e0] ss:$16 sps:$4 sm:$0xff]   ;;  %v12876_v63 = vpack.c.bf16 %v3331_v50, %v3331_v50 }
 0x4a3   :  { %9061 = vmatprep.subr.bf16.mxu1 %v14414_v60  ;;  %v14478_v60 = vld [vmem:[#allocation4 + $0x18e8] ss:$16 sps:$4 sm:$0xff]   ;;  %v14529_v50 = vld [vmem:[#allocation4 + $0x19c0] ss:$16 sps:$4 sm:$0xff]  }
 0x4a5   :  { %9021 = vmatpush1.bf16.msra.mxu0 %v14409_v56  ;;  %v14483_v56 = vld [vmem:[#allocation4 + $0x18c4] ss:$16 sps:$4 sm:$0xff]  }
 0x4a6   :  { %9062 = vmatpush1.bf16.msra.mxu1 %v14412_v4  ;;  %9022 = vmatprep.subr.bf16.mxu0 %v14417_v6  ;;  %v12879_v4 = vpack.c.bf16 %v3334_v33, %v3334_v33  ;;  %v14535_v33 = vld [vmem:[#allocation4 + $0x19a0] ss:$16 sps:$4 sm:$0xff]  }
 0x4a7   :  { %9063 = vmatprep.subr.bf16.mxu1 %v14420_v35 }
 0x4a9   :  { %9023 = vmatpush1.bf16.msra.mxu0 %v14415_v37 }
 0x4aa   :  { %9064 = vmatpush1.bf16.msra.mxu1 %v14418_v45  ;;  %9024 = vmatprep.subr.bf16.mxu0 %v14423_v49  ;;  %v14481_v45 = vld [vmem:[#allocation4 + $0x18c0] ss:$16 sps:$4 sm:$0xff]  }
 0x4ab   :  { %9065 = vmatprep.subr.bf16.mxu1 %v14426_v9  ;;  %v14484_v9 = vld [vmem:[#allocation4 + $0x18c8] ss:$16 sps:$4 sm:$0xff]  }
 0x4ad   :  { %9025 = vmatpush1.bf16.msra.mxu0 %v14421_v10  ;;  %v14489_v10 = vld [vmem:[#allocation4 + $0x18a4] ss:$16 sps:$4 sm:$0xff]  }
 0x4ae   :  { %9066 = vmatpush1.bf16.msra.mxu1 %v14424_v39  ;;  %9026 = vmatprep.subr.bf16.mxu0 %v14429_v51 }
 0x4af   :  { %9067 = vmatprep.subr.bf16.mxu1 %v14432_v24 }
 0x4b1   :  { %9027 = vmatpush2.bf16.msra.mxu0 %v14427_v36 }
 0x4b2   :  { %9068 = vmatpush2.bf16.msra.mxu1 %v14430_v43  ;;  %9028 = vmatprep.subr.bf16.mxu0 %v14435_v27 }
 0x4b3   :  { %9069 = vmatprep.subr.bf16.mxu1 %v14438_v52  ;;  %v14490_v52 = vld [vmem:[#allocation4 + $0x18a8] ss:$16 sps:$4 sm:$0xff]  }
 0x4b5   :  { %9029 = vmatpush2.bf16.msra.mxu0 %v14433_v48  ;;  %v14495_v48 = vld [vmem:[#allocation4 + $0x1884] ss:$16 sps:$4 sm:$0xff]  }
 0x4b6   :  { %9070 = vmatpush2.bf16.msra.mxu1 %v14436_v46  ;;  %9030 = vmatprep.subr.bf16.mxu0 %v14441_v28  ;;  %v14493_v28 = vld [vmem:[#allocation4 + $0x1880] ss:$16 sps:$4 sm:$0xff]  }
 0x4b7   :  { %9071 = vmatprep.subr.bf16.mxu1 %v14444_v5  ;;  %v14496_v5 = vld [vmem:[#allocation4 + $0x1888] ss:$16 sps:$4 sm:$0xff]  }
 0x4b9   :  { %9031 = vmatpush2.bf16.msra.mxu0 %v14439_v47  ;;  %v14504_v47 = vld [vmem:[#allocation4 + $0x186c] ss:$16 sps:$4 sm:$0xff]  }
 0x4ba   :  { %9072 = vmatpush2.bf16.msra.mxu1 %v14442_v30  ;;  %9032 = vmatprep.subr.bf16.mxu0 %v14447_v38  ;;  %v14499_v30 = vld [vmem:[#allocation4 + $0x1860] ss:$16 sps:$4 sm:$0xff]   ;;  %v14502_v38 = vld [vmem:[#allocation4 + $0x1868] ss:$16 sps:$4 sm:$0xff]  }
 0x4bb   :  { %9073 = vmatprep.subr.bf16.mxu1 %v14450_v14  ;;  %v14507_v14 = vld [vmem:[#allocation4 + $0x1844] ss:$16 sps:$4 sm:$0xff]  }
 0x4bd   :  { %9033 = vmatpush2.bf16.msra.mxu0 %v14445_v53  ;;  %v14510_v53 = vld [vmem:[#allocation4 + $0x184c] ss:$16 sps:$4 sm:$0xff]  }
 0x4be   :  { %9074 = vmatpush2.bf16.msra.mxu1 %v14448_v61  ;;  %9034 = vmatprep.subr.bf16.mxu0 %v14453_v62  ;;  %v14505_v61 = vld [vmem:[#allocation4 + $0x1840] ss:$16 sps:$4 sm:$0xff]   ;;  %v14508_v62 = vld [vmem:[#allocation4 + $0x1848] ss:$16 sps:$4 sm:$0xff]  }
 0x4bf   :  { %9075 = vmatprep.subr.bf16.mxu1 %v14456_v11  ;;  %v14513_v11 = vld [vmem:[#allocation4 + $0x1824] ss:$16 sps:$4 sm:$0xff]  }
 0x4c1   :  { %9035 = vmatpush2.bf16.msra.mxu0 %v14451_v12  ;;  %v14516_v12 = vld [vmem:[#allocation4 + $0x182c] ss:$16 sps:$4 sm:$0xff]  }
 0x4c2   :  { %9076 = vmatpush2.bf16.msra.mxu1 %v14454_v31  ;;  %9036 = vmatprep.subr.bf16.mxu0 %v14459_v20  ;;  %v14511_v31 = vld [vmem:[#allocation4 + $0x1820] ss:$16 sps:$4 sm:$0xff]   ;;  %v14514_v20 = vld [vmem:[#allocation4 + $0x1828] ss:$16 sps:$4 sm:$0xff]  }
 0x4c3   :  { %9077 = vmatprep.subr.bf16.mxu1 %v14462_v32  ;;  %v14519_v32 = vld [vmem:[#allocation4 + $0x1804] ss:$16 sps:$4 sm:$0xff]  }
 0x4c5   :  { %9037 = vmatpush2.bf16.msra.mxu0 %v14457_v22  ;;  %v14522_v22 = vld [vmem:[#allocation4 + $0x180c] ss:$16 sps:$4 sm:$0xff]  }
 0x4c6   :  { %9078 = vmatpush2.bf16.msra.mxu1 %v14460_v3  ;;  %9038 = vmatprep.subr.bf16.mxu0 %v14465_v40  ;;  %v14517_v3 = vld [vmem:[#allocation4 + $0x1800] ss:$16 sps:$4 sm:$0xff]   ;;  %v14520_v40 = vld [vmem:[#allocation4 + $0x1808] ss:$16 sps:$4 sm:$0xff]  }
 0x4c7   :  { %9079 = vmatprep.subr.bf16.mxu1 %v14468_v1  ;;  %v14525_v1 = vld [vmem:[#allocation4 + $0x19e4] ss:$16 sps:$4 sm:$0xff]  }
 0x4c9   :  { %9039 = vmatpush2.bf16.msra.mxu0 %v14463_v26  ;;  %v14528_v26 = vld [vmem:[#allocation4 + $0x19ec] ss:$16 sps:$4 sm:$0xff]  }
 0x4ca   :  { %9080 = vmatpush2.bf16.msra.mxu1 %v14466_v2  ;;  %9040 = vmatprep.subr.bf16.mxu0 %v14471_v7  ;;  %v14523_v2 = vld [vmem:[#allocation4 + $0x19e0] ss:$16 sps:$4 sm:$0xff]   ;;  %v14526_v7 = vld [vmem:[#allocation4 + $0x19e8] ss:$16 sps:$4 sm:$0xff]  }
 0x4cb   :  { %9081 = vmatprep.subr.bf16.mxu1 %v14474_v34  ;;  %v14531_v34 = vld [vmem:[#allocation4 + $0x19c4] ss:$16 sps:$4 sm:$0xff]  }
 0x4cd   :  { %9041 = vmatpush2.bf16.msra.mxu0 %v14469_v55  ;;  %v14534_v55 = vld [vmem:[#allocation4 + $0x19cc] ss:$16 sps:$4 sm:$0xff]  }
 0x4ce   :  { %9082 = vmatpush2.bf16.msra.mxu1 %v14472_v21  ;;  %9485 = vmatprep.subr.bf16.mxu0 %v14477_v18  ;;  %v14532_v21 = vld [vmem:[#allocation4 + $0x19c8] ss:$16 sps:$4 sm:$0xff]   ;;  %v14537_v18 = vld [vmem:[#allocation4 + $0x19a4] ss:$16 sps:$4 sm:$0xff]  }
 0x4cf   :  { %9526 = vmatprep.subr.bf16.mxu1 %v14480_v0  ;;  %v14540_v0 = vld [vmem:[#allocation4 + $0x19ac] ss:$16 sps:$4 sm:$0xff]  }
 0x4d0   :  { %v7619_v6 = vpop.f32.mrf.mxu0  ;;  %9043 = vmatmul.mubr.bf16.vlgmr.msra.gmra.mxu0 %v12876_v63 }
 0x4d1   :  { %v16862_v35 = vadd.f32 %v7619_v6, %v16848_v15  ;;  %v7660_v37 = vpop.f32.mrf.mxu1  ;;  %9084 = vmatmul.mubr.bf16.vlgmr.msra.gmra.mxu1 %v12876_v63  ;;  %9486 = vmatpush1.bf16.msra.mxu0 %v14475_v8  ;;  %v14492_v15 = vld [vmem:[#allocation4 + $0x18ac] ss:$16 sps:$4 sm:$0xff]   ;;  %v14538_v8 = vld [vmem:[#allocation4 + $0x19a8] ss:$16 sps:$4 sm:$0xff]   ;;  %v14543_v63 = vld [vmem:[#allocation4 + $0x1984] ss:$16 sps:$4 sm:$0xff]  }
 0x4d2   :  { %v16865_v25 = vadd.f32 %v7660_v37, %v16851_v17  ;;  %9517 = vmatprep.mubr.bf16.mxu0 %v12879_v4  ;;  %9527 = vmatpush1.bf16.msra.mxu1 %v14478_v60  ;;  %v7621_v49 = vpop.f32.mrf.mxu0  ;;  %v14487_v17 = vld [vmem:[#allocation4 + $0x18a0] ss:$16 sps:$4 sm:$0xff]   ;;  %v14546_v60 = vld [vmem:[#allocation4 + $0x198c] ss:$16 sps:$4 sm:$0xff]   ;;  %v14549_v6 = vld [vmem:[#allocation4 + $0x1964] ss:$16 sps:$4 sm:$0xff]  }
 0x4d3   :  { %9558 = vmatprep.mubr.bf16.mxu1 %v12879_v4  ;;  %v16868_v39 = vadd.f32 %v7621_v49, %v16854_v59  ;;  %v7662_v51 = vpop.f32.mrf.mxu1  ;;  %9487 = vmatprep.subr.bf16.mxu0 %v14483_v56  ;;  %v14498_v59 = vld [vmem:[#allocation4 + $0x188c] ss:$16 sps:$4 sm:$0xff]   ;;  %v14541_v56 = vld [vmem:[#allocation4 + $0x1980] ss:$16 sps:$4 sm:$0xff]   ;;  %v14544_v4 = vld [vmem:[#allocation4 + $0x1988] ss:$16 sps:$4 sm:$0xff]  }
 0x4d4   :  { %v16871_v24 = vadd.f32 %v7662_v51, %v16857_v29  ;;  %v7623_v36 = vpop.f32.mrf.mxu0  ;;  %9528 = vmatprep.subr.bf16.mxu1 %v14486_v16  ;;  %v14501_v29 = vld [vmem:[#allocation4 + $0x1864] ss:$16 sps:$4 sm:$0xff]   ;;  %v14552_v16 = vld [vmem:[#allocation4 + $0x196c] ss:$16 sps:$4 sm:$0xff]   ;;  %v14547_v37 = vld [vmem:[#allocation4 + $0x1960] ss:$16 sps:$4 sm:$0xff]  }
 0x4d5   :  { %v7664_v43 = vpop.f32.mrf.mxu1  ;;  %9488 = vmatpush1.bf16.msra.mxu0 %v14481_v45  ;;  %v14550_v45 = vld [vmem:[#allocation4 + $0x1968] ss:$16 sps:$4 sm:$0xff]   ;;  %v14555_v49 = vld [vmem:[#allocation4 + $0x1944] ss:$16 sps:$4 sm:$0xff]   ;;  %v14564_v36 = vld [vmem:[#allocation4 + $0x192c] ss:$16 sps:$4 sm:$0xff]  }
 0x4d6   :  { %9529 = vmatpush1.bf16.msra.mxu1 %v14484_v9  ;;  %v7624_v27 = vpop.f32.mrf.mxu0  ;;  %9489 = vmatprep.subr.bf16.mxu0 %v14489_v10  ;;  %v14558_v9 = vld [vmem:[#allocation4 + $0x194c] ss:$16 sps:$4 sm:$0xff]   ;;  %v14553_v10 = vld [vmem:[#allocation4 + $0x1940] ss:$16 sps:$4 sm:$0xff]   ;;  %v14556_v51 = vld [vmem:[#allocation4 + $0x1948] ss:$16 sps:$4 sm:$0xff]  }
 0x4d7   :  { %v7665_v46 = vpop.f32.mrf.mxu1  ;;  %9530 = vmatprep.subr.bf16.mxu1 %v14492_v15  ;;  %v14561_v15 = vld [vmem:[#allocation4 + $0x1924] ss:$16 sps:$4 sm:$0xff]   ;;  %v14559_v43 = vld [vmem:[#allocation4 + $0x1920] ss:$16 sps:$4 sm:$0xff]  }
 0x4d8   :  { %v14567_v27 = vld [vmem:[#allocation4 + $0x1904] ss:$16 sps:$4 sm:$0xff]   ;;  %v3333_v46 = vmax.f32 %v16714_v44, 0.0  ;;  %v14582_v44 = vld [vmem:[#allocation4 + $0x1acc] ss:$16 sps:$4 sm:$0xff]  }
 0x4d9   :  { %9490 = vmatpush1.bf16.msra.mxu0 %v14487_v17  ;;  %v14562_v17 = vld [vmem:[#allocation4 + $0x1928] ss:$16 sps:$4 sm:$0xff]  }
 0x4da   :  { %9531 = vmatpush1.bf16.msra.mxu1 %v14490_v52  ;;  %9491 = vmatprep.subr.bf16.mxu0 %v14495_v48  ;;  %v14570_v52 = vld [vmem:[#allocation4 + $0x190c] ss:$16 sps:$4 sm:$0xff]   ;;  %v14565_v48 = vld [vmem:[#allocation4 + $0x1900] ss:$16 sps:$4 sm:$0xff]  }
 0x4db   :  { %9532 = vmatprep.subr.bf16.mxu1 %v14498_v59  ;;  %v14568_v59 = vld [vmem:[#allocation4 + $0x1908] ss:$16 sps:$4 sm:$0xff]  }
 0x4dd   :  { %9492 = vmatpush1.bf16.msra.mxu0 %v14493_v28  ;;  %v14573_v28 = vld [vmem:[#allocation4 + $0x1ae4] ss:$16 sps:$4 sm:$0xff]  }
 0x4de   :  { %9533 = vmatpush1.bf16.msra.mxu1 %v14496_v5  ;;  %9493 = vmatprep.subr.bf16.mxu0 %v14501_v29  ;;  %v14576_v5 = vld [vmem:[#allocation4 + $0x1aec] ss:$16 sps:$4 sm:$0xff]   ;;  %v3336_v29 = vmax.f32 %v16723_v41, 0.0 }
 0x4df   :  { %9534 = vmatprep.subr.bf16.mxu1 %v14504_v47  ;;  %v14571_v47 = vld [vmem:[#allocation4 + $0x1ae0] ss:$16 sps:$4 sm:$0xff]  }
 0x4e1   :  { %9494 = vmatpush1.bf16.msra.mxu0 %v14499_v30  ;;  %v12878_v30 = vpack.c.bf16 %v3333_v46, %v3333_v46  ;;  %v14633_v46 = vld [vmem:[#allocation4 + $0x1ba4] ss:$16 sps:$4 sm:$0xff]  }
 0x4e2   :  { %9535 = vmatpush1.bf16.msra.mxu1 %v14502_v38  ;;  %9495 = vmatprep.subr.bf16.mxu0 %v14507_v14  ;;  %v14574_v38 = vld [vmem:[#allocation4 + $0x1ae8] ss:$16 sps:$4 sm:$0xff]   ;;  %v14579_v14 = vld [vmem:[#allocation4 + $0x1ac4] ss:$16 sps:$4 sm:$0xff]  }
 0x4e3   :  { %9536 = vmatprep.subr.bf16.mxu1 %v14510_v53  ;;  %v12881_v53 = vpack.c.bf16 %v3336_v29, %v3336_v29  ;;  %v14639_v29 = vld [vmem:[#allocation4 + $0x1b84] ss:$16 sps:$4 sm:$0xff]  }
 0x4e5   :  { %9496 = vmatpush1.bf16.msra.mxu0 %v14505_v61 }
 0x4e6   :  { %9537 = vmatpush1.bf16.msra.mxu1 %v14508_v62  ;;  %9497 = vmatprep.subr.bf16.mxu0 %v14513_v11 }
 0x4e7   :  { %9538 = vmatprep.subr.bf16.mxu1 %v14516_v12  ;;  %v14577_v12 = vld [vmem:[#allocation4 + $0x1ac0] ss:$16 sps:$4 sm:$0xff]  }
 0x4e9   :  { %9498 = vmatpush1.bf16.msra.mxu0 %v14511_v31 }
 0x4ea   :  { %9539 = vmatpush1.bf16.msra.mxu1 %v14514_v20  ;;  %9499 = vmatprep.subr.bf16.mxu0 %v14519_v32  ;;  %v14580_v20 = vld [vmem:[#allocation4 + $0x1ac8] ss:$16 sps:$4 sm:$0xff]   ;;  %v14585_v32 = vld [vmem:[#allocation4 + $0x1aa4] ss:$16 sps:$4 sm:$0xff]  }
 0x4eb   :  { %9540 = vmatprep.subr.bf16.mxu1 %v14522_v22 }
 0x4ed   :  { %9500 = vmatpush1.bf16.msra.mxu0 %v14517_v3 }
 0x4ee   :  { %9541 = vmatpush1.bf16.msra.mxu1 %v14520_v40  ;;  %9501 = vmatprep.subr.bf16.mxu0 %v14525_v1 }
 0x4ef   :  { %9542 = vmatprep.subr.bf16.mxu1 %v14528_v26 }
 0x4f1   :  { %9502 = vmatpush2.bf16.msra.mxu0 %v14523_v2 }
 0x4f2   :  { %9543 = vmatpush2.bf16.msra.mxu1 %v14526_v7  ;;  %9503 = vmatprep.subr.bf16.mxu0 %v14531_v34  ;;  %v14586_v7 = vld [vmem:[#allocation4 + $0x1aa8] ss:$16 sps:$4 sm:$0xff]   ;;  %v14591_v34 = vld [vmem:[#allocation4 + $0x1a84] ss:$16 sps:$4 sm:$0xff]  }
 0x4f3   :  { %9544 = vmatprep.subr.bf16.mxu1 %v14534_v55 }
 0x4f5   :  { %9504 = vmatpush2.bf16.msra.mxu0 %v14529_v50  ;;  %v14589_v50 = vld [vmem:[#allocation4 + $0x1a80] ss:$16 sps:$4 sm:$0xff]  }
 0x4f6   :  { %9545 = vmatpush2.bf16.msra.mxu1 %v14532_v21  ;;  %9505 = vmatprep.subr.bf16.mxu0 %v14537_v18  ;;  %v14592_v21 = vld [vmem:[#allocation4 + $0x1a88] ss:$16 sps:$4 sm:$0xff]   ;;  %v14600_v18 = vld [vmem:[#allocation4 + $0x1a6c] ss:$16 sps:$4 sm:$0xff]  }
 0x4f7   :  { %9546 = vmatprep.subr.bf16.mxu1 %v14540_v0  ;;  %v14595_v0 = vld [vmem:[#allocation4 + $0x1a60] ss:$16 sps:$4 sm:$0xff]  }
 0x4f9   :  { %9506 = vmatpush2.bf16.msra.mxu0 %v14535_v33  ;;  %v14598_v33 = vld [vmem:[#allocation4 + $0x1a68] ss:$16 sps:$4 sm:$0xff]  }
 0x4fa   :  { %9547 = vmatpush2.bf16.msra.mxu1 %v14538_v8  ;;  %9507 = vmatprep.subr.bf16.mxu0 %v14543_v63  ;;  %v14603_v8 = vld [vmem:[#allocation4 + $0x1a44] ss:$16 sps:$4 sm:$0xff]   ;;  %v14606_v63 = vld [vmem:[#allocation4 + $0x1a4c] ss:$16 sps:$4 sm:$0xff]  }
 0x4fb   :  { %9548 = vmatprep.subr.bf16.mxu1 %v14546_v60  ;;  %v14601_v60 = vld [vmem:[#allocation4 + $0x1a40] ss:$16 sps:$4 sm:$0xff]  }
 0x4fd   :  { %9508 = vmatpush2.bf16.msra.mxu0 %v14541_v56  ;;  %v14604_v56 = vld [vmem:[#allocation4 + $0x1a48] ss:$16 sps:$4 sm:$0xff]  }
 0x4fe   :  { %9549 = vmatpush2.bf16.msra.mxu1 %v14544_v4  ;;  %9509 = vmatprep.subr.bf16.mxu0 %v14549_v6  ;;  %v14609_v4 = vld [vmem:[#allocation4 + $0x1a24] ss:$16 sps:$4 sm:$0xff]   ;;  %v14612_v6 = vld [vmem:[#allocation4 + $0x1a2c] ss:$16 sps:$4 sm:$0xff]  }
 0x4ff   :  { %9550 = vmatprep.subr.bf16.mxu1 %v14552_v16  ;;  %v14607_v16 = vld [vmem:[#allocation4 + $0x1a20] ss:$16 sps:$4 sm:$0xff]  }
 0x501   :  { %9510 = vmatpush2.bf16.msra.mxu0 %v14547_v37  ;;  %v14610_v37 = vld [vmem:[#allocation4 + $0x1a28] ss:$16 sps:$4 sm:$0xff]  }
 0x502   :  { %9551 = vmatpush2.bf16.msra.mxu1 %v14550_v45  ;;  %9511 = vmatprep.subr.bf16.mxu0 %v14555_v49  ;;  %v14615_v45 = vld [vmem:[#allocation4 + $0x1a04] ss:$16 sps:$4 sm:$0xff]   ;;  %v14618_v49 = vld [vmem:[#allocation4 + $0x1a0c] ss:$16 sps:$4 sm:$0xff]  }
 0x503   :  { %9552 = vmatprep.subr.bf16.mxu1 %v14558_v9  ;;  %v14613_v9 = vld [vmem:[#allocation4 + $0x1a00] ss:$16 sps:$4 sm:$0xff]  }
 0x505   :  { %9512 = vmatpush2.bf16.msra.mxu0 %v14553_v10  ;;  %v14616_v10 = vld [vmem:[#allocation4 + $0x1a08] ss:$16 sps:$4 sm:$0xff]  }
 0x506   :  { %9553 = vmatpush2.bf16.msra.mxu1 %v14556_v51  ;;  %9513 = vmatprep.subr.bf16.mxu0 %v14561_v15  ;;  %v14621_v51 = vld [vmem:[#allocation4 + $0x1be4] ss:$16 sps:$4 sm:$0xff]   ;;  %v14624_v15 = vld [vmem:[#allocation4 + $0x1bec] ss:$16 sps:$4 sm:$0xff]  }
 0x507   :  { %9554 = vmatprep.subr.bf16.mxu1 %v14564_v36  ;;  %v14619_v36 = vld [vmem:[#allocation4 + $0x1be0] ss:$16 sps:$4 sm:$0xff]  }
 0x509   :  { %9514 = vmatpush2.bf16.msra.mxu0 %v14559_v43  ;;  %v14622_v43 = vld [vmem:[#allocation4 + $0x1be8] ss:$16 sps:$4 sm:$0xff]  }
 0x50a   :  { %9555 = vmatpush2.bf16.msra.mxu1 %v14562_v17  ;;  %9515 = vmatprep.subr.bf16.mxu0 %v14567_v27  ;;  %v14627_v17 = vld [vmem:[#allocation4 + $0x1bc4] ss:$16 sps:$4 sm:$0xff]   ;;  %v14630_v27 = vld [vmem:[#allocation4 + $0x1bcc] ss:$16 sps:$4 sm:$0xff]  }
 0x50b   :  { %9556 = vmatprep.subr.bf16.mxu1 %v14570_v52  ;;  %v14625_v52 = vld [vmem:[#allocation4 + $0x1bc0] ss:$16 sps:$4 sm:$0xff]  }
 0x50d   :  { %9516 = vmatpush2.bf16.msra.mxu0 %v14565_v48  ;;  %v14628_v48 = vld [vmem:[#allocation4 + $0x1bc8] ss:$16 sps:$4 sm:$0xff]  }
 0x50e   :  { %9557 = vmatpush2.bf16.msra.mxu1 %v14568_v59  ;;  %9960 = vmatprep.subr.bf16.mxu0 %v14573_v28  ;;  %v14636_v59 = vld [vmem:[#allocation4 + $0x1bac] ss:$16 sps:$4 sm:$0xff]   ;;  %v14631_v28 = vld [vmem:[#allocation4 + $0x1ba0] ss:$16 sps:$4 sm:$0xff]  }
 0x50f   :  { %10001 = vmatprep.subr.bf16.mxu1 %v14576_v5  ;;  %v14634_v5 = vld [vmem:[#allocation4 + $0x1ba8] ss:$16 sps:$4 sm:$0xff]  }
 0x510   :  { %v8094_v61 = vpop.f32.mrf.mxu0  ;;  %9518 = vmatmul.mubr.bf16.vlgmr.msra.gmra.mxu0 %v12878_v30 }
 0x511   :  { %v16876_v62 = vadd.f32 %v8094_v61, %v16862_v35  ;;  %v8135_v11 = vpop.f32.mrf.mxu1  ;;  %9559 = vmatmul.mubr.bf16.vlgmr.msra.gmra.mxu1 %v12878_v30  ;;  %9961 = vmatpush1.bf16.msra.mxu0 %v14571_v47  ;;  %v14588_v35 = vld [vmem:[#allocation4 + $0x1aac] ss:$16 sps:$4 sm:$0xff]   ;;  %v14637_v30 = vld [vmem:[#allocation4 + $0x1b80] ss:$16 sps:$4 sm:$0xff]  }
 0x512   :  { %v16879_v41 = vadd.f32 %v8135_v11, %v16865_v25  ;;  %9992 = vmatprep.mubr.bf16.mxu0 %v12881_v53  ;;  %10002 = vmatpush1.bf16.msra.mxu1 %v14574_v38  ;;  %v8096_v31 = vpop.f32.mrf.mxu0  ;;  %v14583_v25 = vld [vmem:[#allocation4 + $0x1aa0] ss:$16 sps:$4 sm:$0xff]   ;;  %v14642_v47 = vld [vmem:[#allocation4 + $0x1b8c] ss:$16 sps:$4 sm:$0xff]   ;;  %v14640_v38 = vld [vmem:[#allocation4 + $0x1b88] ss:$16 sps:$4 sm:$0xff]  }
 0x513   :  { %10033 = vmatprep.mubr.bf16.mxu1 %v12881_v53  ;;  %v16882_v22 = vadd.f32 %v8096_v31, %v16868_v39  ;;  %v8137_v3 = vpop.f32.mrf.mxu1  ;;  %9962 = vmatprep.subr.bf16.mxu0 %v14579_v14  ;;  %v14594_v39 = vld [vmem:[#allocation4 + $0x1a8c] ss:$16 sps:$4 sm:$0xff]   ;;  %v14645_v14 = vld [vmem:[#allocation4 + $0x1b64] ss:$16 sps:$4 sm:$0xff]   ;;  %v14643_v61 = vld [vmem:[#allocation4 + $0x1b60] ss:$16 sps:$4 sm:$0xff]  }
 0x514   :  { %v16885_v40 = vadd.f32 %v8137_v3, %v16871_v24  ;;  %v8098_v1 = vpop.f32.mrf.mxu0  ;;  %10003 = vmatprep.subr.bf16.mxu1 %v14582_v44  ;;  %v14597_v24 = vld [vmem:[#allocation4 + $0x1a64] ss:$16 sps:$4 sm:$0xff]   ;;  %v14648_v53 = vld [vmem:[#allocation4 + $0x1b6c] ss:$16 sps:$4 sm:$0xff]   ;;  %v14646_v44 = vld [vmem:[#allocation4 + $0x1b68] ss:$16 sps:$4 sm:$0xff]  }
 0x515   :  { %v8139_v26 = vpop.f32.mrf.mxu1  ;;  %9963 = vmatpush1.bf16.msra.mxu0 %v14577_v12  ;;  %v14651_v11 = vld [vmem:[#allocation4 + $0x1b44] ss:$16 sps:$4 sm:$0xff]   ;;  %v14654_v12 = vld [vmem:[#allocation4 + $0x1b4c] ss:$16 sps:$4 sm:$0xff]   ;;  %v14649_v31 = vld [vmem:[#allocation4 + $0x1b40] ss:$16 sps:$4 sm:$0xff]  }
 0x516   :  { %10004 = vmatpush1.bf16.msra.mxu1 %v14580_v20  ;;  %v8099_v2 = vpop.f32.mrf.mxu0  ;;  %9964 = vmatprep.subr.bf16.mxu0 %v14585_v32  ;;  %v14652_v20 = vld [vmem:[#allocation4 + $0x1b48] ss:$16 sps:$4 sm:$0xff]   ;;  %v14657_v32 = vld [vmem:[#allocation4 + $0x1b24] ss:$16 sps:$4 sm:$0xff]   ;;  %v14660_v3 = vld [vmem:[#allocation4 + $0x1b2c] ss:$16 sps:$4 sm:$0xff]  }
 0x517   :  { %v8140_v55 = vpop.f32.mrf.mxu1  ;;  %10005 = vmatprep.subr.bf16.mxu1 %v14588_v35  ;;  %v14655_v35 = vld [vmem:[#allocation4 + $0x1b20] ss:$16 sps:$4 sm:$0xff]   ;;  %v14658_v1 = vld [vmem:[#allocation4 + $0x1b28] ss:$16 sps:$4 sm:$0xff]   ;;  %v14663_v26 = vld [vmem:[#allocation4 + $0x1b04] ss:$16 sps:$4 sm:$0xff]  }
 0x518   :  { %v14661_v2 = vld [vmem:[#allocation4 + $0x1b00] ss:$16 sps:$4 sm:$0xff]   ;;  %v14669_v55 = vld [vmem:[#allocation4 + $0x1ce4] ss:$16 sps:$4 sm:$0xff]  }
 0x519   :  { %9965 = vmatpush1.bf16.msra.mxu0 %v14583_v25  ;;  %v14666_v25 = vld [vmem:[#allocation4 + $0x1b0c] ss:$16 sps:$4 sm:$0xff]  }
 0x51a   :  { %10006 = vmatpush1.bf16.msra.mxu1 %v14586_v7  ;;  %9966 = vmatprep.subr.bf16.mxu0 %v14591_v34  ;;  %v3335_v7 = vmax.f32 %v16720_v54, 0.0  ;;  %v14664_v34 = vld [vmem:[#allocation4 + $0x1b08] ss:$16 sps:$4 sm:$0xff]   ;;  %v14678_v54 = vld [vmem:[#allocation4 + $0x1ccc] ss:$16 sps:$4 sm:$0xff]  }
 0x51b   :  { %10007 = vmatprep.subr.bf16.mxu1 %v14594_v39  ;;  %v14672_v39 = vld [vmem:[#allocation4 + $0x1cec] ss:$16 sps:$4 sm:$0xff]  }
 0x51d   :  { %9967 = vmatpush1.bf16.msra.mxu0 %v14589_v50  ;;  %v3338_v50 = vmax.f32 %v16729_v23, 0.0 }
 0x51e   :  { %10008 = vmatpush1.bf16.msra.mxu1 %v14592_v21  ;;  %9968 = vmatprep.subr.bf16.mxu0 %v14597_v24  ;;  %v14667_v21 = vld [vmem:[#allocation4 + $0x1ce0] ss:$16 sps:$4 sm:$0xff]   ;;  %v12880_v24 = vpack.c.bf16 %v3335_v7, %v3335_v7 }
 0x51f   :  { %10009 = vmatprep.subr.bf16.mxu1 %v14600_v18  ;;  %v14670_v18 = vld [vmem:[#allocation4 + $0x1ce8] ss:$16 sps:$4 sm:$0xff]   ;;  %v14727_v7 = vld [vmem:[#allocation4 + $0x1da0] ss:$16 sps:$4 sm:$0xff]  }
 0x521   :  { %9969 = vmatpush1.bf16.msra.mxu0 %v14595_v0  ;;  %v14675_v0 = vld [vmem:[#allocation4 + $0x1cc4] ss:$16 sps:$4 sm:$0xff]  }
 0x522   :  { %10010 = vmatpush1.bf16.msra.mxu1 %v14598_v33  ;;  %9970 = vmatprep.subr.bf16.mxu0 %v14603_v8  ;;  %v12883_v33 = vpack.c.bf16 %v3338_v50, %v3338_v50  ;;  %v14733_v50 = vld [vmem:[#allocation4 + $0x1d80] ss:$16 sps:$4 sm:$0xff]  }
 0x523   :  { %10011 = vmatprep.subr.bf16.mxu1 %v14606_v63 }
 0x525   :  { %9971 = vmatpush1.bf16.msra.mxu0 %v14601_v60 }
 0x526   :  { %10012 = vmatpush1.bf16.msra.mxu1 %v14604_v56  ;;  %9972 = vmatprep.subr.bf16.mxu0 %v14609_v4  ;;  %v14673_v56 = vld [vmem:[#allocation4 + $0x1cc0] ss:$16 sps:$4 sm:$0xff]  }
 0x527   :  { %10013 = vmatprep.subr.bf16.mxu1 %v14612_v6  ;;  %v14676_v6 = vld [vmem:[#allocation4 + $0x1cc8] ss:$16 sps:$4 sm:$0xff]  }
 0x529   :  { %9973 = vmatpush1.bf16.msra.mxu0 %v14607_v16  ;;  %v14681_v16 = vld [vmem:[#allocation4 + $0x1ca4] ss:$16 sps:$4 sm:$0xff]  }
 0x52a   :  { %10014 = vmatpush1.bf16.msra.mxu1 %v14610_v37  ;;  %9974 = vmatprep.subr.bf16.mxu0 %v14615_v45 }
 0x52b   :  { %10015 = vmatprep.subr.bf16.mxu1 %v14618_v49 }
 0x52d   :  { %9975 = vmatpush1.bf16.msra.mxu0 %v14613_v9 }
 0x52e   :  { %10016 = vmatpush1.bf16.msra.mxu1 %v14616_v10  ;;  %9976 = vmatprep.subr.bf16.mxu0 %v14621_v51 }
 0x52f   :  { %10017 = vmatprep.subr.bf16.mxu1 %v14624_v15  ;;  %v14682_v15 = vld [vmem:[#allocation4 + $0x1ca8] ss:$16 sps:$4 sm:$0xff]  }
 0x531   :  { %9977 = vmatpush2.bf16.msra.mxu0 %v14619_v36  ;;  %v14687_v36 = vld [vmem:[#allocation4 + $0x1c84] ss:$16 sps:$4 sm:$0xff]  }
 0x532   :  { %10018 = vmatpush2.bf16.msra.mxu1 %v14622_v43  ;;  %9978 = vmatprep.subr.bf16.mxu0 %v14627_v17  ;;  %v14685_v17 = vld [vmem:[#allocation4 + $0x1c80] ss:$16 sps:$4 sm:$0xff]  }
 0x533   :  { %10019 = vmatprep.subr.bf16.mxu1 %v14630_v27  ;;  %v14688_v27 = vld [vmem:[#allocation4 + $0x1c88] ss:$16 sps:$4 sm:$0xff]  }
 0x535   :  { %9979 = vmatpush2.bf16.msra.mxu0 %v14625_v52  ;;  %v14696_v52 = vld [vmem:[#allocation4 + $0x1c6c] ss:$16 sps:$4 sm:$0xff]  }
 0x536   :  { %10020 = vmatpush2.bf16.msra.mxu1 %v14628_v48  ;;  %9980 = vmatprep.subr.bf16.mxu0 %v14633_v46  ;;  %v14691_v48 = vld [vmem:[#allocation4 + $0x1c60] ss:$16 sps:$4 sm:$0xff]   ;;  %v14694_v46 = vld [vmem:[#allocation4 + $0x1c68] ss:$16 sps:$4 sm:$0xff]  }
 0x537   :  { %10021 = vmatprep.subr.bf16.mxu1 %v14636_v59  ;;  %v14699_v59 = vld [vmem:[#allocation4 + $0x1c44] ss:$16 sps:$4 sm:$0xff]  }
 0x539   :  { %9981 = vmatpush2.bf16.msra.mxu0 %v14631_v28  ;;  %v14702_v28 = vld [vmem:[#allocation4 + $0x1c4c] ss:$16 sps:$4 sm:$0xff]  }
 0x53a   :  { %10022 = vmatpush2.bf16.msra.mxu1 %v14634_v5  ;;  %9982 = vmatprep.subr.bf16.mxu0 %v14639_v29  ;;  %v14697_v5 = vld [vmem:[#allocation4 + $0x1c40] ss:$16 sps:$4 sm:$0xff]   ;;  %v14700_v29 = vld [vmem:[#allocation4 + $0x1c48] ss:$16 sps:$4 sm:$0xff]  }
 0x53b   :  { %10023 = vmatprep.subr.bf16.mxu1 %v14642_v47  ;;  %v14705_v47 = vld [vmem:[#allocation4 + $0x1c24] ss:$16 sps:$4 sm:$0xff]  }
 0x53d   :  { %9983 = vmatpush2.bf16.msra.mxu0 %v14637_v30  ;;  %v14708_v30 = vld [vmem:[#allocation4 + $0x1c2c] ss:$16 sps:$4 sm:$0xff]  }
 0x53e   :  { %10024 = vmatpush2.bf16.msra.mxu1 %v14640_v38  ;;  %9984 = vmatprep.subr.bf16.mxu0 %v14645_v14  ;;  %v14703_v38 = vld [vmem:[#allocation4 + $0x1c20] ss:$16 sps:$4 sm:$0xff]   ;;  %v14706_v14 = vld [vmem:[#allocation4 + $0x1c28] ss:$16 sps:$4 sm:$0xff]  }
 0x53f   :  { %10025 = vmatprep.subr.bf16.mxu1 %v14648_v53  ;;  %v14711_v53 = vld [vmem:[#allocation4 + $0x1c04] ss:$16 sps:$4 sm:$0xff]  }
 0x541   :  { %9985 = vmatpush2.bf16.msra.mxu0 %v14643_v61  ;;  %v14714_v61 = vld [vmem:[#allocation4 + $0x1c0c] ss:$16 sps:$4 sm:$0xff]  }
 0x542   :  { %10026 = vmatpush2.bf16.msra.mxu1 %v14646_v44  ;;  %9986 = vmatprep.subr.bf16.mxu0 %v14651_v11  ;;  %v14709_v44 = vld [vmem:[#allocation4 + $0x1c00] ss:$16 sps:$4 sm:$0xff]   ;;  %v14712_v11 = vld [vmem:[#allocation4 + $0x1c08] ss:$16 sps:$4 sm:$0xff]  }
 0x543   :  { %10027 = vmatprep.subr.bf16.mxu1 %v14654_v12  ;;  %v14717_v12 = vld [vmem:[#allocation4 + $0x1de4] ss:$16 sps:$4 sm:$0xff]  }
 0x545   :  { %9987 = vmatpush2.bf16.msra.mxu0 %v14649_v31  ;;  %v14720_v31 = vld [vmem:[#allocation4 + $0x1dec] ss:$16 sps:$4 sm:$0xff]  }
 0x546   :  { %10028 = vmatpush2.bf16.msra.mxu1 %v14652_v20  ;;  %9988 = vmatprep.subr.bf16.mxu0 %v14657_v32  ;;  %v14715_v20 = vld [vmem:[#allocation4 + $0x1de0] ss:$16 sps:$4 sm:$0xff]   ;;  %v14718_v32 = vld [vmem:[#allocation4 + $0x1de8] ss:$16 sps:$4 sm:$0xff]  }
 0x547   :  { %10029 = vmatprep.subr.bf16.mxu1 %v14660_v3  ;;  %v14723_v3 = vld [vmem:[#allocation4 + $0x1dc4] ss:$16 sps:$4 sm:$0xff]  }
 0x549   :  { %9989 = vmatpush2.bf16.msra.mxu0 %v14655_v35  ;;  %v14726_v35 = vld [vmem:[#allocation4 + $0x1dcc] ss:$16 sps:$4 sm:$0xff]  }
 0x54a   :  { %10030 = vmatpush2.bf16.msra.mxu1 %v14658_v1  ;;  %9990 = vmatprep.subr.bf16.mxu0 %v14663_v26  ;;  %v14721_v1 = vld [vmem:[#allocation4 + $0x1dc0] ss:$16 sps:$4 sm:$0xff]   ;;  %v14724_v26 = vld [vmem:[#allocation4 + $0x1dc8] ss:$16 sps:$4 sm:$0xff]  }
 0x54b   :  { %10031 = vmatprep.subr.bf16.mxu1 %v14666_v25  ;;  %v14729_v25 = vld [vmem:[#allocation4 + $0x1da4] ss:$16 sps:$4 sm:$0xff]  }
 0x54d   :  { %9991 = vmatpush2.bf16.msra.mxu0 %v14661_v2  ;;  %v14732_v2 = vld [vmem:[#allocation4 + $0x1dac] ss:$16 sps:$4 sm:$0xff]  }
 0x54e   :  { %10032 = vmatpush2.bf16.msra.mxu1 %v14664_v34  ;;  %10435 = vmatprep.subr.bf16.mxu0 %v14669_v55  ;;  %v14730_v34 = vld [vmem:[#allocation4 + $0x1da8] ss:$16 sps:$4 sm:$0xff]   ;;  %v14735_v55 = vld [vmem:[#allocation4 + $0x1d84] ss:$16 sps:$4 sm:$0xff]  }
 0x54f   :  { %10476 = vmatprep.subr.bf16.mxu1 %v14672_v39  ;;  %v14738_v39 = vld [vmem:[#allocation4 + $0x1d8c] ss:$16 sps:$4 sm:$0xff]  }
 0x550   :  { %v8569_v8 = vpop.f32.mrf.mxu0  ;;  %9993 = vmatmul.mubr.bf16.vlgmr.msra.gmra.mxu0 %v12880_v24 }
 0x551   :  { %v16890_v63 = vadd.f32 %v8569_v8, %v16876_v62  ;;  %v8610_v60 = vpop.f32.mrf.mxu1  ;;  %10034 = vmatmul.mubr.bf16.vlgmr.msra.gmra.mxu1 %v12880_v24  ;;  %10436 = vmatpush1.bf16.msra.mxu0 %v14667_v21  ;;  %v14684_v62 = vld [vmem:[#allocation4 + $0x1cac] ss:$16 sps:$4 sm:$0xff]   ;;  %v14736_v21 = vld [vmem:[#allocation4 + $0x1d88] ss:$16 sps:$4 sm:$0xff]   ;;  %v14741_v24 = vld [vmem:[#allocation4 + $0x1d64] ss:$16 sps:$4 sm:$0xff]  }
 0x552   :  { %v16893_v23 = vadd.f32 %v8610_v60, %v16879_v41  ;;  %10467 = vmatprep.mubr.bf16.mxu0 %v12883_v33  ;;  %10477 = vmatpush1.bf16.msra.mxu1 %v14670_v18  ;;  %v8571_v4 = vpop.f32.mrf.mxu0  ;;  %v14679_v41 = vld [vmem:[#allocation4 + $0x1ca0] ss:$16 sps:$4 sm:$0xff]   ;;  %v14744_v18 = vld [vmem:[#allocation4 + $0x1d6c] ss:$16 sps:$4 sm:$0xff]   ;;  %v14747_v8 = vld [vmem:[#allocation4 + $0x1d44] ss:$16 sps:$4 sm:$0xff]  }
 0x553   :  { %10508 = vmatprep.mubr.bf16.mxu1 %v12883_v33  ;;  %v16896_v37 = vadd.f32 %v8571_v4, %v16882_v22  ;;  %v8612_v45 = vpop.f32.mrf.mxu1  ;;  %10437 = vmatprep.subr.bf16.mxu0 %v14675_v0  ;;  %v14690_v22 = vld [vmem:[#allocation4 + $0x1c8c] ss:$16 sps:$4 sm:$0xff]   ;;  %v14739_v0 = vld [vmem:[#allocation4 + $0x1d60] ss:$16 sps:$4 sm:$0xff]   ;;  %v14742_v33 = vld [vmem:[#allocation4 + $0x1d68] ss:$16 sps:$4 sm:$0xff]  }
 0x554   :  { %v16899_v49 = vadd.f32 %v8612_v45, %v16885_v40  ;;  %v8573_v9 = vpop.f32.mrf.mxu0  ;;  %10478 = vmatprep.subr.bf16.mxu1 %v14678_v54  ;;  %v14693_v40 = vld [vmem:[#allocation4 + $0x1c64] ss:$16 sps:$4 sm:$0xff]   ;;  %v14750_v54 = vld [vmem:[#allocation4 + $0x1d4c] ss:$16 sps:$4 sm:$0xff]   ;;  %v14745_v60 = vld [vmem:[#allocation4 + $0x1d40] ss:$16 sps:$4 sm:$0xff]  }
 0x555   :  { %v8614_v10 = vpop.f32.mrf.mxu1  ;;  %10438 = vmatpush1.bf16.msra.mxu0 %v14673_v56  ;;  %v14748_v56 = vld [vmem:[#allocation4 + $0x1d48] ss:$16 sps:$4 sm:$0xff]   ;;  %v14753_v4 = vld [vmem:[#allocation4 + $0x1d24] ss:$16 sps:$4 sm:$0xff]   ;;  %v14751_v45 = vld [vmem:[#allocation4 + $0x1d20] ss:$16 sps:$4 sm:$0xff]  }
 0x556   :  { %10479 = vmatpush1.bf16.msra.mxu1 %v14676_v6  ;;  %v8574_v51 = vpop.f32.mrf.mxu0  ;;  %10439 = vmatprep.subr.bf16.mxu0 %v14681_v16  ;;  %v14756_v6 = vld [vmem:[#allocation4 + $0x1d2c] ss:$16 sps:$4 sm:$0xff]   ;;  %v3194_v16 = vadd.f32 %v16749_v19, %v16627_v58  ;;  %v14759_v9 = vld [vmem:[#allocation4 + $0x1d04] ss:$16 sps:$4 sm:$0xff]  }
 0x557   :  { %v8615_v43 = vpop.f32.mrf.mxu1  ;;  %10480 = vmatprep.subr.bf16.mxu1 %v14684_v62  ;;  %v14754_v62 = vld [vmem:[#allocation4 + $0x1d28] ss:$16 sps:$4 sm:$0xff]   ;;  %v14762_v10 = vld [vmem:[#allocation4 + $0x1d0c] ss:$16 sps:$4 sm:$0xff]   ;;  %v14757_v51 = vld [vmem:[#allocation4 + $0x1d00] ss:$16 sps:$4 sm:$0xff]  }
 0x558   :  { %v14765_v43 = vld [vmem:[#allocation4 + $0x1ee4] ss:$16 sps:$4 sm:$0xff]   ;;  %v14768_v58 = vld [vmem:[#allocation4 + $0x1eec] ss:$16 sps:$4 sm:$0xff]  }
 0x559   :  { %10440 = vmatpush1.bf16.msra.mxu0 %v14679_v41  ;;  %v3307_v41 = vadd.f32 %v16751_v42, %v3194_v16  ;;  %v14820_v16 = vld [vmem:[#allocation4 + $0x1fc8] ss:$16 sps:$4 sm:$0xff]  }
 0x55a   :  { %10481 = vmatpush1.bf16.msra.mxu1 %v14682_v15  ;;  %10441 = vmatprep.subr.bf16.mxu0 %v14687_v36  ;;  %v3337_v15 = vmax.f32 %v16726_v13, 0.0  ;;  %v14760_v36 = vld [vmem:[#allocation4 + $0x1d08] ss:$16 sps:$4 sm:$0xff]  }
 0x55b   :  { %10482 = vmatprep.subr.bf16.mxu1 %v14690_v22  ;;  %v3340_v19 = vmax.f32 %v3307_v41, 0.0  ;;  %v14763_v22 = vld [vmem:[#allocation4 + $0x1ee0] ss:$16 sps:$4 sm:$0xff]   ;;  %v14831_v41 = vld [vmem:[#allocation4 + $0x1f84] ss:$16 sps:$4 sm:$0xff]  }
 0x55d   :  { %10442 = vmatpush1.bf16.msra.mxu0 %v14685_v17  ;;  %v12882_v17 = vpack.c.bf16 %v3337_v15, %v3337_v15  ;;  %v12885_v42 = vpack.c.bf16 %v3340_v19, %v3340_v19  ;;  %v14829_v15 = vld [vmem:[#allocation4 + $0x1f80] ss:$16 sps:$4 sm:$0xff]  }
 0x55e   :  { %10483 = vmatpush1.bf16.msra.mxu1 %v14688_v27  ;;  %10443 = vmatprep.subr.bf16.mxu0 %v14693_v40  ;;  %v14766_v27 = vld [vmem:[#allocation4 + $0x1ee8] ss:$16 sps:$4 sm:$0xff]   ;;  %v14771_v40 = vld [vmem:[#allocation4 + $0x1ec4] ss:$16 sps:$4 sm:$0xff]   ;;  %v14835_v19 = vld [vmem:[#allocation4 + $0x1f60] ss:$16 sps:$4 sm:$0xff]  }
 0x55f   :  { %10484 = vmatprep.subr.bf16.mxu1 %v14696_v52 }
 0x561   :  { %10444 = vmatpush1.bf16.msra.mxu0 %v14691_v48  ;;  %v14774_v48 = vld [vmem:[#allocation4 + $0x1ecc] ss:$16 sps:$4 sm:$0xff]  }
 0x562   :  { %10485 = vmatpush1.bf16.msra.mxu1 %v14694_v46  ;;  %10445 = vmatprep.subr.bf16.mxu0 %v14699_v59  ;;  %v14769_v59 = vld [vmem:[#allocation4 + $0x1ec0] ss:$16 sps:$4 sm:$0xff]  }
 0x563   :  { %10486 = vmatprep.subr.bf16.mxu1 %v14702_v28 }
 0x565   :  { %10446 = vmatpush1.bf16.msra.mxu0 %v14697_v5 }
 0x566   :  { %10487 = vmatpush1.bf16.msra.mxu1 %v14700_v29  ;;  %10447 = vmatprep.subr.bf16.mxu0 %v14705_v47  ;;  %v14772_v29 = vld [vmem:[#allocation4 + $0x1ec8] ss:$16 sps:$4 sm:$0xff]   ;;  %v14777_v47 = vld [vmem:[#allocation4 + $0x1ea4] ss:$16 sps:$4 sm:$0xff]  }
 0x567   :  { %10488 = vmatprep.subr.bf16.mxu1 %v14708_v30 }
 0x569   :  { %10448 = vmatpush1.bf16.msra.mxu0 %v14703_v38 }
 0x56a   :  { %10489 = vmatpush1.bf16.msra.mxu1 %v14706_v14  ;;  %10449 = vmatprep.subr.bf16.mxu0 %v14711_v53 }
 0x56b   :  { %10490 = vmatprep.subr.bf16.mxu1 %v14714_v61 }
 0x56d   :  { %10450 = vmatpush1.bf16.msra.mxu0 %v14709_v44 }
 0x56e   :  { %10491 = vmatpush1.bf16.msra.mxu1 %v14712_v11  ;;  %10451 = vmatprep.subr.bf16.mxu0 %v14717_v12  ;;  %v14778_v11 = vld [vmem:[#allocation4 + $0x1ea8] ss:$16 sps:$4 sm:$0xff]   ;;  %v14783_v12 = vld [vmem:[#allocation4 + $0x1e84] ss:$16 sps:$4 sm:$0xff]  }
 0x56f   :  { %10492 = vmatprep.subr.bf16.mxu1 %v14720_v31 }
 0x571   :  { %10452 = vmatpush2.bf16.msra.mxu0 %v14715_v20  ;;  %v14781_v20 = vld [vmem:[#allocation4 + $0x1e80] ss:$16 sps:$4 sm:$0xff]  }
 0x572   :  { %10493 = vmatpush2.bf16.msra.mxu1 %v14718_v32  ;;  %10453 = vmatprep.subr.bf16.mxu0 %v14723_v3  ;;  %v14784_v32 = vld [vmem:[#allocation4 + $0x1e88] ss:$16 sps:$4 sm:$0xff]   ;;  %v14792_v3 = vld [vmem:[#allocation4 + $0x1e6c] ss:$16 sps:$4 sm:$0xff]  }
 0x573   :  { %10494 = vmatprep.subr.bf16.mxu1 %v14726_v35  ;;  %v14787_v35 = vld [vmem:[#allocation4 + $0x1e60] ss:$16 sps:$4 sm:$0xff]  }
 0x575   :  { %10454 = vmatpush2.bf16.msra.mxu0 %v14721_v1  ;;  %v14790_v1 = vld [vmem:[#allocation4 + $0x1e68] ss:$16 sps:$4 sm:$0xff]  }
 0x576   :  { %10495 = vmatpush2.bf16.msra.mxu1 %v14724_v26  ;;  %10455 = vmatprep.subr.bf16.mxu0 %v14729_v25  ;;  %v14795_v26 = vld [vmem:[#allocation4 + $0x1e44] ss:$16 sps:$4 sm:$0xff]   ;;  %v14798_v25 = vld [vmem:[#allocation4 + $0x1e4c] ss:$16 sps:$4 sm:$0xff]  }
 0x577   :  { %10496 = vmatprep.subr.bf16.mxu1 %v14732_v2  ;;  %v14793_v2 = vld [vmem:[#allocation4 + $0x1e40] ss:$16 sps:$4 sm:$0xff]  }
 0x579   :  { %10456 = vmatpush2.bf16.msra.mxu0 %v14727_v7  ;;  %v14796_v7 = vld [vmem:[#allocation4 + $0x1e48] ss:$16 sps:$4 sm:$0xff]  }
 0x57a   :  { %10497 = vmatpush2.bf16.msra.mxu1 %v14730_v34  ;;  %10457 = vmatprep.subr.bf16.mxu0 %v14735_v55  ;;  %v14801_v34 = vld [vmem:[#allocation4 + $0x1e24] ss:$16 sps:$4 sm:$0xff]   ;;  %v14804_v55 = vld [vmem:[#allocation4 + $0x1e2c] ss:$16 sps:$4 sm:$0xff]  }
 0x57b   :  { %10498 = vmatprep.subr.bf16.mxu1 %v14738_v39  ;;  %v14799_v39 = vld [vmem:[#allocation4 + $0x1e20] ss:$16 sps:$4 sm:$0xff]  }
 0x57d   :  { %10458 = vmatpush2.bf16.msra.mxu0 %v14733_v50  ;;  %v14802_v50 = vld [vmem:[#allocation4 + $0x1e28] ss:$16 sps:$4 sm:$0xff]  }
 0x57e   :  { %10499 = vmatpush2.bf16.msra.mxu1 %v14736_v21  ;;  %10459 = vmatprep.subr.bf16.mxu0 %v14741_v24  ;;  %v14807_v21 = vld [vmem:[#allocation4 + $0x1e04] ss:$16 sps:$4 sm:$0xff]   ;;  %v14810_v24 = vld [vmem:[#allocation4 + $0x1e0c] ss:$16 sps:$4 sm:$0xff]  }
 0x57f   :  { %10500 = vmatprep.subr.bf16.mxu1 %v14744_v18  ;;  %v14805_v18 = vld [vmem:[#allocation4 + $0x1e00] ss:$16 sps:$4 sm:$0xff]  }
 0x581   :  { %10460 = vmatpush2.bf16.msra.mxu0 %v14739_v0  ;;  %v14808_v0 = vld [vmem:[#allocation4 + $0x1e08] ss:$16 sps:$4 sm:$0xff]  }
 0x582   :  { %10501 = vmatpush2.bf16.msra.mxu1 %v14742_v33  ;;  %10461 = vmatprep.subr.bf16.mxu0 %v14747_v8  ;;  %v14813_v33 = vld [vmem:[#allocation4 + $0x1fe4] ss:$16 sps:$4 sm:$0xff]   ;;  %v14816_v8 = vld [vmem:[#allocation4 + $0x1fec] ss:$16 sps:$4 sm:$0xff]  }
 0x583   :  { %10502 = vmatprep.subr.bf16.mxu1 %v14750_v54  ;;  %v14811_v54 = vld [vmem:[#allocation4 + $0x1fe0] ss:$16 sps:$4 sm:$0xff]  }
 0x585   :  { %10462 = vmatpush2.bf16.msra.mxu0 %v14745_v60  ;;  %v14814_v60 = vld [vmem:[#allocation4 + $0x1fe8] ss:$16 sps:$4 sm:$0xff]  }
 0x586   :  { %10503 = vmatpush2.bf16.msra.mxu1 %v14748_v56  ;;  %10463 = vmatprep.subr.bf16.mxu0 %v14753_v4  ;;  %v14819_v56 = vld [vmem:[#allocation4 + $0x1fc4] ss:$16 sps:$4 sm:$0xff]   ;;  %v14822_v4 = vld [vmem:[#allocation4 + $0x1fcc] ss:$16 sps:$4 sm:$0xff]  }
 0x587   :  { %10504 = vmatprep.subr.bf16.mxu1 %v14756_v6  ;;  %v14817_v6 = vld [vmem:[#allocation4 + $0x1fc0] ss:$16 sps:$4 sm:$0xff]  }
 0x589   :  { %10464 = vmatpush2.bf16.msra.mxu0 %v14751_v45  ;;  %v14825_v45 = vld [vmem:[#allocation4 + $0x1fa4] ss:$16 sps:$4 sm:$0xff]  }
 0x58a   :  { %10505 = vmatpush2.bf16.msra.mxu1 %v14754_v62  ;;  %10465 = vmatprep.subr.bf16.mxu0 %v14759_v9  ;;  %v14828_v62 = vld [vmem:[#allocation4 + $0x1fac] ss:$16 sps:$4 sm:$0xff]   ;;  %v14823_v9 = vld [vmem:[#allocation4 + $0x1fa0] ss:$16 sps:$4 sm:$0xff]  }
 0x58b   :  { %10506 = vmatprep.subr.bf16.mxu1 %v14762_v10  ;;  %v14826_v10 = vld [vmem:[#allocation4 + $0x1fa8] ss:$16 sps:$4 sm:$0xff]  }
 0x58d   :  { %10466 = vmatpush2.bf16.msra.mxu0 %v14757_v51  ;;  %v14834_v51 = vld [vmem:[#allocation4 + $0x1f8c] ss:$16 sps:$4 sm:$0xff]  }
 0x58e   :  { %10507 = vmatpush2.bf16.msra.mxu1 %v14760_v36  ;;  %10910 = vmatprep.subr.bf16.mxu0 %v14765_v43  ;;  %v14832_v36 = vld [vmem:[#allocation4 + $0x1f88] ss:$16 sps:$4 sm:$0xff]   ;;  %v14837_v43 = vld [vmem:[#allocation4 + $0x1f64] ss:$16 sps:$4 sm:$0xff]  }
 0x58f   :  { %10951 = vmatprep.subr.bf16.mxu1 %v14768_v58  ;;  %v14840_v58 = vld [vmem:[#allocation4 + $0x1f6c] ss:$16 sps:$4 sm:$0xff]  }
 0x590   :  { %v9044_v52 = vpop.f32.mrf.mxu0  ;;  %10468 = vmatmul.mubr.bf16.vlgmr.msra.gmra.mxu0 %v12882_v17 }
 0x591   :  { %v16906_v13 = vadd.f32 %v9044_v52, %v16890_v63  ;;  %v9085_v46 = vpop.f32.mrf.mxu1  ;;  %10509 = vmatmul.mubr.bf16.vlgmr.msra.gmra.mxu1 %v12882_v17  ;;  %10911 = vmatpush1.bf16.msra.mxu0 %v14763_v22  ;;  %v14780_v63 = vld [vmem:[#allocation4 + $0x1eac] ss:$16 sps:$4 sm:$0xff]   ;;  %v14838_v22 = vld [vmem:[#allocation4 + $0x1f68] ss:$16 sps:$4 sm:$0xff]   ;;  %v14843_v17 = vld [vmem:[#allocation4 + $0x1f44] ss:$16 sps:$4 sm:$0xff]  }
 0x592   :  { %v16909_v28 = vadd.f32 %v9085_v46, %v16893_v23  ;;  %10942 = vmatprep.mubr.bf16.mxu0 %v12885_v42  ;;  %10952 = vmatpush1.bf16.msra.mxu1 %v14766_v27  ;;  %v9046_v5 = vpop.f32.mrf.mxu0  ;;  %v14775_v23 = vld [vmem:[#allocation4 + $0x1ea0] ss:$16 sps:$4 sm:$0xff]   ;;  %v14846_v27 = vld [vmem:[#allocation4 + $0x1f4c] ss:$16 sps:$4 sm:$0xff]   ;;  %v14849_v52 = vld [vmem:[#allocation4 + $0x1f24] ss:$16 sps:$4 sm:$0xff]  }
 0x593   :  { %10983 = vmatprep.mubr.bf16.mxu1 %v12885_v42  ;;  %v16912_v30 = vadd.f32 %v9046_v5, %v16896_v37  ;;  %v9087_v38 = vpop.f32.mrf.mxu1  ;;  %10912 = vmatprep.subr.bf16.mxu0 %v14771_v40  ;;  %v14786_v37 = vld [vmem:[#allocation4 + $0x1e8c] ss:$16 sps:$4 sm:$0xff]   ;;  %v14841_v40 = vld [vmem:[#allocation4 + $0x1f40] ss:$16 sps:$4 sm:$0xff]   ;;  %v14844_v42 = vld [vmem:[#allocation4 + $0x1f48] ss:$16 sps:$4 sm:$0xff]  }
 0x594   :  { %v16915_v14 = vadd.f32 %v9087_v38, %v16899_v49  ;;  %v9048_v53 = vpop.f32.mrf.mxu0  ;;  %10953 = vmatprep.subr.bf16.mxu1 %v14774_v48  ;;  %v14789_v49 = vld [vmem:[#allocation4 + $0x1e64] ss:$16 sps:$4 sm:$0xff]   ;;  %v14852_v48 = vld [vmem:[#allocation4 + $0x1f2c] ss:$16 sps:$4 sm:$0xff]   ;;  %v14847_v46 = vld [vmem:[#allocation4 + $0x1f20] ss:$16 sps:$4 sm:$0xff]  }
 0x595   :  { %v9089_v61 = vpop.f32.mrf.mxu1  ;;  %10913 = vmatpush1.bf16.msra.mxu0 %v14769_v59  ;;  %v14850_v59 = vld [vmem:[#allocation4 + $0x1f28] ss:$16 sps:$4 sm:$0xff]   ;;  %v14855_v5 = vld [vmem:[#allocation4 + $0x1f04] ss:$16 sps:$4 sm:$0xff]   ;;  %v3339_v38 = vmax.f32 %v16731_v57, 0.0 }
 0x596   :  { %10954 = vmatpush1.bf16.msra.mxu1 %v14772_v29  ;;  %v9049_v44 = vpop.f32.mrf.mxu0  ;;  %10914 = vmatprep.subr.bf16.mxu0 %v14777_v47  ;;  %v14858_v29 = vld [vmem:[#allocation4 + $0x1f0c] ss:$16 sps:$4 sm:$0xff]   ;;  %v14853_v47 = vld [vmem:[#allocation4 + $0x1f00] ss:$16 sps:$4 sm:$0xff]  }
 0x597   :  { %v9090_v31 = vpop.f32.mrf.mxu1  ;;  %10955 = vmatprep.subr.bf16.mxu1 %v14780_v63  ;;  %v14856_v63 = vld [vmem:[#allocation4 + $0x1f08] ss:$16 sps:$4 sm:$0xff]   ;;  %v12884_v53 = vpack.c.bf16 %v3339_v38, %v3339_v38 }
 0x599   :  { %10915 = vmatpush1.bf16.msra.mxu0 %v14775_v23 }
 0x59a   :  { %10956 = vmatpush1.bf16.msra.mxu1 %v14778_v11  ;;  %10916 = vmatprep.subr.bf16.mxu0 %v14783_v12 }
 0x59b   :  { %10957 = vmatprep.subr.bf16.mxu1 %v14786_v37 }
 0x59d   :  { %10917 = vmatpush1.bf16.msra.mxu0 %v14781_v20 }
 0x59e   :  { %10958 = vmatpush1.bf16.msra.mxu1 %v14784_v32  ;;  %10918 = vmatprep.subr.bf16.mxu0 %v14789_v49 }
 0x59f   :  { %10959 = vmatprep.subr.bf16.mxu1 %v14792_v3 }
 0x5a1   :  { %10919 = vmatpush1.bf16.msra.mxu0 %v14787_v35  ;;  %v14859_v35 = vld [vmem:[#allocation7 + $0x78] sm:$0xff]  }
 0x5a2   :  { %10960 = vmatpush1.bf16.msra.mxu1 %v14790_v1  ;;  %10920 = vmatprep.subr.bf16.mxu0 %v14795_v26  ;;  %v14860_v1 = vld [vmem:[#allocation7 + $0xf8] sm:$0xff]  }
 0x5a3   :  { %10961 = vmatprep.subr.bf16.mxu1 %v14798_v25  ;;  %v14861_v26 = vld [vmem:[#allocation7 + $0x38] sm:$0xff]  }
 0x5a4   :  { %v14862_v25 = vld [vmem:[#allocation7 + $0xb8] sm:$0xff]  }
 0x5a5   :  { %10921 = vmatpush1.bf16.msra.mxu0 %v14793_v2  ;;  %v14863_v2 = vld [vmem:[#allocation7 + $0x70] sm:$0xff]  }
 0x5a6   :  { %10962 = vmatpush1.bf16.msra.mxu1 %v14796_v7  ;;  %10922 = vmatprep.subr.bf16.mxu0 %v14801_v34  ;;  %v14866_v7 = vld [vmem:[#allocation7 + $0xb0] sm:$0xff]   ;;  %v14869_v34 = vld [vmem:[#allocation7 + $0x28] sm:$0xff]  }
 0x5a7   :  { %10963 = vmatprep.subr.bf16.mxu1 %v14804_v55  ;;  %v14870_v55 = vld [vmem:[#allocation7 + $0xa8] sm:$0xff]  }
 0x5a9   :  { %10923 = vmatpush1.bf16.msra.mxu0 %v14799_v39  ;;  %v14871_v39 = vld [vmem:[#allocation7 + $0x60] sm:$0xff]  }
 0x5aa   :  { %10964 = vmatpush1.bf16.msra.mxu1 %v14802_v50  ;;  %10924 = vmatprep.subr.bf16.mxu0 %v14807_v21  ;;  %v14872_v50 = vld [vmem:[#allocation7 + $0xe0] sm:$0xff]  }
 0x5ab   :  { %10965 = vmatprep.subr.bf16.mxu1 %v14810_v24  ;;  %v14873_v21 = vld [vmem:[#allocation7 + $0x20] sm:$0xff]  }
 0x5ac   :  { %v14874_v24 = vld [vmem:[#allocation7 + $0xa0] sm:$0xff]  }
 0x5ad   :  { %10925 = vmatpush1.bf16.msra.mxu0 %v14805_v18  ;;  %v14875_v18 = vld [vmem:[#allocation7 + $0x58] sm:$0xff]  }
 0x5ae   :  { %10966 = vmatpush1.bf16.msra.mxu1 %v14808_v0  ;;  %10926 = vmatprep.subr.bf16.mxu0 %v14813_v33  ;;  %v14876_v0 = vld [vmem:[#allocation7 + $0xd8] sm:$0xff]  }
 0x5af   :  { %10967 = vmatprep.subr.bf16.mxu1 %v14816_v8  ;;  %v14877_v33 = vld [vmem:[#allocation7 + $0x18] sm:$0xff]  }
 0x5b0   :  { %v14878_v8 = vld [vmem:[#allocation7 + $0x98] sm:$0xff]  }
 0x5b1   :  { %10927 = vmatpush2.bf16.msra.mxu0 %v14811_v54 }
 0x5b2   :  { %10968 = vmatpush2.bf16.msra.mxu1 %v14814_v60  ;;  %10928 = vmatprep.subr.bf16.mxu0 %v14819_v56  ;;  %v14879_v60 = vld [vmem:[#allocation7 + $0x50] sm:$0xff]  }
 0x5b3   :  { %10969 = vmatprep.subr.bf16.mxu1 %v14822_v4  ;;  %v14880_v56 = vld [vmem:[#allocation7 + $0xd0] sm:$0xff]  }
 0x5b5   :  { %10929 = vmatpush2.bf16.msra.mxu0 %v14817_v6 }
 0x5b6   :  { %10970 = vmatpush2.bf16.msra.mxu1 %v14820_v16  ;;  %10930 = vmatprep.subr.bf16.mxu0 %v14825_v45  ;;  %v14881_v16 = vld [vmem:[#allocation7 + $0x10] sm:$0xff]  }
 0x5b7   :  { %10971 = vmatprep.subr.bf16.mxu1 %v14828_v62  ;;  %v14882_v45 = vld [vmem:[#allocation7 + $0x90] sm:$0xff]  }
 0x5b9   :  { %10931 = vmatpush2.bf16.msra.mxu0 %v14823_v9 }
 0x5ba   :  { %10972 = vmatpush2.bf16.msra.mxu1 %v14826_v10  ;;  %10932 = vmatprep.subr.bf16.mxu0 %v14831_v41 }
 0x5bb   :  { %10973 = vmatprep.subr.bf16.mxu1 %v14834_v51 }
 0x5bd   :  { %10933 = vmatpush2.bf16.msra.mxu0 %v14829_v15 }
 0x5be   :  { %10974 = vmatpush2.bf16.msra.mxu1 %v14832_v36  ;;  %10934 = vmatprep.subr.bf16.mxu0 %v14837_v43  ;;  %v14883_v36 = vld [vmem:[#allocation7 + $0x48] sm:$0xff]  }
 0x5bf   :  { %10975 = vmatprep.subr.bf16.mxu1 %v14840_v58  ;;  %v14884_v43 = vld [vmem:[#allocation7 + $0xc8] sm:$0xff]  }
 0x5c1   :  { %10935 = vmatpush2.bf16.msra.mxu0 %v14835_v19  ;;  %v14885_v19 = vld [vmem:[#allocation7 + $0x8] sm:$0xff]  }
 0x5c2   :  { %10976 = vmatpush2.bf16.msra.mxu1 %v14838_v22  ;;  %10936 = vmatprep.subr.bf16.mxu0 %v14843_v17  ;;  %v14886_v22 = vld [vmem:[#allocation7 + $0x88] sm:$0xff]  }
 0x5c3   :  { %10977 = vmatprep.subr.bf16.mxu1 %v14846_v27 }
 0x5c5   :  { %10937 = vmatpush2.bf16.msra.mxu0 %v14841_v40  ;;  %v14887_v40 = vld [vmem:[#allocation7 + $0x40] sm:$0xff]  }
 0x5c6   :  { %10978 = vmatpush2.bf16.msra.mxu1 %v14844_v42  ;;  %10938 = vmatprep.subr.bf16.mxu0 %v14849_v52  ;;  %v14888_v42 = vld [vmem:[#allocation7 + $0xc0] sm:$0xff]  }
 0x5c7   :  { %10979 = vmatprep.subr.bf16.mxu1 %v14852_v48  ;;  %v14889_v52 = vld [vmem:[#allocation7] sm:$0xff]  }
 0x5c8   :  { %v14890_v48 = vld [vmem:[#allocation7 + $0x80] sm:$0xff]  }
 0x5c9   :  { %10939 = vmatpush2.bf16.msra.mxu0 %v14847_v46 }
 0x5ca   :  { %10980 = vmatpush2.bf16.msra.mxu1 %v14850_v59  ;;  %10940 = vmatprep.subr.bf16.mxu0 %v14855_v5 }
 0x5cb   :  { %10981 = vmatprep.subr.bf16.mxu1 %v14858_v29 }
 0x5cd   :  { %10941 = vmatpush2.bf16.msra.mxu0 %v14853_v47 }
 0x5ce   :  { %10982 = vmatpush2.bf16.msra.mxu1 %v14856_v63  ;;  %12886 = vmatprep.subr.bf16.mxu0 %v14859_v35 }
 0x5cf   :  { %12908 = vmatprep.subr.bf16.mxu1 %v14860_v1 }
 0x5d0   :  { %v9519_v61 = vpop.f32.mrf.mxu0  ;;  %10943 = vmatmul.mubr.bf16.vlgmr.msra.gmra.mxu0 %v12884_v53 }
 0x5d1   :  { %v9567_v23 = vadd.f32 %v9519_v61, %v16906_v13  ;;  %v9560_v44 = vpop.f32.mrf.mxu1  ;;  %10984 = vmatmul.mubr.bf16.vlgmr.msra.gmra.mxu1 %v12884_v53  ;;  %v14864_v13 = vld [vmem:[#allocation7 + $0xf0] sm:$0xff]   ;;  %12887 = vmatpush3.bf16.msra.mxu0 %v14861_v26 }
 0x5d2   :  { %v9569_v11 = vadd.f32 %v9560_v44, %v16909_v28  ;;  %v9521_v12 = vpop.f32.mrf.mxu0  ;;  %12909 = vmatpush3.bf16.msra.mxu1 %v14862_v25  ;;  %v14865_v28 = vld [vmem:[#allocation7 + $0x30] sm:$0xff]   ;;  %12888 = vmatprep.subr.bf16.mxu0 %v14863_v2  ;;  %v10996_v44 = vld [vmem:[#allocation6] sm:$0xf] }
 0x5d3   :  { %v9568_v31 = vadd.f32 %v9521_v12, %v16912_v30  ;;  %v9562_v37 = vpop.f32.mrf.mxu1  ;;  %12910 = vmatprep.subr.bf16.mxu1 %v14864_v13  ;;  %v14867_v30 = vld [vmem:[#allocation7 + $0x68] sm:$0xff]  }
 0x5d4   :  { %v9570_v57 = vadd.f32 %v9562_v37, %v16915_v14  ;;  %v9523_v20 = vpop.f32.mrf.mxu0  ;;  %v14868_v14 = vld [vmem:[#allocation7 + $0xe8] sm:$0xff]  }
 0x5d5   :  { %v9564_v32 = vpop.f32.mrf.mxu1  ;;  %12889 = vmatpush3.bf16.msra.mxu0 %v14865_v28 }
 0x5d6   :  { %v9524_v49 = vpop.f32.mrf.mxu0  ;;  %12911 = vmatpush3.bf16.msra.mxu1 %v14866_v7  ;;  %12890 = vmatprep.subr.bf16.mxu0 %v14867_v30 }
 0x5d7   :  { %v9565_v3 = vpop.f32.mrf.mxu1  ;;  %12912 = vmatprep.subr.bf16.mxu1 %v14868_v14 }
 0x5d9   :  { %12891 = vmatpush3.bf16.msra.mxu0 %v14869_v34 }
 0x5da   :  { %12913 = vmatpush3.bf16.msra.mxu1 %v14870_v55  ;;  %12892 = vmatprep.subr.bf16.mxu0 %v14871_v39 }
 0x5db   :  { %12914 = vmatprep.subr.bf16.mxu1 %v14872_v50 }
 0x5dd   :  { %12893 = vmatpush3.bf16.msra.mxu0 %v14873_v21 }
 0x5de   :  { %12915 = vmatpush3.bf16.msra.mxu1 %v14874_v24  ;;  %12894 = vmatprep.subr.bf16.mxu0 %v14875_v18 }
 0x5df   :  { %12916 = vmatprep.subr.bf16.mxu1 %v14876_v0 }
 0x5e1   :  { %12895 = vmatpush3.bf16.msra.mxu0 %v14877_v33 }
 0x5e2   :  { %12917 = vmatpush3.bf16.msra.mxu1 %v14878_v8  ;;  %12896 = vmatprep.subr.bf16.mxu0 %v14879_v60 }
 0x5e3   :  { %12918 = vmatprep.subr.bf16.mxu1 %v14880_v56 }
 0x5e5   :  { %12897 = vmatpush3.bf16.msra.mxu0 %v14881_v16 }
 0x5e6   :  { %12919 = vmatpush3.bf16.msra.mxu1 %v14882_v45  ;;  %12898 = vmatprep.subr.bf16.mxu0 %v14883_v36 }
 0x5e7   :  { %12920 = vmatprep.subr.bf16.mxu1 %v14884_v43 }
 0x5e9   :  { %12899 = vmatpush3.bf16.msra.mxu0 %v14885_v19 }
 0x5ea   :  { %12921 = vmatpush3.bf16.msra.mxu1 %v14886_v22  ;;  %12900 = vmatprep.subr.bf16.mxu0 %v14887_v40 }
 0x5eb   :  { %12922 = vmatprep.subr.bf16.mxu1 %v14888_v42 }
 0x5ed   :  { %12901 = vmatpush3.bf16.msra.mxu0 %v14889_v52 }
 0x5ee   :  { %12923 = vmatpush3.bf16.msra.mxu1 %v14890_v48 }
 0x610   :  { %v9994_v54 = vpop.f32.mrf.mxu0 }
 0x611   :  { %v10042_v4 = vadd.f32 %v9994_v54, %v9567_v23  ;;  %v10035_v6 = vpop.f32.mrf.mxu1 }
 0x612   :  { %v10044_v62 = vadd.f32 %v10035_v6, %v9569_v11  ;;  %v9996_v9 = vpop.f32.mrf.mxu0  ;;  %v16974_v11 = vld [vmem:[#allocation13_spill] sm:$0xff] }
 0x613   :  { %v10043_v10 = vadd.f32 %v9996_v9, %v9568_v31  ;;  %v10037_v41 = vpop.f32.mrf.mxu1  ;;  %v11008_v12 = vsub.s32 2, %v16974_v11  ;;  %v11012_v31 = vsub.s32 3, %v16974_v11  ;;  %v16975_v37 = vsub.s32 0, %v16974_v11  ;;  %v12821_v9 = vld [vmem:[#allocation9] ss:$0 sm:$0xff] }
 0x614   :  { %v10045_v51 = vadd.f32 %v10037_v41, %v9570_v57  ;;  %v9998_v15 = vpop.f32.mrf.mxu0  ;;  %v16976_v1 = vsub.s32 1, %v16974_v11 }
 0x615   :  { %v10039_v58 = vpop.f32.mrf.mxu1  ;;  %v11001_v57 = vrot.slane %v10996_v44, %v16975_v37  ;;  %v11009_v32 = vrot.slane %v10996_v44, %v11008_v12  ;;  %v11013_v28 = vrot.slane %v10996_v44, %v11012_v31 }
 0x616   :  { %v9999_v17 = vpop.f32.mrf.mxu0  ;;  %v11005_v26 = vrot.slane %v10996_v44, %v16976_v1 }
 0x617   :  { %v10040_v27 = vpop.f32.mrf.mxu1 }
 0x650   :  { %v10469_v46 = vpop.f32.mrf.mxu0 }
 0x651   :  { %v10517_v59 = vadd.f32 %v10469_v46, %v10042_v4  ;;  %v10510_v5 = vpop.f32.mrf.mxu1 }
 0x652   :  { %v10519_v29 = vadd.f32 %v10510_v5, %v10044_v62  ;;  %v10471_v47 = vpop.f32.mrf.mxu0 }
 0x653   :  { %v10512_v38 = vpop.f32.mrf.mxu1  ;;  %v10518_v49 = vadd.f32 %v10471_v47, %v10043_v10 }
 0x654   :  { %v10473_v63 = vpop.f32.mrf.mxu0  ;;  %v10520_v25 = vadd.f32 %v10512_v38, %v10045_v51 }
 0x655   :  { %v10514_v53 = vpop.f32.mrf.mxu1 }
 0x656   :  { %v10474_v61 = vpop.f32.mrf.mxu0 }
 0x657   :  { %v10515_v23 = vpop.f32.mrf.mxu1 }
 0x690   :  { %v10944_v20 = vpop.f32.mrf.mxu0 }
 0x691   :  { %v10992_v3 = vadd.f32 %v10944_v20, %v10517_v59  ;;  %v10985_v35 = vpop.f32.mrf.mxu1 }
 0x692   :  { %v10994_v2 = vadd.f32 %v10985_v35, %v10519_v29  ;;  %v10946_v13 = vpop.f32.mrf.mxu0 }
 0x693   :  { %v11018_v7 = vadd.f32 %v11001_v57, %v10992_v3  ;;  %v10993_v30 = vadd.f32 %v10946_v13, %v10518_v49  ;;  %v10987_v14 = vpop.f32.mrf.mxu1 }
 0x694   :  { %v11020_v34 = vadd.f32 %v11009_v32, %v10994_v2  ;;  %v10995_v55 = vadd.f32 %v10987_v14, %v10520_v25  ;;  %v10948_v39 = vpop.f32.mrf.mxu0 }
 0x695   :  { %v11019_v50 = vadd.f32 %v11005_v26, %v10993_v30  ;;  %v10989_v21 = vpop.f32.mrf.mxu1  ;;  %v11022_v24 = vmax.f32 %v11018_v7, 0.0 }
 0x696   :  { %v11021_v18 = vadd.f32 %v11013_v28, %v10995_v55  ;;  %v10949_v0 = vpop.f32.mrf.mxu0  ;;  %v11024_v33 = vmax.f32 %v11020_v34, 0.0 }
 0x697   :  { %v11023_v8 = vmax.f32 %v11019_v50, 0.0  ;;  %v10990_v54 = vpop.f32.mrf.mxu1  ;;  %v11026_v4 = vpack.c.bf16 %v11022_v24, %v11022_v24 }
 0x698   :  { %v11025_v60 = vmax.f32 %v11021_v18, 0.0  ;;  %v11028_v16 = vpack.c.bf16 %v11024_v33, %v11024_v33 }
 0x699   :  { %v11027_v56 = vpack.c.bf16 %v11023_v8, %v11023_v8 }
 0x69a   :  { %v11029_v6 = vpack.c.bf16 %v11025_v60, %v11025_v60 }
 0x69b   :  { %11325 = vmatprep.mubr.bf16.mxu0 %v11027_v56 }
 0x69c   :  { %11365 = vmatprep.mubr.bf16.mxu1 %v11029_v6  ;;  %11326 = vmatmul.mubr.bf16.vlgmr.msra.gmra.mxu0 %v11026_v4 }
 0x69d   :  { %11366 = vmatmul.mubr.bf16.vlgmr.msra.gmra.mxu1 %v11028_v16 }
 0x75c   :  { %v12902_v45 = vpop.f32.mrf.mxu0 }
 0x75d   :  { %v12924_v62 = vpop.f32.mrf.mxu1 }
 0x75e   :  { %v12903_v10 = vpop.f32.mrf.mxu0 }
 0x75f   :  { %v12904_v41 = vadd.f32 %v12903_v10, %v12902_v45  ;;  %v12925_v51 = vpop.f32.mrf.mxu1 }
 0x760   :  { %v12905_v15 = vpop.f32.mrf.mxu0  ;;  %v12926_v43 = vadd.f32 %v12925_v51, %v12924_v62 }
 0x761   :  { %v11328_v36 = vadd.f32 %v12904_v41, %v12821_v9  ;;  %v12927_v58 = vpop.f32.mrf.mxu1 }
 0x762   :  { %v12906_v19 = vpop.f32.mrf.mxu0 }
 0x763   :  { %v11368_v22 = vadd.f32 %v12926_v43, %v11328_v36  ;;  %v12928_v17 = vpop.f32.mrf.mxu1 }
 0x765   :  { %11373 = vst [vmem:[%s16938_s7] sm:$0xff] %v11368_v22 }
 0x766   :  { %11378 = vsyncpa [#allocation3], 1 }
 0x767   :  { %11379 = vsyncpa [#allocation5], 1 }
 0x768   :  { %11380 = vsyncpa [#allocation8], 1 }

</bundles_post_ra>
